<compile_context>
chip_gen: v7x
topology: tpu7x:2x2x1
jax: 0.10.0
libtpu: 0.0.40
codegen_flags: <defaults>
</compile_context>

<pallas_src>
import functools

import numpy as np
import jax
import jax.numpy as jnp
from jax.experimental import pallas as pl
from jax.experimental.pallas import tpu as pltpu


_VMEM_LIMIT = 32 * 1024 * 1024


def _round_up(a, b):
    return (a + b - 1) // b * b


def _pick_batch_block(n, max_block=8):
    # Keep grid length >= 2 whenever n >= 2 (v7x has 2 TensorCores); cap block for VMEM.
    if n <= 1:
        return 1
    return min(max_block, max(1, n // 2))


# --------------- fused conv 5x5 (pad 2) + bias + ReLU + 2x2 maxpool (batch-blocked) ---------------

def _conv_pool_kernel(xc_ref, w_ref, b_ref, o_ref, *, T, H, W, O):
    """One batch block per grid step.

    xc_ref: (B, H+T-1, W, K) bf16 tap-packed input; width ordered [even out-cols | odd out-cols].
    w_ref : (T, K, O) bf16 packed weights (T row-taps, taps/channels packed into K).
    b_ref : (1, O) f32.
    o_ref : (B, H//2, W//2, O) pooled output (bf16).
    """
    B = xc_ref.shape[0]
    Hc = H + T - 1
    K = xc_ref.shape[-1]
    Ho, Wo = H // 2, W // 2

    lhs = xc_ref[...].reshape(B * Hc * W, K)                    # collapse leading dims (free view)
    acc = None
    for t in range(T):                                          # T = 1 (conv1) or 5 (conv2)
        d = jnp.dot(lhs, w_ref[t], preferred_element_type=jnp.float32)
        d = d.reshape(B, Hc, W, O)[:, t:t + H]                  # rows feeding output row h - t
        acc = d if t == 0 else acc + d                          # value chain, no VMEM scratch RMW
    y = jnp.maximum(acc + b_ref[...], 0.0)                      # bias + ReLU, (B, H, W, O) f32

    cp = jnp.maximum(y[:, :, :Wo, :], y[:, :, Wo:, :])          # pool the 2 columns (even|odd halves)
    rp = cp.reshape(B, Ho, 2 * Wo, O)                           # rows 2ho | 2ho+1 side by side
    pooled = jnp.maximum(rp[:, :, :Wo, :], rp[:, :, Wo:, :])    # pool the 2 rows -> (B, Ho, Wo, O)
    o_ref[...] = pooled.astype(o_ref.dtype)


def _pack_conv_input(x_nhwc, pack_kh, k_pad):
    """XLA glue: spatial pad(2), pack taps into channels, order output columns even-then-odd.

    pack_kh=True : all 25 taps packed into K (conv1 im2col).
    pack_kh=False: only the 5 kw taps packed into K; rows left for the kernel's kh loop (conv2).
    """
    N, H, W, C = x_nhwc.shape
    Wo = W // 2
    xp = jnp.pad(x_nhwc.astype(jnp.bfloat16), ((0, 0), (2, 2), (2, 2), (0, 0)))
    Hc = H if pack_kh else H + 4
    kh_taps = range(5) if pack_kh else (0,)
    halves = []
    for par in (0, 1):                                          # even output columns, then odd
        chans = []
        for kh in kh_taps:
            r0 = kh if pack_kh else 0
            for kw in range(5):
                sl = xp[:, r0:r0 + Hc, par + kw::2, :][:, :, :Wo, :]
                chans.append(sl)                                # (N, Hc, Wo, C)
        halves.append(jnp.concatenate(chans, axis=-1))
    xc = jnp.concatenate(halves, axis=2)                        # (N, Hc, W, n_taps*C)
    if xc.shape[-1] < k_pad:
        xc = jnp.pad(xc, ((0, 0), (0, 0), (0, 0), (0, k_pad - xc.shape[-1])))
    return xc


def conv5x5_relu_pool(x_nhwc, w_packed, b, *, pack_kh, max_block=8, out_dtype=jnp.bfloat16):
    """'same' 5x5 conv (stride 1, pad 2) + bias + ReLU + 2x2 maxpool, NHWC in / NHWC out."""
    N, H, W, C = x_nhwc.shape
    T, K, O = w_packed.shape
    Ho, Wo = H // 2, W // 2
    Hc = H + T - 1

    bb = _pick_batch_block(N, max_block)
    Np = _round_up(N, bb)
    if Np != N:
        x_nhwc = jnp.pad(x_nhwc, ((0, Np - N), (0, 0), (0, 0), (0, 0)))
    xc = _pack_conv_input(x_nhwc, pack_kh, K)                   # (Np, Hc, W, K) bf16
    b2 = b.reshape(1, O).astype(jnp.float32)

    kern = functools.partial(_conv_pool_kernel, T=T, H=H, W=W, O=O)
    out = pl.pallas_call(
        kern,
        out_shape=jax.ShapeDtypeStruct((Np, Ho, Wo, O), out_dtype),
        grid=(Np // bb,),
        in_specs=[
            pl.BlockSpec((bb, Hc, W, K), lambda i: (i, 0, 0, 0)),
            pl.BlockSpec((T, K, O), lambda i: (0, 0, 0)),
            pl.BlockSpec((1, O), lambda i: (0, 0)),
        ],
        out_specs=pl.BlockSpec((bb, Ho, Wo, O), lambda i: (i, 0, 0, 0)),
        compiler_params=pltpu.CompilerParams(dimension_semantics=("parallel",),
                                             vmem_limit_bytes=_VMEM_LIMIT),
    )(xc, w_packed, b2)
    return out[:N]


# --------------------------- fused 3-layer MLP head (all weights in VMEM) ---------------------------

def _mlp3_kernel(x_ref, w1_ref, b1_ref, w2_ref, b2_ref, w3_ref, b3_ref, o_ref):
    h = jnp.dot(x_ref[...], w1_ref[...], preferred_element_type=jnp.float32) + b1_ref[...]
    h = jnp.maximum(h, 0.0).astype(w2_ref.dtype)
    h = jnp.dot(h, w2_ref[...], preferred_element_type=jnp.float32) + b2_ref[...]
    h = jnp.maximum(h, 0.0).astype(w3_ref.dtype)
    o_ref[...] = (jnp.dot(h, w3_ref[...], preferred_element_type=jnp.float32)
                  + b3_ref[...]).astype(o_ref.dtype)


def mlp3(x, w1, b1, w2, b2, w3, b3, *, tile_m=256):
    # tile_m=256 keeps the double-buffered working set (~11 MiB) under v5e's scoped VMEM too;
    # the explicit vmem_limit_bytes leaves headroom on every generation.
    M, K = x.shape
    N1, N2, N3 = w1.shape[1], w2.shape[1], w3.shape[1]
    tm = min(tile_m, _round_up(M, 8))
    Mp = _round_up(M, tm)
    if Mp != M:
        x = jnp.pad(x, ((0, Mp - M), (0, 0)))
    out = pl.pallas_call(
        _mlp3_kernel,
        out_shape=jax.ShapeDtypeStruct((Mp, N3), jnp.float32),
        grid=(Mp // tm,),
        in_specs=[
            pl.BlockSpec((tm, K), lambda i: (i, 0)),
            pl.BlockSpec((K, N1), lambda i: (0, 0)),
            pl.BlockSpec((1, N1), lambda i: (0, 0)),
            pl.BlockSpec((N1, N2), lambda i: (0, 0)),
            pl.BlockSpec((1, N2), lambda i: (0, 0)),
            pl.BlockSpec((N2, N3), lambda i: (0, 0)),
            pl.BlockSpec((1, N3), lambda i: (0, 0)),
        ],
        out_specs=pl.BlockSpec((tm, N3), lambda i: (i, 0)),
        compiler_params=pltpu.CompilerParams(dimension_semantics=("parallel",),
                                             vmem_limit_bytes=_VMEM_LIMIT),
    )(x, w1, b1.reshape(1, N1).astype(jnp.float32),
      w2, b2.reshape(1, N2).astype(jnp.float32),
      w3, b3.reshape(1, N3).astype(jnp.float32))
    return out[:M]


# ------------------------------------------ model ------------------------------------------

def my_cnn_forward(x_nchw, kp):
    n = x_nchw.shape[0]
    x = jnp.transpose(x_nchw, (0, 2, 3, 1))                      # NCHW -> NHWC (once, tiny)
    x = conv5x5_relu_pool(x, kp["w1"], kp["b1"], pack_kh=True)   # (N,16,16,64) bf16
    x = conv5x5_relu_pool(x, kp["w2"], kp["b2"], pack_kh=False)  # (N, 8, 8,64) bf16
    x = x.reshape(n, 8 * 8 * 64)                                 # NHWC flatten; fc1_w pre-permuted
    logits = mlp3(x, kp["fc1_w"], kp["fc1_b"], kp["fc2_w"], kp["fc2_b"],
                  kp["fc3_w"], kp["fc3_b"])                      # (N,128) f32 (fc3 zero-padded)
    return logits[:, :10]


def init_params(key):
    # PyTorch-layout params with PyTorch-style U(-1/sqrt(fan_in), 1/sqrt(fan_in)) init.
    def u(k, shape, fan_in):
        bound = 1.0 / np.sqrt(fan_in)
        return jax.random.uniform(k, shape, jnp.float32, -bound, bound)

    ks = jax.random.split(key, 10)
    return {
        "w1": u(ks[0], (64, 3, 5, 5), 3 * 25),      # OIHW, like nn.Conv2d
        "b1": u(ks[1], (64,), 3 * 25),
        "w2": u(ks[2], (64, 64, 5, 5), 64 * 25),
        "b2": u(ks[3], (64,), 64 * 25),
        "fc1_w": u(ks[4], (384, 4096), 4096),       # (out, in), like nn.Linear
        "fc1_b": u(ks[5], (384,), 4096),
        "fc2_w": u(ks[6], (192, 384), 384),
        "fc2_b": u(ks[7], (192,), 384),
        "fc3_w": u(ks[8], (10, 192), 192),
        "fc3_b": u(ks[9], (10,), 192),
    }


def prepare_params(p):
    """One-time conversion of PyTorch-layout params to kernel-ready layouts / dtypes."""
    def conv1_w(w_oihw):                            # (O,3,5,5) -> (1, 128, O): all taps packed in K
        O, C = w_oihw.shape[0], w_oihw.shape[1]
        w = jnp.transpose(w_oihw, (2, 3, 1, 0)).reshape(25 * C, O)   # index (kh*5+kw)*C + c
        w = jnp.pad(w, ((0, 128 - 25 * C), (0, 0)))
        return w[None].astype(jnp.bfloat16)

    def conv2_w(w_oihw):                            # (O,64,5,5) -> (5, 320, O): kw taps packed in K
        O, C = w_oihw.shape[0], w_oihw.shape[1]
        w = jnp.transpose(w_oihw, (2, 3, 1, 0)).reshape(5, 5 * C, O)  # [kh, kw*C + c, o]
        return w.astype(jnp.bfloat16)

    # nn.Flatten flattens NCHW (c*64 + h*8 + w); the conv path hands the head NHWC
    # (h*512 + w*64 + c), so fold that permutation + the (out,in)->(in,out) transpose
    # into the fc1 weight once here instead of transposing activations every forward.
    fc1 = p["fc1_w"].reshape(384, 64, 8, 8)                       # (out, c, h, w)
    fc1 = jnp.transpose(fc1, (2, 3, 1, 0)).reshape(8 * 8 * 64, 384)
    # fc3 zero-padded to 128 output columns (unmasked store / clean MXU tile); sliced in forward.
    fc3 = jnp.pad(jnp.transpose(p["fc3_w"]), ((0, 0), (0, 128 - 10)))
    fc3_b = jnp.pad(p["fc3_b"], (0, 128 - 10))
    return {
        "w1": conv1_w(p["w1"]), "b1": p["b1"].astype(jnp.float32),
        "w2": conv2_w(p["w2"]), "b2": p["b2"].astype(jnp.float32),
        "fc1_w": fc1.astype(jnp.bfloat16), "fc1_b": p["fc1_b"].astype(jnp.float32),
        "fc2_w": jnp.transpose(p["fc2_w"]).astype(jnp.bfloat16),
        "fc2_b": p["fc2_b"].astype(jnp.float32),
        "fc3_w": fc3.astype(jnp.bfloat16), "fc3_b": fc3_b.astype(jnp.float32),
    }


if __name__ == "__main__":
    key = jax.random.PRNGKey(0)
    kx, kp = jax.random.split(key)
    # CIFAR-10-shaped input (the 8*8*64 flatten in the module requires 32x32 spatial).
    x = jax.random.normal(kx, (2, 3, 32, 32), jnp.float32)
    params = prepare_params(init_params(kp))

    out = jax.jit(my_cnn_forward)(x, params)
    out = jax.block_until_ready(out)
    assert out.shape == (2, 10) and out.dtype == jnp.float32
    assert bool(jnp.all(jnp.isfinite(out)))
    print("KERNEL_OK")
</pallas_src>

<mosaic_0001>
module attributes {stable_mosaic.version = 11 : i64} {
  func.func @_conv_pool_kernel(%arg0: i32, %arg1: memref<1x32x32x128xbf16, #tpu.memory_space<vmem>>, %arg2: memref<1x128x64xbf16, #tpu.memory_space<vmem>>, %arg3: memref<1x64xf32, #tpu.memory_space<vmem>>, %arg4: memref<1x16x16x64xbf16, #tpu.memory_space<vmem>>) attributes {dimension_semantics = [#tpu.dimension_semantics<parallel>], iteration_bounds = array<i64: 2>, scalar_prefetch = 0 : i64, scratch_operands = 0 : i64, tpu.core_type = #tpu.core_type<tc>, window_params = [{transform_indices = @transform_0, window_bounds = array<i64: 1, 32, 32, 128>}, {pipeline_mode = #tpu.pipeline_mode<synchronous>, transform_indices = @transform_1, window_bounds = array<i64: 1, 128, 64>}, {pipeline_mode = #tpu.pipeline_mode<synchronous>, transform_indices = @transform_2, window_bounds = array<i64: 1, 64>}, {transform_indices = @transform_3, window_bounds = array<i64: 1, 16, 16, 64>}]} {
    %c0 = arith.constant 0 : index
    %c0_0 = arith.constant 0 : index
    %c0_1 = arith.constant 0 : index
    %c0_2 = arith.constant 0 : index
    %0 = vector.load %arg1[%c0, %c0_0, %c0_1, %c0_2] : memref<1x32x32x128xbf16, #tpu.memory_space<vmem>>, vector<1x32x32x128xbf16>
    %1 = vector.shape_cast %0 : vector<1x32x32x128xbf16> to vector<1024x128xbf16>
    %c0_3 = arith.constant 0 : index
    %c0_4 = arith.constant 0 : index
    %c0_5 = arith.constant 0 : index
    %2 = vector.load %arg2[%c0_3, %c0_4, %c0_5] : memref<1x128x64xbf16, #tpu.memory_space<vmem>>, vector<1x128x64xbf16>
    %3 = vector.shape_cast %2 : vector<1x128x64xbf16> to vector<128x64xbf16>
    %cst = arith.constant dense<0.000000e+00> : vector<1024x64xf32>
    %4 = tpu.matmul %1, %3, %cst {dimension_numbers = #tpu.dot_dimension_numbers<[1], [0], [0], [1], [0, 0, 1, 1], [], []>} : vector<1024x128xbf16>, vector<128x64xbf16>, vector<1024x64xf32> -> vector<1024x64xf32>
    %5 = vector.shape_cast %4 : vector<1024x64xf32> to vector<1x32x32x64xf32>
    %c0_6 = arith.constant 0 : index
    %c0_7 = arith.constant 0 : index
    %6 = vector.load %arg3[%c0_6, %c0_7] : memref<1x64xf32, #tpu.memory_space<vmem>>, vector<1x64xf32>
    %7 = vector.shape_cast %6 : vector<1x64xf32> to vector<1x1x1x64xf32>
    %8 = vector.broadcast %7 : vector<1x1x1x64xf32> to vector<1x32x32x64xf32>
    %9 = arith.addf %5, %8 : vector<1x32x32x64xf32>
    %cst_8 = arith.constant 0.000000e+00 : f32
    %10 = vector.broadcast %cst_8 : f32 to vector<1x32x32x64xf32>
    %11 = arith.maximumf %9, %10 : vector<1x32x32x64xf32>
    %12 = vector.extract_strided_slice %11 {offsets = [0, 0, 0, 0], sizes = [1, 32, 16, 64], strides = [1, 1, 1, 1]} : vector<1x32x32x64xf32> to vector<1x32x16x64xf32>
    %13 = vector.extract_strided_slice %11 {offsets = [0, 0, 16, 0], sizes = [1, 32, 16, 64], strides = [1, 1, 1, 1]} : vector<1x32x32x64xf32> to vector<1x32x16x64xf32>
    %14 = arith.maximumf %12, %13 : vector<1x32x16x64xf32>
    %15 = vector.shape_cast %14 : vector<1x32x16x64xf32> to vector<1x16x32x64xf32>
    %16 = vector.extract_strided_slice %15 {offsets = [0, 0, 0, 0], sizes = [1, 16, 16, 64], strides = [1, 1, 1, 1]} : vector<1x16x32x64xf32> to vector<1x16x16x64xf32>
    %17 = vector.extract_strided_slice %15 {offsets = [0, 0, 16, 0], sizes = [1, 16, 16, 64], strides = [1, 1, 1, 1]} : vector<1x16x32x64xf32> to vector<1x16x16x64xf32>
    %18 = arith.maximumf %16, %17 : vector<1x16x16x64xf32>
    %19 = arith.truncf %18 : vector<1x16x16x64xf32> to vector<1x16x16x64xbf16>
    %c0_9 = arith.constant 0 : index
    %c0_10 = arith.constant 0 : index
    %c0_11 = arith.constant 0 : index
    %c0_12 = arith.constant 0 : index
    %20 = vector.load %arg4[%c0_9, %c0_10, %c0_11, %c0_12] : memref<1x16x16x64xbf16, #tpu.memory_space<vmem>>, vector<1x16x16x64xbf16>
    tpu.vector_store %arg4[%c0_9, %c0_10, %c0_11, %c0_12], %19 {strides = array<i32>} : memref<1x16x16x64xbf16, #tpu.memory_space<vmem>>, vector<1x16x16x64xbf16>,
    return
  }
  func.func @transform_0(%arg0: i32) -> (i32, i32, i32, i32) {
    %c0_i32 = arith.constant 0 : i32
    %c0_i32_0 = arith.constant 0 : i32
    %c0_i32_1 = arith.constant 0 : i32
    %c0_i32_2 = arith.constant 0 : i32
    return %arg0, %c0_i32, %c0_i32_0, %c0_i32_1 : i32, i32, i32, i32
  }
  func.func @transform_1(%arg0: i32) -> (i32, i32, i32) {
    %c0_i32 = arith.constant 0 : i32
    %c0_i32_0 = arith.constant 0 : i32
    %c0_i32_1 = arith.constant 0 : i32
    %c0_i32_2 = arith.constant 0 : i32
    return %c0_i32, %c0_i32_0, %c0_i32_1 : i32, i32, i32
  }
  func.func @transform_2(%arg0: i32) -> (i32, i32) {
    %c0_i32 = arith.constant 0 : i32
    %c0_i32_0 = arith.constant 0 : i32
    %c0_i32_1 = arith.constant 0 : i32
    return %c0_i32, %c0_i32_0 : i32, i32
  }
  func.func @transform_3(%arg0: i32) -> (i32, i32, i32, i32) {
    %c0_i32 = arith.constant 0 : i32
    %c0_i32_0 = arith.constant 0 : i32
    %c0_i32_1 = arith.constant 0 : i32
    %c0_i32_2 = arith.constant 0 : i32
    return %arg0, %c0_i32, %c0_i32_0, %c0_i32_1 : i32, i32, i32, i32
  }
}

module attributes {stable_mosaic.version = 11 : i64} {
  func.func @_conv_pool_kernel(%arg0: i32, %arg1: memref<1x20x16x320xbf16, #tpu.memory_space<vmem>>, %arg2: memref<5x320x64xbf16, #tpu.memory_space<vmem>>, %arg3: memref<1x64xf32, #tpu.memory_space<vmem>>, %arg4: memref<1x8x8x64xbf16, #tpu.memory_space<vmem>>) attributes {dimension_semantics = [#tpu.dimension_semantics<parallel>], iteration_bounds = array<i64: 2>, scalar_prefetch = 0 : i64, scratch_operands = 0 : i64, tpu.core_type = #tpu.core_type<tc>, window_params = [{transform_indices = @transform_0, window_bounds = array<i64: 1, 20, 16, 320>}, {pipeline_mode = #tpu.pipeline_mode<synchronous>, transform_indices = @transform_1, window_bounds = array<i64: 5, 320, 64>}, {pipeline_mode = #tpu.pipeline_mode<synchronous>, transform_indices = @transform_2, window_bounds = array<i64: 1, 64>}, {transform_indices = @transform_3, window_bounds = array<i64: 1, 8, 8, 64>}]} {
    %c0 = arith.constant 0 : index
    %c0_0 = arith.constant 0 : index
    %c0_1 = arith.constant 0 : index
    %c0_2 = arith.constant 0 : index
    %0 = vector.load %arg1[%c0, %c0_0, %c0_1, %c0_2] : memref<1x20x16x320xbf16, #tpu.memory_space<vmem>>, vector<1x20x16x320xbf16>
    %1 = vector.shape_cast %0 : vector<1x20x16x320xbf16> to vector<320x320xbf16>
    %c0_3 = arith.constant 0 : index
    %c0_4 = arith.constant 0 : index
    %c0_5 = arith.constant 0 : index
    %2 = vector.load %arg2[%c0_3, %c0_4, %c0_5] : memref<5x320x64xbf16, #tpu.memory_space<vmem>>, vector<1x320x64xbf16>
    %3 = vector.shape_cast %2 : vector<1x320x64xbf16> to vector<320x64xbf16>
    %cst = arith.constant dense<0.000000e+00> : vector<320x64xf32>
    %4 = tpu.matmul %1, %3, %cst {dimension_numbers = #tpu.dot_dimension_numbers<[1], [0], [0], [1], [0, 0, 1, 1], [], []>} : vector<320x320xbf16>, vector<320x64xbf16>, vector<320x64xf32> -> vector<320x64xf32>
    %5 = vector.shape_cast %4 : vector<320x64xf32> to vector<1x20x16x64xf32>
    %6 = vector.extract_strided_slice %5 {offsets = [0, 0, 0, 0], sizes = [1, 16, 16, 64], strides = [1, 1, 1, 1]} : vector<1x20x16x64xf32> to vector<1x16x16x64xf32>
    %c1 = arith.constant 1 : index
    %c0_6 = arith.constant 0 : index
    %c0_7 = arith.constant 0 : index
    %7 = vector.load %arg2[%c1, %c0_6, %c0_7] : memref<5x320x64xbf16, #tpu.memory_space<vmem>>, vector<1x320x64xbf16>
    %8 = vector.shape_cast %7 : vector<1x320x64xbf16> to vector<320x64xbf16>
    %cst_8 = arith.constant dense<0.000000e+00> : vector<320x64xf32>
    %9 = tpu.matmul %1, %8, %cst_8 {dimension_numbers = #tpu.dot_dimension_numbers<[1], [0], [0], [1], [0, 0, 1, 1], [], []>} : vector<320x320xbf16>, vector<320x64xbf16>, vector<320x64xf32> -> vector<320x64xf32>
    %10 = vector.shape_cast %9 : vector<320x64xf32> to vector<1x20x16x64xf32>
    %11 = vector.extract_strided_slice %10 {offsets = [0, 1, 0, 0], sizes = [1, 16, 16, 64], strides = [1, 1, 1, 1]} : vector<1x20x16x64xf32> to vector<1x16x16x64xf32>
    %12 = arith.addf %6, %11 : vector<1x16x16x64xf32>
    %c2 = arith.constant 2 : index
    %c0_9 = arith.constant 0 : index
    %c0_10 = arith.constant 0 : index
    %13 = vector.load %arg2[%c2, %c0_9, %c0_10] : memref<5x320x64xbf16, #tpu.memory_space<vmem>>, vector<1x320x64xbf16>
    %14 = vector.shape_cast %13 : vector<1x320x64xbf16> to vector<320x64xbf16>
    %cst_11 = arith.constant dense<0.000000e+00> : vector<320x64xf32>
    %15 = tpu.matmul %1, %14, %cst_11 {dimension_numbers = #tpu.dot_dimension_numbers<[1], [0], [0], [1], [0, 0, 1, 1], [], []>} : vector<320x320xbf16>, vector<320x64xbf16>, vector<320x64xf32> -> vector<320x64xf32>
    %16 = vector.shape_cast %15 : vector<320x64xf32> to vector<1x20x16x64xf32>
    %17 = vector.extract_strided_slice %16 {offsets = [0, 2, 0, 0], sizes = [1, 16, 16, 64], strides = [1, 1, 1, 1]} : vector<1x20x16x64xf32> to vector<1x16x16x64xf32>
    %18 = arith.addf %12, %17 : vector<1x16x16x64xf32>
    %c3 = arith.constant 3 : index
    %c0_12 = arith.constant 0 : index
    %c0_13 = arith.constant 0 : index
    %19 = vector.load %arg2[%c3, %c0_12, %c0_13] : memref<5x320x64xbf16, #tpu.memory_space<vmem>>, vector<1x320x64xbf16>
    %20 = vector.shape_cast %19 : vector<1x320x64xbf16> to vector<320x64xbf16>
    %cst_14 = arith.constant dense<0.000000e+00> : vector<320x64xf32>
    %21 = tpu.matmul %1, %20, %cst_14 {dimension_numbers = #tpu.dot_dimension_numbers<[1], [0], [0], [1], [0, 0, 1, 1], [], []>} : vector<320x320xbf16>, vector<320x64xbf16>, vector<320x64xf32> -> vector<320x64xf32>
    %22 = vector.shape_cast %21 : vector<320x64xf32> to vector<1x20x16x64xf32>
    %23 = vector.extract_strided_slice %22 {offsets = [0, 3, 0, 0], sizes = [1, 16, 16, 64], strides = [1, 1, 1, 1]} : vector<1x20x16x64xf32> to vector<1x16x16x64xf32>
    %24 = arith.addf %18, %23 : vector<1x16x16x64xf32>
    %c4 = arith.constant 4 : index
    %c0_15 = arith.constant 0 : index
    %c0_16 = arith.constant 0 : index
    %25 = vector.load %arg2[%c4, %c0_15, %c0_16] : memref<5x320x64xbf16, #tpu.memory_space<vmem>>, vector<1x320x64xbf16>
    %26 = vector.shape_cast %25 : vector<1x320x64xbf16> to vector<320x64xbf16>
    %cst_17 = arith.constant dense<0.000000e+00> : vector<320x64xf32>
    %27 = tpu.matmul %1, %26, %cst_17 {dimension_numbers = #tpu.dot_dimension_numbers<[1], [0], [0], [1], [0, 0, 1, 1], [], []>} : vector<320x320xbf16>, vector<320x64xbf16>, vector<320x64xf32> -> vector<320x64xf32>
    %28 = vector.shape_cast %27 : vector<320x64xf32> to vector<1x20x16x64xf32>
    %29 = vector.extract_strided_slice %28 {offsets = [0, 4, 0, 0], sizes = [1, 16, 16, 64], strides = [1, 1, 1, 1]} : vector<1x20x16x64xf32> to vector<1x16x16x64xf32>
    %30 = arith.addf %24, %29 : vector<1x16x16x64xf32>
    %c0_18 = arith.constant 0 : index
    %c0_19 = arith.constant 0 : index
    %31 = vector.load %arg3[%c0_18, %c0_19] : memref<1x64xf32, #tpu.memory_space<vmem>>, vector<1x64xf32>
    %32 = vector.shape_cast %31 : vector<1x64xf32> to vector<1x1x1x64xf32>
    %33 = vector.broadcast %32 : vector<1x1x1x64xf32> to vector<1x16x16x64xf32>
    %34 = arith.addf %30, %33 : vector<1x16x16x64xf32>
    %cst_20 = arith.constant 0.000000e+00 : f32
    %35 = vector.broadcast %cst_20 : f32 to vector<1x16x16x64xf32>
    %36 = arith.maximumf %34, %35 : vector<1x16x16x64xf32>
    %37 = vector.extract_strided_slice %36 {offsets = [0, 0, 0, 0], sizes = [1, 16, 8, 64], strides = [1, 1, 1, 1]} : vector<1x16x16x64xf32> to vector<1x16x8x64xf32>
    %38 = vector.extract_strided_slice %36 {offsets = [0, 0, 8, 0], sizes = [1, 16, 8, 64], strides = [1, 1, 1, 1]} : vector<1x16x16x64xf32> to vector<1x16x8x64xf32>
    %39 = arith.maximumf %37, %38 : vector<1x16x8x64xf32>
    %40 = vector.shape_cast %39 : vector<1x16x8x64xf32> to vector<1x8x16x64xf32>
    %41 = vector.extract_strided_slice %40 {offsets = [0, 0, 0, 0], sizes = [1, 8, 8, 64], strides = [1, 1, 1, 1]} : vector<1x8x16x64xf32> to vector<1x8x8x64xf32>
    %42 = vector.extract_strided_slice %40 {offsets = [0, 0, 8, 0], sizes = [1, 8, 8, 64], strides = [1, 1, 1, 1]} : vector<1x8x16x64xf32> to vector<1x8x8x64xf32>
    %43 = arith.maximumf %41, %42 : vector<1x8x8x64xf32>
    %44 = arith.truncf %43 : vector<1x8x8x64xf32> to vector<1x8x8x64xbf16>
    %c0_21 = arith.constant 0 : index
    %c0_22 = arith.constant 0 : index
    %c0_23 = arith.constant 0 : index
    %c0_24 = arith.constant 0 : index
    %45 = vector.load %arg4[%c0_21, %c0_22, %c0_23, %c0_24] : memref<1x8x8x64xbf16, #tpu.memory_space<vmem>>, vector<1x8x8x64xbf16>
    tpu.vector_store %arg4[%c0_21, %c0_22, %c0_23, %c0_24], %44 {strides = array<i32>} : memref<1x8x8x64xbf16, #tpu.memory_space<vmem>>, vector<1x8x8x64xbf16>,
    return
  }
  func.func @transform_0(%arg0: i32) -> (i32, i32, i32, i32) {
    %c0_i32 = arith.constant 0 : i32
    %c0_i32_0 = arith.constant 0 : i32
    %c0_i32_1 = arith.constant 0 : i32
    %c0_i32_2 = arith.constant 0 : i32
    return %arg0, %c0_i32, %c0_i32_0, %c0_i32_1 : i32, i32, i32, i32
  }
  func.func @transform_1(%arg0: i32) -> (i32, i32, i32) {
    %c0_i32 = arith.constant 0 : i32
    %c0_i32_0 = arith.constant 0 : i32
    %c0_i32_1 = arith.constant 0 : i32
    %c0_i32_2 = arith.constant 0 : i32
    return %c0_i32, %c0_i32_0, %c0_i32_1 : i32, i32, i32
  }
  func.func @transform_2(%arg0: i32) -> (i32, i32) {
    %c0_i32 = arith.constant 0 : i32
    %c0_i32_0 = arith.constant 0 : i32
    %c0_i32_1 = arith.constant 0 : i32
    return %c0_i32, %c0_i32_0 : i32, i32
  }
  func.func @transform_3(%arg0: i32) -> (i32, i32, i32, i32) {
    %c0_i32 = arith.constant 0 : i32
    %c0_i32_0 = arith.constant 0 : i32
    %c0_i32_1 = arith.constant 0 : i32
    %c0_i32_2 = arith.constant 0 : i32
    return %arg0, %c0_i32, %c0_i32_0, %c0_i32_1 : i32, i32, i32, i32
  }
}

module attributes {stable_mosaic.version = 11 : i64} {
  func.func @_mlp3_kernel(%arg0: i32, %arg1: memref<8x4096xbf16, #tpu.memory_space<vmem>>, %arg2: memref<4096x384xbf16, #tpu.memory_space<vmem>>, %arg3: memref<1x384xf32, #tpu.memory_space<vmem>>, %arg4: memref<384x192xbf16, #tpu.memory_space<vmem>>, %arg5: memref<1x192xf32, #tpu.memory_space<vmem>>, %arg6: memref<192x128xbf16, #tpu.memory_space<vmem>>, %arg7: memref<1x128xf32, #tpu.memory_space<vmem>>, %arg8: memref<8x128xf32, #tpu.memory_space<vmem>>) attributes {dimension_semantics = [#tpu.dimension_semantics<parallel>], iteration_bounds = array<i64: 1>, scalar_prefetch = 0 : i64, scratch_operands = 0 : i64, tpu.core_type = #tpu.core_type<tc>, window_params = [{transform_indices = @transform_0, window_bounds = array<i64: 8, 4096>}, {pipeline_mode = #tpu.pipeline_mode<synchronous>, transform_indices = @transform_1, window_bounds = array<i64: 4096, 384>}, {pipeline_mode = #tpu.pipeline_mode<synchronous>, transform_indices = @transform_2, window_bounds = array<i64: 1, 384>}, {pipeline_mode = #tpu.pipeline_mode<synchronous>, transform_indices = @transform_3, window_bounds = array<i64: 384, 192>}, {pipeline_mode = #tpu.pipeline_mode<synchronous>, transform_indices = @transform_4, window_bounds = array<i64: 1, 192>}, {pipeline_mode = #tpu.pipeline_mode<synchronous>, transform_indices = @transform_5, window_bounds = array<i64: 192, 128>}, {pipeline_mode = #tpu.pipeline_mode<synchronous>, transform_indices = @transform_6, window_bounds = array<i64: 1, 128>}, {transform_indices = @transform_7, window_bounds = array<i64: 8, 128>}]} {
    %c0 = arith.constant 0 : index
    %c0_0 = arith.constant 0 : index
    %0 = vector.load %arg1[%c0, %c0_0] : memref<8x4096xbf16, #tpu.memory_space<vmem>>, vector<8x4096xbf16>
    %c0_1 = arith.constant 0 : index
    %c0_2 = arith.constant 0 : index
    %1 = vector.load %arg2[%c0_1, %c0_2] : memref<4096x384xbf16, #tpu.memory_space<vmem>>, vector<4096x384xbf16>
    %cst = arith.constant dense<0.000000e+00> : vector<8x384xf32>
    %2 = tpu.matmul %0, %1, %cst {dimension_numbers = #tpu.dot_dimension_numbers<[1], [0], [0], [1], [0, 0, 1, 1], [], []>} : vector<8x4096xbf16>, vector<4096x384xbf16>, vector<8x384xf32> -> vector<8x384xf32>
    %c0_3 = arith.constant 0 : index
    %c0_4 = arith.constant 0 : index
    %3 = vector.load %arg3[%c0_3, %c0_4] : memref<1x384xf32, #tpu.memory_space<vmem>>, vector<1x384xf32>
    %4 = vector.broadcast %3 : vector<1x384xf32> to vector<8x384xf32>
    %5 = arith.addf %2, %4 : vector<8x384xf32>
    %cst_5 = arith.constant 0.000000e+00 : f32
    %6 = vector.broadcast %cst_5 : f32 to vector<8x384xf32>
    %7 = arith.maximumf %5, %6 : vector<8x384xf32>
    %8 = arith.truncf %7 : vector<8x384xf32> to vector<8x384xbf16>
    %c0_6 = arith.constant 0 : index
    %c0_7 = arith.constant 0 : index
    %9 = vector.load %arg4[%c0_6, %c0_7] : memref<384x192xbf16, #tpu.memory_space<vmem>>, vector<384x192xbf16>
    %cst_8 = arith.constant dense<0.000000e+00> : vector<8x192xf32>
    %10 = tpu.matmul %8, %9, %cst_8 {dimension_numbers = #tpu.dot_dimension_numbers<[1], [0], [0], [1], [0, 0, 1, 1], [], []>} : vector<8x384xbf16>, vector<384x192xbf16>, vector<8x192xf32> -> vector<8x192xf32>
    %c0_9 = arith.constant 0 : index
    %c0_10 = arith.constant 0 : index
    %11 = vector.load %arg5[%c0_9, %c0_10] : memref<1x192xf32, #tpu.memory_space<vmem>>, vector<1x192xf32>
    %12 = vector.broadcast %11 : vector<1x192xf32> to vector<8x192xf32>
    %13 = arith.addf %10, %12 : vector<8x192xf32>
    %cst_11 = arith.constant 0.000000e+00 : f32
    %14 = vector.broadcast %cst_11 : f32 to vector<8x192xf32>
    %15 = arith.maximumf %13, %14 : vector<8x192xf32>
    %16 = arith.truncf %15 : vector<8x192xf32> to vector<8x192xbf16>
    %c0_12 = arith.constant 0 : index
    %c0_13 = arith.constant 0 : index
    %17 = vector.load %arg6[%c0_12, %c0_13] : memref<192x128xbf16, #tpu.memory_space<vmem>>, vector<192x128xbf16>
    %cst_14 = arith.constant dense<0.000000e+00> : vector<8x128xf32>
    %18 = tpu.matmul %16, %17, %cst_14 {dimension_numbers = #tpu.dot_dimension_numbers<[1], [0], [0], [1], [0, 0, 1, 1], [], []>} : vector<8x192xbf16>, vector<192x128xbf16>, vector<8x128xf32> -> vector<8x128xf32>
    %c0_15 = arith.constant 0 : index
    %c0_16 = arith.constant 0 : index
    %19 = vector.load %arg7[%c0_15, %c0_16] : memref<1x128xf32, #tpu.memory_space<vmem>>, vector<1x128xf32>
    %20 = vector.broadcast %19 : vector<1x128xf32> to vector<8x128xf32>
    %21 = arith.addf %18, %20 : vector<8x128xf32>
    %c0_17 = arith.constant 0 : index
    %c0_18 = arith.constant 0 : index
    %22 = vector.load %arg8[%c0_17, %c0_18] : memref<8x128xf32, #tpu.memory_space<vmem>>, vector<8x128xf32>
    tpu.vector_store %arg8[%c0_17, %c0_18], %21 {strides = array<i32>} : memref<8x128xf32, #tpu.memory_space<vmem>>, vector<8x128xf32>,
    return
  }
  func.func @transform_0(%arg0: i32) -> (i32, i32) {
    %c0_i32 = arith.constant 0 : i32
    %c0_i32_0 = arith.constant 0 : i32
    return %arg0, %c0_i32 : i32, i32
  }
  func.func @transform_1(%arg0: i32) -> (i32, i32) {
    %c0_i32 = arith.constant 0 : i32
    %c0_i32_0 = arith.constant 0 : i32
    %c0_i32_1 = arith.constant 0 : i32
    return %c0_i32, %c0_i32_0 : i32, i32
  }
  func.func @transform_2(%arg0: i32) -> (i32, i32) {
    %c0_i32 = arith.constant 0 : i32
    %c0_i32_0 = arith.constant 0 : i32
    %c0_i32_1 = arith.constant 0 : i32
    return %c0_i32, %c0_i32_0 : i32, i32
  }
  func.func @transform_3(%arg0: i32) -> (i32, i32) {
    %c0_i32 = arith.constant 0 : i32
    %c0_i32_0 = arith.constant 0 : i32
    %c0_i32_1 = arith.constant 0 : i32
    return %c0_i32, %c0_i32_0 : i32, i32
  }
  func.func @transform_4(%arg0: i32) -> (i32, i32) {
    %c0_i32 = arith.constant 0 : i32
    %c0_i32_0 = arith.constant 0 : i32
    %c0_i32_1 = arith.constant 0 : i32
    return %c0_i32, %c0_i32_0 : i32, i32
  }
  func.func @transform_5(%arg0: i32) -> (i32, i32) {
    %c0_i32 = arith.constant 0 : i32
    %c0_i32_0 = arith.constant 0 : i32
    %c0_i32_1 = arith.constant 0 : i32
    return %c0_i32, %c0_i32_0 : i32, i32
  }
  func.func @transform_6(%arg0: i32) -> (i32, i32) {
    %c0_i32 = arith.constant 0 : i32
    %c0_i32_0 = arith.constant 0 : i32
    %c0_i32_1 = arith.constant 0 : i32
    return %c0_i32, %c0_i32_0 : i32, i32
  }
  func.func @transform_7(%arg0: i32) -> (i32, i32) {
    %c0_i32 = arith.constant 0 : i32
    %c0_i32_0 = arith.constant 0 : i32
    return %arg0, %c0_i32 : i32, i32
  }
}

</mosaic_0001>

<bundles_post_ra>
// kernel: my_cnn_forward.3
= control target key start
LH: loop header
LB: loop body
LE: loop exit
PB: predicated region body
PF: predicated region fallthrough
CT: control target
= control target key end

     0   :  { %s2359_s12 = smov 0   ;;  %s2666_s0 = inlined_call_operand.vmem [shape: bf16[2,32,32,128], index: 0, kind: input, shape index: {}]   ;;  %s2667_s1 = inlined_call_operand.vmem [shape: bf16[1,128,64], index: 1, kind: input, shape index: {}]   ;;  %s2668_s2 = inlined_call_operand.vmem [shape: f32[1,64], index: 2, kind: input, shape index: {}]   ;;  %s2669_s3 = inlined_call_operand.vmem [shape: bf16[2,16,16,64], index: 3, kind: output, shape index: {}]  }
   0x1 LB: > { %s1868_s13 = sadd.s32 4294967295, %s2337_s12   ;;  %p1872_p0 = scmp.ge.s32.totalorder %s2337_s12, 1  ;;  %s2337_s12 = sphi %s2359_s12, %s13_s12  }
   0x2   : > { %p137_p1 = scmp.lt.s32.totalorder %s2337_s12, 3 }
   0x4   : > { %p138_p2 = pnand %p1872_p0, %p137_p1 }
   0x5   : > { %v2258_v0 = vld [vmem:[%s2667_s1] sm:$0xff] (!%p138_p2)   ;;  %p161_p3 = scmp.lt.s32.totalorder (!%p138_p2), %s1868_s13, 1  ;;  %v2259_v1 = vld [vmem:[%s2667_s1 + $0x8] sm:$0xff] (!%p138_p2)   ;;  %v2260_v2 = vld [vmem:[%s2667_s1 + $0x10] sm:$0xff] (!%p138_p2)   ;;  %vm1780_vm0 = vcmask (!%p138_p2), 519168  }
   0x6   : > { %141 = sbr.rel (%p138_p2) target bundleno = 384 (0x180), region = 32  ;;  %2090 = vmatprep.subr.bf16.mxu0 (!%p138_p2), %v2258_v0  ;;  %2234 = vmatprep.subr.bf16.mxu1 (!%p138_p2), %v2258_v0  ;;  %v2261_v3 = vld [vmem:[%s2667_s1 + $0x18] sm:$0xff] (!%p138_p2)   ;;  %v2262_v6 = vld [vmem:[%s2667_s1 + $0x20] sm:$0xff] (!%p138_p2)   ;;  %v2263_v7 = vld [vmem:[%s2667_s1 + $0x28] sm:$0xff] (!%p138_p2)  }
   0x7   : > { %2091 = vmatpush3.bf16.msra.mxu0 (!%p138_p2), %v2258_v0  ;;  %2242 = vmatpush3.bf16.msra.mxu1 (!%p138_p2), %v2258_v0  ;;  %v2264_v8 = vld [vmem:[%s2667_s1 + $0x30] sm:$0xff] (!%p138_p2)   ;;  %v2265_v9 = vld [vmem:[%s2667_s1 + $0x38] sm:$0xff] (!%p138_p2)  }
   0x8   : > { %2092 = vmatprep.subr.bf16.mxu0 (!%p138_p2), %v2259_v1  ;;  %2235 = vmatprep.subr.bf16.mxu1 (!%p138_p2), %v2259_v1 }
   0xb   : > { %2093 = vmatpush3.bf16.msra.mxu0 (!%p138_p2), %v2259_v1  ;;  %2243 = vmatpush3.bf16.msra.mxu1 (!%p138_p2), %v2259_v1 }
   0xc   : > { %2094 = vmatprep.subr.bf16.mxu0 (!%p138_p2), %v2260_v2  ;;  %2236 = vmatprep.subr.bf16.mxu1 (!%p138_p2), %v2260_v2 }
   0xd   : > { %s2671_s13 = smov (!%p161_p3, %s1868_s13), 1 }
   0xe   : > { %s1984_s20 = sshll.u32 %s2671_s13, 9  ;;  %s1985_s9 = sshll.u32 %s2671_s13, 7 }
   0xf   : > { %s2382_s23 = scalar_lea.vmem %s2666_s0, %s1984_s20  ;;  %2095 = vmatpush3.bf16.msra.mxu0 %v2260_v2  ;;  %2244 = vmatpush3.bf16.msra.mxu1 %v2260_v2  ;;  %s2488_s14 = scalar_lea.vmem %s2669_s3, %s1985_s9 }
  0x10   : > { %v2266_v4 = vld [vmem:[%s2382_s23] sm:$0xff]   ;;  %2096 = vmatprep.subr.bf16.mxu0 %v2261_v3  ;;  %2237 = vmatprep.subr.bf16.mxu1 %v2261_v3  ;;  %v2268_v10 = vld [vmem:[%s2382_s23 + $0x8] sm:$0xff]   ;;  %v2270_v12 = vld [vmem:[%s2382_s23 + $0x10] sm:$0xff]  }
  0x11   : > { %v2267_v5 = vld [vmem:[%s2382_s23 + $0x100] sm:$0xff]   ;;  %2106 = vmatprep.mubr.bf16.mxu0 %v2266_v4  ;;  %v2269_v11 = vld [vmem:[%s2382_s23 + $0x108] sm:$0xff]   ;;  %v2271_v13 = vld [vmem:[%s2382_s23 + $0x110] sm:$0xff]  }
  0x12   : > { %2170 = vmatprep.mubr.bf16.mxu1 %v2267_v5  ;;  %v2272_v14 = vld [vmem:[%s2382_s23 + $0x18] sm:$0xff]   ;;  %v2274_v16 = vld [vmem:[%s2382_s23 + $0x20] sm:$0xff]   ;;  %v2276_v18 = vld [vmem:[%s2382_s23 + $0x28] sm:$0xff]  }
  0x13   : > { %2097 = vmatpush3.bf16.msra.mxu0 %v2261_v3  ;;  %2245 = vmatpush3.bf16.msra.mxu1 %v2261_v3  ;;  %v2273_v15 = vld [vmem:[%s2382_s23 + $0x118] sm:$0xff]   ;;  %v2275_v17 = vld [vmem:[%s2382_s23 + $0x120] sm:$0xff]   ;;  %v2277_v19 = vld [vmem:[%s2382_s23 + $0x128] sm:$0xff]  }
  0x14   : > { %2098 = vmatprep.subr.bf16.mxu0 %v2262_v6  ;;  %2238 = vmatprep.subr.bf16.mxu1 %v2262_v6  ;;  %v2278_v20 = vld [vmem:[%s2382_s23 + $0x30] sm:$0xff]   ;;  %v2280_v22 = vld [vmem:[%s2382_s23 + $0x38] sm:$0xff]   ;;  %v2282_v24 = vld [vmem:[%s2382_s23 + $0x40] sm:$0xff]  }
  0x15   : > { %v2279_v21 = vld [vmem:[%s2382_s23 + $0x130] sm:$0xff]   ;;  %v2281_v23 = vld [vmem:[%s2382_s23 + $0x138] sm:$0xff]   ;;  %v2283_v25 = vld [vmem:[%s2382_s23 + $0x140] sm:$0xff]  }
  0x16   : > { %v2284_v26 = vld [vmem:[%s2382_s23 + $0x48] sm:$0xff]   ;;  %v2286_v28 = vld [vmem:[%s2382_s23 + $0x50] sm:$0xff]   ;;  %v2288_v30 = vld [vmem:[%s2382_s23 + $0x58] sm:$0xff]  }
  0x17   : > { %2099 = vmatpush3.bf16.msra.mxu0 %v2262_v6  ;;  %2246 = vmatpush3.bf16.msra.mxu1 %v2262_v6  ;;  %v2285_v27 = vld [vmem:[%s2382_s23 + $0x148] sm:$0xff]   ;;  %v2287_v29 = vld [vmem:[%s2382_s23 + $0x150] sm:$0xff]   ;;  %v2289_v31 = vld [vmem:[%s2382_s23 + $0x158] sm:$0xff]  }
  0x18   : > { %2100 = vmatprep.subr.bf16.mxu0 %v2263_v7  ;;  %2239 = vmatprep.subr.bf16.mxu1 %v2263_v7  ;;  %v2290_v32 = vld [vmem:[%s2382_s23 + $0x60] sm:$0xff]   ;;  %v2292_v34 = vld [vmem:[%s2382_s23 + $0x68] sm:$0xff]   ;;  %v2294_v36 = vld [vmem:[%s2382_s23 + $0x70] sm:$0xff]  }
  0x19   : > { %v2291_v33 = vld [vmem:[%s2382_s23 + $0x160] sm:$0xff]   ;;  %v2293_v35 = vld [vmem:[%s2382_s23 + $0x168] sm:$0xff]   ;;  %v2295_v37 = vld [vmem:[%s2382_s23 + $0x170] sm:$0xff]  }
  0x1a   : > { %v2296_v38 = vld [vmem:[%s2382_s23 + $0x78] sm:$0xff]   ;;  %v2298_v40 = vld [vmem:[%s2382_s23 + $0x80] sm:$0xff]   ;;  %v2300_v42 = vld [vmem:[%s2382_s23 + $0x88] sm:$0xff]  }
  0x1b   : > { %2101 = vmatpush3.bf16.msra.mxu0 %v2263_v7  ;;  %2247 = vmatpush3.bf16.msra.mxu1 %v2263_v7  ;;  %v2297_v39 = vld [vmem:[%s2382_s23 + $0x178] sm:$0xff]   ;;  %v2299_v41 = vld [vmem:[%s2382_s23 + $0x180] sm:$0xff]   ;;  %v2301_v43 = vld [vmem:[%s2382_s23 + $0x188] sm:$0xff]  }
  0x1c   : > { %2102 = vmatprep.subr.bf16.mxu0 %v2264_v8  ;;  %2240 = vmatprep.subr.bf16.mxu1 %v2264_v8  ;;  %v2302_v44 = vld [vmem:[%s2382_s23 + $0x90] sm:$0xff]   ;;  %v2304_v46 = vld [vmem:[%s2382_s23 + $0x98] sm:$0xff]   ;;  %v2306_v48 = vld [vmem:[%s2382_s23 + $0xa0] sm:$0xff]  }
  0x1d   : > { %v2303_v45 = vld [vmem:[%s2382_s23 + $0x190] sm:$0xff]   ;;  %v2305_v47 = vld [vmem:[%s2382_s23 + $0x198] sm:$0xff]   ;;  %v2307_v49 = vld [vmem:[%s2382_s23 + $0x1a0] sm:$0xff]  }
  0x1e   : > { %v2308_v50 = vld [vmem:[%s2382_s23 + $0xa8] sm:$0xff]   ;;  %v2310_v52 = vld [vmem:[%s2382_s23 + $0xb0] sm:$0xff]   ;;  %v2312_v54 = vld [vmem:[%s2382_s23 + $0xb8] sm:$0xff]  }
  0x1f   : > { %2103 = vmatpush3.bf16.msra.mxu0 %v2264_v8  ;;  %2248 = vmatpush3.bf16.msra.mxu1 %v2264_v8  ;;  %v2309_v51 = vld [vmem:[%s2382_s23 + $0x1a8] sm:$0xff]   ;;  %v2311_v53 = vld [vmem:[%s2382_s23 + $0x1b0] sm:$0xff]   ;;  %v2313_v55 = vld [vmem:[%s2382_s23 + $0x1b8] sm:$0xff]  }
  0x20   : > { %2104 = vmatprep.subr.bf16.mxu0 %v2265_v9  ;;  %2241 = vmatprep.subr.bf16.mxu1 %v2265_v9  ;;  %v2314_v56 = vld [vmem:[%s2382_s23 + $0xc0] sm:$0xff]   ;;  %v2316_v58 = vld [vmem:[%s2382_s23 + $0xc8] sm:$0xff]   ;;  %v2318_v60 = vld [vmem:[%s2382_s23 + $0xd0] sm:$0xff]  }
  0x21   : > { %v2315_v57 = vld [vmem:[%s2382_s23 + $0x1c0] sm:$0xff]   ;;  %v2317_v59 = vld [vmem:[%s2382_s23 + $0x1c8] sm:$0xff]   ;;  %v2319_v61 = vld [vmem:[%s2382_s23 + $0x1d0] sm:$0xff]  }
  0x22   : > { %v2320_v62 = vld [vmem:[%s2382_s23 + $0xd8] sm:$0xff]   ;;  %v2322_v0 = vld [vmem:[%s2382_s23 + $0xe0] sm:$0xff]   ;;  %v2324_v2 = vld [vmem:[%s2382_s23 + $0xe8] sm:$0xff]  }
  0x23   : > { %2105 = vmatpush3.bf16.msra.mxu0 %v2265_v9  ;;  %2249 = vmatpush3.bf16.msra.mxu1 %v2265_v9  ;;  %v2321_v63 = vld [vmem:[%s2382_s23 + $0x1d8] sm:$0xff]   ;;  %v2323_v1 = vld [vmem:[%s2382_s23 + $0x1e0] sm:$0xff]   ;;  %v2325_v3 = vld [vmem:[%s2382_s23 + $0x1e8] sm:$0xff]  }
  0x24   : > { %v2326_v4 = vld [vmem:[%s2382_s23 + $0xf0] sm:$0xff]   ;;  %v2328_v6 = vld [vmem:[%s2382_s23 + $0xf8] sm:$0xff]   ;;  %v2466_v8 = vld [vmem:[%s2668_s2] ss:$0 sm:$0xff] }
  0x25   : > { %v2327_v5 = vld [vmem:[%s2382_s23 + $0x1f0] sm:$0xff]   ;;  %v2329_v7 = vld [vmem:[%s2382_s23 + $0x1f8] sm:$0xff]  }
  0x26   : > { %2107 = vmatmul.mubr.bf16.vlgmr.msra.gmra.mrb[0].mxu0 %v2268_v10  ;;  %2171 = vmatmul.mubr.bf16.vlgmr.msra.gmra.mrb[0].mxu1 %v2269_v11 }
  0x27   : > { %2110 = vmatprep.mubr.bf16.mxu0 %v2270_v12  ;;  %2174 = vmatprep.mubr.bf16.mxu1 %v2271_v13 }
  0x2e   : > { %2111 = vmatmul.mubr.bf16.gmra.mrb[4].mxu0 %v2272_v14  ;;  %2175 = vmatmul.mubr.bf16.gmra.mrb[4].mxu1 %v2273_v15 }
  0x2f   : > { %2114 = vmatprep.mubr.bf16.mxu0 %v2274_v16  ;;  %2178 = vmatprep.mubr.bf16.mxu1 %v2275_v17 }
  0x36   : > { %2115 = vmatmul.mubr.bf16.gmra.mrb[8].mxu0 %v2276_v18  ;;  %2179 = vmatmul.mubr.bf16.gmra.mrb[8].mxu1 %v2277_v19 }
  0x37   : > { %2118 = vmatprep.mubr.bf16.mxu0 %v2278_v20  ;;  %2182 = vmatprep.mubr.bf16.mxu1 %v2279_v21 }
  0x3e   : > { %2119 = vmatmul.mubr.bf16.gmra.mrb[12].mxu0 %v2280_v22  ;;  %2183 = vmatmul.mubr.bf16.gmra.mrb[12].mxu1 %v2281_v23 }
  0x3f   : > { %2122 = vmatprep.mubr.bf16.mxu0 %v2282_v24  ;;  %2186 = vmatprep.mubr.bf16.mxu1 %v2283_v25 }
  0x46   : > { %2123 = vmatmul.mubr.bf16.gmra.mrb[16].mxu0 %v2284_v26  ;;  %2187 = vmatmul.mubr.bf16.gmra.mrb[16].mxu1 %v2285_v27 }
  0x47   : > { %2126 = vmatprep.mubr.bf16.mxu0 %v2286_v28  ;;  %2190 = vmatprep.mubr.bf16.mxu1 %v2287_v29 }
  0x4e   : > { %2127 = vmatmul.mubr.bf16.gmra.mrb[20].mxu0 %v2288_v30  ;;  %2191 = vmatmul.mubr.bf16.gmra.mrb[20].mxu1 %v2289_v31 }
  0x4f   : > { %2130 = vmatprep.mubr.bf16.mxu0 %v2290_v32  ;;  %2194 = vmatprep.mubr.bf16.mxu1 %v2291_v33 }
  0x56   : > { %2131 = vmatmul.mubr.bf16.gmra.mrb[24].mxu0 %v2292_v34  ;;  %2195 = vmatmul.mubr.bf16.gmra.mrb[24].mxu1 %v2293_v35 }
  0x57   : > { %2134 = vmatprep.mubr.bf16.mxu0 %v2294_v36  ;;  %2198 = vmatprep.mubr.bf16.mxu1 %v2295_v37 }
  0x5e   : > { %2135 = vmatmul.mubr.bf16.gmra.mrb[28].mxu0 %v2296_v38  ;;  %2199 = vmatmul.mubr.bf16.gmra.mrb[28].mxu1 %v2297_v39 }
  0x5f   : > { %2138 = vmatprep.mubr.bf16.mxu0 %v2298_v40  ;;  %2202 = vmatprep.mubr.bf16.mxu1 %v2299_v41 }
  0x66   : > { %2139 = vmatmul.mubr.bf16.gmra.mrb[32].mxu0 %v2300_v42  ;;  %2203 = vmatmul.mubr.bf16.gmra.mrb[32].mxu1 %v2301_v43 }
  0x67   : > { %2142 = vmatprep.mubr.bf16.mxu0 %v2302_v44  ;;  %2206 = vmatprep.mubr.bf16.mxu1 %v2303_v45 }
  0x6e   : > { %2143 = vmatmul.mubr.bf16.gmra.mrb[36].mxu0 %v2304_v46  ;;  %2207 = vmatmul.mubr.bf16.gmra.mrb[36].mxu1 %v2305_v47 }
  0x6f   : > { %2146 = vmatprep.mubr.bf16.mxu0 %v2306_v48  ;;  %2210 = vmatprep.mubr.bf16.mxu1 %v2307_v49 }
  0x76   : > { %2147 = vmatmul.mubr.bf16.gmra.mrb[40].mxu0 %v2308_v50  ;;  %2211 = vmatmul.mubr.bf16.gmra.mrb[40].mxu1 %v2309_v51 }
  0x77   : > { %2150 = vmatprep.mubr.bf16.mxu0 %v2310_v52  ;;  %2214 = vmatprep.mubr.bf16.mxu1 %v2311_v53 }
  0x7e   : > { %2151 = vmatmul.mubr.bf16.gmra.mrb[44].mxu0 %v2312_v54  ;;  %2215 = vmatmul.mubr.bf16.gmra.mrb[44].mxu1 %v2313_v55 }
  0x7f   : > { %2154 = vmatprep.mubr.bf16.mxu0 %v2314_v56  ;;  %2218 = vmatprep.mubr.bf16.mxu1 %v2315_v57 }
  0x86   : > { %2155 = vmatmul.mubr.bf16.gmra.mrb[48].mxu0 %v2316_v58  ;;  %2219 = vmatmul.mubr.bf16.gmra.mrb[48].mxu1 %v2317_v59 }
  0x87   : > { %2158 = vmatprep.mubr.bf16.mxu0 %v2318_v60  ;;  %2222 = vmatprep.mubr.bf16.mxu1 %v2319_v61 }
  0x8e   : > { %2159 = vmatmul.mubr.bf16.gmra.mrb[52].mxu0 %v2320_v62  ;;  %2223 = vmatmul.mubr.bf16.gmra.mrb[52].mxu1 %v2321_v63 }
  0x8f   : > { %2162 = vmatprep.mubr.bf16.mxu0 %v2322_v0  ;;  %2226 = vmatprep.mubr.bf16.mxu1 %v2323_v1 }
  0x96   : > { %2163 = vmatmul.mubr.bf16.gmra.mrb[56].mxu0 %v2324_v2  ;;  %2227 = vmatmul.mubr.bf16.gmra.mrb[56].mxu1 %v2325_v3 }
  0x97   : > { %2166 = vmatprep.mubr.bf16.mxu0 %v2326_v4  ;;  %2230 = vmatprep.mubr.bf16.mxu1 %v2327_v5 }
  0x9e   : > { %2167 = vmatmul.mubr.bf16.gmra.mrb[60].mxu0 %v2328_v6  ;;  %2231 = vmatmul.mubr.bf16.gmra.mrb[60].mxu1 %v2329_v7 }
  0xf9   : > { %v2108_v9 = vpop.f32.mrb[0].mxu0  ;;  %v2172_v10 = vpop.f32.mrb[0].mxu1 }
  0xfa   : > { %v1302_v11 = vadd.f32 %v2108_v9, %v2466_v8  ;;  %v1366_v12 = vadd.f32 %v2172_v10, %v2466_v8  ;;  %v782_v13 = vpop.f32.mrb[1].mxu0  ;;  %v1038_v14 = vpop.f32.mrb[1].mxu1 }
  0xfb   : > { %v1300_v15 = vadd.f32 %v2466_v8, %v782_v13  ;;  %v1364_v16 = vadd.f32 %v2466_v8, %v1038_v14  ;;  %v2109_v17 = vpop.f32.mrb[2].mxu0  ;;  %v2173_v18 = vpop.f32.mrb[2].mxu1 }
  0xfc   : > { %v1430_v19 = vmax.f32 %v1302_v11, 0.0  ;;  %v1494_v20 = vmax.f32 %v1366_v12, 0.0  ;;  %v1303_v21 = vadd.f32 %v2109_v17, %v2466_v8  ;;  %v1367_v22 = vadd.f32 %v2173_v18, %v2466_v8  ;;  %v785_v23 = vpop.f32.mrb[3].mxu0  ;;  %v1041_v24 = vpop.f32.mrb[3].mxu1 }
  0xfd   : > { %v1428_v25 = vmax.f32 %v1300_v15, 0.0  ;;  %v1492_v26 = vmax.f32 %v1364_v16, 0.0  ;;  %v1301_v27 = vadd.f32 %v2466_v8, %v785_v23  ;;  %v1365_v28 = vadd.f32 %v2466_v8, %v1041_v24 }
  0xfe   : > { %v1431_v29 = vmax.f32 %v1303_v21, 0.0  ;;  %v1495_v30 = vmax.f32 %v1367_v22, 0.0 }
  0xff   : > { %v1556_v31 = vmax.f32 %v1428_v25, %v1430_v19  ;;  %v1588_v32 = vmax.f32 %v1492_v26, %v1494_v20  ;;  %v1429_v33 = vmax.f32 %v1301_v27, 0.0  ;;  %v1493_v34 = vmax.f32 %v1365_v28, 0.0 }
 0x101   : > { %v1557_v35 = vmax.f32 %v1429_v33, %v1431_v29  ;;  %v1589_v36 = vmax.f32 %v1493_v34, %v1495_v30  ;;  %v2112_v37 = vpop.f32.mrb[4].mxu0  ;;  %v2176_v38 = vpop.f32.mrb[4].mxu1 }
 0x102   : > { %v1306_v39 = vadd.f32 %v2112_v37, %v2466_v8  ;;  %v1370_v40 = vadd.f32 %v2176_v38, %v2466_v8  ;;  %v798_v41 = vpop.f32.mrb[5].mxu0  ;;  %v1054_v42 = vpop.f32.mrb[5].mxu1 }
 0x103   : > { %v1304_v43 = vadd.f32 %v2466_v8, %v798_v41  ;;  %v1368_v44 = vadd.f32 %v2466_v8, %v1054_v42  ;;  %v2113_v45 = vpop.f32.mrb[6].mxu0  ;;  %v2177_v46 = vpop.f32.mrb[6].mxu1 }
 0x104   : > { %v1434_v47 = vmax.f32 %v1306_v39, 0.0  ;;  %v1498_v48 = vmax.f32 %v1370_v40, 0.0  ;;  %v1307_v49 = vadd.f32 %v2113_v45, %v2466_v8  ;;  %v1371_v50 = vadd.f32 %v2177_v46, %v2466_v8  ;;  %v801_v51 = vpop.f32.mrb[7].mxu0  ;;  %v1057_v52 = vpop.f32.mrb[7].mxu1 }
 0x105   : > { %v1432_v53 = vmax.f32 %v1304_v43, 0.0  ;;  %v1496_v54 = vmax.f32 %v1368_v44, 0.0  ;;  %v1305_v55 = vadd.f32 %v2466_v8, %v801_v51  ;;  %v1369_v56 = vadd.f32 %v2466_v8, %v1057_v52 }
 0x106   : > { %v1435_v57 = vmax.f32 %v1307_v49, 0.0  ;;  %v1499_v58 = vmax.f32 %v1371_v50, 0.0 }
 0x107   : > { %v1558_v59 = vmax.f32 %v1432_v53, %v1434_v47  ;;  %v1590_v60 = vmax.f32 %v1496_v54, %v1498_v48  ;;  %v1433_v61 = vmax.f32 %v1305_v55, 0.0  ;;  %v1497_v62 = vmax.f32 %v1369_v56, 0.0 }
 0x109   : > { %v1620_v63 = vmax.f32 %v1556_v31, %v1558_v59  ;;  %v1636_v0 = vmax.f32 %v1588_v32, %v1590_v60  ;;  %v1559_v1 = vmax.f32 %v1433_v61, %v1435_v57  ;;  %v1591_v2 = vmax.f32 %v1497_v62, %v1499_v58  ;;  %v2116_v3 = vpop.f32.mrb[8].mxu0  ;;  %v2180_v4 = vpop.f32.mrb[8].mxu1 }
 0x10a   : > { %v1310_v5 = vadd.f32 %v2116_v3, %v2466_v8  ;;  %v1374_v6 = vadd.f32 %v2180_v4, %v2466_v8  ;;  %v814_v7 = vpop.f32.mrb[9].mxu0  ;;  %v1070_v9 = vpop.f32.mrb[9].mxu1 }
 0x10b   : > { %v1986_v10 = vpack.c.bf16 %v1620_v63, %v1620_v63  ;;  %v2002_v11 = vpack.c.bf16 %v1636_v0, %v1636_v0  ;;  %v1621_v12 = vmax.f32 %v1557_v35, %v1559_v1  ;;  %v1637_v13 = vmax.f32 %v1589_v36, %v1591_v2  ;;  %v2117_v14 = vpop.f32.mrb[10].mxu0  ;;  %v2181_v15 = vpop.f32.mrb[10].mxu1 }
 0x10c   : > { %v1438_v16 = vmax.f32 %v1310_v5, 0.0  ;;  %v1502_v17 = vmax.f32 %v1374_v6, 0.0  ;;  %v1308_v18 = vadd.f32 %v2466_v8, %v814_v7  ;;  %v1372_v19 = vadd.f32 %v2466_v8, %v1070_v9  ;;  %v817_v20 = vpop.f32.mrb[11].mxu0  ;;  %v1073_v21 = vpop.f32.mrb[11].mxu1 }
 0x10d   : > { %1781 = vst.msk [vmem:[%s2488_s14] sm:$0xf] %vm1780_vm0, %v1986_v10  ;;  %1797 = vst.msk [vmem:[%s2488_s14 + $0x40] sm:$0xf] %vm1780_vm0, %v2002_v11  ;;  %v1987_v22 = vpack.c.bf16 %v1621_v12, %v1621_v12  ;;  %v2003_v23 = vpack.c.bf16 %v1637_v13, %v1637_v13  ;;  %v1311_v24 = vadd.f32 %v2117_v14, %v2466_v8 }
 0x10e   : > { %v1375_v25 = vadd.f32 %v2181_v15, %v2466_v8  ;;  %v1436_v26 = vmax.f32 %v1308_v18, 0.0  ;;  %v1500_v27 = vmax.f32 %v1372_v19, 0.0  ;;  %v1309_v28 = vadd.f32 %v2466_v8, %v817_v20 }
 0x10f   : > { %v1373_v29 = vadd.f32 %v2466_v8, %v1073_v21  ;;  %1782 = vst.msk [vmem:[%s2488_s14 + $0x4] sm:$0xf] %vm1780_vm0, %v1987_v22  ;;  %1798 = vst.msk [vmem:[%s2488_s14 + $0x44] sm:$0xf] %vm1780_vm0, %v2003_v23  ;;  %v1439_v30 = vmax.f32 %v1311_v24, 0.0 }
 0x110   : > { %v1503_v31 = vmax.f32 %v1375_v25, 0.0  ;;  %v1560_v32 = vmax.f32 %v1436_v26, %v1438_v16  ;;  %v1592_v33 = vmax.f32 %v1500_v27, %v1502_v17  ;;  %v1437_v34 = vmax.f32 %v1309_v28, 0.0 }
 0x111   : > { %v1501_v35 = vmax.f32 %v1373_v29, 0.0  ;;  %v2120_v36 = vpop.f32.mrb[12].mxu0  ;;  %v2184_v37 = vpop.f32.mrb[12].mxu1 }
 0x112   : > { %v1561_v38 = vmax.f32 %v1437_v34, %v1439_v30  ;;  %v1314_v40 = vadd.f32 %v2120_v36, %v2466_v8  ;;  %v1378_v41 = vadd.f32 %v2184_v37, %v2466_v8  ;;  %v830_v42 = vpop.f32.mrb[13].mxu0  ;;  %v1086_v43 = vpop.f32.mrb[13].mxu1 }
 0x113   : > { %v1593_v39 = vmax.f32 %v1501_v35, %v1503_v31  ;;  %v1312_v44 = vadd.f32 %v2466_v8, %v830_v42  ;;  %v1376_v45 = vadd.f32 %v2466_v8, %v1086_v43  ;;  %v2121_v46 = vpop.f32.mrb[14].mxu0  ;;  %v2185_v47 = vpop.f32.mrb[14].mxu1 }
 0x114   : > { %v1442_v48 = vmax.f32 %v1314_v40, 0.0  ;;  %v1506_v49 = vmax.f32 %v1378_v41, 0.0  ;;  %v1315_v50 = vadd.f32 %v2121_v46, %v2466_v8  ;;  %v1379_v51 = vadd.f32 %v2185_v47, %v2466_v8  ;;  %v833_v52 = vpop.f32.mrb[15].mxu0  ;;  %v1089_v53 = vpop.f32.mrb[15].mxu1 }
 0x115   : > { %v1440_v54 = vmax.f32 %v1312_v44, 0.0  ;;  %v1504_v55 = vmax.f32 %v1376_v45, 0.0  ;;  %v1313_v56 = vadd.f32 %v2466_v8, %v833_v52  ;;  %v1377_v57 = vadd.f32 %v2466_v8, %v1089_v53 }
 0x116   : > { %v1443_v58 = vmax.f32 %v1315_v50, 0.0  ;;  %v1507_v59 = vmax.f32 %v1379_v51, 0.0 }
 0x117   : > { %v1562_v60 = vmax.f32 %v1440_v54, %v1442_v48  ;;  %v1594_v61 = vmax.f32 %v1504_v55, %v1506_v49  ;;  %v1441_v62 = vmax.f32 %v1313_v56, 0.0  ;;  %v1505_v63 = vmax.f32 %v1377_v57, 0.0 }
 0x119   : > { %v1622_v0 = vmax.f32 %v1560_v32, %v1562_v60  ;;  %v1638_v1 = vmax.f32 %v1592_v33, %v1594_v61  ;;  %v1563_v2 = vmax.f32 %v1441_v62, %v1443_v58  ;;  %v1595_v3 = vmax.f32 %v1505_v63, %v1507_v59  ;;  %v2124_v4 = vpop.f32.mrb[16].mxu0  ;;  %v2188_v5 = vpop.f32.mrb[16].mxu1 }
 0x11a   : > { %v1318_v6 = vadd.f32 %v2124_v4, %v2466_v8  ;;  %v1382_v7 = vadd.f32 %v2188_v5, %v2466_v8  ;;  %v846_v9 = vpop.f32.mrb[17].mxu0  ;;  %v1102_v10 = vpop.f32.mrb[17].mxu1 }
 0x11b   : > { %v1988_v11 = vpack.c.bf16 %v1622_v0, %v1622_v0  ;;  %v2004_v12 = vpack.c.bf16 %v1638_v1, %v1638_v1  ;;  %v1623_v13 = vmax.f32 %v1561_v38, %v1563_v2  ;;  %v1639_v14 = vmax.f32 %v1593_v39, %v1595_v3  ;;  %v2125_v15 = vpop.f32.mrb[18].mxu0  ;;  %v2189_v16 = vpop.f32.mrb[18].mxu1 }
 0x11c   : > { %v1446_v17 = vmax.f32 %v1318_v6, 0.0  ;;  %v1510_v18 = vmax.f32 %v1382_v7, 0.0  ;;  %v1316_v19 = vadd.f32 %v2466_v8, %v846_v9  ;;  %v1380_v20 = vadd.f32 %v2466_v8, %v1102_v10  ;;  %v849_v21 = vpop.f32.mrb[19].mxu0  ;;  %v1105_v22 = vpop.f32.mrb[19].mxu1 }
 0x11d   : > { %1783 = vst.msk [vmem:[%s2488_s14 + $0x8] sm:$0xf] %vm1780_vm0, %v1988_v11  ;;  %1799 = vst.msk [vmem:[%s2488_s14 + $0x48] sm:$0xf] %vm1780_vm0, %v2004_v12  ;;  %v1989_v23 = vpack.c.bf16 %v1623_v13, %v1623_v13  ;;  %v2005_v24 = vpack.c.bf16 %v1639_v14, %v1639_v14  ;;  %v1319_v25 = vadd.f32 %v2125_v15, %v2466_v8 }
 0x11e   : > { %v1383_v26 = vadd.f32 %v2189_v16, %v2466_v8  ;;  %v1444_v27 = vmax.f32 %v1316_v19, 0.0  ;;  %v1508_v28 = vmax.f32 %v1380_v20, 0.0  ;;  %v1317_v29 = vadd.f32 %v2466_v8, %v849_v21 }
 0x11f   : > { %v1381_v30 = vadd.f32 %v2466_v8, %v1105_v22  ;;  %1784 = vst.msk [vmem:[%s2488_s14 + $0xc] sm:$0xf] %vm1780_vm0, %v1989_v23  ;;  %1800 = vst.msk [vmem:[%s2488_s14 + $0x4c] sm:$0xf] %vm1780_vm0, %v2005_v24  ;;  %v1447_v31 = vmax.f32 %v1319_v25, 0.0 }
 0x120   : > { %v1511_v32 = vmax.f32 %v1383_v26, 0.0  ;;  %v1564_v33 = vmax.f32 %v1444_v27, %v1446_v17  ;;  %v1596_v34 = vmax.f32 %v1508_v28, %v1510_v18  ;;  %v1445_v35 = vmax.f32 %v1317_v29, 0.0 }
 0x121   : > { %v1509_v36 = vmax.f32 %v1381_v30, 0.0  ;;  %v2128_v37 = vpop.f32.mrb[20].mxu0  ;;  %v2192_v38 = vpop.f32.mrb[20].mxu1 }
 0x122   : > { %v1565_v39 = vmax.f32 %v1445_v35, %v1447_v31  ;;  %v1322_v41 = vadd.f32 %v2128_v37, %v2466_v8  ;;  %v1386_v42 = vadd.f32 %v2192_v38, %v2466_v8  ;;  %v862_v43 = vpop.f32.mrb[21].mxu0  ;;  %v1118_v44 = vpop.f32.mrb[21].mxu1 }
 0x123   : > { %v1597_v40 = vmax.f32 %v1509_v36, %v1511_v32  ;;  %v1320_v45 = vadd.f32 %v2466_v8, %v862_v43  ;;  %v1384_v46 = vadd.f32 %v2466_v8, %v1118_v44  ;;  %v2129_v47 = vpop.f32.mrb[22].mxu0  ;;  %v2193_v48 = vpop.f32.mrb[22].mxu1 }
 0x124   : > { %v1450_v49 = vmax.f32 %v1322_v41, 0.0  ;;  %v1514_v50 = vmax.f32 %v1386_v42, 0.0  ;;  %v1323_v51 = vadd.f32 %v2129_v47, %v2466_v8  ;;  %v1387_v52 = vadd.f32 %v2193_v48, %v2466_v8  ;;  %v865_v53 = vpop.f32.mrb[23].mxu0  ;;  %v1121_v54 = vpop.f32.mrb[23].mxu1 }
 0x125   : > { %v1448_v55 = vmax.f32 %v1320_v45, 0.0  ;;  %v1512_v56 = vmax.f32 %v1384_v46, 0.0  ;;  %v1321_v57 = vadd.f32 %v2466_v8, %v865_v53  ;;  %v1385_v58 = vadd.f32 %v2466_v8, %v1121_v54 }
 0x126   : > { %v1451_v59 = vmax.f32 %v1323_v51, 0.0  ;;  %v1515_v60 = vmax.f32 %v1387_v52, 0.0 }
 0x127   : > { %v1566_v61 = vmax.f32 %v1448_v55, %v1450_v49  ;;  %v1598_v62 = vmax.f32 %v1512_v56, %v1514_v50  ;;  %v1449_v63 = vmax.f32 %v1321_v57, 0.0  ;;  %v1513_v0 = vmax.f32 %v1385_v58, 0.0 }
 0x129   : > { %v1624_v1 = vmax.f32 %v1564_v33, %v1566_v61  ;;  %v1640_v2 = vmax.f32 %v1596_v34, %v1598_v62  ;;  %v1567_v3 = vmax.f32 %v1449_v63, %v1451_v59  ;;  %v1599_v4 = vmax.f32 %v1513_v0, %v1515_v60  ;;  %v2132_v5 = vpop.f32.mrb[24].mxu0  ;;  %v2196_v6 = vpop.f32.mrb[24].mxu1 }
 0x12a   : > { %v1326_v7 = vadd.f32 %v2132_v5, %v2466_v8  ;;  %v1390_v9 = vadd.f32 %v2196_v6, %v2466_v8  ;;  %v878_v10 = vpop.f32.mrb[25].mxu0  ;;  %v1134_v11 = vpop.f32.mrb[25].mxu1 }
 0x12b   : > { %v1990_v12 = vpack.c.bf16 %v1624_v1, %v1624_v1  ;;  %v2006_v13 = vpack.c.bf16 %v1640_v2, %v1640_v2  ;;  %v1625_v14 = vmax.f32 %v1565_v39, %v1567_v3  ;;  %v1641_v15 = vmax.f32 %v1597_v40, %v1599_v4  ;;  %v2133_v16 = vpop.f32.mrb[26].mxu0  ;;  %v2197_v17 = vpop.f32.mrb[26].mxu1 }
 0x12c   : > { %v1454_v18 = vmax.f32 %v1326_v7, 0.0  ;;  %v1518_v19 = vmax.f32 %v1390_v9, 0.0  ;;  %v1324_v20 = vadd.f32 %v2466_v8, %v878_v10  ;;  %v1388_v21 = vadd.f32 %v2466_v8, %v1134_v11  ;;  %v881_v22 = vpop.f32.mrb[27].mxu0  ;;  %v1137_v23 = vpop.f32.mrb[27].mxu1 }
 0x12d   : > { %1785 = vst.msk [vmem:[%s2488_s14 + $0x10] sm:$0xf] %vm1780_vm0, %v1990_v12  ;;  %1801 = vst.msk [vmem:[%s2488_s14 + $0x50] sm:$0xf] %vm1780_vm0, %v2006_v13  ;;  %v1991_v24 = vpack.c.bf16 %v1625_v14, %v1625_v14  ;;  %v2007_v25 = vpack.c.bf16 %v1641_v15, %v1641_v15  ;;  %v1327_v26 = vadd.f32 %v2133_v16, %v2466_v8 }
 0x12e   : > { %v1391_v27 = vadd.f32 %v2197_v17, %v2466_v8  ;;  %v1452_v28 = vmax.f32 %v1324_v20, 0.0  ;;  %v1516_v29 = vmax.f32 %v1388_v21, 0.0  ;;  %v1325_v30 = vadd.f32 %v2466_v8, %v881_v22 }
 0x12f   : > { %v1389_v31 = vadd.f32 %v2466_v8, %v1137_v23  ;;  %1786 = vst.msk [vmem:[%s2488_s14 + $0x14] sm:$0xf] %vm1780_vm0, %v1991_v24  ;;  %1802 = vst.msk [vmem:[%s2488_s14 + $0x54] sm:$0xf] %vm1780_vm0, %v2007_v25  ;;  %v1455_v32 = vmax.f32 %v1327_v26, 0.0 }
 0x130   : > { %v1519_v33 = vmax.f32 %v1391_v27, 0.0  ;;  %v1568_v34 = vmax.f32 %v1452_v28, %v1454_v18  ;;  %v1600_v35 = vmax.f32 %v1516_v29, %v1518_v19  ;;  %v1453_v36 = vmax.f32 %v1325_v30, 0.0 }
 0x131   : > { %v1517_v37 = vmax.f32 %v1389_v31, 0.0  ;;  %v2136_v38 = vpop.f32.mrb[28].mxu0  ;;  %v2200_v39 = vpop.f32.mrb[28].mxu1 }
 0x132   : > { %v1569_v40 = vmax.f32 %v1453_v36, %v1455_v32  ;;  %v1330_v42 = vadd.f32 %v2136_v38, %v2466_v8  ;;  %v1394_v43 = vadd.f32 %v2200_v39, %v2466_v8  ;;  %v894_v44 = vpop.f32.mrb[29].mxu0  ;;  %v1150_v45 = vpop.f32.mrb[29].mxu1 }
 0x133   : > { %v1601_v41 = vmax.f32 %v1517_v37, %v1519_v33  ;;  %v1328_v46 = vadd.f32 %v2466_v8, %v894_v44  ;;  %v1392_v47 = vadd.f32 %v2466_v8, %v1150_v45  ;;  %v2137_v48 = vpop.f32.mrb[30].mxu0  ;;  %v2201_v49 = vpop.f32.mrb[30].mxu1 }
 0x134   : > { %v1458_v50 = vmax.f32 %v1330_v42, 0.0  ;;  %v1522_v51 = vmax.f32 %v1394_v43, 0.0  ;;  %v1331_v52 = vadd.f32 %v2137_v48, %v2466_v8  ;;  %v1395_v53 = vadd.f32 %v2201_v49, %v2466_v8  ;;  %v897_v54 = vpop.f32.mrb[31].mxu0  ;;  %v1153_v55 = vpop.f32.mrb[31].mxu1 }
 0x135   : > { %v1456_v56 = vmax.f32 %v1328_v46, 0.0  ;;  %v1520_v57 = vmax.f32 %v1392_v47, 0.0  ;;  %v1329_v58 = vadd.f32 %v2466_v8, %v897_v54  ;;  %v1393_v59 = vadd.f32 %v2466_v8, %v1153_v55 }
 0x136   : > { %v1459_v60 = vmax.f32 %v1331_v52, 0.0  ;;  %v1523_v61 = vmax.f32 %v1395_v53, 0.0 }
 0x137   : > { %v1570_v62 = vmax.f32 %v1456_v56, %v1458_v50  ;;  %v1602_v63 = vmax.f32 %v1520_v57, %v1522_v51  ;;  %v1457_v0 = vmax.f32 %v1329_v58, 0.0  ;;  %v1521_v1 = vmax.f32 %v1393_v59, 0.0 }
 0x139   : > { %v1626_v2 = vmax.f32 %v1568_v34, %v1570_v62  ;;  %v1642_v3 = vmax.f32 %v1600_v35, %v1602_v63  ;;  %v1571_v4 = vmax.f32 %v1457_v0, %v1459_v60  ;;  %v1603_v5 = vmax.f32 %v1521_v1, %v1523_v61  ;;  %v2140_v6 = vpop.f32.mrb[32].mxu0  ;;  %v2204_v7 = vpop.f32.mrb[32].mxu1 }
 0x13a   : > { %v1334_v9 = vadd.f32 %v2140_v6, %v2466_v8  ;;  %v1398_v10 = vadd.f32 %v2204_v7, %v2466_v8  ;;  %v910_v11 = vpop.f32.mrb[33].mxu0  ;;  %v1166_v12 = vpop.f32.mrb[33].mxu1 }
 0x13b   : > { %v1992_v13 = vpack.c.bf16 %v1626_v2, %v1626_v2  ;;  %v2008_v14 = vpack.c.bf16 %v1642_v3, %v1642_v3  ;;  %v1627_v15 = vmax.f32 %v1569_v40, %v1571_v4  ;;  %v1643_v16 = vmax.f32 %v1601_v41, %v1603_v5  ;;  %v2141_v17 = vpop.f32.mrb[34].mxu0  ;;  %v2205_v18 = vpop.f32.mrb[34].mxu1 }
 0x13c   : > { %v1462_v19 = vmax.f32 %v1334_v9, 0.0  ;;  %v1526_v20 = vmax.f32 %v1398_v10, 0.0  ;;  %v1332_v21 = vadd.f32 %v2466_v8, %v910_v11  ;;  %v1396_v22 = vadd.f32 %v2466_v8, %v1166_v12  ;;  %v913_v23 = vpop.f32.mrb[35].mxu0  ;;  %v1169_v24 = vpop.f32.mrb[35].mxu1 }
 0x13d   : > { %1787 = vst.msk [vmem:[%s2488_s14 + $0x18] sm:$0xf] %vm1780_vm0, %v1992_v13  ;;  %1803 = vst.msk [vmem:[%s2488_s14 + $0x58] sm:$0xf] %vm1780_vm0, %v2008_v14  ;;  %v1993_v25 = vpack.c.bf16 %v1627_v15, %v1627_v15  ;;  %v2009_v26 = vpack.c.bf16 %v1643_v16, %v1643_v16  ;;  %v1335_v27 = vadd.f32 %v2141_v17, %v2466_v8 }
 0x13e   : > { %v1399_v28 = vadd.f32 %v2205_v18, %v2466_v8  ;;  %v1460_v29 = vmax.f32 %v1332_v21, 0.0  ;;  %v1524_v30 = vmax.f32 %v1396_v22, 0.0  ;;  %v1333_v31 = vadd.f32 %v2466_v8, %v913_v23 }
 0x13f   : > { %v1397_v32 = vadd.f32 %v2466_v8, %v1169_v24  ;;  %1788 = vst.msk [vmem:[%s2488_s14 + $0x1c] sm:$0xf] %vm1780_vm0, %v1993_v25  ;;  %1804 = vst.msk [vmem:[%s2488_s14 + $0x5c] sm:$0xf] %vm1780_vm0, %v2009_v26  ;;  %v1463_v33 = vmax.f32 %v1335_v27, 0.0 }
 0x140   : > { %v1527_v34 = vmax.f32 %v1399_v28, 0.0  ;;  %v1572_v35 = vmax.f32 %v1460_v29, %v1462_v19  ;;  %v1604_v36 = vmax.f32 %v1524_v30, %v1526_v20  ;;  %v1461_v37 = vmax.f32 %v1333_v31, 0.0 }
 0x141   : > { %v1525_v38 = vmax.f32 %v1397_v32, 0.0  ;;  %v2144_v39 = vpop.f32.mrb[36].mxu0  ;;  %v2208_v40 = vpop.f32.mrb[36].mxu1 }
 0x142   : > { %v1573_v41 = vmax.f32 %v1461_v37, %v1463_v33  ;;  %v1338_v43 = vadd.f32 %v2144_v39, %v2466_v8  ;;  %v1402_v44 = vadd.f32 %v2208_v40, %v2466_v8  ;;  %v926_v45 = vpop.f32.mrb[37].mxu0  ;;  %v1182_v46 = vpop.f32.mrb[37].mxu1 }
 0x143   : > { %v1605_v42 = vmax.f32 %v1525_v38, %v1527_v34  ;;  %v1336_v47 = vadd.f32 %v2466_v8, %v926_v45  ;;  %v1400_v48 = vadd.f32 %v2466_v8, %v1182_v46  ;;  %v2145_v49 = vpop.f32.mrb[38].mxu0  ;;  %v2209_v50 = vpop.f32.mrb[38].mxu1 }
 0x144   : > { %v1466_v51 = vmax.f32 %v1338_v43, 0.0  ;;  %v1530_v52 = vmax.f32 %v1402_v44, 0.0  ;;  %v1339_v53 = vadd.f32 %v2145_v49, %v2466_v8  ;;  %v1403_v54 = vadd.f32 %v2209_v50, %v2466_v8  ;;  %v929_v55 = vpop.f32.mrb[39].mxu0  ;;  %v1185_v56 = vpop.f32.mrb[39].mxu1 }
 0x145   : > { %v1464_v57 = vmax.f32 %v1336_v47, 0.0  ;;  %v1528_v58 = vmax.f32 %v1400_v48, 0.0  ;;  %v1337_v59 = vadd.f32 %v2466_v8, %v929_v55  ;;  %v1401_v60 = vadd.f32 %v2466_v8, %v1185_v56 }
 0x146   : > { %v1467_v61 = vmax.f32 %v1339_v53, 0.0  ;;  %v1531_v62 = vmax.f32 %v1403_v54, 0.0 }
 0x147   : > { %v1574_v63 = vmax.f32 %v1464_v57, %v1466_v51  ;;  %v1606_v0 = vmax.f32 %v1528_v58, %v1530_v52  ;;  %v1465_v1 = vmax.f32 %v1337_v59, 0.0  ;;  %v1529_v2 = vmax.f32 %v1401_v60, 0.0 }
 0x149   : > { %v1628_v3 = vmax.f32 %v1572_v35, %v1574_v63  ;;  %v1644_v4 = vmax.f32 %v1604_v36, %v1606_v0  ;;  %v1575_v5 = vmax.f32 %v1465_v1, %v1467_v61  ;;  %v1607_v6 = vmax.f32 %v1529_v2, %v1531_v62  ;;  %v2148_v7 = vpop.f32.mrb[40].mxu0  ;;  %v2212_v9 = vpop.f32.mrb[40].mxu1 }
 0x14a   : > { %v1342_v10 = vadd.f32 %v2148_v7, %v2466_v8  ;;  %v1406_v11 = vadd.f32 %v2212_v9, %v2466_v8  ;;  %v942_v12 = vpop.f32.mrb[41].mxu0  ;;  %v1198_v13 = vpop.f32.mrb[41].mxu1 }
 0x14b   : > { %v1994_v14 = vpack.c.bf16 %v1628_v3, %v1628_v3  ;;  %v2010_v15 = vpack.c.bf16 %v1644_v4, %v1644_v4  ;;  %v1629_v16 = vmax.f32 %v1573_v41, %v1575_v5  ;;  %v1645_v17 = vmax.f32 %v1605_v42, %v1607_v6  ;;  %v2149_v18 = vpop.f32.mrb[42].mxu0  ;;  %v2213_v19 = vpop.f32.mrb[42].mxu1 }
 0x14c   : > { %v1470_v20 = vmax.f32 %v1342_v10, 0.0  ;;  %v1534_v21 = vmax.f32 %v1406_v11, 0.0  ;;  %v1340_v22 = vadd.f32 %v2466_v8, %v942_v12  ;;  %v1404_v23 = vadd.f32 %v2466_v8, %v1198_v13  ;;  %v945_v24 = vpop.f32.mrb[43].mxu0  ;;  %v1201_v25 = vpop.f32.mrb[43].mxu1 }
 0x14d   : > { %1789 = vst.msk [vmem:[%s2488_s14 + $0x20] sm:$0xf] %vm1780_vm0, %v1994_v14  ;;  %1805 = vst.msk [vmem:[%s2488_s14 + $0x60] sm:$0xf] %vm1780_vm0, %v2010_v15  ;;  %v1995_v26 = vpack.c.bf16 %v1629_v16, %v1629_v16  ;;  %v2011_v27 = vpack.c.bf16 %v1645_v17, %v1645_v17  ;;  %v1343_v28 = vadd.f32 %v2149_v18, %v2466_v8 }
 0x14e   : > { %v1407_v29 = vadd.f32 %v2213_v19, %v2466_v8  ;;  %v1468_v30 = vmax.f32 %v1340_v22, 0.0  ;;  %v1532_v31 = vmax.f32 %v1404_v23, 0.0  ;;  %v1341_v32 = vadd.f32 %v2466_v8, %v945_v24 }
 0x14f   : > { %v1405_v33 = vadd.f32 %v2466_v8, %v1201_v25  ;;  %1790 = vst.msk [vmem:[%s2488_s14 + $0x24] sm:$0xf] %vm1780_vm0, %v1995_v26  ;;  %1806 = vst.msk [vmem:[%s2488_s14 + $0x64] sm:$0xf] %vm1780_vm0, %v2011_v27  ;;  %v1471_v34 = vmax.f32 %v1343_v28, 0.0 }
 0x150   : > { %v1535_v35 = vmax.f32 %v1407_v29, 0.0  ;;  %v1576_v36 = vmax.f32 %v1468_v30, %v1470_v20  ;;  %v1608_v37 = vmax.f32 %v1532_v31, %v1534_v21  ;;  %v1469_v38 = vmax.f32 %v1341_v32, 0.0 }
 0x151   : > { %v1533_v39 = vmax.f32 %v1405_v33, 0.0  ;;  %v2152_v40 = vpop.f32.mrb[44].mxu0  ;;  %v2216_v41 = vpop.f32.mrb[44].mxu1 }
 0x152   : > { %v1577_v42 = vmax.f32 %v1469_v38, %v1471_v34  ;;  %v1346_v44 = vadd.f32 %v2152_v40, %v2466_v8  ;;  %v1410_v45 = vadd.f32 %v2216_v41, %v2466_v8  ;;  %v958_v46 = vpop.f32.mrb[45].mxu0  ;;  %v1214_v47 = vpop.f32.mrb[45].mxu1 }
 0x153   : > { %v1609_v43 = vmax.f32 %v1533_v39, %v1535_v35  ;;  %v1344_v48 = vadd.f32 %v2466_v8, %v958_v46  ;;  %v1408_v49 = vadd.f32 %v2466_v8, %v1214_v47  ;;  %v2153_v50 = vpop.f32.mrb[46].mxu0  ;;  %v2217_v51 = vpop.f32.mrb[46].mxu1 }
 0x154   : > { %v1474_v52 = vmax.f32 %v1346_v44, 0.0  ;;  %v1538_v53 = vmax.f32 %v1410_v45, 0.0  ;;  %v1347_v54 = vadd.f32 %v2153_v50, %v2466_v8  ;;  %v1411_v55 = vadd.f32 %v2217_v51, %v2466_v8  ;;  %v961_v56 = vpop.f32.mrb[47].mxu0  ;;  %v1217_v57 = vpop.f32.mrb[47].mxu1 }
 0x155   : > { %v1472_v58 = vmax.f32 %v1344_v48, 0.0  ;;  %v1536_v59 = vmax.f32 %v1408_v49, 0.0  ;;  %v1345_v60 = vadd.f32 %v2466_v8, %v961_v56  ;;  %v1409_v61 = vadd.f32 %v2466_v8, %v1217_v57 }
 0x156   : > { %v1475_v62 = vmax.f32 %v1347_v54, 0.0  ;;  %v1539_v63 = vmax.f32 %v1411_v55, 0.0 }
 0x157   : > { %v1578_v0 = vmax.f32 %v1472_v58, %v1474_v52  ;;  %v1610_v1 = vmax.f32 %v1536_v59, %v1538_v53  ;;  %v1473_v2 = vmax.f32 %v1345_v60, 0.0  ;;  %v1537_v3 = vmax.f32 %v1409_v61, 0.0 }
 0x159   : > { %v1630_v4 = vmax.f32 %v1576_v36, %v1578_v0  ;;  %v1646_v5 = vmax.f32 %v1608_v37, %v1610_v1  ;;  %v1579_v6 = vmax.f32 %v1473_v2, %v1475_v62  ;;  %v1611_v7 = vmax.f32 %v1537_v3, %v1539_v63  ;;  %v2156_v9 = vpop.f32.mrb[48].mxu0  ;;  %v2220_v10 = vpop.f32.mrb[48].mxu1 }
 0x15a   : > { %v1350_v11 = vadd.f32 %v2156_v9, %v2466_v8  ;;  %v1414_v12 = vadd.f32 %v2220_v10, %v2466_v8  ;;  %v974_v13 = vpop.f32.mrb[49].mxu0  ;;  %v1230_v14 = vpop.f32.mrb[49].mxu1 }
 0x15b   : > { %v1996_v15 = vpack.c.bf16 %v1630_v4, %v1630_v4  ;;  %v2012_v16 = vpack.c.bf16 %v1646_v5, %v1646_v5  ;;  %v1631_v17 = vmax.f32 %v1577_v42, %v1579_v6  ;;  %v1647_v18 = vmax.f32 %v1609_v43, %v1611_v7  ;;  %v2157_v19 = vpop.f32.mrb[50].mxu0  ;;  %v2221_v20 = vpop.f32.mrb[50].mxu1 }
 0x15c   : > { %v1478_v21 = vmax.f32 %v1350_v11, 0.0  ;;  %v1542_v22 = vmax.f32 %v1414_v12, 0.0  ;;  %v1348_v23 = vadd.f32 %v2466_v8, %v974_v13  ;;  %v1412_v24 = vadd.f32 %v2466_v8, %v1230_v14  ;;  %v977_v25 = vpop.f32.mrb[51].mxu0  ;;  %v1233_v26 = vpop.f32.mrb[51].mxu1 }
 0x15d   : > { %1791 = vst.msk [vmem:[%s2488_s14 + $0x28] sm:$0xf] %vm1780_vm0, %v1996_v15  ;;  %1807 = vst.msk [vmem:[%s2488_s14 + $0x68] sm:$0xf] %vm1780_vm0, %v2012_v16  ;;  %v1997_v27 = vpack.c.bf16 %v1631_v17, %v1631_v17  ;;  %v2013_v28 = vpack.c.bf16 %v1647_v18, %v1647_v18  ;;  %v1351_v29 = vadd.f32 %v2157_v19, %v2466_v8 }
 0x15e   : > { %v1415_v30 = vadd.f32 %v2221_v20, %v2466_v8  ;;  %v1476_v31 = vmax.f32 %v1348_v23, 0.0  ;;  %v1540_v32 = vmax.f32 %v1412_v24, 0.0  ;;  %v1349_v33 = vadd.f32 %v2466_v8, %v977_v25 }
 0x15f   : > { %v1413_v34 = vadd.f32 %v2466_v8, %v1233_v26  ;;  %1792 = vst.msk [vmem:[%s2488_s14 + $0x2c] sm:$0xf] %vm1780_vm0, %v1997_v27  ;;  %1808 = vst.msk [vmem:[%s2488_s14 + $0x6c] sm:$0xf] %vm1780_vm0, %v2013_v28  ;;  %v1479_v35 = vmax.f32 %v1351_v29, 0.0 }
 0x160   : > { %v1543_v36 = vmax.f32 %v1415_v30, 0.0  ;;  %v1580_v37 = vmax.f32 %v1476_v31, %v1478_v21  ;;  %v1612_v38 = vmax.f32 %v1540_v32, %v1542_v22  ;;  %v1477_v39 = vmax.f32 %v1349_v33, 0.0 }
 0x161   : > { %v1541_v40 = vmax.f32 %v1413_v34, 0.0  ;;  %v2160_v41 = vpop.f32.mrb[52].mxu0  ;;  %v2224_v42 = vpop.f32.mrb[52].mxu1 }
 0x162   : > { %v1581_v43 = vmax.f32 %v1477_v39, %v1479_v35  ;;  %v1354_v45 = vadd.f32 %v2160_v41, %v2466_v8  ;;  %v1418_v46 = vadd.f32 %v2224_v42, %v2466_v8  ;;  %v990_v47 = vpop.f32.mrb[53].mxu0  ;;  %v1246_v48 = vpop.f32.mrb[53].mxu1 }
 0x163   : > { %v1613_v44 = vmax.f32 %v1541_v40, %v1543_v36  ;;  %v1352_v49 = vadd.f32 %v2466_v8, %v990_v47  ;;  %v1416_v50 = vadd.f32 %v2466_v8, %v1246_v48  ;;  %v2161_v51 = vpop.f32.mrb[54].mxu0  ;;  %v2225_v52 = vpop.f32.mrb[54].mxu1 }
 0x164   : > { %v1482_v53 = vmax.f32 %v1354_v45, 0.0  ;;  %v1546_v54 = vmax.f32 %v1418_v46, 0.0  ;;  %v1355_v55 = vadd.f32 %v2161_v51, %v2466_v8  ;;  %v1419_v56 = vadd.f32 %v2225_v52, %v2466_v8  ;;  %v993_v57 = vpop.f32.mrb[55].mxu0  ;;  %v1249_v58 = vpop.f32.mrb[55].mxu1 }
 0x165   : > { %v1480_v59 = vmax.f32 %v1352_v49, 0.0  ;;  %v1544_v60 = vmax.f32 %v1416_v50, 0.0  ;;  %v1353_v61 = vadd.f32 %v2466_v8, %v993_v57  ;;  %v1417_v62 = vadd.f32 %v2466_v8, %v1249_v58  ;;  %v2330_v50 = vld [vmem:[%s2668_s2] ss:$0 sm:$0xff] }
 0x166   : > { %v1483_v63 = vmax.f32 %v1355_v55, 0.0  ;;  %v1547_v0 = vmax.f32 %v1419_v56, 0.0 }
 0x167   : > { %v1582_v1 = vmax.f32 %v1480_v59, %v1482_v53  ;;  %v1614_v2 = vmax.f32 %v1544_v60, %v1546_v54  ;;  %v1481_v3 = vmax.f32 %v1353_v61, 0.0  ;;  %v1545_v4 = vmax.f32 %v1417_v62, 0.0 }
 0x169   : > { %v1632_v5 = vmax.f32 %v1580_v37, %v1582_v1  ;;  %v1648_v6 = vmax.f32 %v1612_v38, %v1614_v2  ;;  %v1583_v7 = vmax.f32 %v1481_v3, %v1483_v63  ;;  %v1615_v9 = vmax.f32 %v1545_v4, %v1547_v0  ;;  %v2164_v10 = vpop.f32.mrb[56].mxu0  ;;  %v2228_v11 = vpop.f32.mrb[56].mxu1 }
 0x16a   : > { %v1358_v12 = vadd.f32 %v2164_v10, %v2466_v8  ;;  %v1422_v13 = vadd.f32 %v2228_v11, %v2466_v8  ;;  %v1006_v14 = vpop.f32.mrb[57].mxu0  ;;  %v1262_v15 = vpop.f32.mrb[57].mxu1 }
 0x16b   : > { %v1998_v16 = vpack.c.bf16 %v1632_v5, %v1632_v5  ;;  %v2014_v17 = vpack.c.bf16 %v1648_v6, %v1648_v6  ;;  %v1633_v18 = vmax.f32 %v1581_v43, %v1583_v7  ;;  %v1649_v19 = vmax.f32 %v1613_v44, %v1615_v9  ;;  %v2165_v20 = vpop.f32.mrb[58].mxu0  ;;  %v2229_v21 = vpop.f32.mrb[58].mxu1 }
 0x16c   : > { %v1486_v22 = vmax.f32 %v1358_v12, 0.0  ;;  %v1550_v23 = vmax.f32 %v1422_v13, 0.0  ;;  %v1356_v24 = vadd.f32 %v2466_v8, %v1006_v14  ;;  %v1420_v25 = vadd.f32 %v2466_v8, %v1262_v15  ;;  %v1009_v26 = vpop.f32.mrb[59].mxu0  ;;  %v1265_v27 = vpop.f32.mrb[59].mxu1 }
 0x16d   : > { %1793 = vst.msk [vmem:[%s2488_s14 + $0x30] sm:$0xf] %vm1780_vm0, %v1998_v16  ;;  %1809 = vst.msk [vmem:[%s2488_s14 + $0x70] sm:$0xf] %vm1780_vm0, %v2014_v17  ;;  %v1999_v28 = vpack.c.bf16 %v1633_v18, %v1633_v18  ;;  %v2015_v29 = vpack.c.bf16 %v1649_v19, %v1649_v19  ;;  %v1359_v30 = vadd.f32 %v2165_v20, %v2466_v8 }
 0x16e   : > { %v1423_v31 = vadd.f32 %v2229_v21, %v2466_v8  ;;  %v1484_v32 = vmax.f32 %v1356_v24, 0.0  ;;  %v1548_v33 = vmax.f32 %v1420_v25, 0.0  ;;  %v1357_v34 = vadd.f32 %v2466_v8, %v1009_v26 }
 0x16f   : > { %v1421_v35 = vadd.f32 %v2466_v8, %v1265_v27  ;;  %1794 = vst.msk [vmem:[%s2488_s14 + $0x34] sm:$0xf] %vm1780_vm0, %v1999_v28  ;;  %1810 = vst.msk [vmem:[%s2488_s14 + $0x74] sm:$0xf] %vm1780_vm0, %v2015_v29  ;;  %v1487_v36 = vmax.f32 %v1359_v30, 0.0 }
 0x170   : > { %v1551_v37 = vmax.f32 %v1423_v31, 0.0  ;;  %v1584_v38 = vmax.f32 %v1484_v32, %v1486_v22  ;;  %v1616_v39 = vmax.f32 %v1548_v33, %v1550_v23  ;;  %v1485_v40 = vmax.f32 %v1357_v34, 0.0 }
 0x171   : > { %v1549_v41 = vmax.f32 %v1421_v35, 0.0  ;;  %v2168_v42 = vpop.f32.mrb[60].mxu0  ;;  %v2232_v43 = vpop.f32.mrb[60].mxu1 }
 0x172   : > { %v1585_v44 = vmax.f32 %v1485_v40, %v1487_v36  ;;  %v1362_v46 = vadd.f32 %v2168_v42, %v2466_v8  ;;  %v1426_v47 = vadd.f32 %v2232_v43, %v2466_v8  ;;  %v1022_v48 = vpop.f32.mrb[61].mxu0  ;;  %v1278_v49 = vpop.f32.mrb[61].mxu1 }
 0x173   : > { %v1617_v45 = vmax.f32 %v1549_v41, %v1551_v37  ;;  %v1360_v51 = vadd.f32 %v2330_v50, %v1022_v48  ;;  %v1424_v52 = vadd.f32 %v2330_v50, %v1278_v49  ;;  %v2169_v53 = vpop.f32.mrb[62].mxu0  ;;  %v2233_v54 = vpop.f32.mrb[62].mxu1 }
 0x174   : > { %v1490_v55 = vmax.f32 %v1362_v46, 0.0  ;;  %v1554_v56 = vmax.f32 %v1426_v47, 0.0  ;;  %v1363_v57 = vadd.f32 %v2330_v50, %v2169_v53  ;;  %v1427_v58 = vadd.f32 %v2330_v50, %v2233_v54  ;;  %v1025_v59 = vpop.f32.mrb[63].mxu0  ;;  %v1281_v60 = vpop.f32.mrb[63].mxu1 }
 0x175   : > { %v1488_v61 = vmax.f32 %v1360_v51, 0.0  ;;  %v1552_v62 = vmax.f32 %v1424_v52, 0.0  ;;  %v1361_v63 = vadd.f32 %v2330_v50, %v1025_v59  ;;  %v1425_v8 = vadd.f32 %v2330_v50, %v1281_v60 }
 0x176   : > { %v1491_v0 = vmax.f32 %v1363_v57, 0.0  ;;  %v1555_v1 = vmax.f32 %v1427_v58, 0.0 }
 0x177   : > { %v1586_v2 = vmax.f32 %v1488_v61, %v1490_v55  ;;  %v1618_v3 = vmax.f32 %v1552_v62, %v1554_v56  ;;  %v1489_v4 = vmax.f32 %v1361_v63, 0.0  ;;  %v1553_v5 = vmax.f32 %v1425_v8, 0.0 }
 0x179   : > { %v1634_v6 = vmax.f32 %v1584_v38, %v1586_v2  ;;  %v1650_v7 = vmax.f32 %v1616_v39, %v1618_v3  ;;  %v1587_v9 = vmax.f32 %v1489_v4, %v1491_v0  ;;  %v1619_v10 = vmax.f32 %v1553_v5, %v1555_v1 }
 0x17b   : > { %v2000_v11 = vpack.c.bf16 %v1634_v6, %v1634_v6  ;;  %v2016_v12 = vpack.c.bf16 %v1650_v7, %v1650_v7  ;;  %v1635_v13 = vmax.f32 %v1585_v44, %v1587_v9  ;;  %v1651_v14 = vmax.f32 %v1617_v45, %v1619_v10 }
 0x17d   : > { %1795 = vst.msk [vmem:[%s2488_s14 + $0x38] sm:$0xf] %vm1780_vm0, %v2000_v11  ;;  %1811 = vst.msk [vmem:[%s2488_s14 + $0x78] sm:$0xf] %vm1780_vm0, %v2016_v12  ;;  %v2001_v15 = vpack.c.bf16 %v1635_v13, %v1635_v13  ;;  %v2017_v16 = vpack.c.bf16 %v1651_v14, %v1651_v14 }
 0x17f   : > { %1796 = vst.msk [vmem:[%s2488_s14 + $0x3c] sm:$0xf] %vm1780_vm0, %v2001_v15  ;;  %1812 = vst.msk [vmem:[%s2488_s14 + $0x7c] sm:$0xf] %vm1780_vm0, %v2017_v16 }
 0x180 PF: > { %s13_s12 = sadd.s32 1, %s2337_s12  }
 0x181   : > { %p10_p4 = scmp.ge.s32.totalorder %s13_s12, 4  }
 0x183   :  { %12 = sbr.rel (!%p10_p4) target bundleno = 1 (0x1), region = 62 }

// kernel: my_cnn_forward.4
= control target key start
LH: loop header
LB: loop body
LE: loop exit
PB: predicated region body
PF: predicated region fallthrough
CT: control target
= control target key end

     0   :  { %s4657_s12 = smov 0   ;;  %s6618_s0 = inlined_call_operand.vmem [shape: bf16[2,20,16,320], index: 0, kind: input, shape index: {}]   ;;  %s6619_s1 = inlined_call_operand.vmem [shape: bf16[5,320,64], index: 1, kind: input, shape index: {}]   ;;  %s6620_s2 = inlined_call_operand.vmem [shape: f32[1,64], index: 2, kind: input, shape index: {}]   ;;  %s6621_s3 = inlined_call_operand.vmem [shape: bf16[2,8,8,64], index: 3, kind: output, shape index: {}]  }
   0x1 LB: > { %s3562_s13 = sadd.s32 4294967295, %s4634_s12   ;;  %p3566_p0 = scmp.ge.s32.totalorder %s4634_s12, 1  ;;  %s4634_s12 = sphi %s4657_s12, %s13_s12  }
   0x2   : > { %p137_p1 = scmp.lt.s32.totalorder %s4634_s12, 3 }
   0x4   : > { %p138_p2 = pnand %p3566_p0, %p137_p1 }
   0x6   : > { %141 = sbr.rel (%p138_p2) target bundleno = 877 (0x36d), region = 32 }
   0xd   : > { %v4372_v0 = vld [vmem:[%s6619_s1] sm:$0xff]   ;;  %v6622_v1 = vmov 0   ;;  %p161_p3 = scmp.lt.s32.totalorder %s3562_s13, 1  ;;  %v4374_v3 = vld [vmem:[%s6619_s1 + $0x8] sm:$0xff]   ;;  %v4691_v5 = vld [vmem:[%s6619_s1 + $0x90] sm:$0xff]   ;;  %vm712_vm0 = vcmask 523264  }
   0xe   : > { %773 = vmatprep.subr.bf16.mxu0 %v6622_v1  ;;  %v4672_v2 = vld [vmem:[%s6619_s1 + $0x80] sm:$0xff]   ;;  %v4682_v4 = vld [vmem:[%s6619_s1 + $0x88] sm:$0xff]   ;;  %v4376_v6 = vld [vmem:[%s6619_s1 + $0x10] sm:$0xff]   ;;  %vm3498_vm1 = vcmask 519168  }
   0xf   : > { %774 = vmatpush1.bf16.msra.mxu0 %v4372_v0  ;;  %4354 = vmatprep.subr.bf16.mxu1 %v4672_v2  ;;  %s6798_s13 = smov (!%p161_p3, %s3562_s13), 1  ;;  %v4709_v8 = vld [vmem:[%s6619_s1 + $0x98] sm:$0xff]   ;;  %v4381_v10 = vld [vmem:[%s6619_s1 + $0x20] sm:$0xff]   ;;  %v4384_v14 = vld [vmem:[%s6619_s1 + $0x28] sm:$0xff]  }
  0x10   : > { %775 = vmatprep.subr.bf16.mxu0 %v6622_v1  ;;  %4358 = vmatpush3.bf16.msra.mxu1 %v4672_v2  ;;  %s4362_s24 = smul.u32 480, %s6798_s13  ;;  %v4378_v9 = vld [vmem:[%s6619_s1 + $0x18] sm:$0xff]   ;;  %v4383_v12 = vld [vmem:[%s6619_s1 + $0xa0] sm:$0xff]   ;;  %v4385_v15 = vld [vmem:[%s6619_s1 + $0xa8] sm:$0xff]   ;;  %s3993_s26 = sshll.u32 %s6798_s13, 5 }
  0x11   : > { %4355 = vmatprep.subr.bf16.mxu1 %v4682_v4  ;;  %v4387_v16 = vld [vmem:[%s6619_s1 + $0x30] sm:$0xff]   ;;  %v4390_v20 = vld [vmem:[%s6619_s1 + $0x38] sm:$0xff]   ;;  %v4393_v22 = vld [vmem:[%s6619_s1 + $0x40] sm:$0xff]   ;;  %s6529_s13 = scalar_lea.vmem %s6621_s3, %s3993_s26 }
  0x12   : > { %s4701_s29 = scalar_lea.vmem %s6618_s0, %s4362_s24  ;;  %v4389_v18 = vld [vmem:[%s6619_s1 + $0xb0] sm:$0xff]   ;;  %v4391_v21 = vld [vmem:[%s6619_s1 + $0xb8] sm:$0xff]   ;;  %v4395_v24 = vld [vmem:[%s6619_s1 + $0xc0] sm:$0xff]  }
  0x13   : > { %776 = vmatpush1.bf16.msra.mxu0 %v4374_v3  ;;  %v4380_v7 = vld [vmem:[%s4701_s29 + $0x68] ss:$12 sps:$4 sm:$0xff]   ;;  %v4382_v11 = vld [vmem:[%s4701_s29 + $0x80] ss:$12 sps:$4 sm:$0xff]   ;;  %v4386_v13 = vld [vmem:[%s4701_s29 + $0x98] ss:$12 sps:$4 sm:$0xff]  }
  0x14   : > { %777 = vmatprep.subr.bf16.mxu0 %v6622_v1  ;;  %4359 = vmatpush3.bf16.msra.mxu1 %v4682_v4  ;;  %v4388_v17 = vld [vmem:[%s4701_s29 + $0xb0] ss:$12 sps:$4 sm:$0xff]   ;;  %v4392_v19 = vld [vmem:[%s4701_s29 + $0xc8] ss:$12 sps:$4 sm:$0xff]   ;;  %v4394_v23 = vld [vmem:[%s4701_s29 + $0xe0] ss:$12 sps:$4 sm:$0xff]  }
  0x15   : > { %4356 = vmatprep.subr.bf16.mxu1 %v4691_v5  ;;  %4130 = vmatprep.mubr.msk.bf16.mxu1 %vm712_vm0, %v4380_v7  ;;  %v4398_v25 = vld [vmem:[%s4701_s29 + $0xf8] ss:$12 sps:$4 sm:$0xff]   ;;  %v4396_v26 = vld [vmem:[%s6619_s1 + $0x48] sm:$0xff]   ;;  %v4399_v28 = vld [vmem:[%s6619_s1 + $0x50] sm:$0xff]  }
  0x16   : > { %v4397_v27 = vld [vmem:[%s6619_s1 + $0xc8] sm:$0xff]   ;;  %v4400_v29 = vld [vmem:[%s4701_s29 + $0x110] ss:$12 sps:$4 sm:$0xff]   ;;  %v4405_v35 = vld [vmem:[%s6619_s1 + $0x60] sm:$0xff]  }
  0x17   : > { %778 = vmatpush1.bf16.msra.mxu0 %v4376_v6  ;;  %v4401_v30 = vld [vmem:[%s6619_s1 + $0xd0] sm:$0xff]   ;;  %v4402_v32 = vld [vmem:[%s6619_s1 + $0x58] sm:$0xff]   ;;  %v4406_v36 = vld [vmem:[%s4701_s29 + $0x140] ss:$12 sps:$4 sm:$0xff]  }
  0x18   : > { %779 = vmatprep.subr.bf16.mxu0 %v6622_v1  ;;  %4360 = vmatpush3.bf16.msra.mxu1 %v4691_v5  ;;  %v4404_v31 = vld [vmem:[%s4701_s29 + $0x128] ss:$12 sps:$4 sm:$0xff]   ;;  %v4403_v33 = vld [vmem:[%s6619_s1 + $0xd8] sm:$0xff]   ;;  %v4799_v34 = vld [vmem:[%s4701_s29 + $0x4] ss:$12 sps:$4 sm:$0xff]  }
  0x19   : > { %4357 = vmatprep.subr.bf16.mxu1 %v4709_v8  ;;  %805 = vmatprep.mubr.bf16.mxu0 %v4799_v34  ;;  %v4407_v37 = vld [vmem:[%s6619_s1 + $0xe0] sm:$0xff]   ;;  %v4408_v39 = vld [vmem:[%s6619_s1 + $0x68] sm:$0xff]   ;;  %v4411_v41 = vld [vmem:[%s6619_s1 + $0x70] sm:$0xff]  }
  0x1a   : > { %v4410_v38 = vld [vmem:[%s4701_s29 + $0x158] ss:$12 sps:$4 sm:$0xff]   ;;  %v4409_v40 = vld [vmem:[%s6619_s1 + $0xe8] sm:$0xff]   ;;  %v4828_v42 = vld [vmem:[%s4701_s29 + $0x170] ss:$12 sps:$4 sm:$0xff]  }
  0x1b   : > { %780 = vmatpush1.bf16.msra.mxu0 %v4378_v9  ;;  %v4413_v43 = vld [vmem:[%s6619_s1 + $0xf0] sm:$0xff]   ;;  %v4414_v45 = vld [vmem:[%s6619_s1 + $0x78] sm:$0xff]   ;;  %v4850_v47 = vld [vmem:[%s4701_s29] ss:$12 sps:$4 sm:$0xff]  }
  0x1c   : > { %781 = vmatprep.subr.bf16.mxu0 %v6622_v1  ;;  %4361 = vmatpush3.bf16.msra.mxu1 %v4709_v8  ;;  %v4834_v44 = vld [vmem:[%s4701_s29 + $0x188] ss:$12 sps:$4 sm:$0xff]   ;;  %v4415_v46 = vld [vmem:[%s6619_s1 + $0xf8] sm:$0xff]   ;;  %v4853_v48 = vld [vmem:[%s4701_s29 + $0x1a0] ss:$12 sps:$4 sm:$0xff]  }
  0x1d   : > { %1304 = vmatprep.subr.bf16.mxu1 %v6622_v1  ;;  %v4856_v49 = vld [vmem:[%s4701_s29 + $0x1c] ss:$12 sps:$4 sm:$0xff]   ;;  %v4421_v50 = vld [vmem:[%s6619_s1 + $0x100] sm:$0xff]   ;;  %v4428_v56 = vld [vmem:[%s6619_s1 + $0x110] sm:$0xff]  }
  0x1e   : > { %v4863_v51 = vld [vmem:[%s4701_s29 + $0x1b8] ss:$12 sps:$4 sm:$0xff]   ;;  %v4422_v52 = vld [vmem:[%s6619_s1 + $0x108] sm:$0xff]   ;;  %v4882_v54 = vld [vmem:[%s4701_s29 + $0x34] ss:$12 sps:$4 sm:$0xff]  }
  0x1f   : > { %782 = vmatpush1.bf16.msra.mxu0 %v4381_v10  ;;  %4131 = vmatmul.mubr.msk.bf16.vlgmr.msra.gmra.mrb[0].mxu1 %vm712_vm0, %v4382_v11  ;;  %v4879_v53 = vld [vmem:[%s4701_s29 + $0x18] ss:$12 sps:$4 sm:$0xff]   ;;  %v4886_v55 = vld [vmem:[%s4701_s29 + $0x1d0] ss:$12 sps:$4 sm:$0xff]   ;;  %v4437_v61 = vld [vmem:[%s6619_s1 + $0x148] sm:$0xff]  }
  0x20   : > { %783 = vmatprep.subr.bf16.mxu0 %v6622_v1  ;;  %1305 = vmatpush1.bf16.msra.mxu1 %v4383_v12  ;;  %v4429_v57 = vld [vmem:[%s6619_s1 + $0x118] sm:$0xff]   ;;  %v4433_v60 = vld [vmem:[%s6619_s1 + $0x140] sm:$0xff]   ;;  %v4923_v62 = vld [vmem:[%s4701_s29 + $0x48] ss:$12 sps:$4 sm:$0xff]  }
  0x21   : > { %4134 = vmatprep.mubr.msk.bf16.mxu1 %vm712_vm0, %v4386_v13  ;;  %1306 = vmatprep.subr.bf16.mxu1 %v6622_v1  ;;  %v4905_v58 = vld [vmem:[%s4701_s29 + $0x30] ss:$12 sps:$4 sm:$0xff]   ;;  %v4908_v59 = vld [vmem:[%s4701_s29 + $0x4c] ss:$12 sps:$4 sm:$0xff]   ;;  %v4953_v6 = vld [vmem:[%s6619_s1 + $0x120] sm:$0xff]  }
  0x22   : > { %v4927_v63 = vld [vmem:[%s4701_s29 + $0x64] ss:$12 sps:$4 sm:$0xff]   ;;  %v4941_v3 = vld [vmem:[%s4701_s29 + $0x60] ss:$12 sps:$4 sm:$0xff]   ;;  %v4467_v13 = vld [vmem:[%s6619_s1 + $0x178] sm:$0xff]  }
  0x23   : > { %784 = vmatpush1.bf16.msra.mxu0 %v4384_v14  ;;  %v4441_v0 = vld [vmem:[%s6619_s1 + $0x150] sm:$0xff]   ;;  %v4961_v7 = vld [vmem:[%s4701_s29 + $0x78] ss:$12 sps:$4 sm:$0xff]   ;;  %v4456_v9 = vld [vmem:[%s6619_s1 + $0x168] sm:$0xff]  }
  0x24   : > { %785 = vmatprep.subr.bf16.mxu0 %v6622_v1  ;;  %1307 = vmatpush1.bf16.msra.mxu1 %v4385_v15  ;;  %v4460_v10 = vld [vmem:[%s6619_s1 + $0x170] sm:$0xff]   ;;  %v4983_v12 = vld [vmem:[%s4701_s29 + $0xac] ss:$12 sps:$4 sm:$0xff]   ;;  %v4471_v14 = vld [vmem:[%s6619_s1 + $0x180] sm:$0xff]  }
  0x25   : > { %1308 = vmatprep.subr.bf16.mxu1 %v6622_v1  ;;  %v4979_v11 = vld [vmem:[%s4701_s29 + $0x90] ss:$12 sps:$4 sm:$0xff]   ;;  %v4997_v15 = vld [vmem:[%s4701_s29 + $0xa8] ss:$12 sps:$4 sm:$0xff]  }
  0x27   : > { %786 = vmatpush1.bf16.msra.mxu0 %v4387_v16  ;;  %4135 = vmatmul.mubr.msk.bf16.gmra.mrb[4].mxu1 %vm712_vm0, %v4388_v17  ;;  %v4475_v16 = vld [vmem:[%s6619_s1 + $0x188] sm:$0xff]   ;;  %v5004_v17 = vld [vmem:[%s4701_s29 + $0xc4] ss:$12 sps:$4 sm:$0xff]  }
  0x28   : > { %787 = vmatprep.subr.bf16.mxu0 %v6622_v1  ;;  %1309 = vmatpush1.bf16.msra.mxu1 %v4389_v18  ;;  %v4479_v18 = vld [vmem:[%s6619_s1 + $0x190] sm:$0xff]  }
  0x29   : > { %4138 = vmatprep.mubr.msk.bf16.mxu1 %vm712_vm0, %v4392_v19  ;;  %1310 = vmatprep.subr.bf16.mxu1 %v6622_v1  ;;  %v4486_v19 = vld [vmem:[%s6619_s1 + $0x198] sm:$0xff]  }
  0x2b   : > { %788 = vmatpush1.bf16.msra.mxu0 %v4390_v20  ;;  %v5018_v20 = vld [vmem:[%s4701_s29 + $0xc0] ss:$12 sps:$4 sm:$0xff]  }
  0x2c   : > { %789 = vmatprep.subr.bf16.mxu0 %v6622_v1  ;;  %1311 = vmatpush1.bf16.msra.mxu1 %v4391_v21  ;;  %v5022_v21 = vld [vmem:[%s4701_s29 + $0xdc] ss:$12 sps:$4 sm:$0xff]  }
  0x2d   : > { %1312 = vmatprep.subr.bf16.mxu1 %v6622_v1 }
  0x2f   : > { %790 = vmatpush1.bf16.msra.mxu0 %v4393_v22  ;;  %4139 = vmatmul.mubr.msk.bf16.gmra.mrb[8].mxu1 %vm712_vm0, %v4394_v23  ;;  %v4490_v22 = vld [vmem:[%s6619_s1 + $0x1a0] sm:$0xff]   ;;  %v4494_v23 = vld [vmem:[%s6619_s1 + $0x1a8] sm:$0xff]  }
  0x30   : > { %791 = vmatprep.subr.bf16.mxu0 %v6622_v1  ;;  %1313 = vmatpush1.bf16.msra.mxu1 %v4395_v24  ;;  %v5037_v24 = vld [vmem:[%s4701_s29 + $0xd8] ss:$12 sps:$4 sm:$0xff]  }
  0x31   : > { %4142 = vmatprep.mubr.msk.bf16.mxu1 %vm712_vm0, %v4398_v25  ;;  %1314 = vmatprep.subr.bf16.mxu1 %v6622_v1  ;;  %v5041_v25 = vld [vmem:[%s4701_s29 + $0xf4] ss:$12 sps:$4 sm:$0xff]  }
  0x33   : > { %792 = vmatpush1.bf16.msra.mxu0 %v4396_v26  ;;  %v4498_v26 = vld [vmem:[%s6619_s1 + $0x1b0] sm:$0xff]  }
  0x34   : > { %793 = vmatprep.subr.bf16.mxu0 %v6622_v1  ;;  %1315 = vmatpush1.bf16.msra.mxu1 %v4397_v27  ;;  %v4506_v27 = vld [vmem:[%s6619_s1 + $0x1b8] sm:$0xff]  }
  0x35   : > { %1316 = vmatprep.subr.bf16.mxu1 %v6622_v1 }
  0x37   : > { %794 = vmatpush1.bf16.msra.mxu0 %v4399_v28  ;;  %4143 = vmatmul.mubr.msk.bf16.gmra.mrb[12].mxu1 %vm712_vm0, %v4400_v29  ;;  %v5055_v28 = vld [vmem:[%s4701_s29 + $0xf0] ss:$12 sps:$4 sm:$0xff]   ;;  %v5061_v29 = vld [vmem:[%s6619_s1 + $0x260] sm:$0xff]  }
  0x38   : > { %795 = vmatprep.subr.bf16.mxu0 %v6622_v1  ;;  %1317 = vmatpush1.bf16.msra.mxu1 %v4401_v30  ;;  %v5064_v30 = vld [vmem:[%s4701_s29 + $0x10c] ss:$12 sps:$4 sm:$0xff]  }
  0x39   : > { %4146 = vmatprep.mubr.msk.bf16.mxu1 %vm712_vm0, %v4404_v31  ;;  %1318 = vmatprep.subr.bf16.mxu1 %v6622_v1  ;;  %v5072_v31 = vld [vmem:[%s4701_s29 + $0x108] ss:$12 sps:$4 sm:$0xff]  }
  0x3b   : > { %796 = vmatpush1.bf16.msra.mxu0 %v4402_v32  ;;  %v5075_v32 = vld [vmem:[%s4701_s29 + $0x124] ss:$12 sps:$4 sm:$0xff]  }
  0x3c   : > { %797 = vmatprep.subr.bf16.mxu0 %v6622_v1  ;;  %1319 = vmatpush1.bf16.msra.mxu1 %v4403_v33  ;;  %v5082_v33 = vld [vmem:[%s4701_s29 + $0x120] ss:$12 sps:$4 sm:$0xff]  }
  0x3d   : > { %1320 = vmatprep.subr.bf16.mxu1 %v6622_v1 }
  0x3f   : > { %798 = vmatpush1.bf16.msra.mxu0 %v4405_v35  ;;  %4147 = vmatmul.mubr.msk.bf16.gmra.mrb[16].mxu1 %vm712_vm0, %v4406_v36  ;;  %v5085_v35 = vld [vmem:[%s4701_s29 + $0x13c] ss:$12 sps:$4 sm:$0xff]   ;;  %v5092_v36 = vld [vmem:[%s4701_s29 + $0x138] ss:$12 sps:$4 sm:$0xff]  }
  0x40   : > { %799 = vmatprep.subr.bf16.mxu0 %v6622_v1  ;;  %1321 = vmatpush1.bf16.msra.mxu1 %v4407_v37  ;;  %v5095_v37 = vld [vmem:[%s4701_s29 + $0x154] ss:$12 sps:$4 sm:$0xff]  }
  0x41   : > { %4150 = vmatprep.mubr.msk.bf16.mxu1 %vm712_vm0, %v4410_v38  ;;  %1322 = vmatprep.subr.bf16.mxu1 %v6622_v1  ;;  %v5102_v38 = vld [vmem:[%s4701_s29 + $0x150] ss:$12 sps:$4 sm:$0xff]  }
  0x43   : > { %800 = vmatpush1.bf16.msra.mxu0 %v4408_v39  ;;  %v5105_v39 = vld [vmem:[%s4701_s29 + $0x16c] ss:$12 sps:$4 sm:$0xff]  }
  0x44   : > { %801 = vmatprep.subr.bf16.mxu0 %v6622_v1  ;;  %1323 = vmatpush1.bf16.msra.mxu1 %v4409_v40  ;;  %v5112_v40 = vld [vmem:[%s4701_s29 + $0x168] ss:$12 sps:$4 sm:$0xff]  }
  0x45   : > { %1324 = vmatprep.subr.bf16.mxu1 %v6622_v1 }
  0x47   : > { %802 = vmatpush1.bf16.msra.mxu0 %v4411_v41  ;;  %4151 = vmatmul.mubr.msk.bf16.gmra.mrb[20].mxu1 %vm712_vm0, %v4828_v42  ;;  %v5115_v41 = vld [vmem:[%s4701_s29 + $0x184] ss:$12 sps:$4 sm:$0xff]  }
  0x48   : > { %803 = vmatprep.subr.bf16.mxu0 %v6622_v1  ;;  %1325 = vmatpush1.bf16.msra.mxu1 %v4413_v43  ;;  %6646 = vst [vmem:[#allocation2_spill] sm:$0xff] %v5115_v41  ;;  %v5122_v43 = vld [vmem:[%s4701_s29 + $0x180] ss:$12 sps:$4 sm:$0xff]  }
  0x49   : > { %4154 = vmatprep.mubr.msk.bf16.mxu1 %vm712_vm0, %v4834_v44  ;;  %1326 = vmatprep.subr.bf16.mxu1 %v6622_v1  ;;  %6647 = vst [vmem:[#allocation3_spill] sm:$0xff] %v5122_v43 }
  0x4b   : > { %804 = vmatpush1.bf16.msra.mxu0 %v4414_v45  ;;  %v5125_v45 = vld [vmem:[%s4701_s29 + $0x19c] ss:$12 sps:$4 sm:$0xff]  }
  0x4c   : > { %4114 = vmatprep.subr.bf16.mxu0 %v4672_v2  ;;  %1327 = vmatpush1.bf16.msra.mxu1 %v4415_v46  ;;  %6648 = vst [vmem:[#allocation4_spill] sm:$0xff] %v5125_v45  ;;  %v5132_v46 = vld [vmem:[%s4701_s29 + $0x198] ss:$12 sps:$4 sm:$0xff]  }
  0x4d   : > { %1328 = vmatprep.subr.bf16.mxu1 %v6622_v1  ;;  %6649 = vst [vmem:[#allocation5_spill] sm:$0xff] %v5132_v46 }
  0x4e   : > { %806 = vmatmul.mubr.bf16.vlgmr.msra.gmra.mrb[0].mxu0 %v4850_v47 }
  0x4f   : > { %4115 = vmatpush3.bf16.msra.mxu0 %v4672_v2  ;;  %813 = vmatprep.mubr.bf16.mxu0 %v4856_v49  ;;  %v4448_v2 = vld [vmem:[%s6619_s1 + $0x158] sm:$0xff]  }
  0x50   : > { %4155 = vmatmul.mubr.msk.bf16.gmra.mrb[24].mxu1 %vm712_vm0, %v4853_v48  ;;  %4116 = vmatprep.subr.bf16.mxu0 %v4682_v4 }
  0x51   : > { %1329 = vmatpush1.bf16.msra.mxu1 %v4421_v50  ;;  %4158 = vmatprep.mubr.msk.bf16.mxu1 %vm712_vm0, %v4863_v51  ;;  %v5135_v50 = vld [vmem:[%s4701_s29 + $0x1b4] ss:$12 sps:$4 sm:$0xff]  }
  0x52   : > { %1330 = vmatprep.subr.bf16.mxu1 %v6622_v1  ;;  %6650 = vst [vmem:[#allocation6_spill] sm:$0xff] %v5135_v50 }
  0x53   : > { %4117 = vmatpush3.bf16.msra.mxu0 %v4682_v4  ;;  %v4945_v4 = vld [vmem:[%s4701_s29 + $0x7c] ss:$12 sps:$4 sm:$0xff]  }
  0x54   : > { %4118 = vmatprep.subr.bf16.mxu0 %v4691_v5 }
  0x55   : > { %1331 = vmatpush1.bf16.msra.mxu1 %v4422_v52  ;;  %v5142_v52 = vld [vmem:[%s4701_s29 + $0x1b0] ss:$12 sps:$4 sm:$0xff]  }
  0x56   : > { %814 = vmatmul.mubr.bf16.gmra.mrb[4].mxu0 %v4879_v53  ;;  %1332 = vmatprep.subr.bf16.mxu1 %v6622_v1  ;;  %6651 = vst [vmem:[#allocation7_spill] sm:$0xff] %v5142_v52 }
  0x57   : > { %821 = vmatprep.mubr.bf16.mxu0 %v4882_v54  ;;  %4119 = vmatpush3.bf16.msra.mxu0 %v4691_v5  ;;  %v4452_v5 = vld [vmem:[%s6619_s1 + $0x160] sm:$0xff]  }
  0x58   : > { %4159 = vmatmul.mubr.msk.bf16.gmra.mrb[28].mxu1 %vm712_vm0, %v4886_v55  ;;  %4120 = vmatprep.subr.bf16.mxu0 %v4709_v8 }
  0x59   : > { %1333 = vmatpush1.bf16.msra.mxu1 %v4428_v56  ;;  %1336 = vmatprep.mubr.bf16.mxu1 %v4799_v34  ;;  %v5145_v56 = vld [vmem:[%s4701_s29 + $0x1cc] ss:$12 sps:$4 sm:$0xff]  }
  0x5a   : > { %1334 = vmatprep.subr.bf16.mxu1 %v6622_v1  ;;  %6652 = vst [vmem:[#allocation8_spill] sm:$0xff] %v5145_v56 }
  0x5b   : > { %4121 = vmatpush3.bf16.msra.mxu0 %v4709_v8  ;;  %v4965_v8 = vld [vmem:[%s4701_s29 + $0x94] ss:$12 sps:$4 sm:$0xff]  }
  0x5c   : > { %4162 = vmatprep.subr.bf16.mxu0 %v4953_v6 }
  0x5d   : > { %1335 = vmatpush1.bf16.msra.mxu1 %v4429_v57  ;;  %v5152_v57 = vld [vmem:[%s4701_s29 + $0x1c8] ss:$12 sps:$4 sm:$0xff]  }
  0x5e   : > { %822 = vmatmul.mubr.bf16.gmra.mrb[8].mxu0 %v4905_v58  ;;  %1867 = vmatprep.subr.bf16.mxu1 %v6622_v1  ;;  %6653 = vst [vmem:[#allocation9_spill] sm:$0xff] %v5152_v57 }
  0x5f   : > { %829 = vmatprep.mubr.bf16.mxu0 %v4908_v59 }
  0x60   : > { %1337 = vmatmul.mubr.bf16.vlgmr.msra.gmra.mrb[32].mxu1 %v4850_v47 }
  0x61   : > { %1868 = vmatpush1.bf16.msra.mxu1 %v4433_v60  ;;  %1342 = vmatprep.mubr.bf16.mxu1 %v4856_v49  ;;  %v5155_v60 = vld [vmem:[%s4701_s29 + $0x8] ss:$12 sps:$4 sm:$0xff]  }
  0x62   : > { %1869 = vmatprep.subr.bf16.mxu1 %v6622_v1 }
  0x65   : > { %1870 = vmatpush1.bf16.msra.mxu1 %v4437_v61  ;;  %v5163_v61 = vld [vmem:[%s4701_s29 + $0x20] ss:$12 sps:$4 sm:$0xff]  }
  0x66   : > { %830 = vmatmul.mubr.bf16.gmra.mrb[12].mxu0 %v4923_v62  ;;  %1871 = vmatprep.subr.bf16.mxu1 %v6622_v1 }
  0x67   : > { %837 = vmatprep.mubr.bf16.mxu0 %v4927_v63 }
  0x68   : > { %1343 = vmatmul.mubr.bf16.gmra.mrb[36].mxu1 %v4879_v53 }
  0x69   : > { %1350 = vmatprep.mubr.bf16.mxu1 %v4882_v54  ;;  %1872 = vmatpush1.bf16.msra.mxu1 %v4441_v0  ;;  %v5166_v0 = vld [vmem:[%s4701_s29 + $0x38] ss:$12 sps:$4 sm:$0xff]  }
  0x6a   : > { %1873 = vmatprep.subr.bf16.mxu1 %v6622_v1 }
  0x6d   : > { %1874 = vmatpush1.bf16.msra.mxu1 %v4448_v2  ;;  %v4502_v2 = vld [vmem:[%s6619_s1 + $0x128] sm:$0xff]  }
  0x6e   : > { %838 = vmatmul.mubr.bf16.gmra.mrb[16].mxu0 %v4941_v3  ;;  %1875 = vmatprep.subr.bf16.mxu1 %v6622_v1 }
  0x6f   : > { %845 = vmatprep.mubr.bf16.mxu0 %v4945_v4 }
  0x70   : > { %1351 = vmatmul.mubr.bf16.gmra.mrb[40].mxu1 %v4905_v58 }
  0x71   : > { %1358 = vmatprep.mubr.bf16.mxu1 %v4908_v59  ;;  %1876 = vmatpush1.bf16.msra.mxu1 %v4452_v5  ;;  %v4505_v5 = vld [vmem:[%s6619_s1 + $0x130] sm:$0xff]  }
  0x72   : > { %1877 = vmatprep.subr.bf16.mxu1 %v6622_v1 }
  0x75   : > { %1878 = vmatpush1.bf16.msra.mxu1 %v4456_v9  ;;  %v5182_v9 = vld [vmem:[%s4701_s29 + $0x50] ss:$12 sps:$4 sm:$0xff]  }
  0x76   : > { %846 = vmatmul.mubr.bf16.gmra.mrb[20].mxu0 %v4961_v7  ;;  %1879 = vmatprep.subr.bf16.mxu1 %v6622_v1 }
  0x77   : > { %853 = vmatprep.mubr.bf16.mxu0 %v4965_v8 }
  0x78   : > { %1359 = vmatmul.mubr.bf16.gmra.mrb[44].mxu1 %v4923_v62 }
  0x79   : > { %1366 = vmatprep.mubr.bf16.mxu1 %v4927_v63  ;;  %1880 = vmatpush1.bf16.msra.mxu1 %v4460_v10 }
  0x7a   : > { %1881 = vmatprep.subr.bf16.mxu1 %v6622_v1 }
  0x7d   : > { %1882 = vmatpush1.bf16.msra.mxu1 %v4467_v13 }
  0x7e   : > { %854 = vmatmul.mubr.bf16.gmra.mrb[24].mxu0 %v4979_v11  ;;  %1883 = vmatprep.subr.bf16.mxu1 %v6622_v1 }
  0x7f   : > { %861 = vmatprep.mubr.bf16.mxu0 %v4983_v12 }
  0x80   : > { %1367 = vmatmul.mubr.bf16.gmra.mrb[48].mxu1 %v4941_v3 }
  0x81   : > { %1374 = vmatprep.mubr.bf16.mxu1 %v4945_v4  ;;  %1884 = vmatpush1.bf16.msra.mxu1 %v4471_v14 }
  0x82   : > { %1885 = vmatprep.subr.bf16.mxu1 %v6622_v1 }
  0x85   : > { %1886 = vmatpush1.bf16.msra.mxu1 %v4475_v16 }
  0x86   : > { %862 = vmatmul.mubr.bf16.gmra.mrb[28].mxu0 %v4997_v15  ;;  %1887 = vmatprep.subr.bf16.mxu1 %v6622_v1 }
  0x87   : > { %869 = vmatprep.mubr.bf16.mxu0 %v5004_v17 }
  0x88   : > { %1375 = vmatmul.mubr.bf16.gmra.mrb[52].mxu1 %v4961_v7 }
  0x89   : > { %1382 = vmatprep.mubr.bf16.mxu1 %v4965_v8  ;;  %1888 = vmatpush1.bf16.msra.mxu1 %v4479_v18  ;;  %v4508_v18 = vld [vmem:[%s6619_s1 + $0x1c0] sm:$0xff]  }
  0x8a   : > { %1889 = vmatprep.subr.bf16.mxu1 %v6622_v1 }
  0x8d   : > { %1890 = vmatpush1.bf16.msra.mxu1 %v4486_v19 }
  0x8e   : > { %870 = vmatmul.mubr.bf16.gmra.mrb[32].mxu0 %v5018_v20  ;;  %1891 = vmatprep.subr.bf16.mxu1 %v6622_v1 }
  0x8f   : > { %877 = vmatprep.mubr.bf16.mxu0 %v5022_v21 }
  0x90   : > { %1383 = vmatmul.mubr.bf16.gmra.mrb[56].mxu1 %v4979_v11 }
  0x91   : > { %1390 = vmatprep.mubr.bf16.mxu1 %v4983_v12  ;;  %1892 = vmatpush1.bf16.msra.mxu1 %v4490_v22 }
  0x92   : > { %1893 = vmatprep.subr.bf16.mxu1 %v6622_v1 }
  0x95   : > { %1894 = vmatpush1.bf16.msra.mxu1 %v4494_v23  ;;  %v4510_v23 = vld [vmem:[%s6619_s1 + $0x1c8] sm:$0xff]  }
  0x96   : > { %878 = vmatmul.mubr.bf16.gmra.mrb[36].mxu0 %v5037_v24  ;;  %1895 = vmatprep.subr.bf16.mxu1 %v6622_v1 }
  0x97   : > { %885 = vmatprep.mubr.bf16.mxu0 %v5041_v25 }
  0x98   : > { %1391 = vmatmul.mubr.bf16.gmra.mrb[60].mxu1 %v4997_v15 }
  0x99   : > { %1398 = vmatprep.mubr.bf16.mxu1 %v5004_v17  ;;  %1896 = vmatpush1.bf16.msra.mxu1 %v4498_v26 }
  0x9a   : > { %1897 = vmatprep.subr.bf16.mxu1 %v6622_v1 }
  0x9d   : > { %1898 = vmatpush1.bf16.msra.mxu1 %v4506_v27 }
  0x9e   : > { %886 = vmatmul.mubr.bf16.gmra.mrb[40].mxu0 %v5055_v28  ;;  %4258 = vmatprep.subr.bf16.mxu1 %v5061_v29 }
  0x9f   : > { %893 = vmatprep.mubr.bf16.mxu0 %v5064_v30 }
  0xa0   : > { %1399 = vmatmul.mubr.bf16.gmra.mrb[64].mxu1 %v5018_v20 }
  0xa1   : > { %1406 = vmatprep.mubr.bf16.mxu1 %v5022_v21 }
  0xa6   : > { %894 = vmatmul.mubr.bf16.gmra.mrb[44].mxu0 %v5072_v31 }
  0xa7   : > { %901 = vmatprep.mubr.bf16.mxu0 %v5075_v32 }
  0xa8   : > { %1407 = vmatmul.mubr.bf16.gmra.mrb[68].mxu1 %v5037_v24 }
  0xa9   : > { %1414 = vmatprep.mubr.bf16.mxu1 %v5041_v25 }
  0xae   : > { %902 = vmatmul.mubr.bf16.gmra.mrb[48].mxu0 %v5082_v33 }
  0xaf   : > { %909 = vmatprep.mubr.bf16.mxu0 %v5085_v35 }
  0xb0   : > { %1415 = vmatmul.mubr.bf16.gmra.mrb[72].mxu1 %v5055_v28 }
  0xb1   : > { %1422 = vmatprep.mubr.bf16.mxu1 %v5064_v30 }
  0xb6   : > { %910 = vmatmul.mubr.bf16.gmra.mrb[52].mxu0 %v5092_v36 }
  0xb7   : > { %917 = vmatprep.mubr.bf16.mxu0 %v5095_v37 }
  0xb8   : > { %1423 = vmatmul.mubr.bf16.gmra.mrb[76].mxu1 %v5072_v31 }
  0xb9   : > { %1430 = vmatprep.mubr.bf16.mxu1 %v5075_v32 }
  0xbe   : > { %918 = vmatmul.mubr.bf16.gmra.mrb[56].mxu0 %v5102_v38 }
  0xbf   : > { %925 = vmatprep.mubr.bf16.mxu0 %v5105_v39 }
  0xc0   : > { %1431 = vmatmul.mubr.bf16.gmra.mrb[80].mxu1 %v5082_v33 }
  0xc1   : > { %1438 = vmatprep.mubr.bf16.mxu1 %v5085_v35 }
  0xc6   : > { %926 = vmatmul.mubr.bf16.gmra.mrb[60].mxu0 %v5112_v40 }
  0xc7   : > { %933 = vmatprep.mubr.bf16.mxu0 %v5115_v41 }
  0xc8   : > { %1439 = vmatmul.mubr.bf16.gmra.mrb[84].mxu1 %v5092_v36 }
  0xc9   : > { %1446 = vmatprep.mubr.bf16.mxu1 %v5095_v37 }
  0xce   : > { %934 = vmatmul.mubr.bf16.gmra.mrb[64].mxu0 %v5122_v43 }
  0xcf   : > { %939 = vmatprep.mubr.bf16.mxu0 %v5125_v45 }
  0xd0   : > { %1447 = vmatmul.mubr.bf16.gmra.mrb[88].mxu1 %v5102_v38 }
  0xd1   : > { %1454 = vmatprep.mubr.bf16.mxu1 %v5105_v39 }
  0xd6   : > { %940 = vmatmul.mubr.bf16.gmra.mrb[68].mxu0 %v5132_v46 }
  0xd7   : > { %945 = vmatprep.mubr.bf16.mxu0 %v5135_v50 }
  0xd8   : > { %1455 = vmatmul.mubr.bf16.gmra.mrb[92].mxu1 %v5112_v40 }
  0xd9   : > { %1462 = vmatprep.mubr.bf16.mxu1 %v5115_v41  ;;  %v5342_v41 = vld [vmem:[%s4701_s29 + $0x158] ss:$12 sps:$4 sm:$0xff]  }
  0xde   : > { %946 = vmatmul.mubr.bf16.gmra.mrb[72].mxu0 %v5142_v52 }
  0xdf   : > { %951 = vmatprep.mubr.bf16.mxu0 %v5145_v56 }
  0xe0   : > { %1463 = vmatmul.mubr.bf16.gmra.mrb[96].mxu1 %v5122_v43 }
  0xe1   : > { %1470 = vmatprep.mubr.bf16.mxu1 %v5125_v45  ;;  %v5290_v45 = vld [vmem:[%s4701_s29 + $0xc8] ss:$12 sps:$4 sm:$0xff]  }
  0xe6   : > { %952 = vmatmul.mubr.bf16.gmra.mrb[76].mxu0 %v5152_v57 }
  0xe7   : > { %4122 = vmatprep.mubr.msk.bf16.mxu0 %vm712_vm0, %v5155_v60 }
  0xe8   : > { %1471 = vmatmul.mubr.bf16.gmra.mrb[100].mxu1 %v5132_v46  ;;  %v5285_v46 = vld [vmem:[%s4701_s29 + $0xb0] ss:$12 sps:$4 sm:$0xff]  }
  0xe9   : > { %1476 = vmatprep.mubr.bf16.mxu1 %v5135_v50 }
  0xee   : > { %4123 = vmatmul.mubr.msk.bf16.vlgmr.msra.gmra.mrb[80].mxu0 %vm712_vm0, %v5163_v61 }
  0xef   : > { %4163 = vmatpush3.bf16.msra.mxu0 %v4953_v6  ;;  %4126 = vmatprep.mubr.msk.bf16.mxu0 %vm712_vm0, %v5166_v0  ;;  %v4507_v6 = vld [vmem:[%s6619_s1 + $0x138] sm:$0xff]  }
  0xf0   : > { %1477 = vmatmul.mubr.bf16.gmra.mrb[104].mxu1 %v5142_v52  ;;  %4164 = vmatprep.subr.bf16.mxu0 %v4502_v2 }
  0xf1   : > { %1482 = vmatprep.mubr.bf16.mxu1 %v5145_v56  ;;  %v6655_v56 = vmov 0  }
  0xf2   : > { %v5184_v10 = vpop.f32.mrb[0].mxu1 }
  0xf3   : > { %4165 = vmatpush3.bf16.msra.mxu0 %v4502_v2  ;;  %v5186_v13 = vpop.f32.mrb[1].mxu1  ;;  %v4511_v2 = vld [vmem:[%s6619_s1 + $0x1d0] sm:$0xff]  }
  0xf4   : > { %4166 = vmatprep.subr.bf16.mxu0 %v4505_v5  ;;  %v5191_v14 = vpop.f32.mrb[2].mxu1 }
  0xf5   : > { %v5193_v16 = vpop.f32.mrb[3].mxu1 }
  0xf6   : > { %4127 = vmatmul.mubr.msk.bf16.gmra.mrb[84].mxu0 %vm712_vm0, %v5182_v9 }
  0xf7   : > { %4167 = vmatpush3.bf16.msra.mxu0 %v4505_v5  ;;  %4170 = vmatprep.mubr.msk.bf16.mxu0 %vm712_vm0, %v5155_v60  ;;  %v4515_v5 = vld [vmem:[%s6619_s1 + $0x270] sm:$0xff]  }
  0xf8   : > { %1483 = vmatmul.mubr.bf16.gmra.mrb[108].mxu1 %v5152_v57  ;;  %4168 = vmatprep.subr.bf16.mxu0 %v4507_v6 }
  0xf9   : > { %1899 = vmatprep.mubr.bf16.mxu1 %v4799_v34  ;;  %v4512_v34 = vld [vmem:[%s6619_s1 + $0x268] sm:$0xff]  }
  0xfa   : > { %v5204_v19 = vpop.f32.mrb[4].mxu1 }
  0xfb   : > { %4169 = vmatpush3.bf16.msra.mxu0 %v4507_v6  ;;  %v5206_v22 = vpop.f32.mrb[5].mxu1 }
  0xfc   : > { %4210 = vmatprep.subr.bf16.mxu0 %v4508_v18  ;;  %v5211_v26 = vpop.f32.mrb[6].mxu1 }
  0xfd   : > { %v5213_v27 = vpop.f32.mrb[7].mxu1 }
  0xfe   : > { %4171 = vmatmul.mubr.msk.bf16.vlgmr.msra.gmra.mrb[88].mxu0 %vm712_vm0, %v5163_v61 }
  0xff   : > { %4211 = vmatpush3.bf16.msra.mxu0 %v4508_v18  ;;  %4174 = vmatprep.mubr.msk.bf16.mxu0 %vm712_vm0, %v5166_v0 }
 0x100   : > { %1900 = vmatmul.mubr.bf16.vlgmr.msra.gmra.mrb[112].mxu1 %v4850_v47  ;;  %4212 = vmatprep.subr.bf16.mxu0 %v4510_v23  ;;  %v4513_v47 = vld [vmem:[%s6619_s1 + $0x1d8] sm:$0xff]  }
 0x101   : > { %4259 = vmatpush3.bf16.msra.mxu1 %v5061_v29  ;;  %1905 = vmatprep.mubr.bf16.mxu1 %v4856_v49  ;;  %v4524_v49 = vld [vmem:[%s6619_s1 + $0x278] sm:$0xff]  }
 0x102   : > { %4260 = vmatprep.subr.bf16.mxu1 %v4512_v34  ;;  %v5231_v6 = vpop.f32.mrb[8].mxu1 }
 0x103   : > { %4213 = vmatpush3.bf16.msra.mxu0 %v4510_v23  ;;  %v5233_v18 = vpop.f32.mrb[9].mxu1  ;;  %v5248_v23 = vld [vmem:[%s4701_s29 + $0x68] ss:$12 sps:$4 sm:$0xff]  }
 0x104   : > { %4214 = vmatprep.subr.bf16.mxu0 %v4511_v2  ;;  %v5238_v1 = vpop.f32.mrb[10].mxu1 }
 0x105   : > { %4261 = vmatpush3.bf16.msra.mxu1 %v4512_v34  ;;  %v5240_v29 = vpop.f32.mrb[11].mxu1 }
 0x106   : > { %4175 = vmatmul.mubr.msk.bf16.gmra.mrb[92].mxu0 %vm712_vm0, %v5182_v9  ;;  %4262 = vmatprep.subr.bf16.mxu1 %v4515_v5 }
 0x107   : > { %4178 = vmatprep.mubr.msk.bf16.mxu0 %vm712_vm0, %v5248_v23  ;;  %4215 = vmatpush3.bf16.msra.mxu0 %v4511_v2 }
 0x108   : > { %1906 = vmatmul.mubr.bf16.gmra.mrb[116].mxu1 %v4879_v53  ;;  %4216 = vmatprep.subr.bf16.mxu0 %v4513_v47  ;;  %v5264_v53 = vld [vmem:[%s4701_s29 + $0x80] ss:$12 sps:$4 sm:$0xff]  }
 0x109   : > { %1911 = vmatprep.mubr.bf16.mxu1 %v4882_v54  ;;  %4263 = vmatpush3.bf16.msra.mxu1 %v4515_v5  ;;  %v5270_v54 = vld [vmem:[%s4701_s29 + $0x98] ss:$12 sps:$4 sm:$0xff]  }
 0x10a   : > { %4264 = vmatprep.subr.bf16.mxu1 %v4524_v49  ;;  %v5254_v34 = vpop.f32.mrb[12].mxu1 }
 0x10b   : > { %6654 = vst [vmem:[#allocation10_spill] sm:$0xff] %v5254_v34  ;;  %4217 = vmatpush3.bf16.msra.mxu0 %v4513_v47  ;;  %v5256_v57 = vpop.f32.mrb[13].mxu1  ;;  %v5321_v34 = vld [vmem:[%s4701_s29 + $0x110] ss:$12 sps:$4 sm:$0xff]  }
 0x10c   : > { %2430 = vmatprep.subr.bf16.mxu0 %v6655_v56  ;;  %v5259_v52 = vpop.f32.mrb[14].mxu1 }
 0x10d   : > { %6656 = vst [vmem:[#allocation11_spill] sm:$0xff] %v5259_v52  ;;  %4265 = vmatpush3.bf16.msra.mxu1 %v4524_v49  ;;  %v5261_v2 = vpop.f32.mrb[15].mxu1 }
 0x10e   : > { %4179 = vmatmul.mubr.msk.bf16.gmra.mrb[96].mxu0 %vm712_vm0, %v5264_v53  ;;  %2993 = vmatprep.subr.bf16.mxu1 %v6655_v56 }
 0x10f   : > { %4182 = vmatprep.mubr.msk.bf16.mxu0 %vm712_vm0, %v5270_v54 }
 0x110   : > { %1912 = vmatmul.mubr.bf16.gmra.mrb[120].mxu1 %v4905_v58 }
 0x111   : > { %1919 = vmatprep.mubr.bf16.mxu1 %v4908_v59 }
 0x112   : > { %v5276_v5 = vpop.f32.mrb[16].mxu1 }
 0x113   : > { %6657 = vst [vmem:[#allocation12_spill] sm:$0xff] %v5276_v5  ;;  %v5278_v47 = vpop.f32.mrb[17].mxu1 }
 0x114   : > { %6658 = vst [vmem:[#allocation13_spill] sm:$0xff] %v5278_v47  ;;  %v5280_v49 = vpop.f32.mrb[18].mxu1  ;;  %v5310_v47 = vld [vmem:[%s4701_s29 + $0xf8] ss:$12 sps:$4 sm:$0xff]  }
 0x115   : > { %6659 = vst [vmem:[#allocation14_spill] sm:$0xff] %v5280_v49  ;;  %v5282_v50 = vpop.f32.mrb[19].mxu1 }
 0x116   : > { %6660 = vst [vmem:[#allocation15_spill] sm:$0xff] %v5282_v50  ;;  %4183 = vmatmul.mubr.msk.bf16.gmra.mrb[100].mxu0 %vm712_vm0, %v5285_v46  ;;  %v5305_v50 = vld [vmem:[%s4701_s29 + $0xe0] ss:$12 sps:$4 sm:$0xff]  }
 0x117   : > { %4186 = vmatprep.mubr.msk.bf16.mxu0 %vm712_vm0, %v5290_v45 }
 0x118   : > { %1920 = vmatmul.mubr.bf16.gmra.mrb[124].mxu1 %v4923_v62 }
 0x119   : > { %1927 = vmatprep.mubr.bf16.mxu1 %v4927_v63 }
 0x11a   : > { %v5296_v58 = vpop.f32.mrb[20].mxu1 }
 0x11b   : > { %6661 = vst [vmem:[#allocation16_spill] sm:$0xff] %v5296_v58  ;;  %v5298_v59 = vpop.f32.mrb[21].mxu1 }
 0x11c   : > { %6662 = vst [vmem:[#allocation17_spill] sm:$0xff] %v5298_v59  ;;  %v5300_v49 = vpop.f32.mrb[22].mxu1 }
 0x11d   : > { %6663 = vst [vmem:[#allocation18_spill] sm:$0xff] %v5300_v49  ;;  %v5302_v5 = vpop.f32.mrb[23].mxu1 }
 0x11e   : > { %6664 = vst [vmem:[#allocation19_spill] sm:$0xff] %v5302_v5  ;;  %4187 = vmatmul.mubr.msk.bf16.gmra.mrb[104].mxu0 %vm712_vm0, %v5305_v50 }
 0x11f   : > { %4190 = vmatprep.mubr.msk.bf16.mxu0 %vm712_vm0, %v5310_v47 }
 0x120   : > { %1928 = vmatmul.mubr.bf16.gmra.mrb[128].mxu1 %v4941_v3  ;;  %v5326_v3 = vld [vmem:[%s4701_s29 + $0x128] ss:$12 sps:$4 sm:$0xff]  }
 0x121   : > { %v5315_v62 = vpop.f32.mrb[0].mxu0  ;;  %1935 = vmatprep.mubr.bf16.mxu1 %v4945_v4 }
 0x122   : > { %6665 = vst [vmem:[#allocation20_spill] sm:$0xff] %v5315_v62  ;;  %v809_v63 = vpop.f32.mrb[1].mxu0  ;;  %v5337_v62 = vld [vmem:[%s4701_s29 + $0x140] ss:$12 sps:$4 sm:$0xff]  }
 0x123   : > { %v4156_v49 = vpop.f32.mrb[24].mxu1  ;;  %v5318_v58 = vpop.f32.mrb[2].mxu0 }
 0x124   : > { %6666 = vst [vmem:[#allocation21_spill] sm:$0xff] %v5318_v58  ;;  %v1120_v5 = vpop.f32.mrb[25].mxu1  ;;  %v812_v59 = vpop.f32.mrb[3].mxu0 }
 0x125   : > { %v4157_v43 = vpop.f32.mrb[26].mxu1 }
 0x126   : > { %v1122_v52 = vpop.f32.mrb[27].mxu1  ;;  %4191 = vmatmul.mubr.msk.bf16.gmra.mrb[108].mxu0 %vm712_vm0, %v5321_v34 }
 0x127   : > { %4194 = vmatprep.mubr.msk.bf16.mxu0 %vm712_vm0, %v5326_v3 }
 0x128   : > { %1936 = vmatmul.mubr.bf16.gmra.mrb[132].mxu1 %v4961_v7 }
 0x129   : > { %v5331_v4 = vpop.f32.mrb[4].mxu0  ;;  %1943 = vmatprep.mubr.bf16.mxu1 %v4965_v8 }
 0x12a   : > { %v817_v43 = vpop.f32.mrb[5].mxu0 }
 0x12b   : > { %v4160_v5 = vpop.f32.mrb[28].mxu1  ;;  %v5334_v52 = vpop.f32.mrb[6].mxu0 }
 0x12c   : > { %v1132_v49 = vpop.f32.mrb[29].mxu1  ;;  %v820_v59 = vpop.f32.mrb[7].mxu0 }
 0x12d   : > { %v4161_v63 = vpop.f32.mrb[30].mxu1 }
 0x12e   : > { %v1134_v58 = vpop.f32.mrb[31].mxu1  ;;  %4195 = vmatmul.mubr.msk.bf16.gmra.mrb[112].mxu0 %vm712_vm0, %v5337_v62 }
 0x12f   : > { %4198 = vmatprep.mubr.msk.bf16.mxu0 %vm712_vm0, %v5342_v41 }
 0x130   : > { %1944 = vmatmul.mubr.bf16.gmra.mrb[136].mxu1 %v4979_v11 }
 0x131   : > { %v5347_v7 = vpop.f32.mrb[8].mxu0  ;;  %1951 = vmatprep.mubr.bf16.mxu1 %v4983_v12 }
 0x132   : > { %v825_v8 = vpop.f32.mrb[9].mxu0 }
 0x133   : > { %v1338_v43 = vpop.f32.mrb[32].mxu1  ;;  %v5350_v5 = vpop.f32.mrb[10].mxu0 }
 0x134   : > { %v1339_v58 = vpop.f32.mrb[33].mxu1  ;;  %v828_v49 = vpop.f32.mrb[11].mxu0 }
 0x135   : > { %v1340_v59 = vpop.f32.mrb[34].mxu1 }
 0x136   : > { %v1341_v63 = vpop.f32.mrb[35].mxu1  ;;  %4199 = vmatmul.mubr.msk.bf16.gmra.mrb[116].mxu0 %vm712_vm0, %v4828_v42 }
 0x137   : > { %4202 = vmatprep.mubr.msk.bf16.mxu0 %vm712_vm0, %v4834_v44 }
 0x138   : > { %1952 = vmatmul.mubr.bf16.gmra.mrb[140].mxu1 %v4997_v15 }
 0x139   : > { %v5357_v11 = vpop.f32.mrb[12].mxu0  ;;  %1959 = vmatprep.mubr.bf16.mxu1 %v5004_v17 }
 0x13a   : > { %v833_v12 = vpop.f32.mrb[13].mxu0 }
 0x13b   : > { %v5360_v8 = vpop.f32.mrb[36].mxu1  ;;  %v5362_v43 = vpop.f32.mrb[14].mxu0 }
 0x13c   : > { %v1346_v58 = vpop.f32.mrb[37].mxu1  ;;  %v836_v49 = vpop.f32.mrb[15].mxu0 }
 0x13d   : > { %v5364_v59 = vpop.f32.mrb[38].mxu1 }
 0x13e   : > { %v1349_v63 = vpop.f32.mrb[39].mxu1  ;;  %4203 = vmatmul.mubr.msk.bf16.gmra.mrb[120].mxu0 %vm712_vm0, %v4853_v48 }
 0x13f   : > { %4206 = vmatprep.mubr.msk.bf16.mxu0 %vm712_vm0, %v4863_v51 }
 0x140   : > { %1960 = vmatmul.mubr.bf16.gmra.mrb[144].mxu1 %v5018_v20 }
 0x141   : > { %v839_v42 = vpop.f32.mrb[16].mxu0  ;;  %1967 = vmatprep.mubr.bf16.mxu1 %v5022_v21 }
 0x142   : > { %v5373_v44 = vadd.f32 %v5186_v13, %v839_v42  ;;  %v841_v15 = vpop.f32.mrb[17].mxu0 }
 0x143   : > { %v5375_v17 = vpop.f32.mrb[40].mxu1  ;;  %v842_v12 = vpop.f32.mrb[18].mxu0  ;;  %v4514_v15 = vld [vmem:[%s6619_s1 + $0x1e0] sm:$0xff]  }
 0x144   : > { %v5378_v58 = vadd.f32 %v5193_v16, %v842_v12  ;;  %v1354_v49 = vpop.f32.mrb[41].mxu1  ;;  %v844_v48 = vpop.f32.mrb[19].mxu0 }
 0x145   : > { %v5380_v63 = vpop.f32.mrb[42].mxu1 }
 0x146   : > { %v1357_v51 = vpop.f32.mrb[43].mxu1  ;;  %4207 = vmatmul.mubr.msk.bf16.gmra.mrb[124].mxu0 %vm712_vm0, %v4886_v55 }
 0x147   : > { %4218 = vmatprep.mubr.msk.bf16.mxu0 %vm712_vm0, %v5155_v60 }
 0x148   : > { %1968 = vmatmul.mubr.bf16.gmra.mrb[148].mxu1 %v5037_v24 }
 0x149   : > { %v847_v20 = vpop.f32.mrb[20].mxu0  ;;  %1975 = vmatprep.mubr.bf16.mxu1 %v5041_v25  ;;  %v4516_v25 = vld [vmem:[%s6619_s1 + $0x1e8] sm:$0xff]  }
 0x14a   : > { %v5389_v21 = vadd.f32 %v5184_v10, %v847_v20  ;;  %v849_v13 = vpop.f32.mrb[21].mxu0 }
 0x14b   : > { %v5391_v16 = vpop.f32.mrb[44].mxu1  ;;  %v850_v42 = vpop.f32.mrb[22].mxu0 }
 0x14c   : > { %v5397_v55 = vadd.f32 %v5191_v14, %v850_v42  ;;  %v1362_v12 = vpop.f32.mrb[45].mxu1  ;;  %v852_v49 = vpop.f32.mrb[23].mxu0  ;;  %v4517_v42 = vld [vmem:[%s6619_s1 + $0x1f0] sm:$0xff]  }
 0x14d   : > { %v5399_v24 = vpop.f32.mrb[46].mxu1  ;;  %v4518_v49 = vld [vmem:[%s6619_s1 + $0x1f8] sm:$0xff]  }
 0x14e   : > { %v1365_v48 = vpop.f32.mrb[47].mxu1  ;;  %4219 = vmatmul.mubr.msk.bf16.vlgmr.msra.gmra.mrb[128].mxu0 %vm712_vm0, %v5163_v61 }
 0x14f   : > { %2431 = vmatpush1.bf16.msra.mxu0 %v4514_v15  ;;  %4222 = vmatprep.mubr.msk.bf16.mxu0 %vm712_vm0, %v5166_v0 }
 0x150   : > { %1976 = vmatmul.mubr.bf16.gmra.mrb[152].mxu1 %v5055_v28  ;;  %2432 = vmatprep.subr.bf16.mxu0 %v6655_v56 }
 0x151   : > { %v855_v10 = vpop.f32.mrb[24].mxu0  ;;  %1983 = vmatprep.mubr.bf16.mxu1 %v5064_v30 }
 0x152   : > { %v5412_v14 = vadd.f32 %v5206_v22, %v855_v10  ;;  %v857_v51 = vpop.f32.mrb[25].mxu0 }
 0x153   : > { %v5414_v20 = vpop.f32.mrb[48].mxu1  ;;  %v858_v13 = vpop.f32.mrb[26].mxu0  ;;  %2433 = vmatpush1.bf16.msra.mxu0 %v4516_v25 }
 0x154   : > { %v5420_v15 = vadd.f32 %v5213_v27, %v858_v13  ;;  %v1370_v28 = vpop.f32.mrb[49].mxu1  ;;  %v860_v12 = vpop.f32.mrb[27].mxu0  ;;  %2434 = vmatprep.subr.bf16.mxu0 %v6655_v56  ;;  %v4519_v13 = vld [vmem:[%s6619_s1 + $0x200] sm:$0xff]  }
 0x155   : > { %v5423_v30 = vpop.f32.mrb[50].mxu1  ;;  %v4520_v12 = vld [vmem:[%s6619_s1 + $0x208] sm:$0xff]  }
 0x156   : > { %v1373_v22 = vpop.f32.mrb[51].mxu1  ;;  %4223 = vmatmul.mubr.msk.bf16.gmra.mrb[132].mxu0 %vm712_vm0, %v5182_v9 }
 0x157   : > { %2435 = vmatpush1.bf16.msra.mxu0 %v4517_v42  ;;  %4226 = vmatprep.mubr.msk.bf16.mxu0 %vm712_vm0, %v5248_v23 }
 0x158   : > { %1984 = vmatmul.mubr.bf16.gmra.mrb[156].mxu1 %v5072_v31  ;;  %2436 = vmatprep.subr.bf16.mxu0 %v6655_v56 }
 0x159   : > { %v863_v27 = vpop.f32.mrb[28].mxu0  ;;  %1991 = vmatprep.mubr.bf16.mxu1 %v5075_v32 }
 0x15a   : > { %v5436_v48 = vadd.f32 %v5204_v19, %v863_v27  ;;  %v865_v25 = vpop.f32.mrb[29].mxu0 }
 0x15b   : > { %v5438_v10 = vpop.f32.mrb[52].mxu1  ;;  %v866_v51 = vpop.f32.mrb[30].mxu0  ;;  %2437 = vmatpush1.bf16.msra.mxu0 %v4518_v49 }
 0x15c   : > { %6667 = vst [vmem:[#allocation22_spill] sm:$0xff] %v5436_v48  ;;  %v5444_v42 = vadd.f32 %v5211_v26, %v866_v51  ;;  %v1378_v31 = vpop.f32.mrb[53].mxu1  ;;  %v868_v28 = vpop.f32.mrb[31].mxu0  ;;  %2438 = vmatprep.subr.bf16.mxu0 %v6655_v56  ;;  %v4521_v51 = vld [vmem:[%s6619_s1 + $0x210] sm:$0xff]   ;;  %v5599_v48 = vld [vmem:[%s4701_s29 + $0x1a0] ss:$12 sps:$4 sm:$0xff]  }
 0x15d   : > { %v5447_v32 = vpop.f32.mrb[54].mxu1  ;;  %v4522_v28 = vld [vmem:[%s6619_s1 + $0x218] sm:$0xff]  }
 0x15e   : > { %6668 = vst [vmem:[#allocation23_spill] sm:$0xff] %v5444_v42  ;;  %v1381_v19 = vpop.f32.mrb[55].mxu1  ;;  %4227 = vmatmul.mubr.msk.bf16.gmra.mrb[136].mxu0 %vm712_vm0, %v5264_v53 }
 0x15f   : > { %2439 = vmatpush1.bf16.msra.mxu0 %v4519_v13  ;;  %4230 = vmatprep.mubr.msk.bf16.mxu0 %vm712_vm0, %v5270_v54 }
 0x160   : > { %1992 = vmatmul.mubr.bf16.gmra.mrb[160].mxu1 %v5082_v33  ;;  %2440 = vmatprep.subr.bf16.mxu0 %v6655_v56 }
 0x161   : > { %v871_v26 = vpop.f32.mrb[32].mxu0  ;;  %1999 = vmatprep.mubr.bf16.mxu1 %v5085_v35 }
 0x162   : > { %v5460_v22 = vadd.f32 %v5233_v18, %v871_v26  ;;  %v873_v49 = vpop.f32.mrb[33].mxu0 }
 0x163   : > { %v5462_v27 = vpop.f32.mrb[56].mxu1  ;;  %v874_v25 = vpop.f32.mrb[34].mxu0  ;;  %2441 = vmatpush1.bf16.msra.mxu0 %v4520_v12 }
 0x164   : > { %6669 = vst [vmem:[#allocation24_spill] sm:$0xff] %v5460_v22  ;;  %v5468_v13 = vadd.f32 %v5240_v29, %v874_v25  ;;  %v1386_v33 = vpop.f32.mrb[57].mxu1  ;;  %v876_v31 = vpop.f32.mrb[35].mxu0  ;;  %2442 = vmatprep.subr.bf16.mxu0 %v6655_v56  ;;  %v4523_v25 = vld [vmem:[%s6619_s1 + $0x220] sm:$0xff]   ;;  %v5621_v22 = vld [vmem:[%s4701_s29 + $0x1d0] ss:$12 sps:$4 sm:$0xff]  }
 0x165   : > { %v5471_v35 = vpop.f32.mrb[58].mxu1  ;;  %v4525_v31 = vld [vmem:[%s6619_s1 + $0x228] sm:$0xff]  }
 0x166   : > { %6670 = vst [vmem:[#allocation25_spill] sm:$0xff] %v5468_v13  ;;  %v1389_v18 = vpop.f32.mrb[59].mxu1  ;;  %4231 = vmatmul.mubr.msk.bf16.gmra.mrb[140].mxu0 %vm712_vm0, %v5285_v46 }
 0x167   : > { %4234 = vmatprep.mubr.msk.bf16.mxu0 %vm712_vm0, %v5290_v45  ;;  %2443 = vmatpush1.bf16.msra.mxu0 %v4521_v51 }
 0x168   : > { %2000 = vmatmul.mubr.bf16.gmra.mrb[164].mxu1 %v5092_v36  ;;  %2444 = vmatprep.subr.bf16.mxu0 %v6655_v56 }
 0x169   : > { %v879_v29 = vpop.f32.mrb[36].mxu0  ;;  %2007 = vmatprep.mubr.bf16.mxu1 %v5095_v37 }
 0x16a   : > { %v5484_v19 = vadd.f32 %v5231_v6, %v879_v29  ;;  %v881_v12 = vpop.f32.mrb[37].mxu0 }
 0x16b   : > { %v5486_v26 = vpop.f32.mrb[60].mxu1  ;;  %v882_v49 = vpop.f32.mrb[38].mxu0  ;;  %2445 = vmatpush1.bf16.msra.mxu0 %v4522_v28 }
 0x16c   : > { %6671 = vst [vmem:[#allocation26_spill] sm:$0xff] %v5484_v19  ;;  %v5492_v51 = vadd.f32 %v5238_v1, %v882_v49  ;;  %v1394_v36 = vpop.f32.mrb[61].mxu1  ;;  %v884_v33 = vpop.f32.mrb[39].mxu0  ;;  %2446 = vmatprep.subr.bf16.mxu0 %v6655_v56  ;;  %v4526_v49 = vld [vmem:[%s6619_s1 + $0x230] sm:$0xff]  }
 0x16d   : > { %v5495_v37 = vpop.f32.mrb[62].mxu1  ;;  %v4527_v33 = vld [vmem:[%s6619_s1 + $0x238] sm:$0xff]  }
 0x16e   : > { %6672 = vst [vmem:[#allocation27_spill] sm:$0xff] %v5492_v51  ;;  %v1397_v6 = vpop.f32.mrb[63].mxu1  ;;  %4235 = vmatmul.mubr.msk.bf16.gmra.mrb[144].mxu0 %vm712_vm0, %v5305_v50 }
 0x16f   : > { %4238 = vmatprep.mubr.msk.bf16.mxu0 %vm712_vm0, %v5310_v47  ;;  %2447 = vmatpush1.bf16.msra.mxu0 %v4523_v25  ;;  %v6676_v6 = vld [vmem:[#allocation2_spill] sm:$0xff] }
 0x170   : > { %2008 = vmatmul.mubr.bf16.gmra.mrb[168].mxu1 %v5102_v38  ;;  %2448 = vmatprep.subr.bf16.mxu0 %v6655_v56 }
 0x171   : > { %v887_v1 = vpop.f32.mrb[40].mxu0  ;;  %2015 = vmatprep.mubr.bf16.mxu1 %v5105_v39 }
 0x172   : > { %v5508_v18 = vadd.f32 %v5256_v57, %v887_v1  ;;  %v889_v28 = vpop.f32.mrb[41].mxu0 }
 0x173   : > { %v5510_v29 = vpop.f32.mrb[64].mxu1  ;;  %v890_v12 = vpop.f32.mrb[42].mxu0  ;;  %2449 = vmatpush1.bf16.msra.mxu0 %v4525_v31  ;;  %v6677_v31 = vld [vmem:[#allocation10_spill] sm:$0xff] }
 0x174   : > { %6673 = vst [vmem:[#allocation28_spill] sm:$0xff] %v5508_v18  ;;  %v5516_v25 = vadd.f32 %v5261_v2, %v890_v12  ;;  %v1402_v38 = vpop.f32.mrb[65].mxu1  ;;  %v892_v36 = vpop.f32.mrb[43].mxu0  ;;  %2450 = vmatprep.subr.bf16.mxu0 %v6655_v56 }
 0x175   : > { %v5519_v39 = vpop.f32.mrb[66].mxu1  ;;  %v6679_v36 = vld [vmem:[#allocation11_spill] sm:$0xff] }
 0x176   : > { %6674 = vst [vmem:[#allocation29_spill] sm:$0xff] %v5516_v25  ;;  %6675 = vst [vmem:[#allocation30_spill] sm:$0xff] %v5519_v39  ;;  %v1405_v57 = vpop.f32.mrb[67].mxu1  ;;  %4239 = vmatmul.mubr.msk.bf16.gmra.mrb[148].mxu0 %vm712_vm0, %v5321_v34 }
 0x177   : > { %4242 = vmatprep.mubr.msk.bf16.mxu0 %vm712_vm0, %v5326_v3  ;;  %2451 = vmatpush1.bf16.msra.mxu0 %v4526_v49  ;;  %v4528_v49 = vld [vmem:[%s6619_s1 + $0x240] sm:$0xff]  }
 0x178   : > { %2016 = vmatmul.mubr.bf16.gmra.mrb[172].mxu1 %v5112_v40  ;;  %2452 = vmatprep.subr.bf16.mxu0 %v6655_v56 }
 0x179   : > { %v895_v2 = vpop.f32.mrb[44].mxu0  ;;  %2023 = vmatprep.mubr.bf16.mxu1 %v6676_v6 }
 0x17a   : > { %v5532_v1 = vadd.f32 %v6677_v31, %v895_v2  ;;  %v897_v28 = vpop.f32.mrb[45].mxu0  ;;  %v6682_v31 = vld [vmem:[#allocation3_spill] sm:$0xff] }
 0x17b   : > { %v5534_v12 = vpop.f32.mrb[68].mxu1  ;;  %v898_v38 = vpop.f32.mrb[46].mxu0  ;;  %2453 = vmatpush1.bf16.msra.mxu0 %v4527_v33  ;;  %v4529_v33 = vld [vmem:[%s6619_s1 + $0x248] sm:$0xff]   ;;  %v6683_v28 = vld [vmem:[#allocation4_spill] sm:$0xff] }
 0x17c   : > { %6678 = vst [vmem:[#allocation2_spill] sm:$0xff] %v5532_v1  ;;  %v5540_v57 = vadd.f32 %v6679_v36, %v898_v38  ;;  %v1410_v40 = vpop.f32.mrb[69].mxu1  ;;  %v900_v51 = vpop.f32.mrb[47].mxu0  ;;  %2454 = vmatprep.subr.bf16.mxu0 %v6655_v56  ;;  %v6684_v38 = vld [vmem:[#allocation13_spill] sm:$0xff] }
 0x17d   : > { %v5543_v6 = vpop.f32.mrb[70].mxu1 }
 0x17e   : > { %6680 = vst [vmem:[#allocation10_spill] sm:$0xff] %v5540_v57  ;;  %6681 = vst [vmem:[#allocation11_spill] sm:$0xff] %v5543_v6  ;;  %v1413_v2 = vpop.f32.mrb[71].mxu1  ;;  %4243 = vmatmul.mubr.msk.bf16.gmra.mrb[152].mxu0 %vm712_vm0, %v5337_v62  ;;  %v4530_v57 = vld [vmem:[%s6619_s1 + $0x250] sm:$0xff]  }
 0x17f   : > { %4246 = vmatprep.mubr.msk.bf16.mxu0 %vm712_vm0, %v5342_v41  ;;  %2455 = vmatpush1.bf16.msra.mxu0 %v4528_v49 }
 0x180   : > { %2024 = vmatmul.mubr.bf16.gmra.mrb[176].mxu1 %v6682_v31  ;;  %2456 = vmatprep.subr.bf16.mxu0 %v6655_v56  ;;  %v6687_v31 = vld [vmem:[#allocation15_spill] sm:$0xff] }
 0x181   : > { %v903_v51 = vpop.f32.mrb[48].mxu0  ;;  %2031 = vmatprep.mubr.bf16.mxu1 %v6683_v28 }
 0x182   : > { %v5556_v36 = vadd.f32 %v6684_v38, %v903_v51  ;;  %v905_v40 = vpop.f32.mrb[49].mxu0  ;;  %v5570_v38 = vld [vmem:[%s4701_s29 + $0x170] ss:$12 sps:$4 sm:$0xff]  }
 0x183   : > { %v5558_v2 = vpop.f32.mrb[72].mxu1  ;;  %v906_v49 = vpop.f32.mrb[50].mxu0  ;;  %2457 = vmatpush1.bf16.msra.mxu0 %v4529_v33  ;;  %v5575_v33 = vld [vmem:[%s4701_s29 + $0x188] ss:$12 sps:$4 sm:$0xff]   ;;  %v4532_v40 = vld [vmem:[%s6619_s1 + $0x300] sm:$0xff]  }
 0x184   : > { %6685 = vst [vmem:[#allocation3_spill] sm:$0xff] %v5556_v36  ;;  %6686 = vst [vmem:[#allocation4_spill] sm:$0xff] %v5558_v2  ;;  %v5564_v1 = vadd.f32 %v6687_v31, %v906_v49  ;;  %v1418_v25 = vpop.f32.mrb[73].mxu1  ;;  %v908_v19 = vpop.f32.mrb[51].mxu0  ;;  %2458 = vmatprep.subr.bf16.mxu0 %v6655_v56  ;;  %v6691_v31 = vld [vmem:[#allocation6_spill] sm:$0xff] }
 0x185   : > { %v5567_v28 = vpop.f32.mrb[74].mxu1  ;;  %v4531_v19 = vld [vmem:[%s6619_s1 + $0x258] sm:$0xff]  }
 0x186   : > { %6688 = vst [vmem:[#allocation13_spill] sm:$0xff] %v5564_v1  ;;  %6689 = vst [vmem:[#allocation15_spill] sm:$0xff] %v5567_v28  ;;  %v1421_v51 = vpop.f32.mrb[75].mxu1  ;;  %4247 = vmatmul.mubr.msk.bf16.gmra.mrb[156].mxu0 %vm712_vm0, %v5570_v38  ;;  %v6690_v25 = vld [vmem:[#allocation5_spill] sm:$0xff] }
 0x187   : > { %4250 = vmatprep.mubr.msk.bf16.mxu0 %vm712_vm0, %v5575_v33  ;;  %2459 = vmatpush1.bf16.msra.mxu0 %v4530_v57  ;;  %v6692_v51 = vld [vmem:[#allocation12_spill] sm:$0xff] }
 0x188   : > { %2032 = vmatmul.mubr.bf16.gmra.mrb[180].mxu1 %v6690_v25  ;;  %2460 = vmatprep.subr.bf16.mxu0 %v6655_v56  ;;  %v6695_v25 = vld [vmem:[#allocation14_spill] sm:$0xff] }
 0x189   : > { %v911_v49 = vpop.f32.mrb[52].mxu0  ;;  %2039 = vmatprep.mubr.bf16.mxu1 %v6691_v31 }
 0x18a   : > { %v5589_v1 = vadd.f32 %v6692_v51, %v911_v49  ;;  %v913_v57 = vpop.f32.mrb[53].mxu0  ;;  %v5604_v49 = vld [vmem:[%s4701_s29 + $0x1b8] ss:$12 sps:$4 sm:$0xff]  }
 0x18b   : > { %v5591_v36 = vpop.f32.mrb[76].mxu1  ;;  %v914_v28 = vpop.f32.mrb[54].mxu0  ;;  %2461 = vmatpush1.bf16.msra.mxu0 %v4531_v19  ;;  %v6700_v19 = vld [vmem:[#allocation17_spill] sm:$0xff] }
 0x18c   : > { %6693 = vst [vmem:[#allocation5_spill] sm:$0xff] %v5589_v1  ;;  %6694 = vst [vmem:[#allocation6_spill] sm:$0xff] %v5591_v36  ;;  %v5594_v18 = vadd.f32 %v6695_v25, %v914_v28  ;;  %v1426_v2 = vpop.f32.mrb[77].mxu1  ;;  %v916_v42 = vpop.f32.mrb[55].mxu0  ;;  %4306 = vmatprep.subr.bf16.mxu0 %v4532_v40  ;;  %v6698_v28 = vld [vmem:[#allocation7_spill] sm:$0xff] }
 0x18d   : > { %v5596_v13 = vpop.f32.mrb[78].mxu1  ;;  %v6699_v42 = vld [vmem:[#allocation8_spill] sm:$0xff]  ;;  %v6702_v25 = vld [vmem:[#allocation19_spill] sm:$0xff] }
 0x18e   : > { %6696 = vst [vmem:[#allocation12_spill] sm:$0xff] %v5594_v18  ;;  %6697 = vst [vmem:[#allocation14_spill] sm:$0xff] %v5596_v13  ;;  %v1429_v39 = vpop.f32.mrb[79].mxu1  ;;  %4251 = vmatmul.mubr.msk.bf16.gmra.mrb[160].mxu0 %vm712_vm0, %v5599_v48 }
 0x18f   : > { %4254 = vmatprep.mubr.msk.bf16.mxu0 %vm712_vm0, %v5604_v49 }
 0x190   : > { %2040 = vmatmul.mubr.bf16.gmra.mrb[184].mxu1 %v6698_v28  ;;  %v5626_v28 = vld [vmem:[%s4701_s29 + $0x4] ss:$12 sps:$4 sm:$0xff]  }
 0x191   : > { %v919_v2 = vpop.f32.mrb[56].mxu0  ;;  %2045 = vmatprep.mubr.bf16.mxu1 %v6699_v42 }
 0x192   : > { %v5611_v31 = vadd.f32 %v6700_v19, %v919_v2  ;;  %v921_v39 = vpop.f32.mrb[57].mxu0  ;;  %v6705_v2 = vld [vmem:[#allocation9_spill] sm:$0xff] }
 0x193   : > { %v5613_v51 = vpop.f32.mrb[80].mxu1  ;;  %v922_v57 = vpop.f32.mrb[58].mxu0 }
 0x194   : > { %6701 = vst [vmem:[#allocation7_spill] sm:$0xff] %v5611_v31  ;;  %v5616_v18 = vadd.f32 %v6702_v25, %v922_v57  ;;  %v1434_v1 = vpop.f32.mrb[81].mxu1  ;;  %v924_v13 = vpop.f32.mrb[59].mxu0  ;;  %v6708_v57 = vld [vmem:[#allocation18_spill] sm:$0xff] }
 0x195   : > { %v5618_v36 = vpop.f32.mrb[82].mxu1  ;;  %v6706_v13 = vld [vmem:[#allocation16_spill] sm:$0xff] }
 0x196   : > { %6703 = vst [vmem:[#allocation8_spill] sm:$0xff] %v5616_v18  ;;  %6704 = vst [vmem:[#allocation17_spill] sm:$0xff] %v5618_v36  ;;  %v1437_v6 = vpop.f32.mrb[83].mxu1  ;;  %4255 = vmatmul.mubr.msk.bf16.gmra.mrb[164].mxu0 %vm712_vm0, %v5621_v22 }
 0x197   : > { %2462 = vmatprep.mubr.bf16.mxu0 %v5626_v28 }
 0x198   : > { %2046 = vmatmul.mubr.bf16.gmra.mrb[188].mxu1 %v6705_v2  ;;  %v4541_v2 = vld [vmem:[%s6619_s1 + $0x308] sm:$0xff]  }
 0x199   : > { %v927_v42 = vpop.f32.mrb[60].mxu0  ;;  %4266 = vmatprep.mubr.msk.bf16.mxu1 %vm712_vm0, %v5155_v60  ;;  %v4533_v60 = vld [vmem:[%s6619_s1 + $0x280] sm:$0xff]  }
 0x19a   : > { %v5633_v1 = vadd.f32 %v6706_v13, %v927_v42  ;;  %v929_v6 = vpop.f32.mrb[61].mxu0  ;;  %v5649_v13 = vld [vmem:[%s4701_s29] ss:$12 sps:$4 sm:$0xff]  }
 0x19b   : > { %v5635_v19 = vpop.f32.mrb[84].mxu1  ;;  %v930_v39 = vpop.f32.mrb[62].mxu0  ;;  %v5653_v6 = vld [vmem:[%s4701_s29 + $0x1c] ss:$12 sps:$4 sm:$0xff]  }
 0x19c   : > { %6707 = vst [vmem:[#allocation19_spill] sm:$0xff] %v5633_v1  ;;  %v5638_v25 = vadd.f32 %v6708_v57, %v930_v39  ;;  %v1442_v18 = vpop.f32.mrb[85].mxu1  ;;  %v932_v31 = vpop.f32.mrb[63].mxu0  ;;  %v4534_v39 = vld [vmem:[%s6619_s1 + $0x288] sm:$0xff]   ;;  %v5678_v1 = vld [vmem:[%s4701_s29 + $0x18] ss:$12 sps:$4 sm:$0xff]  }
 0x19d   : > { %v5643_v36 = vpop.f32.mrb[86].mxu1  ;;  %v4550_v18 = vld [vmem:[%s6619_s1 + $0x310] sm:$0xff]  }
 0x19e   : > { %6709 = vst [vmem:[#allocation9_spill] sm:$0xff] %v5638_v25  ;;  %v1445_v42 = vpop.f32.mrb[87].mxu1  ;;  %2463 = vmatmul.mubr.bf16.vlgmr.msra.gmra.mrb[168].mxu0 %v5649_v13 }
 0x19f   : > { %4307 = vmatpush3.bf16.msra.mxu0 %v4532_v40  ;;  %2468 = vmatprep.mubr.bf16.mxu0 %v5653_v6 }
 0x1a0   : > { %4267 = vmatmul.mubr.msk.bf16.vlgmr.msra.gmra.mrb[192].mxu1 %vm712_vm0, %v5163_v61  ;;  %4308 = vmatprep.subr.bf16.mxu0 %v4541_v2 }
 0x1a1   : > { %2994 = vmatpush1.bf16.msra.mxu1 %v4533_v60  ;;  %v935_v31 = vpop.f32.mrb[64].mxu0  ;;  %4270 = vmatprep.mubr.msk.bf16.mxu1 %vm712_vm0, %v5166_v0  ;;  %v4551_v60 = vld [vmem:[%s6619_s1 + $0x318] sm:$0xff]   ;;  %v4535_v0 = vld [vmem:[%s6619_s1 + $0x290] sm:$0xff]  }
 0x1a2   : > { %v936_v40 = vpop.f32.mrb[65].mxu0  ;;  %2995 = vmatprep.subr.bf16.mxu1 %v6655_v56 }
 0x1a3   : > { %v5667_v61 = vpop.f32.mrb[88].mxu1  ;;  %v937_v57 = vpop.f32.mrb[66].mxu0  ;;  %4309 = vmatpush3.bf16.msra.mxu0 %v4541_v2 }
 0x1a4   : > { %6710 = vst [vmem:[#allocation16_spill] sm:$0xff] %v5667_v61  ;;  %v1450_v42 = vpop.f32.mrb[89].mxu1  ;;  %v938_v25 = vpop.f32.mrb[67].mxu0  ;;  %4310 = vmatprep.subr.bf16.mxu0 %v4550_v18 }
 0x1a5   : > { %v5672_v31 = vpop.f32.mrb[90].mxu1  ;;  %2996 = vmatpush1.bf16.msra.mxu1 %v4534_v39  ;;  %v5683_v25 = vld [vmem:[%s4701_s29 + $0x34] ss:$12 sps:$4 sm:$0xff]   ;;  %v4536_v39 = vld [vmem:[%s6619_s1 + $0x298] sm:$0xff]  }
 0x1a6   : > { %6711 = vst [vmem:[#allocation18_spill] sm:$0xff] %v5672_v31  ;;  %v1453_v40 = vpop.f32.mrb[91].mxu1  ;;  %2469 = vmatmul.mubr.bf16.gmra.mrb[172].mxu0 %v5678_v1  ;;  %2997 = vmatprep.subr.bf16.mxu1 %v6655_v56 }
 0x1a7   : > { %2474 = vmatprep.mubr.bf16.mxu0 %v5683_v25  ;;  %4311 = vmatpush3.bf16.msra.mxu0 %v4550_v18 }
 0x1a8   : > { %4271 = vmatmul.mubr.msk.bf16.gmra.mrb[196].mxu1 %vm712_vm0, %v5182_v9  ;;  %4312 = vmatprep.subr.bf16.mxu0 %v4551_v60 }
 0x1a9   : > { %v941_v2 = vpop.f32.mrb[68].mxu0  ;;  %2998 = vmatpush1.bf16.msra.mxu1 %v4535_v0  ;;  %4274 = vmatprep.mubr.msk.bf16.mxu1 %vm712_vm0, %v5248_v23  ;;  %v4537_v23 = vld [vmem:[%s6619_s1 + $0x2a0] sm:$0xff]  }
 0x1aa   : > { %v942_v57 = vpop.f32.mrb[69].mxu0  ;;  %2999 = vmatprep.subr.bf16.mxu1 %v6655_v56  ;;  %v5702_v2 = vld [vmem:[%s4701_s29 + $0x30] ss:$12 sps:$4 sm:$0xff]  }
 0x1ab   : > { %v5694_v42 = vpop.f32.mrb[92].mxu1  ;;  %v943_v18 = vpop.f32.mrb[70].mxu0  ;;  %4313 = vmatpush3.bf16.msra.mxu0 %v4551_v60  ;;  %v5707_v57 = vld [vmem:[%s4701_s29 + $0x4c] ss:$12 sps:$4 sm:$0xff]  }
 0x1ac   : > { %6712 = vst [vmem:[#allocation31_spill] sm:$0xff] %v5694_v42  ;;  %v1458_v9 = vpop.f32.mrb[93].mxu1  ;;  %v944_v40 = vpop.f32.mrb[71].mxu0 }
 0x1ad   : > { %v5696_v31 = vpop.f32.mrb[94].mxu1  ;;  %3000 = vmatpush1.bf16.msra.mxu1 %v4536_v39  ;;  %v4538_v39 = vld [vmem:[%s6619_s1 + $0x2a8] sm:$0xff]  }
 0x1ae   : > { %6713 = vst [vmem:[#allocation32_spill] sm:$0xff] %v5696_v31  ;;  %v1461_v0 = vpop.f32.mrb[95].mxu1  ;;  %2475 = vmatmul.mubr.bf16.gmra.mrb[176].mxu0 %v5702_v2  ;;  %3001 = vmatprep.subr.bf16.mxu1 %v6655_v56 }
 0x1af   : > { %2480 = vmatprep.mubr.bf16.mxu0 %v5707_v57 }
 0x1b0   : > { %4275 = vmatmul.mubr.msk.bf16.gmra.mrb[200].mxu1 %vm712_vm0, %v5264_v53  ;;  %v4539_v53 = vld [vmem:[%s6619_s1 + $0x2b0] sm:$0xff]  }
 0x1b1   : > { %v947_v60 = vpop.f32.mrb[72].mxu0  ;;  %3002 = vmatpush1.bf16.msra.mxu1 %v4537_v23  ;;  %4278 = vmatprep.mubr.msk.bf16.mxu1 %vm712_vm0, %v5270_v54  ;;  %v5726_v23 = vld [vmem:[%s4701_s29 + $0x48] ss:$12 sps:$4 sm:$0xff]  }
 0x1b2   : > { %v948_v18 = vpop.f32.mrb[73].mxu0  ;;  %3003 = vmatprep.subr.bf16.mxu1 %v6655_v56  ;;  %v5731_v60 = vld [vmem:[%s4701_s29 + $0x64] ss:$12 sps:$4 sm:$0xff]  }
 0x1b3   : > { %v5718_v9 = vpop.f32.mrb[96].mxu1  ;;  %v949_v40 = vpop.f32.mrb[74].mxu0  ;;  %6716 = vst [vmem:[#allocation35_spill] sm:$0xff] %v5731_v60 }
 0x1b4   : > { %6714 = vst [vmem:[#allocation33_spill] sm:$0xff] %v5718_v9  ;;  %v1466_v0 = vpop.f32.mrb[97].mxu1  ;;  %v950_v31 = vpop.f32.mrb[75].mxu0 }
 0x1b5   : > { %v5720_v61 = vpop.f32.mrb[98].mxu1  ;;  %3004 = vmatpush1.bf16.msra.mxu1 %v4538_v39  ;;  %v4540_v39 = vld [vmem:[%s6619_s1 + $0x2b8] sm:$0xff]  }
 0x1b6   : > { %6715 = vst [vmem:[#allocation34_spill] sm:$0xff] %v5720_v61  ;;  %v1469_v54 = vpop.f32.mrb[99].mxu1  ;;  %2481 = vmatmul.mubr.bf16.gmra.mrb[180].mxu0 %v5726_v23  ;;  %3005 = vmatprep.subr.bf16.mxu1 %v6655_v56 }
 0x1b7   : > { %2488 = vmatprep.mubr.bf16.mxu0 %v5731_v60  ;;  %v5774_v60 = vld [vmem:[%s4701_s29 + $0x78] ss:$12 sps:$4 sm:$0xff]  }
 0x1b8   : > { %4279 = vmatmul.mubr.msk.bf16.gmra.mrb[204].mxu1 %vm712_vm0, %v5285_v46  ;;  %v4542_v46 = vld [vmem:[%s6619_s1 + $0x2c0] sm:$0xff]  }
 0x1b9   : > { %v953_v31 = vpop.f32.mrb[76].mxu0  ;;  %4282 = vmatprep.mubr.msk.bf16.mxu1 %vm712_vm0, %v5290_v45  ;;  %3006 = vmatpush1.bf16.msra.mxu1 %v4539_v53  ;;  %v5751_v53 = vld [vmem:[%s4701_s29 + $0x7c] ss:$12 sps:$4 sm:$0xff]  }
 0x1ba   : > { %v954_v18 = vpop.f32.mrb[77].mxu0  ;;  %3007 = vmatprep.subr.bf16.mxu1 %v6655_v56  ;;  %v5746_v31 = vld [vmem:[%s4701_s29 + $0x60] ss:$12 sps:$4 sm:$0xff]   ;;  %6718 = vst [vmem:[#allocation37_spill] sm:$0xff] %v5751_v53 }
 0x1bb   : > { %v1472_v40 = vpop.f32.mrb[100].mxu1  ;;  %v955_v0 = vpop.f32.mrb[78].mxu0  ;;  %6717 = vst [vmem:[#allocation36_spill] sm:$0xff] %v5746_v31 }
 0x1bc   : > { %v1473_v54 = vpop.f32.mrb[101].mxu1  ;;  %v956_v61 = vpop.f32.mrb[79].mxu0  ;;  %v6719_v40 = vld [vmem:[#allocation20_spill] sm:$0xff] }
 0x1bd   : > { %v1474_v9 = vpop.f32.mrb[102].mxu1  ;;  %3008 = vmatpush1.bf16.msra.mxu1 %v4540_v39 }
 0x1be   : > { %v1475_v45 = vpop.f32.mrb[103].mxu1  ;;  %2489 = vmatmul.mubr.bf16.gmra.mrb[184].mxu0 %v5746_v31  ;;  %3009 = vmatprep.subr.bf16.mxu1 %v6655_v56  ;;  %v4543_v9 = vld [vmem:[%s6619_s1 + $0x2c8] sm:$0xff]  }
 0x1bf   : > { %2496 = vmatprep.mubr.bf16.mxu0 %v5751_v53  ;;  %v6720_v53 = vld [vmem:[#allocation21_spill] sm:$0xff] }
 0x1c0   : > { %4283 = vmatmul.mubr.msk.bf16.gmra.mrb[208].mxu1 %vm712_vm0, %v5305_v50 }
 0x1c1   : > { %v4124_v61 = vpop.f32.mrb[80].mxu0  ;;  %4286 = vmatprep.mubr.msk.bf16.mxu1 %vm712_vm0, %v5310_v47  ;;  %3010 = vmatpush1.bf16.msra.mxu1 %v4542_v46 }
 0x1c2   : > { %v5762_v39 = vadd.f32 %v4124_v61, %v5331_v4  ;;  %v992_v18 = vpop.f32.mrb[81].mxu0  ;;  %3011 = vmatprep.subr.bf16.mxu1 %v6655_v56  ;;  %v4544_v4 = vld [vmem:[%s6619_s1 + $0x2d0] sm:$0xff]  }
 0x1c3   : > { %v993_v0 = vadd.f32 %v992_v18, %v6719_v40  ;;  %v1478_v50 = vpop.f32.mrb[104].mxu1  ;;  %v4125_v54 = vpop.f32.mrb[82].mxu0  ;;  %v5779_v18 = vld [vmem:[%s4701_s29 + $0x94] ss:$12 sps:$4 sm:$0xff]  }
 0x1c4   : > { %v5767_v45 = vadd.f32 %v4125_v54, %v5334_v52  ;;  %v1479_v47 = vpop.f32.mrb[105].mxu1  ;;  %v995_v46 = vpop.f32.mrb[83].mxu0 }
 0x1c5   : > { %v996_v31 = vadd.f32 %v995_v46, %v6720_v53  ;;  %v1480_v42 = vpop.f32.mrb[106].mxu1  ;;  %3012 = vmatpush1.bf16.msra.mxu1 %v4543_v9 }
 0x1c6   : > { %v1481_v61 = vpop.f32.mrb[107].mxu1  ;;  %2497 = vmatmul.mubr.bf16.gmra.mrb[188].mxu0 %v5774_v60  ;;  %3013 = vmatprep.subr.bf16.mxu1 %v6655_v56  ;;  %v4545_v42 = vld [vmem:[%s6619_s1 + $0x2d8] sm:$0xff]  }
 0x1c7   : > { %2504 = vmatprep.mubr.bf16.mxu0 %v5779_v18 }
 0x1c8   : > { %4287 = vmatmul.mubr.msk.bf16.gmra.mrb[212].mxu1 %vm712_vm0, %v5321_v34 }
 0x1c9   : > { %v4128_v52 = vpop.f32.mrb[84].mxu0  ;;  %4290 = vmatprep.mubr.msk.bf16.mxu1 %vm712_vm0, %v5326_v3  ;;  %3014 = vmatpush1.bf16.msra.mxu1 %v4544_v4 }
 0x1ca   : > { %v5790_v53 = vadd.f32 %v4128_v52, %v5357_v11  ;;  %v1008_v9 = vpop.f32.mrb[85].mxu0  ;;  %3015 = vmatprep.subr.bf16.mxu1 %v6655_v56  ;;  %v4546_v11 = vld [vmem:[%s6619_s1 + $0x2e0] sm:$0xff]   ;;  %v5802_v52 = vld [vmem:[%s4701_s29 + $0x90] ss:$12 sps:$4 sm:$0xff]  }
 0x1cb   : > { %v1009_v40 = vadd.f32 %v1008_v9, %v5347_v7  ;;  %v1484_v34 = vpop.f32.mrb[108].mxu1  ;;  %v4129_v50 = vpop.f32.mrb[86].mxu0  ;;  %v5807_v7 = vld [vmem:[%s4701_s29 + $0xac] ss:$12 sps:$4 sm:$0xff]  }
 0x1cc   : > { %v5795_v54 = vadd.f32 %v4129_v50, %v5362_v43  ;;  %v1485_v3 = vpop.f32.mrb[109].mxu1  ;;  %v1011_v47 = vpop.f32.mrb[87].mxu0  ;;  %v4547_v43 = vld [vmem:[%s6619_s1 + $0x2e8] sm:$0xff]  }
 0x1cd   : > { %v1012_v46 = vadd.f32 %v1011_v47, %v5350_v5  ;;  %v1486_v4 = vpop.f32.mrb[110].mxu1  ;;  %3016 = vmatpush1.bf16.msra.mxu1 %v4545_v42 }
 0x1ce   : > { %v1487_v61 = vpop.f32.mrb[111].mxu1  ;;  %2505 = vmatmul.mubr.bf16.gmra.mrb[192].mxu0 %v5802_v52  ;;  %3017 = vmatprep.subr.bf16.mxu1 %v6655_v56 }
 0x1cf   : > { %2512 = vmatprep.mubr.bf16.mxu0 %v5807_v7 }
 0x1d0   : > { %4291 = vmatmul.mubr.msk.bf16.gmra.mrb[216].mxu1 %vm712_vm0, %v5337_v62 }
 0x1d1   : > { %v4172_v5 = vpop.f32.mrb[88].mxu0  ;;  %4294 = vmatprep.mubr.msk.bf16.mxu1 %vm712_vm0, %v5342_v41  ;;  %3018 = vmatpush1.bf16.msra.mxu1 %v4546_v11  ;;  %v4548_v11 = vld [vmem:[%s6619_s1 + $0x2f0] sm:$0xff]  }
 0x1d2   : > { %v1530_v42 = vadd.f32 %v4172_v5, %v5360_v8  ;;  %v1523_v9 = vpop.f32.mrb[89].mxu0  ;;  %3019 = vmatprep.subr.bf16.mxu1 %v6655_v56  ;;  %v5828_v5 = vld [vmem:[%s4701_s29 + $0xa8] ss:$12 sps:$4 sm:$0xff]  }
 0x1d3   : > { %v1901_v34 = vpop.f32.mrb[112].mxu1  ;;  %v4173_v50 = vpop.f32.mrb[90].mxu0 }
 0x1d4   : > { %v5819_v3 = vadd.f32 %v1530_v42, %v993_v0  ;;  %v1533_v62 = vadd.f32 %v4173_v50, %v5364_v59  ;;  %v1902_v47 = vpop.f32.mrb[113].mxu1  ;;  %v1525_v41 = vpop.f32.mrb[91].mxu0  ;;  %v5833_v0 = vld [vmem:[%s4701_s29 + $0xc4] ss:$12 sps:$4 sm:$0xff]  }
 0x1d5   : > { %v1903_v4 = vpop.f32.mrb[114].mxu1  ;;  %3020 = vmatpush1.bf16.msra.mxu1 %v4547_v43 }
 0x1d6   : > { %v5825_v61 = vadd.f32 %v1533_v62, %v996_v31  ;;  %v1904_v8 = vpop.f32.mrb[115].mxu1  ;;  %2513 = vmatmul.mubr.bf16.gmra.mrb[196].mxu0 %v5828_v5  ;;  %3021 = vmatprep.subr.bf16.mxu1 %v6655_v56  ;;  %v4549_v31 = vld [vmem:[%s6619_s1 + $0x2f8] sm:$0xff]  }
 0x1d7   : > { %2520 = vmatprep.mubr.bf16.mxu0 %v5833_v0 }
 0x1d8   : > { %4295 = vmatmul.mubr.msk.bf16.gmra.mrb[220].mxu1 %vm712_vm0, %v5570_v38 }
 0x1d9   : > { %v4176_v59 = vpop.f32.mrb[92].mxu0  ;;  %4298 = vmatprep.mubr.msk.bf16.mxu1 %vm712_vm0, %v5575_v33  ;;  %3022 = vmatpush1.bf16.msra.mxu1 %v4548_v11 }
 0x1da   : > { %v1546_v43 = vadd.f32 %v4176_v59, %v5391_v16  ;;  %v1537_v42 = vpop.f32.mrb[93].mxu0  ;;  %3023 = vmatprep.subr.bf16.mxu1 %v6655_v56 }
 0x1db   : > { %v1538_v9 = vadd.f32 %v1537_v42, %v5375_v17  ;;  %v1907_v34 = vpop.f32.mrb[116].mxu1  ;;  %v4177_v38 = vpop.f32.mrb[94].mxu0  ;;  %v5856_v17 = vld [vmem:[%s4701_s29 + $0xc0] ss:$12 sps:$4 sm:$0xff]  }
 0x1dc   : > { %v5846_v50 = vadd.f32 %v1546_v43, %v1009_v40  ;;  %v1549_v33 = vadd.f32 %v4177_v38, %v5399_v24  ;;  %v1908_v62 = vpop.f32.mrb[117].mxu1  ;;  %v1540_v47 = vpop.f32.mrb[95].mxu0  ;;  %v5863_v24 = vld [vmem:[%s4701_s29 + $0xdc] ss:$12 sps:$4 sm:$0xff]   ;;  %v5888_v38 = vld [vmem:[%s4701_s29 + $0xd8] ss:$12 sps:$4 sm:$0xff]  }
 0x1dd   : > { %v5850_v41 = vadd.f32 %v1538_v9, %v5762_v39  ;;  %v1541_v16 = vadd.f32 %v1540_v47, %v5380_v63  ;;  %v1909_v4 = vpop.f32.mrb[118].mxu1  ;;  %3024 = vmatpush1.bf16.msra.mxu1 %v4549_v31 }
 0x1de   : > { %v5853_v11 = vadd.f32 %v1549_v33, %v1012_v46  ;;  %v1910_v56 = vpop.f32.mrb[119].mxu1  ;;  %2521 = vmatmul.mubr.bf16.gmra.mrb[200].mxu0 %v5856_v17 }
 0x1df   : > { %v5860_v40 = vadd.f32 %v1541_v16, %v5767_v45  ;;  %2528 = vmatprep.mubr.bf16.mxu0 %v5863_v24 }
 0x1e0   : > { %4299 = vmatmul.mubr.msk.bf16.gmra.mrb[224].mxu1 %vm712_vm0, %v5599_v48 }
 0x1e1   : > { %v4180_v63 = vpop.f32.mrb[96].mxu0  ;;  %4302 = vmatprep.mubr.msk.bf16.mxu1 %vm712_vm0, %v5604_v49 }
 0x1e2   : > { %v1562_v39 = vadd.f32 %v4180_v63, %v5438_v10  ;;  %v1553_v46 = vpop.f32.mrb[97].mxu0 }
 0x1e3   : > { %v1554_v8 = vadd.f32 %v1553_v46, %v5414_v20  ;;  %v5872_v45 = vpop.f32.mrb[120].mxu1  ;;  %v4181_v59 = vpop.f32.mrb[98].mxu0 }
 0x1e4   : > { %v5875_v31 = vadd.f32 %v1562_v39, %v5373_v44  ;;  %v1565_v43 = vadd.f32 %v4181_v59, %v5447_v32  ;;  %v1915_v48 = vpop.f32.mrb[121].mxu1  ;;  %v1556_v42 = vpop.f32.mrb[99].mxu0  ;;  %v5895_v32 = vld [vmem:[%s4701_s29 + $0xf4] ss:$12 sps:$4 sm:$0xff]   ;;  %v5919_v39 = vld [vmem:[%s4701_s29 + $0xf0] ss:$12 sps:$4 sm:$0xff]  }
 0x1e5   : > { %v5879_v9 = vadd.f32 %v1554_v8, %v5790_v53  ;;  %v1557_v49 = vadd.f32 %v1556_v42, %v5423_v30  ;;  %v5882_v10 = vpop.f32.mrb[122].mxu1  ;;  %v6721_v59 = vld [vmem:[#allocation24_spill] sm:$0xff]  ;;  %v6722_v48 = vld [vmem:[#allocation11_spill] sm:$0xff] }
 0x1e6   : > { %v5885_v34 = vadd.f32 %v1565_v43, %v5378_v58  ;;  %v1918_v20 = vpop.f32.mrb[123].mxu1  ;;  %2529 = vmatmul.mubr.bf16.gmra.mrb[204].mxu0 %v5888_v38 }
 0x1e7   : > { %v5892_v44 = vadd.f32 %v1557_v49, %v5795_v54  ;;  %2536 = vmatprep.mubr.bf16.mxu0 %v5895_v32  ;;  %v6723_v20 = vld [vmem:[#allocation22_spill] sm:$0xff] }
 0x1e8   : > { %4303 = vmatmul.mubr.msk.bf16.gmra.mrb[228].mxu1 %vm712_vm0, %v5621_v22 }
 0x1e9   : > { %v4184_v30 = vpop.f32.mrb[100].mxu0  ;;  %3025 = vmatprep.mubr.bf16.mxu1 %v5626_v28 }
 0x1ea   : > { %v1578_v58 = vadd.f32 %v4184_v30, %v5486_v26  ;;  %v1569_v53 = vpop.f32.mrb[101].mxu0 }
 0x1eb   : > { %v1570_v33 = vadd.f32 %v1569_v53, %v5462_v27  ;;  %v5903_v62 = vpop.f32.mrb[124].mxu1  ;;  %v4185_v54 = vpop.f32.mrb[102].mxu0  ;;  %v6725_v53 = vld [vmem:[#allocation25_spill] sm:$0xff] }
 0x1ec   : > { %v5906_v47 = vadd.f32 %v1578_v58, %v5412_v14  ;;  %v1581_v16 = vadd.f32 %v4185_v54, %v5495_v37  ;;  %v1923_v4 = vpop.f32.mrb[125].mxu1  ;;  %v1572_v22 = vpop.f32.mrb[103].mxu0  ;;  %v5926_v37 = vld [vmem:[%s4701_s29 + $0x10c] ss:$12 sps:$4 sm:$0xff]   ;;  %v5949_v54 = vld [vmem:[%s4701_s29 + $0x108] ss:$12 sps:$4 sm:$0xff]  }
 0x1ed   : > { %v5910_v56 = vadd.f32 %v1570_v33, %v5389_v21  ;;  %v1573_v28 = vadd.f32 %v1572_v22, %v5471_v35  ;;  %v5913_v26 = vpop.f32.mrb[126].mxu1  ;;  %v5956_v22 = vld [vmem:[%s4701_s29 + $0x124] ss:$12 sps:$4 sm:$0xff]  }
 0x1ee   : > { %v5916_v63 = vadd.f32 %v1581_v16, %v5420_v15  ;;  %v1926_v27 = vpop.f32.mrb[127].mxu1  ;;  %2537 = vmatmul.mubr.bf16.gmra.mrb[208].mxu0 %v5919_v39  ;;  %v6726_v16 = vld [vmem:[#allocation23_spill] sm:$0xff] }
 0x1ef   : > { %v5923_v14 = vadd.f32 %v1573_v28, %v5397_v55  ;;  %2544 = vmatprep.mubr.bf16.mxu0 %v5926_v37  ;;  %v6727_v27 = vld [vmem:[#allocation6_spill] sm:$0xff] }
 0x1f0   : > { %3026 = vmatmul.mubr.bf16.vlgmr.msra.gmra.mrb[232].mxu1 %v5649_v13 }
 0x1f1   : > { %v4188_v21 = vpop.f32.mrb[104].mxu0  ;;  %3031 = vmatprep.mubr.bf16.mxu1 %v5653_v6  ;;  %v6724_v6 = vld [vmem:[#allocation30_spill] sm:$0xff] }
 0x1f2   : > { %v1594_v15 = vadd.f32 %v4188_v21, %v5534_v12  ;;  %v1585_v35 = vpop.f32.mrb[105].mxu0 }
 0x1f3   : > { %v1586_v46 = vadd.f32 %v1585_v35, %v5510_v29  ;;  %v5933_v8 = vpop.f32.mrb[128].mxu1  ;;  %v4189_v55 = vpop.f32.mrb[106].mxu0  ;;  %v6728_v35 = vld [vmem:[#allocation4_spill] sm:$0xff] }
 0x1f4   : > { %v5936_v43 = vadd.f32 %v1594_v15, %v6721_v59  ;;  %v1597_v42 = vadd.f32 %v4189_v55, %v6722_v48  ;;  %v1931_v49 = vpop.f32.mrb[129].mxu1  ;;  %v1588_v13 = vpop.f32.mrb[107].mxu0  ;;  %v6729_v48 = vld [vmem:[#allocation28_spill] sm:$0xff] }
 0x1f5   : > { %v5940_v30 = vadd.f32 %v1586_v46, %v6723_v20  ;;  %v1589_v58 = vadd.f32 %v1588_v13, %v6724_v6  ;;  %v5943_v12 = vpop.f32.mrb[130].mxu1  ;;  %v6731_v49 = vld [vmem:[#allocation14_spill] sm:$0xff] }
 0x1f6   : > { %v5946_v33 = vadd.f32 %v1597_v42, %v6725_v53  ;;  %v1934_v29 = vpop.f32.mrb[131].mxu1  ;;  %2545 = vmatmul.mubr.bf16.gmra.mrb[212].mxu0 %v5949_v54  ;;  %v6732_v6 = vld [vmem:[#allocation26_spill] sm:$0xff] }
 0x1f7   : > { %v5953_v4 = vadd.f32 %v1589_v58, %v6726_v16  ;;  %2552 = vmatprep.mubr.bf16.mxu0 %v5956_v22  ;;  %v6734_v16 = vld [vmem:[#allocation29_spill] sm:$0xff] }
 0x1f8   : > { %3032 = vmatmul.mubr.bf16.gmra.mrb[236].mxu1 %v5678_v1 }
 0x1f9   : > { %v4192_v28 = vpop.f32.mrb[108].mxu0  ;;  %3037 = vmatprep.mubr.bf16.mxu1 %v5683_v25  ;;  %v6733_v25 = vld [vmem:[#allocation15_spill] sm:$0xff] }
 0x1fa   : > { %v1610_v21 = vadd.f32 %v4192_v28, %v6727_v27  ;;  %v1601_v15 = vpop.f32.mrb[109].mxu0 }
 0x1fb   : > { %v1602_v46 = vadd.f32 %v1601_v15, %v6728_v35  ;;  %v5963_v55 = vpop.f32.mrb[132].mxu1  ;;  %v4193_v59 = vpop.f32.mrb[110].mxu0  ;;  %v5979_v15 = vld [vmem:[%s4701_s29 + $0x120] ss:$12 sps:$4 sm:$0xff]  }
 0x1fc   : > { %v5966_v42 = vadd.f32 %v1610_v21, %v6729_v48  ;;  %v1613_v13 = vadd.f32 %v4193_v59, %v6731_v49  ;;  %v1939_v20 = vpop.f32.mrb[133].mxu1  ;;  %v1604_v1 = vpop.f32.mrb[111].mxu0  ;;  %v6736_v21 = vld [vmem:[#allocation27_spill] sm:$0xff] }
 0x1fd   : > { %v5970_v58 = vadd.f32 %v1602_v46, %v6732_v6  ;;  %v1605_v53 = vadd.f32 %v1604_v1, %v6733_v25  ;;  %v5973_v29 = vpop.f32.mrb[134].mxu1  ;;  %v5986_v59 = vld [vmem:[%s4701_s29 + $0x13c] ss:$12 sps:$4 sm:$0xff]  }
 0x1fe   : > { %6730 = vst [vmem:[#allocation20_spill] sm:$0xff] %v5966_v42  ;;  %v5976_v28 = vadd.f32 %v1613_v13, %v6734_v16  ;;  %v1942_v27 = vpop.f32.mrb[135].mxu1  ;;  %2553 = vmatmul.mubr.bf16.gmra.mrb[216].mxu0 %v5979_v15  ;;  %6737 = vst [vmem:[#allocation24_spill] sm:$0xff] %v5986_v59  ;;  %v6738_v6 = vld [vmem:[#allocation3_spill] sm:$0xff] }
 0x1ff   : > { %v5983_v35 = vadd.f32 %v1605_v53, %v6736_v21  ;;  %2560 = vmatprep.mubr.bf16.mxu0 %v5986_v59  ;;  %v6740_v27 = vld [vmem:[#allocation2_spill] sm:$0xff] }
 0x200   : > { %6735 = vst [vmem:[#allocation21_spill] sm:$0xff] %v5976_v28  ;;  %3038 = vmatmul.mubr.bf16.gmra.mrb[240].mxu1 %v5702_v2 }
 0x201   : > { %v4196_v46 = vpop.f32.mrb[112].mxu0  ;;  %3043 = vmatprep.mubr.bf16.mxu1 %v5707_v57  ;;  %v6742_v57 = vld [vmem:[#allocation17_spill] sm:$0xff] }
 0x202   : > { %v1626_v48 = vadd.f32 %v4196_v46, %v5635_v19  ;;  %v1617_v49 = vpop.f32.mrb[113].mxu0  ;;  %v6743_v46 = vld [vmem:[#allocation13_spill] sm:$0xff] }
 0x203   : > { %v1618_v13 = vadd.f32 %v1617_v49, %v5613_v51  ;;  %v5993_v20 = vpop.f32.mrb[136].mxu1  ;;  %v4197_v1 = vpop.f32.mrb[114].mxu0  ;;  %v6009_v49 = vld [vmem:[%s4701_s29 + $0x138] ss:$12 sps:$4 sm:$0xff]  }
 0x204   : > { %v5996_v25 = vadd.f32 %v1626_v48, %v6738_v6  ;;  %v1629_v53 = vadd.f32 %v4197_v1, %v5643_v36  ;;  %v1947_v16 = vpop.f32.mrb[137].mxu1  ;;  %v1620_v2 = vpop.f32.mrb[115].mxu0  ;;  %6745 = vst [vmem:[#allocation25_spill] sm:$0xff] %v6009_v49  ;;  %v6746_v48 = vld [vmem:[#allocation10_spill] sm:$0xff]  ;;  %v6749_v1 = vld [vmem:[#allocation35_spill] sm:$0xff] }
 0x205   : > { %v6000_v21 = vadd.f32 %v1618_v13, %v6740_v27  ;;  %v1621_v28 = vadd.f32 %v1620_v2, %v6742_v57  ;;  %v6003_v19 = vpop.f32.mrb[138].mxu1  ;;  %v6016_v36 = vld [vmem:[%s4701_s29 + $0x154] ss:$12 sps:$4 sm:$0xff]  }
 0x206   : > { %6739 = vst [vmem:[#allocation11_spill] sm:$0xff] %v5996_v25  ;;  %v6006_v42 = vadd.f32 %v1629_v53, %v6743_v46  ;;  %v1950_v51 = vpop.f32.mrb[139].mxu1  ;;  %2561 = vmatmul.mubr.bf16.gmra.mrb[220].mxu0 %v6009_v49  ;;  %6748 = vst [vmem:[#allocation6_spill] sm:$0xff] %v6016_v36  ;;  %v6750_v53 = vld [vmem:[#allocation31_spill] sm:$0xff]  ;;  %v6751_v27 = vld [vmem:[#allocation16_spill] sm:$0xff] }
 0x207   : > { %6741 = vst [vmem:[#allocation22_spill] sm:$0xff] %v6000_v21  ;;  %v6013_v6 = vadd.f32 %v1621_v28, %v6746_v48  ;;  %2568 = vmatprep.mubr.bf16.mxu0 %v6016_v36  ;;  %v6752_v51 = vld [vmem:[#allocation7_spill] sm:$0xff]  ;;  %v6755_v49 = vld [vmem:[#allocation5_spill] sm:$0xff] }
 0x208   : > { %6744 = vst [vmem:[#allocation30_spill] sm:$0xff] %v6006_v42  ;;  %3044 = vmatmul.mubr.bf16.gmra.mrb[244].mxu1 %v5726_v23  ;;  %v6754_v42 = vld [vmem:[#allocation32_spill] sm:$0xff] }
 0x209   : > { %6747 = vst [vmem:[#allocation23_spill] sm:$0xff] %v6013_v6  ;;  %v4200_v13 = vpop.f32.mrb[116].mxu0  ;;  %3049 = vmatprep.mubr.bf16.mxu1 %v6749_v1  ;;  %v6756_v1 = vld [vmem:[#allocation18_spill] sm:$0xff] }
 0x20a   : > { %v1642_v16 = vadd.f32 %v4200_v13, %v6750_v53  ;;  %v1633_v2 = vpop.f32.mrb[117].mxu0  ;;  %v6757_v53 = vld [vmem:[#allocation8_spill] sm:$0xff] }
 0x20b   : > { %v1634_v57 = vadd.f32 %v1633_v2, %v6751_v27  ;;  %v6023_v46 = vpop.f32.mrb[140].mxu1  ;;  %v4201_v28 = vpop.f32.mrb[118].mxu0  ;;  %v6039_v27 = vld [vmem:[%s4701_s29 + $0x150] ss:$12 sps:$4 sm:$0xff]  }
 0x20c   : > { %v6026_v48 = vadd.f32 %v1642_v16, %v6752_v51  ;;  %v1645_v25 = vadd.f32 %v4201_v28, %v6754_v42  ;;  %v1955_v36 = vpop.f32.mrb[141].mxu1  ;;  %v1636_v23 = vpop.f32.mrb[119].mxu0  ;;  %6759 = vst [vmem:[#allocation14_spill] sm:$0xff] %v6039_v27  ;;  %v6760_v16 = vld [vmem:[#allocation12_spill] sm:$0xff]  ;;  %v6046_v42 = vld [vmem:[%s4701_s29 + $0x16c] ss:$12 sps:$4 sm:$0xff]  }
 0x20d   : > { %v6030_v6 = vadd.f32 %v1634_v57, %v6755_v49  ;;  %v1637_v21 = vadd.f32 %v1636_v23, %v6756_v1  ;;  %v6033_v13 = vpop.f32.mrb[142].mxu1  ;;  %6761 = vst [vmem:[#allocation26_spill] sm:$0xff] %v6046_v42  ;;  %v6762_v49 = vld [vmem:[#allocation36_spill] sm:$0xff]  ;;  %v6763_v57 = vld [vmem:[#allocation37_spill] sm:$0xff] }
 0x20e   : > { %6753 = vst [vmem:[#allocation4_spill] sm:$0xff] %v6026_v48  ;;  %v6036_v59 = vadd.f32 %v1645_v25, %v6757_v53  ;;  %v1958_v2 = vpop.f32.mrb[143].mxu1  ;;  %2569 = vmatmul.mubr.bf16.gmra.mrb[224].mxu0 %v6039_v27  ;;  %v6764_v28 = vld [vmem:[#allocation33_spill] sm:$0xff]  ;;  %v6766_v48 = vld [vmem:[#allocation34_spill] sm:$0xff] }
 0x20f   : > { %v6043_v51 = vadd.f32 %v1637_v21, %v6760_v16  ;;  %2576 = vmatprep.mubr.bf16.mxu0 %v6046_v42  ;;  %v6765_v16 = vld [vmem:[#allocation19_spill] sm:$0xff] }
 0x210   : > { %6758 = vst [vmem:[#allocation28_spill] sm:$0xff] %v6036_v59  ;;  %3050 = vmatmul.mubr.bf16.gmra.mrb[248].mxu1 %v6762_v49 }
 0x211   : > { %v4204_v36 = vpop.f32.mrb[120].mxu0  ;;  %3057 = vmatprep.mubr.bf16.mxu1 %v6763_v57  ;;  %v6768_v57 = vld [vmem:[#allocation9_spill] sm:$0xff] }
 0x212   : > { %v1649_v25 = vpop.f32.mrb[121].mxu0  ;;  %v6061_v36 = vld [vmem:[%s4701_s29 + $0x168] ss:$12 sps:$4 sm:$0xff]  }
 0x213   : > { %v1650_v23 = vadd.f32 %v1649_v25, %v6764_v28  ;;  %v6052_v1 = vpop.f32.mrb[144].mxu1  ;;  %v4205_v53 = vpop.f32.mrb[122].mxu0  ;;  %6767 = vst [vmem:[#allocation15_spill] sm:$0xff] %v6061_v36  ;;  %v6068_v28 = vld [vmem:[%s4701_s29 + $0x184] ss:$12 sps:$4 sm:$0xff]  }
 0x214   : > { %v1963_v2 = vpop.f32.mrb[145].mxu1  ;;  %v1652_v21 = vpop.f32.mrb[123].mxu0  ;;  %6769 = vst [vmem:[#allocation29_spill] sm:$0xff] %v6068_v28 }
 0x215   : > { %v6055_v59 = vadd.f32 %v1650_v23, %v6765_v16  ;;  %v1653_v27 = vadd.f32 %v1652_v21, %v6766_v48  ;;  %v6058_v42 = vpop.f32.mrb[146].mxu1 }
 0x216   : > { %v1966_v49 = vpop.f32.mrb[147].mxu1  ;;  %2577 = vmatmul.mubr.bf16.gmra.mrb[228].mxu0 %v6061_v36  ;;  %v6092_v36 = vld [vmem:[%s4701_s29 + $0x198] ss:$12 sps:$4 sm:$0xff]  }
 0x217   : > { %v6065_v25 = vadd.f32 %v1653_v27, %v6768_v57  ;;  %2584 = vmatprep.mubr.bf16.mxu0 %v6068_v28  ;;  %v6078_v57 = vld [vmem:[%s4701_s29 + $0x180] ss:$12 sps:$4 sm:$0xff]   ;;  %v6082_v28 = vld [vmem:[%s4701_s29 + $0x19c] ss:$12 sps:$4 sm:$0xff]   ;;  %6772 = vst [vmem:[#allocation2_spill] sm:$0xff] %v6092_v36 }
 0x218   : > { %3058 = vmatmul.mubr.bf16.gmra.mrb[252].mxu1 %v5774_v60  ;;  %6770 = vst [vmem:[#allocation27_spill] sm:$0xff] %v6078_v57  ;;  %6771 = vst [vmem:[#allocation3_spill] sm:$0xff] %v6082_v28 }
 0x219   : > { %v4208_v23 = vpop.f32.mrb[124].mxu0  ;;  %3065 = vmatprep.mubr.bf16.mxu1 %v5779_v18 }
 0x21a   : > { %v1663_v48 = vpop.f32.mrb[125].mxu0 }
 0x21b   : > { %v6073_v53 = vpop.f32.mrb[148].mxu1  ;;  %v4209_v2 = vpop.f32.mrb[126].mxu0 }
 0x21c   : > { %v1971_v21 = vpop.f32.mrb[149].mxu1  ;;  %v1665_v16 = vpop.f32.mrb[127].mxu0 }
 0x21d   : > { %v6075_v49 = vpop.f32.mrb[150].mxu1 }
 0x21e   : > { %v1974_v27 = vpop.f32.mrb[151].mxu1  ;;  %2585 = vmatmul.mubr.bf16.gmra.mrb[232].mxu0 %v6078_v57  ;;  %v6096_v57 = vld [vmem:[%s4701_s29 + $0x1b4] ss:$12 sps:$4 sm:$0xff]  }
 0x21f   : > { %2592 = vmatprep.mubr.bf16.mxu0 %v6082_v28  ;;  %6773 = vst [vmem:[#allocation17_spill] sm:$0xff] %v6096_v57 }
 0x220   : > { %3066 = vmatmul.mubr.bf16.gmra.mrb[0].mxu1 %v5802_v52 }
 0x221   : > { %v4220_v60 = vpop.f32.mrb[128].mxu0  ;;  %3073 = vmatprep.mubr.bf16.mxu1 %v5807_v7 }
 0x222   : > { %v2086_v18 = vpop.f32.mrb[129].mxu0 }
 0x223   : > { %v6087_v23 = vpop.f32.mrb[152].mxu1  ;;  %v4221_v48 = vpop.f32.mrb[130].mxu0 }
 0x224   : > { %v1979_v2 = vpop.f32.mrb[153].mxu1  ;;  %v2088_v21 = vpop.f32.mrb[131].mxu0 }
 0x225   : > { %v6089_v16 = vpop.f32.mrb[154].mxu1 }
 0x226   : > { %v1982_v27 = vpop.f32.mrb[155].mxu1  ;;  %2593 = vmatmul.mubr.bf16.gmra.mrb[236].mxu0 %v6092_v36 }
 0x227   : > { %2600 = vmatprep.mubr.bf16.mxu0 %v6096_v57 }
 0x228   : > { %3074 = vmatmul.mubr.bf16.gmra.mrb[4].mxu1 %v5828_v5 }
 0x229   : > { %v4224_v52 = vpop.f32.mrb[132].mxu0  ;;  %3081 = vmatprep.mubr.bf16.mxu1 %v5833_v0 }
 0x22a   : > { %v2107_v7 = vadd.f32 %v4224_v52, %v5903_v62  ;;  %v2098_v60 = vpop.f32.mrb[133].mxu0 }
 0x22b   : > { %v6102_v18 = vpop.f32.mrb[156].mxu1  ;;  %v2099_v48 = vadd.f32 %v2098_v60, %v5872_v45  ;;  %v4225_v2 = vpop.f32.mrb[134].mxu0  ;;  %v6119_v45 = vld [vmem:[%s4701_s29 + $0x1b0] ss:$12 sps:$4 sm:$0xff]  }
 0x22c   : > { %v6106_v21 = vadd.f32 %v2107_v7, %v5850_v41  ;;  %v1987_v27 = vpop.f32.mrb[157].mxu1  ;;  %v2110_v57 = vadd.f32 %v4225_v2, %v5913_v26  ;;  %v2101_v5 = vpop.f32.mrb[135].mxu0  ;;  %v6126_v26 = vld [vmem:[%s4701_s29 + $0x1cc] ss:$12 sps:$4 sm:$0xff]  }
 0x22d   : > { %v6110_v36 = vadd.f32 %v2099_v48, %v5819_v3  ;;  %v6112_v0 = vpop.f32.mrb[158].mxu1  ;;  %v2102_v62 = vadd.f32 %v2101_v5, %v5882_v10 }
 0x22e   : > { %v6116_v52 = vadd.f32 %v2110_v57, %v5860_v40  ;;  %v1990_v28 = vpop.f32.mrb[159].mxu1  ;;  %2601 = vmatmul.mubr.bf16.gmra.mrb[240].mxu0 %v6119_v45 }
 0x22f   : > { %v6123_v41 = vadd.f32 %v2102_v62, %v5825_v61  ;;  %2608 = vmatprep.mubr.bf16.mxu0 %v6126_v26 }
 0x230   : > { %3082 = vmatmul.mubr.bf16.gmra.mrb[8].mxu1 %v5856_v17 }
 0x231   : > { %v4228_v3 = vpop.f32.mrb[136].mxu0  ;;  %3089 = vmatprep.mubr.bf16.mxu1 %v5863_v24 }
 0x232   : > { %v2123_v40 = vadd.f32 %v4228_v3, %v5963_v55  ;;  %v2114_v10 = vpop.f32.mrb[137].mxu0 }
 0x233   : > { %v6132_v28 = vpop.f32.mrb[160].mxu1  ;;  %v2115_v57 = vadd.f32 %v2114_v10, %v5933_v8  ;;  %v4229_v61 = vpop.f32.mrb[138].mxu0  ;;  %v6149_v8 = vld [vmem:[%s4701_s29 + $0x1c8] ss:$12 sps:$4 sm:$0xff]  }
 0x234   : > { %v6136_v7 = vadd.f32 %v2123_v40, %v5879_v9  ;;  %v1995_v60 = vpop.f32.mrb[161].mxu1  ;;  %v2126_v48 = vadd.f32 %v4229_v61, %v5973_v29  ;;  %v2117_v17 = vpop.f32.mrb[139].mxu0  ;;  %v4608_v29 = vld [vmem:[%s4701_s29 + $0x8] ss:$12 sps:$4 sm:$0xff]  }
 0x235   : > { %v6140_v2 = vadd.f32 %v2115_v57, %v5846_v50  ;;  %v6142_v24 = vpop.f32.mrb[162].mxu1  ;;  %v2118_v55 = vadd.f32 %v2117_v17, %v5943_v12  ;;  %v4610_v17 = vld [vmem:[%s4701_s29 + $0x38] ss:$12 sps:$4 sm:$0xff]  }
 0x236   : > { %v6146_v27 = vadd.f32 %v2126_v48, %v5892_v44  ;;  %v1998_v5 = vpop.f32.mrb[163].mxu1  ;;  %2609 = vmatmul.mubr.bf16.gmra.mrb[244].mxu0 %v6149_v8 }
 0x237   : > { %v6153_v9 = vadd.f32 %v2118_v55, %v5853_v11  ;;  %4314 = vmatprep.mubr.msk.bf16.mxu0 %vm712_vm0, %v4608_v29 }
 0x238   : > { %3090 = vmatmul.mubr.bf16.gmra.mrb[12].mxu1 %v5888_v38 }
 0x239   : > { %v4232_v50 = vpop.f32.mrb[140].mxu0  ;;  %3097 = vmatprep.mubr.bf16.mxu1 %v5895_v32 }
 0x23a   : > { %v2139_v44 = vadd.f32 %v4232_v50, %v6023_v46  ;;  %v2130_v12 = vpop.f32.mrb[141].mxu0 }
 0x23b   : > { %v6160_v62 = vpop.f32.mrb[164].mxu1  ;;  %v2131_v3 = vadd.f32 %v2130_v12, %v5993_v20  ;;  %v4233_v40 = vpop.f32.mrb[142].mxu0  ;;  %v4609_v20 = vld [vmem:[%s4701_s29 + $0x20] ss:$12 sps:$4 sm:$0xff]  }
 0x23c   : > { %v6164_v11 = vadd.f32 %v2139_v44, %v5910_v56  ;;  %v2003_v10 = vpop.f32.mrb[165].mxu1  ;;  %v2142_v57 = vadd.f32 %v4233_v40, %v6033_v13  ;;  %v2133_v38 = vpop.f32.mrb[143].mxu0  ;;  %v4612_v40 = vld [vmem:[%s4701_s29 + $0x68] ss:$12 sps:$4 sm:$0xff]  }
 0x23d   : > { %v6168_v61 = vadd.f32 %v2131_v3, %v5875_v31  ;;  %v6170_v32 = vpop.f32.mrb[166].mxu1  ;;  %v2134_v46 = vadd.f32 %v2133_v38, %v6003_v19 }
 0x23e   : > { %v6174_v60 = vadd.f32 %v2142_v57, %v5923_v14  ;;  %v2006_v48 = vpop.f32.mrb[167].mxu1  ;;  %4315 = vmatmul.mubr.msk.bf16.vlgmr.msra.gmra.mrb[248].mxu0 %vm712_vm0, %v4609_v20 }
 0x23f   : > { %v6179_v56 = vadd.f32 %v2134_v46, %v5885_v34  ;;  %4318 = vmatprep.mubr.msk.bf16.mxu0 %vm712_vm0, %v4610_v17 }
 0x240   : > { %3098 = vmatmul.mubr.bf16.gmra.mrb[16].mxu1 %v5919_v39 }
 0x241   : > { %v4236_v31 = vpop.f32.mrb[144].mxu0  ;;  %3105 = vmatprep.mubr.bf16.mxu1 %v5926_v37 }
 0x242   : > { %v2155_v19 = vadd.f32 %v4236_v31, %v6073_v53  ;;  %v2146_v14 = vpop.f32.mrb[145].mxu0  ;;  %v4613_v31 = vld [vmem:[%s4701_s29 + $0x80] ss:$12 sps:$4 sm:$0xff]  }
 0x243   : > { %v6186_v13 = vpop.f32.mrb[168].mxu1  ;;  %v2147_v55 = vadd.f32 %v2146_v14, %v6052_v1  ;;  %v4237_v5 = vpop.f32.mrb[146].mxu0  ;;  %v4611_v1 = vld [vmem:[%s4701_s29 + $0x50] ss:$12 sps:$4 sm:$0xff]  }
 0x244   : > { %v6190_v34 = vadd.f32 %v2155_v19, %v5940_v30  ;;  %v2011_v29 = vpop.f32.mrb[169].mxu1  ;;  %v2158_v50 = vadd.f32 %v4237_v5, %v6075_v49  ;;  %v2149_v39 = vpop.f32.mrb[147].mxu0  ;;  %v6775_v5 = vld [vmem:[#allocation22_spill] sm:$0xff] }
 0x245   : > { %v6194_v44 = vadd.f32 %v2147_v55, %v5906_v47  ;;  %v6196_v37 = vpop.f32.mrb[170].mxu1  ;;  %v2150_v53 = vadd.f32 %v2149_v39, %v6058_v42 }
 0x246   : > { %v6200_v12 = vadd.f32 %v2158_v50, %v5953_v4  ;;  %v2014_v3 = vpop.f32.mrb[171].mxu1  ;;  %4319 = vmatmul.mubr.msk.bf16.gmra.mrb[252].mxu0 %vm712_vm0, %v4611_v1 }
 0x247   : > { %v6205_v30 = vadd.f32 %v2150_v53, %v5916_v63  ;;  %4322 = vmatprep.mubr.msk.bf16.mxu0 %vm712_vm0, %v4612_v40 }
 0x248   : > { %3106 = vmatmul.mubr.bf16.gmra.mrb[20].mxu1 %v5949_v54 }
 0x249   : > { %v4240_v47 = vpop.f32.mrb[148].mxu0  ;;  %3113 = vmatprep.mubr.bf16.mxu1 %v5956_v22 }
 0x24a   : > { %v2171_v42 = vadd.f32 %v4240_v47, %v6102_v18  ;;  %v2162_v4 = vpop.f32.mrb[149].mxu0 }
 0x24b   : > { %v2017_v49 = vpop.f32.mrb[172].mxu1  ;;  %v2163_v10 = vadd.f32 %v2162_v4, %v6087_v23  ;;  %v4241_v57 = vpop.f32.mrb[150].mxu0  ;;  %v4614_v23 = vld [vmem:[%s4701_s29 + $0x98] ss:$12 sps:$4 sm:$0xff]  }
 0x24c   : > { %v6214_v63 = vadd.f32 %v2171_v42, %v5970_v58  ;;  %v2019_v38 = vpop.f32.mrb[173].mxu1  ;;  %v2174_v46 = vadd.f32 %v4241_v57, %v6112_v0  ;;  %v2165_v48 = vpop.f32.mrb[151].mxu0  ;;  %v6774_v0 = vld [vmem:[#allocation24_spill] sm:$0xff] }
 0x24d   : > { %v6218_v54 = vadd.f32 %v2163_v10, %v5936_v43  ;;  %v2020_v20 = vpop.f32.mrb[174].mxu1  ;;  %v2166_v22 = vadd.f32 %v2165_v48, %v6089_v16  ;;  %v4615_v42 = vld [vmem:[%s4701_s29 + $0xb0] ss:$12 sps:$4 sm:$0xff]   ;;  %v4616_v10 = vld [vmem:[%s4701_s29 + $0xc8] ss:$12 sps:$4 sm:$0xff]   ;;  %v6780_v38 = vld [vmem:[#allocation6_spill] sm:$0xff] }
 0x24e   : > { %v6222_v18 = vadd.f32 %v2174_v46, %v5983_v35  ;;  %v2022_v17 = vpop.f32.mrb[175].mxu1  ;;  %4323 = vmatmul.mubr.msk.bf16.gmra.mrb[0].mxu0 %vm712_vm0, %v4613_v31 }
 0x24f   : > { %v6227_v58 = vadd.f32 %v2166_v22, %v5946_v33  ;;  %4326 = vmatprep.mubr.msk.bf16.mxu0 %vm712_vm0, %v4614_v23 }
 0x250   : > { %3114 = vmatmul.mubr.bf16.gmra.mrb[24].mxu1 %v5979_v15  ;;  %v6776_v15 = vld [vmem:[#allocation20_spill] sm:$0xff] }
 0x251   : > { %v4244_v43 = vpop.f32.mrb[152].mxu0  ;;  %3121 = vmatprep.mubr.bf16.mxu1 %v6774_v0 }
 0x252   : > { %v2187_v16 = vadd.f32 %v4244_v43, %v6160_v62  ;;  %v2178_v35 = vpop.f32.mrb[153].mxu0  ;;  %v6777_v62 = vld [vmem:[#allocation23_spill] sm:$0xff] }
 0x253   : > { %v2025_v19 = vpop.f32.mrb[176].mxu1  ;;  %v2179_v14 = vadd.f32 %v2178_v35, %v6132_v28  ;;  %v4245_v55 = vpop.f32.mrb[154].mxu0  ;;  %v6778_v28 = vld [vmem:[#allocation21_spill] sm:$0xff] }
 0x254   : > { %v6236_v33 = vadd.f32 %v2187_v16, %v6775_v5  ;;  %v2027_v29 = vpop.f32.mrb[177].mxu1  ;;  %v2190_v50 = vadd.f32 %v4245_v55, %v6170_v32  ;;  %v2181_v39 = vpop.f32.mrb[155].mxu0  ;;  %v6779_v32 = vld [vmem:[#allocation25_spill] sm:$0xff]  ;;  %v6781_v16 = vld [vmem:[#allocation11_spill] sm:$0xff] }
 0x255   : > { %v6240_v53 = vadd.f32 %v2179_v14, %v6776_v15  ;;  %v2028_v3 = vpop.f32.mrb[178].mxu1  ;;  %v2182_v1 = vadd.f32 %v2181_v39, %v6142_v24  ;;  %v4617_v29 = vld [vmem:[%s4701_s29 + $0xe0] ss:$12 sps:$4 sm:$0xff]  }
 0x256   : > { %v6244_v40 = vadd.f32 %v2190_v50, %v6777_v62  ;;  %v2030_v47 = vpop.f32.mrb[179].mxu1  ;;  %4327 = vmatmul.mubr.msk.bf16.gmra.mrb[4].mxu0 %vm712_vm0, %v4615_v42  ;;  %v6784_v15 = vld [vmem:[#allocation26_spill] sm:$0xff] }
 0x257   : > { %v6249_v4 = vadd.f32 %v2182_v1, %v6778_v28  ;;  %4330 = vmatprep.mubr.msk.bf16.mxu0 %vm712_vm0, %v4616_v10 }
 0x258   : > { %3122 = vmatmul.mubr.bf16.gmra.mrb[28].mxu1 %v6779_v32 }
 0x259   : > { %v4248_v57 = vpop.f32.mrb[156].mxu0  ;;  %3129 = vmatprep.mubr.bf16.mxu1 %v6780_v38 }
 0x25a   : > { %v2203_v24 = vadd.f32 %v4248_v57, %v2017_v49  ;;  %v2194_v46 = vpop.f32.mrb[157].mxu0  ;;  %v6785_v57 = vld [vmem:[#allocation4_spill] sm:$0xff] }
 0x25b   : > { %v2033_v48 = vpop.f32.mrb[180].mxu1  ;;  %v2195_v22 = vadd.f32 %v2194_v46, %v6186_v13  ;;  %v4249_v17 = vpop.f32.mrb[158].mxu0  ;;  %v6782_v13 = vld [vmem:[#allocation30_spill] sm:$0xff] }
 0x25c   : > { %v6257_v31 = vadd.f32 %v2203_v24, %v6030_v6  ;;  %v2035_v23 = vpop.f32.mrb[181].mxu1  ;;  %v2206_v43 = vadd.f32 %v4249_v17, %v2020_v20  ;;  %v2197_v0 = vpop.f32.mrb[159].mxu0  ;;  %v4618_v6 = vld [vmem:[%s4701_s29 + $0xf8] ss:$12 sps:$4 sm:$0xff]   ;;  %v4619_v17 = vld [vmem:[%s4701_s29 + $0x110] ss:$12 sps:$4 sm:$0xff]  }
 0x25d   : > { %v6260_v35 = vadd.f32 %v2195_v22, %v6781_v16  ;;  %v2036_v14 = vpop.f32.mrb[182].mxu1  ;;  %v2198_v55 = vadd.f32 %v2197_v0, %v6196_v37  ;;  %v6783_v20 = vld [vmem:[#allocation14_spill] sm:$0xff]  ;;  %v4620_v23 = vld [vmem:[%s4701_s29 + $0x128] ss:$12 sps:$4 sm:$0xff]   ;;  %v6788_v16 = vld [vmem:[#allocation29_spill] sm:$0xff] }
 0x25e   : > { %v6264_v49 = vadd.f32 %v2206_v43, %v6043_v51  ;;  %v2038_v5 = vpop.f32.mrb[183].mxu1  ;;  %4331 = vmatmul.mubr.msk.bf16.gmra.mrb[8].mxu0 %vm712_vm0, %v4617_v29  ;;  %v6787_v43 = vld [vmem:[#allocation15_spill] sm:$0xff] }
 0x25f   : > { %v6269_v50 = vadd.f32 %v2198_v55, %v6782_v13  ;;  %4334 = vmatprep.mubr.msk.bf16.mxu0 %vm712_vm0, %v4618_v6  ;;  %v4621_v6 = vld [vmem:[%s4701_s29 + $0x140] ss:$12 sps:$4 sm:$0xff]  }
 0x260   : > { %3130 = vmatmul.mubr.bf16.gmra.mrb[32].mxu1 %v6783_v20  ;;  %v4622_v20 = vld [vmem:[%s4701_s29 + $0x158] ss:$12 sps:$4 sm:$0xff]  }
 0x261   : > { %v4252_v39 = vpop.f32.mrb[160].mxu0  ;;  %3137 = vmatprep.mubr.bf16.mxu1 %v6784_v15 }
 0x262   : > { %v2219_v37 = vadd.f32 %v4252_v39, %v2033_v48  ;;  %v2210_v1 = vpop.f32.mrb[161].mxu0  ;;  %v6789_v39 = vld [vmem:[#allocation27_spill] sm:$0xff] }
 0x263   : > { %v2041_v51 = vpop.f32.mrb[184].mxu1  ;;  %v2211_v62 = vadd.f32 %v2210_v1, %v2025_v19  ;;  %v4253_v47 = vpop.f32.mrb[162].mxu0  ;;  %v6786_v19 = vld [vmem:[#allocation28_spill] sm:$0xff] }
 0x264   : > { %v6276_v42 = vadd.f32 %v2219_v37, %v6055_v59  ;;  %v2042_v28 = vpop.f32.mrb[185].mxu1  ;;  %v2222_v10 = vadd.f32 %v4253_v47, %v2036_v14  ;;  %v2213_v32 = vpop.f32.mrb[163].mxu0  ;;  %v6790_v37 = vld [vmem:[#allocation3_spill] sm:$0xff] }
 0x265   : > { %v6279_v38 = vadd.f32 %v2211_v62, %v6785_v57  ;;  %v2043_v24 = vpop.f32.mrb[186].mxu1  ;;  %v2214_v46 = vadd.f32 %v2213_v32, %v2028_v3  ;;  %v4623_v57 = vld [vmem:[%s4701_s29 + $0x170] ss:$12 sps:$4 sm:$0xff]  }
 0x266   : > { %v6282_v22 = vadd.f32 %v2222_v10, %v6065_v25  ;;  %v2044_v48 = vpop.f32.mrb[187].mxu1  ;;  %4335 = vmatmul.mubr.msk.bf16.gmra.mrb[12].mxu0 %vm712_vm0, %v4619_v17  ;;  %v4624_v24 = vld [vmem:[%s4701_s29 + $0x188] ss:$12 sps:$4 sm:$0xff]   ;;  %v6792_v17 = vld [vmem:[#allocation17_spill] sm:$0xff] }
 0x267   : > { %v6287_v59 = vadd.f32 %v2214_v46, %v6786_v19  ;;  %4338 = vmatprep.mubr.msk.bf16.mxu0 %vm712_vm0, %v4620_v23  ;;  %v6791_v46 = vld [vmem:[#allocation2_spill] sm:$0xff] }
 0x268   : > { %3138 = vmatmul.mubr.bf16.gmra.mrb[36].mxu1 %v6787_v43 }
 0x269   : > { %v4256_v0 = vpop.f32.mrb[164].mxu0  ;;  %3145 = vmatprep.mubr.bf16.mxu1 %v6788_v16 }
 0x26a   : > { %v2226_v3 = vpop.f32.mrb[165].mxu0 }
 0x26b   : > { %v2047_v25 = vpop.f32.mrb[188].mxu1  ;;  %v4257_v14 = vpop.f32.mrb[166].mxu0 }
 0x26c   : > { %v2048_v55 = vpop.f32.mrb[189].mxu1  ;;  %v2228_v5 = vpop.f32.mrb[167].mxu0  ;;  %v4625_v14 = vld [vmem:[%s4701_s29 + $0x1a0] ss:$12 sps:$4 sm:$0xff]  }
 0x26d   : > { %v2049_v29 = vpop.f32.mrb[190].mxu1  ;;  %v4626_v55 = vld [vmem:[%s4701_s29 + $0x1b8] ss:$12 sps:$4 sm:$0xff]  }
 0x26e   : > { %v2050_v13 = vpop.f32.mrb[191].mxu1  ;;  %4339 = vmatmul.mubr.msk.bf16.gmra.mrb[16].mxu0 %vm712_vm0, %v4621_v6 }
 0x26f   : > { %4342 = vmatprep.mubr.msk.bf16.mxu0 %vm712_vm0, %v4622_v20 }
 0x270   : > { %3146 = vmatmul.mubr.bf16.gmra.mrb[40].mxu1 %v6789_v39 }
 0x271   : > { %v2464_v15 = vpop.f32.mrb[168].mxu0  ;;  %3153 = vmatprep.mubr.bf16.mxu1 %v6790_v37 }
 0x272   : > { %v2465_v1 = vpop.f32.mrb[169].mxu0 }
 0x273   : > { %v4268_v51 = vpop.f32.mrb[192].mxu1  ;;  %v2466_v62 = vpop.f32.mrb[170].mxu0  ;;  %v4627_v1 = vld [vmem:[%s4701_s29 + $0x1d0] ss:$12 sps:$4 sm:$0xff]  }
 0x274   : > { %v2649_v47 = vpop.f32.mrb[193].mxu1  ;;  %v2467_v28 = vpop.f32.mrb[171].mxu0 }
 0x275   : > { %v4269_v10 = vpop.f32.mrb[194].mxu1 }
 0x276   : > { %v2651_v32 = vpop.f32.mrb[195].mxu1  ;;  %4343 = vmatmul.mubr.msk.bf16.gmra.mrb[20].mxu0 %vm712_vm0, %v4623_v57 }
 0x277   : > { %4346 = vmatprep.mubr.msk.bf16.mxu0 %vm712_vm0, %v4624_v24 }
 0x278   : > { %3154 = vmatmul.mubr.bf16.gmra.mrb[44].mxu1 %v6791_v46 }
 0x279   : > { %v2470_v48 = vpop.f32.mrb[172].mxu0  ;;  %3161 = vmatprep.mubr.bf16.mxu1 %v6792_v17 }
 0x27a   : > { %v2471_v19 = vpop.f32.mrb[173].mxu0 }
 0x27b   : > { %v4272_v23 = vpop.f32.mrb[196].mxu1  ;;  %v2472_v43 = vpop.f32.mrb[174].mxu0 }
 0x27c   : > { %v2661_v0 = vpop.f32.mrb[197].mxu1  ;;  %v2473_v16 = vpop.f32.mrb[175].mxu0 }
 0x27d   : > { %v4273_v3 = vpop.f32.mrb[198].mxu1 }
 0x27e   : > { %v2663_v25 = vpop.f32.mrb[199].mxu1  ;;  %4347 = vmatmul.mubr.msk.bf16.gmra.mrb[24].mxu0 %vm712_vm0, %v4625_v14 }
 0x27f   : > { %4350 = vmatprep.mubr.msk.bf16.mxu0 %vm712_vm0, %v4626_v55 }
 0x280   : > { %3162 = vmatmul.mubr.bf16.gmra.mrb[48].mxu1 %v6119_v45 }
 0x281   : > { %v2476_v5 = vpop.f32.mrb[176].mxu0  ;;  %3169 = vmatprep.mubr.bf16.mxu1 %v6126_v26 }
 0x282   : > { %v2477_v29 = vpop.f32.mrb[177].mxu0 }
 0x283   : > { %v4276_v13 = vpop.f32.mrb[200].mxu1  ;;  %v2478_v6 = vpop.f32.mrb[178].mxu0 }
 0x284   : > { %v2675_v20 = vpop.f32.mrb[201].mxu1  ;;  %v2479_v39 = vpop.f32.mrb[179].mxu0 }
 0x285   : > { %v4277_v15 = vpop.f32.mrb[202].mxu1 }
 0x286   : > { %v2678_v37 = vpop.f32.mrb[203].mxu1  ;;  %4351 = vmatmul.mubr.msk.bf16.gmra.mrb[28].mxu0 %vm712_vm0, %v4627_v1 }
 0x288   : > { %3170 = vmatmul.mubr.bf16.gmra.mrb[52].mxu1 %v6149_v8 }
 0x289   : > { %v2482_v51 = vpop.f32.mrb[180].mxu0 }
 0x28a   : > { %v2668_v62 = vadd.f32 %v4272_v23, %v2482_v51  ;;  %v2484_v47 = vpop.f32.mrb[181].mxu0 }
 0x28b   : > { %v4280_v28 = vpop.f32.mrb[204].mxu1  ;;  %v2485_v45 = vpop.f32.mrb[182].mxu0 }
 0x28c   : > { %v6315_v10 = vadd.f32 %v2668_v62, %v6110_v36  ;;  %v2671_v26 = vadd.f32 %v4273_v3, %v2485_v45  ;;  %v2691_v32 = vpop.f32.mrb[205].mxu1  ;;  %v2487_v57 = vpop.f32.mrb[183].mxu0 }
 0x28d   : > { %v4281_v24 = vpop.f32.mrb[206].mxu1 }
 0x28e   : > { %v6318_v46 = vadd.f32 %v2671_v26, %v6123_v41  ;;  %v2694_v48 = vpop.f32.mrb[207].mxu1 }
 0x291   : > { %v2490_v17 = vpop.f32.mrb[184].mxu0 }
 0x292   : > { %v2676_v19 = vadd.f32 %v2675_v20, %v2490_v17  ;;  %v2492_v43 = vpop.f32.mrb[185].mxu0 }
 0x293   : > { %v4284_v8 = vpop.f32.mrb[208].mxu1  ;;  %v2493_v0 = vpop.f32.mrb[186].mxu0 }
 0x294   : > { %v6321_v23 = vadd.f32 %v2676_v19, %v6106_v21  ;;  %v2679_v16 = vadd.f32 %v2678_v37, %v2493_v0  ;;  %v2707_v25 = vpop.f32.mrb[209].mxu1  ;;  %v2495_v36 = vpop.f32.mrb[187].mxu0 }
 0x295   : > { %v4285_v14 = vpop.f32.mrb[210].mxu1 }
 0x296   : > { %v6324_v3 = vadd.f32 %v2679_v16, %v6116_v52  ;;  %v2710_v55 = vpop.f32.mrb[211].mxu1 }
 0x299   : > { %v2498_v5 = vpop.f32.mrb[188].mxu0 }
 0x29a   : > { %v2684_v41 = vadd.f32 %v4276_v13, %v2498_v5  ;;  %v2500_v29 = vpop.f32.mrb[189].mxu0 }
 0x29b   : > { %v6326_v6 = vpop.f32.mrb[212].mxu1  ;;  %v2501_v20 = vpop.f32.mrb[190].mxu0 }
 0x29c   : > { %v6329_v39 = vadd.f32 %v2684_v41, %v6140_v2  ;;  %v2687_v1 = vadd.f32 %v4277_v15, %v2501_v20  ;;  %v2723_v21 = vpop.f32.mrb[213].mxu1  ;;  %v2503_v51 = vpop.f32.mrb[191].mxu0 }
 0x29d   : > { %v6331_v37 = vpop.f32.mrb[214].mxu1 }
 0x29e   : > { %v6334_v62 = vadd.f32 %v2687_v1, %v6153_v9  ;;  %v2726_v52 = vpop.f32.mrb[215].mxu1 }
 0x2a1   : > { %v2506_v47 = vpop.f32.mrb[192].mxu0 }
 0x2a2   : > { %v2692_v45 = vadd.f32 %v2691_v32, %v2506_v47  ;;  %v2508_v26 = vpop.f32.mrb[193].mxu0 }
 0x2a3   : > { %v6336_v13 = vpop.f32.mrb[216].mxu1  ;;  %v2509_v57 = vpop.f32.mrb[194].mxu0 }
 0x2a4   : > { %v6339_v17 = vadd.f32 %v2692_v45, %v6136_v7  ;;  %v2695_v2 = vadd.f32 %v2694_v48, %v2509_v57  ;;  %v6341_v19 = vpop.f32.mrb[217].mxu1  ;;  %v2511_v15 = vpop.f32.mrb[195].mxu0 }
 0x2a5   : > { %v6343_v43 = vpop.f32.mrb[218].mxu1 }
 0x2a6   : > { %v6346_v0 = vadd.f32 %v2695_v2, %v6146_v27  ;;  %v6348_v9 = vpop.f32.mrb[219].mxu1 }
 0x2a9   : > { %v2514_v16 = vpop.f32.mrb[196].mxu0 }
 0x2aa   : > { %v2700_v32 = vadd.f32 %v4280_v28, %v2514_v16  ;;  %v2516_v36 = vpop.f32.mrb[197].mxu0 }
 0x2ab   : > { %v6350_v5 = vpop.f32.mrb[220].mxu1  ;;  %v2517_v41 = vpop.f32.mrb[198].mxu0 }
 0x2ac   : > { %v6353_v7 = vadd.f32 %v2700_v32, %v6168_v61  ;;  %v2703_v48 = vadd.f32 %v4281_v24, %v2517_v41  ;;  %v6355_v29 = vpop.f32.mrb[221].mxu1  ;;  %v2519_v20 = vpop.f32.mrb[199].mxu0 }
 0x2ad   : > { %v6357_v1 = vpop.f32.mrb[222].mxu1 }
 0x2ae   : > { %v6360_v27 = vadd.f32 %v2703_v48, %v6179_v56  ;;  %v6362_v51 = vpop.f32.mrb[223].mxu1 }
 0x2b0   : > { %6793 = vst [vmem:[#allocation13_spill] sm:$0xff] %v6360_v27 }
 0x2b1   : > { %v2522_v47 = vpop.f32.mrb[200].mxu0 }
 0x2b2   : > { %v2708_v28 = vadd.f32 %v2707_v25, %v2522_v47  ;;  %v2524_v45 = vpop.f32.mrb[201].mxu0 }
 0x2b3   : > { %v6364_v26 = vpop.f32.mrb[224].mxu1  ;;  %v2525_v57 = vpop.f32.mrb[202].mxu0 }
 0x2b4   : > { %v6367_v61 = vadd.f32 %v2708_v28, %v6164_v11  ;;  %v2711_v24 = vadd.f32 %v2710_v55, %v2525_v57  ;;  %v6369_v2 = vpop.f32.mrb[225].mxu1  ;;  %v2527_v15 = vpop.f32.mrb[203].mxu0 }
 0x2b5   : > { %v6371_v16 = vpop.f32.mrb[226].mxu1 }
 0x2b6   : > { %v6374_v56 = vadd.f32 %v2711_v24, %v6174_v60  ;;  %v6376_v32 = vpop.f32.mrb[227].mxu1 }
 0x2b9   : > { %v2530_v36 = vpop.f32.mrb[204].mxu0 }
 0x2ba   : > { %v2716_v25 = vadd.f32 %v4284_v8, %v2530_v36  ;;  %v2532_v41 = vpop.f32.mrb[205].mxu0 }
 0x2bb   : > { %v4304_v48 = vpop.f32.mrb[228].mxu1  ;;  %v2533_v20 = vpop.f32.mrb[206].mxu0 }
 0x2bc   : > { %v6379_v47 = vadd.f32 %v2716_v25, %v6194_v44  ;;  %v2719_v11 = vadd.f32 %v4285_v14, %v2533_v20  ;;  %v6381_v55 = vpop.f32.mrb[229].mxu1  ;;  %v2535_v28 = vpop.f32.mrb[207].mxu0 }
 0x2bd   : > { %v4305_v45 = vpop.f32.mrb[230].mxu1 }
 0x2be   : > { %v6384_v57 = vadd.f32 %v2719_v11, %v6205_v30  ;;  %v6386_v60 = vpop.f32.mrb[231].mxu1 }
 0x2c0   : > { %6794 = vst [vmem:[#allocation10_spill] sm:$0xff] %v6384_v57 }
 0x2c1   : > { %v2538_v24 = vpop.f32.mrb[208].mxu0 }
 0x2c2   : > { %v2724_v15 = vadd.f32 %v2723_v21, %v2538_v24  ;;  %v2540_v27 = vpop.f32.mrb[209].mxu0 }
 0x2c3   : > { %v3027_v8 = vpop.f32.mrb[232].mxu1  ;;  %v2541_v36 = vpop.f32.mrb[210].mxu0 }
 0x2c4   : > { %v6389_v41 = vadd.f32 %v2724_v15, %v6190_v34  ;;  %v2727_v44 = vadd.f32 %v2726_v52, %v2541_v36  ;;  %v3028_v25 = vpop.f32.mrb[233].mxu1  ;;  %v2543_v14 = vpop.f32.mrb[211].mxu0 }
 0x2c5   : > { %v3029_v48 = vpop.f32.mrb[234].mxu1 }
 0x2c6   : > { %v6392_v20 = vadd.f32 %v2727_v44, %v6200_v12  ;;  %v3030_v28 = vpop.f32.mrb[235].mxu1 }
 0x2c9   : > { %v2546_v30 = vpop.f32.mrb[212].mxu0 }
 0x2ca   : > { %v2732_v11 = vadd.f32 %v6326_v6, %v2546_v30  ;;  %v2548_v45 = vpop.f32.mrb[213].mxu0 }
 0x2cb   : > { %v3033_v57 = vpop.f32.mrb[236].mxu1  ;;  %v2549_v21 = vpop.f32.mrb[214].mxu0 }
 0x2cc   : > { %v6396_v27 = vadd.f32 %v2732_v11, %v6218_v54  ;;  %v2735_v34 = vadd.f32 %v6331_v37, %v2549_v21  ;;  %v3034_v24 = vpop.f32.mrb[237].mxu1  ;;  %v2551_v52 = vpop.f32.mrb[215].mxu0 }
 0x2cd   : > { %v3035_v15 = vpop.f32.mrb[238].mxu1 }
 0x2ce   : > { %v6400_v8 = vadd.f32 %v2735_v34, %v6227_v58  ;;  %v3036_v12 = vpop.f32.mrb[239].mxu1 }
 0x2d1   : > { %v2554_v36 = vpop.f32.mrb[216].mxu0 }
 0x2d2   : > { %v2740_v44 = vadd.f32 %v6341_v19, %v2554_v36  ;;  %v2556_v25 = vpop.f32.mrb[217].mxu0 }
 0x2d3   : > { %v3039_v6 = vpop.f32.mrb[240].mxu1  ;;  %v2557_v14 = vpop.f32.mrb[218].mxu0 }
 0x2d4   : > { %v6404_v57 = vadd.f32 %v2740_v44, %v6214_v63  ;;  %v2743_v54 = vadd.f32 %v6348_v9, %v2557_v14  ;;  %v3040_v48 = vpop.f32.mrb[241].mxu1  ;;  %v2559_v37 = vpop.f32.mrb[219].mxu0 }
 0x2d5   : > { %v3041_v28 = vpop.f32.mrb[242].mxu1 }
 0x2d6   : > { %v6408_v30 = vadd.f32 %v2743_v54, %v6222_v18  ;;  %v3042_v58 = vpop.f32.mrb[243].mxu1 }
 0x2d9   : > { %v2562_v11 = vpop.f32.mrb[220].mxu0 }
 0x2da   : > { %v2748_v45 = vadd.f32 %v6336_v13, %v2562_v11  ;;  %v2564_v21 = vpop.f32.mrb[221].mxu0 }
 0x2db   : > { %v3045_v19 = vpop.f32.mrb[244].mxu1  ;;  %v2565_v34 = vpop.f32.mrb[222].mxu0 }
 0x2dc   : > { %v6412_v24 = vadd.f32 %v2748_v45, %v6240_v53  ;;  %v2751_v63 = vadd.f32 %v6343_v43, %v2565_v34  ;;  %v3046_v52 = vpop.f32.mrb[245].mxu1  ;;  %v2567_v9 = vpop.f32.mrb[223].mxu0 }
 0x2dd   : > { %v3047_v15 = vpop.f32.mrb[246].mxu1 }
 0x2de   : > { %v6416_v12 = vadd.f32 %v2751_v63, %v6249_v4  ;;  %v3048_v18 = vpop.f32.mrb[247].mxu1 }
 0x2e1   : > { %v2570_v36 = vpop.f32.mrb[224].mxu0 }
 0x2e2   : > { %v2756_v44 = vadd.f32 %v6355_v29, %v2570_v36  ;;  %v2572_v25 = vpop.f32.mrb[225].mxu0 }
 0x2e3   : > { %v6419_v13 = vpop.f32.mrb[248].mxu1  ;;  %v2573_v6 = vpop.f32.mrb[226].mxu0 }
 0x2e4   : > { %v6422_v14 = vadd.f32 %v2756_v44, %v6236_v33  ;;  %v2759_v53 = vadd.f32 %v6362_v51, %v2573_v6  ;;  %v3053_v43 = vpop.f32.mrb[249].mxu1  ;;  %v2575_v54 = vpop.f32.mrb[227].mxu0 }
 0x2e5   : > { %v6425_v48 = vpop.f32.mrb[250].mxu1 }
 0x2e6   : > { %v6428_v4 = vadd.f32 %v2759_v53, %v6244_v40  ;;  %v3056_v37 = vpop.f32.mrb[251].mxu1 }
 0x2e9   : > { %v2578_v28 = vpop.f32.mrb[228].mxu0 }
 0x2ea   : > { %v2764_v29 = vadd.f32 %v6350_v5, %v2578_v28  ;;  %v2580_v58 = vpop.f32.mrb[229].mxu0 }
 0x2eb   : > { %v6431_v11 = vpop.f32.mrb[252].mxu1  ;;  %v2581_v45 = vpop.f32.mrb[230].mxu0 }
 0x2ec   : > { %v6434_v33 = vadd.f32 %v2764_v29, %v6260_v35  ;;  %v2767_v51 = vadd.f32 %v6357_v1, %v2581_v45  ;;  %v3061_v21 = vpop.f32.mrb[253].mxu1  ;;  %v2583_v19 = vpop.f32.mrb[231].mxu0 }
 0x2ed   : > { %v6437_v34 = vpop.f32.mrb[254].mxu1 }
 0x2ee   : > { %v6440_v40 = vadd.f32 %v2767_v51, %v6269_v50  ;;  %v3064_v63 = vpop.f32.mrb[255].mxu1 }
 0x2f1   : > { %v2586_v52 = vpop.f32.mrb[232].mxu0 }
 0x2f2   : > { %v2772_v5 = vadd.f32 %v6369_v2, %v2586_v52  ;;  %v2588_v9 = vpop.f32.mrb[233].mxu0 }
 0x2f3   : > { %v6443_v15 = vpop.f32.mrb[0].mxu1  ;;  %v2589_v18 = vpop.f32.mrb[234].mxu0 }
 0x2f4   : > { %v6446_v35 = vadd.f32 %v2772_v5, %v6257_v31  ;;  %v2775_v1 = vadd.f32 %v6376_v32, %v2589_v18  ;;  %v3069_v36 = vpop.f32.mrb[1].mxu1  ;;  %v2591_v44 = vpop.f32.mrb[235].mxu0 }
 0x2f5   : > { %v6449_v25 = vpop.f32.mrb[2].mxu1 }
 0x2f6   : > { %v6452_v50 = vadd.f32 %v2775_v1, %v6264_v49  ;;  %v3072_v6 = vpop.f32.mrb[3].mxu1 }
 0x2f9   : > { %v2594_v53 = vpop.f32.mrb[236].mxu0 }
 0x2fa   : > { %v2780_v2 = vadd.f32 %v6364_v26, %v2594_v53  ;;  %v2596_v43 = vpop.f32.mrb[237].mxu0 }
 0x2fb   : > { %v6455_v54 = vpop.f32.mrb[4].mxu1  ;;  %v2597_v37 = vpop.f32.mrb[238].mxu0 }
 0x2fc   : > { %v6458_v31 = vadd.f32 %v2780_v2, %v6279_v38  ;;  %v2783_v32 = vadd.f32 %v6371_v16, %v2597_v37  ;;  %v3077_v28 = vpop.f32.mrb[5].mxu1  ;;  %v2599_v29 = vpop.f32.mrb[239].mxu0 }
 0x2fd   : > { %v6461_v58 = vpop.f32.mrb[6].mxu1 }
 0x2fe   : > { %v6464_v49 = vadd.f32 %v2783_v32, %v6287_v59  ;;  %v3080_v45 = vpop.f32.mrb[7].mxu1 }
 0x301   : > { %v2602_v51 = vpop.f32.mrb[240].mxu0 }
 0x302   : > { %v2788_v26 = vadd.f32 %v6381_v55, %v2602_v51  ;;  %v2604_v21 = vpop.f32.mrb[241].mxu0 }
 0x303   : > { %v6467_v19 = vpop.f32.mrb[8].mxu1  ;;  %v2605_v63 = vpop.f32.mrb[242].mxu0 }
 0x304   : > { %v6470_v38 = vadd.f32 %v2788_v26, %v6276_v42  ;;  %v2791_v16 = vadd.f32 %v6386_v60, %v2605_v63  ;;  %v3085_v52 = vpop.f32.mrb[9].mxu1  ;;  %v2607_v5 = vpop.f32.mrb[243].mxu0 }
 0x305   : > { %v6473_v9 = vpop.f32.mrb[10].mxu1 }
 0x306   : > { %v6476_v59 = vadd.f32 %v2791_v16, %v6282_v22  ;;  %v3088_v18 = vpop.f32.mrb[11].mxu1 }
 0x309   : > { %v2610_v1 = vpop.f32.mrb[244].mxu0 }
 0x30a   : > { %v2611_v36 = vpop.f32.mrb[245].mxu0 }
 0x30b   : > { %v6478_v55 = vpop.f32.mrb[12].mxu1  ;;  %v2612_v44 = vpop.f32.mrb[246].mxu0 }
 0x30c   : > { %v3093_v6 = vpop.f32.mrb[13].mxu1  ;;  %v2613_v53 = vpop.f32.mrb[247].mxu0 }
 0x30d   : > { %v6480_v2 = vpop.f32.mrb[14].mxu1  ;;  %v6494_v6 = vld [vmem:[%s6620_s2] ss:$0 sm:$0xff] }
 0x30e   : > { %v3096_v42 = vpop.f32.mrb[15].mxu1 }
 0x311   : > { %v4316_v43 = vpop.f32.mrb[248].mxu0 }
 0x312   : > { %v3212_v60 = vpop.f32.mrb[249].mxu0 }
 0x313   : > { %v6482_v37 = vpop.f32.mrb[16].mxu1  ;;  %v4317_v32 = vpop.f32.mrb[250].mxu0 }
 0x314   : > { %v3101_v28 = vpop.f32.mrb[17].mxu1  ;;  %v3214_v29 = vpop.f32.mrb[251].mxu0 }
 0x315   : > { %v6484_v22 = vpop.f32.mrb[18].mxu1 }
 0x316   : > { %v3104_v45 = vpop.f32.mrb[19].mxu1 }
 0x319   : > { %v4320_v51 = vpop.f32.mrb[252].mxu0 }
 0x31a   : > { %v3224_v26 = vpop.f32.mrb[253].mxu0 }
 0x31b   : > { %v6486_v21 = vpop.f32.mrb[20].mxu1  ;;  %v4321_v63 = vpop.f32.mrb[254].mxu0 }
 0x31c   : > { %v3109_v16 = vpop.f32.mrb[21].mxu1  ;;  %v3226_v52 = vpop.f32.mrb[255].mxu0 }
 0x31d   : > { %v6488_v5 = vpop.f32.mrb[22].mxu1 }
 0x31e   : > { %v3112_v18 = vpop.f32.mrb[23].mxu1 }
 0x321   : > { %v4324_v1 = vpop.f32.mrb[0].mxu0 }
 0x322   : > { %v3245_v36 = vadd.f32 %v4324_v1, %v6431_v11  ;;  %v3236_v44 = vpop.f32.mrb[1].mxu0 }
 0x323   : > { %v6496_v53 = vpop.f32.mrb[24].mxu1  ;;  %v3237_v42 = vadd.f32 %v3236_v44, %v6419_v13  ;;  %v4325_v43 = vpop.f32.mrb[2].mxu0 }
 0x324   : > { %v3365_v60 = vadd.f32 %v3245_v36, %v6321_v23  ;;  %v3117_v32 = vpop.f32.mrb[25].mxu1  ;;  %v3248_v28 = vadd.f32 %v4325_v43, %v6437_v34  ;;  %v3239_v29 = vpop.f32.mrb[3].mxu0 }
 0x325   : > { %v3363_v45 = vadd.f32 %v3237_v42, %v6315_v10  ;;  %v6502_v11 = vpop.f32.mrb[26].mxu1  ;;  %v3240_v51 = vadd.f32 %v3239_v29, %v6425_v48 }
 0x326   : > { %v3404_v26 = vadd.f32 %v6494_v6, %v3365_v60  ;;  %v3366_v63 = vadd.f32 %v3248_v28, %v6324_v3  ;;  %v3120_v16 = vpop.f32.mrb[27].mxu1 }
 0x327   : > { %v3402_v13 = vadd.f32 %v6494_v6, %v3363_v45  ;;  %v3364_v52 = vadd.f32 %v3240_v51, %v6318_v46 }
 0x328   : > { %v3405_v23 = vadd.f32 %v6494_v6, %v3366_v63  ;;  %v3436_v10 = vmax.f32 %v3404_v26, 0.0 }
 0x329   : > { %v3403_v34 = vadd.f32 %v6494_v6, %v3364_v52  ;;  %v4328_v18 = vpop.f32.mrb[4].mxu0  ;;  %v3434_v44 = vmax.f32 %v3402_v13, 0.0 }
 0x32a   : > { %v3437_v1 = vmax.f32 %v3405_v23, 0.0  ;;  %v3261_v36 = vadd.f32 %v4328_v18, %v6455_v54  ;;  %v3252_v48 = vpop.f32.mrb[5].mxu0 }
 0x32b   : > { %v3435_v42 = vmax.f32 %v3403_v34, 0.0  ;;  %v6512_v43 = vpop.f32.mrb[28].mxu1  ;;  %v3253_v3 = vadd.f32 %v3252_v48, %v6443_v15  ;;  %v4329_v60 = vpop.f32.mrb[6].mxu0 }
 0x32c   : > { %v3467_v32 = vmax.f32 %v3436_v10, %v3437_v1  ;;  %v3369_v46 = vadd.f32 %v3261_v36, %v6339_v17  ;;  %v3125_v28 = vpop.f32.mrb[29].mxu1  ;;  %v3264_v29 = vadd.f32 %v4329_v60, %v6461_v58  ;;  %v3255_v45 = vpop.f32.mrb[7].mxu0 }
 0x32d   : > { %v3466_v51 = vmax.f32 %v3434_v44, %v3435_v42  ;;  %v3367_v26 = vadd.f32 %v3253_v3, %v6329_v39  ;;  %v6519_v54 = vpop.f32.mrb[30].mxu1  ;;  %v3256_v63 = vadd.f32 %v3255_v45, %v6449_v25 }
 0x32e   : > { %v3408_v16 = vadd.f32 %v6494_v6, %v3369_v46  ;;  %v3370_v15 = vadd.f32 %v3264_v29, %v6346_v0  ;;  %v3128_v13 = vpop.f32.mrb[31].mxu1 }
 0x32f   : > { %v3482_v52 = vmax.f32 %v3466_v51, %v3467_v32  ;;  %v3406_v17 = vadd.f32 %v6494_v6, %v3367_v26  ;;  %v3368_v23 = vadd.f32 %v3256_v63, %v6334_v62 }
 0x330   : > { %v3409_v39 = vadd.f32 %v6494_v6, %v3370_v15  ;;  %v3440_v0 = vmax.f32 %v3408_v16, 0.0  ;;  %v6795_v15 = vld [vmem:[#allocation13_spill] sm:$0xff] }
 0x331   : > { %v3490_v25 = vpack.c.bf16 %v3482_v52, %v3482_v52  ;;  %v3407_v58 = vadd.f32 %v6494_v6, %v3368_v23  ;;  %v4332_v34 = vpop.f32.mrb[8].mxu0  ;;  %v3438_v62 = vmax.f32 %v3406_v17, 0.0 }
 0x332   : > { %v3441_v18 = vmax.f32 %v3409_v39, 0.0  ;;  %v3277_v10 = vadd.f32 %v4332_v34, %v6478_v55  ;;  %v3268_v1 = vpop.f32.mrb[9].mxu0 }
 0x333   : > { %3499 = vst.msk [vmem:[%s6529_s13] sm:$0xf] %vm3498_vm1, %v3490_v25  ;;  %v3439_v36 = vmax.f32 %v3407_v58, 0.0  ;;  %v6536_v48 = vpop.f32.mrb[32].mxu1  ;;  %v3269_v44 = vadd.f32 %v3268_v1, %v6467_v19  ;;  %v4333_v42 = vpop.f32.mrb[10].mxu0 }
 0x334   : > { %v3469_v3 = vmax.f32 %v3440_v0, %v3441_v18  ;;  %v3373_v60 = vadd.f32 %v3277_v10, %v6367_v61  ;;  %v3133_v32 = vpop.f32.mrb[33].mxu1  ;;  %v3280_v46 = vadd.f32 %v4333_v42, %v6480_v2  ;;  %v3271_v28 = vpop.f32.mrb[11].mxu0 }
 0x335   : > { %v3468_v29 = vmax.f32 %v3438_v62, %v3439_v36  ;;  %v3371_v55 = vadd.f32 %v3269_v44, %v6353_v7  ;;  %v6542_v45 = vpop.f32.mrb[34].mxu1  ;;  %v3272_v51 = vadd.f32 %v3271_v28, %v6473_v9 }
 0x336   : > { %v3412_v26 = vadd.f32 %v6494_v6, %v3373_v60  ;;  %v3374_v19 = vadd.f32 %v3280_v46, %v6374_v56  ;;  %v3136_v63 = vpop.f32.mrb[35].mxu1 }
 0x337   : > { %v3483_v16 = vmax.f32 %v3468_v29, %v3469_v3  ;;  %v3410_v61 = vadd.f32 %v6494_v6, %v3371_v55  ;;  %v3372_v13 = vadd.f32 %v3272_v51, %v6795_v15 }
 0x338   : > { %v3413_v2 = vadd.f32 %v6494_v6, %v3374_v19  ;;  %v3444_v23 = vmax.f32 %v3412_v26, 0.0 }
 0x339   : > { %v3491_v52 = vpack.c.bf16 %v3483_v16, %v3483_v16  ;;  %v3411_v7 = vadd.f32 %v6494_v6, %v3372_v13  ;;  %v4336_v17 = vpop.f32.mrb[12].mxu0  ;;  %v3442_v56 = vmax.f32 %v3410_v61, 0.0 }
 0x33a   : > { %v3445_v39 = vmax.f32 %v3413_v2, 0.0  ;;  %v3293_v9 = vadd.f32 %v4336_v17, %v6486_v21  ;;  %v3284_v25 = vpop.f32.mrb[13].mxu0 }
 0x33b   : > { %3500 = vst.msk [vmem:[%s6529_s13 + $0x4] sm:$0xf] %vm3498_vm1, %v3491_v52  ;;  %v3443_v58 = vmax.f32 %v3411_v7, 0.0  ;;  %v3139_v34 = vpop.f32.mrb[36].mxu1  ;;  %v3285_v0 = vadd.f32 %v3284_v25, %v6482_v37  ;;  %v4337_v18 = vpop.f32.mrb[14].mxu0 }
 0x33c   : > { %v3471_v10 = vmax.f32 %v3444_v23, %v3445_v39  ;;  %v3377_v1 = vadd.f32 %v3293_v9, %v6389_v41  ;;  %v3141_v62 = vpop.f32.mrb[37].mxu1  ;;  %v3296_v36 = vadd.f32 %v4337_v18, %v6488_v5  ;;  %v3287_v44 = vpop.f32.mrb[15].mxu0  ;;  %v6796_v41 = vld [vmem:[#allocation10_spill] sm:$0xff] }
 0x33d   : > { %v3470_v42 = vmax.f32 %v3442_v56, %v3443_v58  ;;  %v3375_v3 = vadd.f32 %v3285_v0, %v6379_v47  ;;  %v3142_v21 = vpop.f32.mrb[38].mxu1  ;;  %v3288_v60 = vadd.f32 %v3287_v44, %v6484_v22 }
 0x33e   : > { %v3416_v32 = vadd.f32 %v6494_v6, %v3377_v1  ;;  %v3378_v46 = vadd.f32 %v3296_v36, %v6392_v20  ;;  %v3144_v37 = vpop.f32.mrb[39].mxu1 }
 0x33f   : > { %v3484_v28 = vmax.f32 %v3470_v42, %v3471_v10  ;;  %v3414_v29 = vadd.f32 %v6494_v6, %v3375_v3  ;;  %v3376_v55 = vadd.f32 %v3288_v60, %v6796_v41 }
 0x340   : > { %v3417_v5 = vadd.f32 %v6494_v6, %v3378_v46  ;;  %v3448_v19 = vmax.f32 %v3416_v32, 0.0 }
 0x341   : > { %v3492_v51 = vpack.c.bf16 %v3484_v28, %v3484_v28  ;;  %v3415_v26 = vadd.f32 %v6494_v6, %v3376_v55  ;;  %v4340_v47 = vpop.f32.mrb[16].mxu0  ;;  %v3446_v20 = vmax.f32 %v3414_v29, 0.0 }
 0x342   : > { %v3449_v63 = vmax.f32 %v3417_v5, 0.0  ;;  %v3309_v22 = vadd.f32 %v4340_v47, %v6512_v43  ;;  %v3300_v16 = vpop.f32.mrb[17].mxu0 }
 0x343   : > { %3501 = vst.msk [vmem:[%s6529_s13 + $0x8] sm:$0xf] %vm3498_vm1, %v3492_v51  ;;  %v3447_v61 = vmax.f32 %v3415_v26, 0.0  ;;  %v3147_v15 = vpop.f32.mrb[40].mxu1  ;;  %v3301_v13 = vadd.f32 %v3300_v16, %v6496_v53  ;;  %v4341_v2 = vpop.f32.mrb[18].mxu0 }
 0x344   : > { %v3473_v52 = vmax.f32 %v3448_v19, %v3449_v63  ;;  %v3381_v7 = vadd.f32 %v3309_v22, %v6404_v57  ;;  %v3149_v17 = vpop.f32.mrb[41].mxu1  ;;  %v3312_v23 = vadd.f32 %v4341_v2, %v6519_v54  ;;  %v3303_v39 = vpop.f32.mrb[19].mxu0 }
 0x345   : > { %v3472_v9 = vmax.f32 %v3446_v20, %v3447_v61  ;;  %v3379_v25 = vadd.f32 %v3301_v13, %v6396_v27  ;;  %v3150_v43 = vpop.f32.mrb[42].mxu1  ;;  %v3304_v56 = vadd.f32 %v3303_v39, %v6502_v11 }
 0x346   : > { %v3420_v58 = vadd.f32 %v6494_v6, %v3381_v7  ;;  %v3382_v0 = vadd.f32 %v3312_v23, %v6408_v30  ;;  %v3152_v53 = vpop.f32.mrb[43].mxu1 }
 0x347   : > { %v3485_v18 = vmax.f32 %v3472_v9, %v3473_v52  ;;  %v3418_v10 = vadd.f32 %v6494_v6, %v3379_v25  ;;  %v3380_v57 = vadd.f32 %v3304_v56, %v6400_v8 }
 0x348   : > { %v3421_v54 = vadd.f32 %v6494_v6, %v3382_v0  ;;  %v3452_v36 = vmax.f32 %v3420_v58, 0.0 }
 0x349   : > { %v3493_v1 = vpack.c.bf16 %v3485_v18, %v3485_v18  ;;  %v3419_v62 = vadd.f32 %v6494_v6, %v3380_v57  ;;  %v4344_v27 = vpop.f32.mrb[20].mxu0  ;;  %v3450_v3 = vmax.f32 %v3418_v10, 0.0 }
 0x34a   : > { %v3453_v44 = vmax.f32 %v3421_v54, 0.0  ;;  %v3325_v42 = vadd.f32 %v4344_v27, %v3139_v34  ;;  %v3316_v11 = vpop.f32.mrb[21].mxu0 }
 0x34b   : > { %3502 = vst.msk [vmem:[%s6529_s13 + $0xc] sm:$0xf] %vm3498_vm1, %v3493_v1  ;;  %v3451_v30 = vmax.f32 %v3419_v62, 0.0  ;;  %v3155_v60 = vpop.f32.mrb[44].mxu1  ;;  %v3317_v32 = vadd.f32 %v3316_v11, %v6536_v48  ;;  %v4345_v46 = vpop.f32.mrb[22].mxu0 }
 0x34c   : > { %v3475_v37 = vmax.f32 %v3452_v36, %v3453_v44  ;;  %v3385_v8 = vadd.f32 %v3325_v42, %v6422_v14  ;;  %v3157_v28 = vpop.f32.mrb[45].mxu1  ;;  %v3328_v29 = vadd.f32 %v4345_v46, %v3142_v21  ;;  %v3319_v41 = vpop.f32.mrb[23].mxu0 }
 0x34d   : > { %v3474_v55 = vmax.f32 %v3450_v3, %v3451_v30  ;;  %v3383_v5 = vadd.f32 %v3317_v32, %v6412_v24  ;;  %v3158_v51 = vpop.f32.mrb[46].mxu1  ;;  %v3320_v34 = vadd.f32 %v3319_v41, %v6542_v45 }
 0x34e   : > { %v3424_v26 = vadd.f32 %v6494_v6, %v3385_v8  ;;  %v3386_v47 = vadd.f32 %v3328_v29, %v6428_v4  ;;  %v3160_v19 = vpop.f32.mrb[47].mxu1 }
 0x34f   : > { %v3486_v48 = vmax.f32 %v3474_v55, %v3475_v37  ;;  %v3422_v63 = vadd.f32 %v6494_v6, %v3383_v5  ;;  %v3384_v14 = vadd.f32 %v3320_v34, %v6416_v12 }
 0x350   : > { %v3425_v21 = vadd.f32 %v6494_v6, %v3386_v47  ;;  %v3456_v20 = vmax.f32 %v3424_v26, 0.0 }
 0x351   : > { %v3494_v22 = vpack.c.bf16 %v3486_v48, %v3486_v48  ;;  %v3423_v16 = vadd.f32 %v6494_v6, %v3384_v14  ;;  %v4348_v24 = vpop.f32.mrb[24].mxu0  ;;  %v3454_v2 = vmax.f32 %v3422_v63, 0.0 }
 0x352   : > { %v3457_v61 = vmax.f32 %v3425_v21, 0.0  ;;  %v3341_v13 = vadd.f32 %v4348_v24, %v3155_v60  ;;  %v3332_v45 = vpop.f32.mrb[25].mxu0 }
 0x353   : > { %3503 = vst.msk [vmem:[%s6529_s13 + $0x10] sm:$0xf] %vm3498_vm1, %v3494_v22  ;;  %v3455_v4 = vmax.f32 %v3423_v16, 0.0  ;;  %v3163_v52 = vpop.f32.mrb[48].mxu1  ;;  %v3333_v7 = vadd.f32 %v3332_v45, %v3147_v15  ;;  %v4349_v17 = vpop.f32.mrb[26].mxu0 }
 0x354   : > { %v3477_v23 = vmax.f32 %v3456_v20, %v3457_v61  ;;  %v3389_v12 = vadd.f32 %v3341_v13, %v6446_v35  ;;  %v3165_v39 = vpop.f32.mrb[49].mxu1  ;;  %v3344_v9 = vadd.f32 %v4349_v17, %v3158_v51  ;;  %v3335_v25 = vpop.f32.mrb[27].mxu0 }
 0x355   : > { %v3476_v56 = vmax.f32 %v3454_v2, %v3455_v4  ;;  %v3387_v58 = vadd.f32 %v3333_v7, %v6434_v33  ;;  %v3166_v0 = vpop.f32.mrb[50].mxu1  ;;  %v3336_v53 = vadd.f32 %v3335_v25, %v3150_v43 }
 0x356   : > { %v3428_v18 = vadd.f32 %v6494_v6, %v3389_v12  ;;  %v3390_v10 = vadd.f32 %v3344_v9, %v6452_v50  ;;  %v3168_v57 = vpop.f32.mrb[51].mxu1 }
 0x357   : > { %v3487_v54 = vmax.f32 %v3476_v56, %v3477_v23  ;;  %v3426_v15 = vadd.f32 %v6494_v6, %v3387_v58  ;;  %v3388_v1 = vadd.f32 %v3336_v53, %v6440_v40 }
 0x358   : > { %v3429_v35 = vadd.f32 %v6494_v6, %v3390_v10  ;;  %v3460_v33 = vmax.f32 %v3428_v18, 0.0 }
 0x359   : > { %v3495_v62 = vpack.c.bf16 %v3487_v54, %v3487_v54  ;;  %v3427_v27 = vadd.f32 %v6494_v6, %v3388_v1  ;;  %v4352_v36 = vpop.f32.mrb[28].mxu0  ;;  %v3458_v43 = vmax.f32 %v3426_v15, 0.0 }
 0x35a   : > { %v3461_v44 = vmax.f32 %v3429_v35, 0.0  ;;  %v3348_v42 = vpop.f32.mrb[29].mxu0 }
 0x35b   : > { %3504 = vst.msk [vmem:[%s6529_s13 + $0x14] sm:$0xf] %vm3498_vm1, %v3495_v62  ;;  %v3459_v11 = vmax.f32 %v3427_v27, 0.0  ;;  %v3171_v50 = vpop.f32.mrb[52].mxu1  ;;  %v3349_v3 = vadd.f32 %v3348_v42, %v3163_v52  ;;  %v4353_v30 = vpop.f32.mrb[30].mxu0 }
 0x35c   : > { %v3479_v60 = vmax.f32 %v3460_v33, %v3461_v44  ;;  %v3357_v32 = vadd.f32 %v4352_v36, %v3171_v50  ;;  %v3173_v46 = vpop.f32.mrb[53].mxu1  ;;  %v3351_v40 = vpop.f32.mrb[31].mxu0 }
 0x35d   : > { %v3478_v37 = vmax.f32 %v3458_v43, %v3459_v11  ;;  %v3391_v8 = vadd.f32 %v3349_v3, %v6458_v31  ;;  %v3174_v28 = vpop.f32.mrb[54].mxu1  ;;  %v3352_v29 = vadd.f32 %v3351_v40, %v3166_v0 }
 0x35e   : > { %v3393_v41 = vadd.f32 %v3357_v32, %v6470_v38  ;;  %v3360_v55 = vadd.f32 %v4353_v30, %v3174_v28  ;;  %v3176_v5 = vpop.f32.mrb[55].mxu1 }
 0x35f   : > { %v3488_v51 = vmax.f32 %v3478_v37, %v3479_v60  ;;  %v3430_v34 = vadd.f32 %v6494_v6, %v3391_v8  ;;  %v3392_v26 = vadd.f32 %v3352_v29, %v6464_v49 }
 0x360   : > { %v3432_v47 = vadd.f32 %v6494_v6, %v3393_v41  ;;  %v3394_v19 = vadd.f32 %v3360_v55, %v6476_v59 }
 0x361   : > { %v3496_v48 = vpack.c.bf16 %v3488_v51, %v3488_v51  ;;  %v3431_v63 = vadd.f32 %v6494_v6, %v3392_v26  ;;  %v3462_v38 = vmax.f32 %v3430_v34, 0.0 }
 0x362   : > { %v3433_v31 = vadd.f32 %v6494_v6, %v3394_v19  ;;  %v3464_v21 = vmax.f32 %v3432_v47, 0.0 }
 0x363   : > { %3505 = vst.msk [vmem:[%s6529_s13 + $0x18] sm:$0xf] %vm3498_vm1, %v3496_v48  ;;  %v3463_v14 = vmax.f32 %v3431_v63, 0.0 }
 0x364   : > { %v3465_v22 = vmax.f32 %v3433_v31, 0.0 }
 0x365   : > { %v3480_v16 = vmax.f32 %v3462_v38, %v3463_v14 }
 0x366   : > { %v3481_v24 = vmax.f32 %v3464_v21, %v3465_v22 }
 0x368   : > { %v3489_v20 = vmax.f32 %v3480_v16, %v3481_v24 }
 0x36a   : > { %v3497_v61 = vpack.c.bf16 %v3489_v20, %v3489_v20 }
 0x36c   : > { %3506 = vst.msk [vmem:[%s6529_s13 + $0x1c] sm:$0xf] %vm3498_vm1, %v3497_v61 }
 0x36d PF: > { %s13_s12 = sadd.s32 1, %s4634_s12  }
 0x36e   : > { %p10_p4 = scmp.ge.s32.totalorder %s13_s12, 4  }
 0x370   :  { %12 = sbr.rel (!%p10_p4) target bundleno = 1 (0x1), region = 66 }

// kernel: my_cnn_forward.5
= control target key start
LH: loop header
LB: loop body
LE: loop exit
PB: predicated region body
PF: predicated region fallthrough
CT: control target
= control target key end

     0   :  { %vm7083_vm0 = vcmask 523264   ;;  %s12402_s1 = inlined_call_operand.vmem [shape: bf16[4096,384], index: 1, kind: input, shape index: {}]   ;;  %s12403_s0 = inlined_call_operand.vmem [shape: bf16[8,4096], index: 0, kind: input, shape index: {}]   ;;  %s12404_s2 = inlined_call_operand.vmem [shape: f32[1,384], index: 2, kind: input, shape index: {}]   ;;  %s12405_s3 = inlined_call_operand.vmem [shape: bf16[384,192], index: 3, kind: input, shape index: {}]   ;;  %s12406_s5 = inlined_call_operand.vmem [shape: bf16[192,128], index: 5, kind: input, shape index: {}]   ;;  %s12407_s4 = inlined_call_operand.vmem [shape: f32[1,192], index: 4, kind: input, shape index: {}]   ;;  %s12408_s6 = inlined_call_operand.vmem [shape: f32[1,128], index: 6, kind: input, shape index: {}]   ;;  %s12409_s7 = inlined_call_operand.vmem [shape: f32[8,128], index: 7, kind: output, shape index: {}]  }
   0x1   :  { %v8413_v0 = vld [vmem:[%s12402_s1 + $0x4] ss:$12 sps:$4 sm:$0xff]   ;;  %v8417_v2 = vld [vmem:[%s12402_s1] ss:$12 sps:$4 sm:$0xff]   ;;  %v8419_v4 = vld [vmem:[%s12402_s1 + $0x1c] ss:$12 sps:$4 sm:$0xff]  }
   0x2   :  { %v8415_v1 = vld [vmem:[%s12402_s1 + $0x484] ss:$12 sps:$4 sm:$0xff]   ;;  %5292 = vmatprep.subr.bf16.mxu1 %v8413_v0  ;;  %v8418_v3 = vld [vmem:[%s12402_s1 + $0x480] ss:$12 sps:$4 sm:$0xff]   ;;  %v8421_v5 = vld [vmem:[%s12402_s1 + $0x49c] ss:$12 sps:$4 sm:$0xff]  }
   0x3   :  { %5415 = vmatprep.subr.bf16.mxu0 %v8415_v1  ;;  %5293 = vmatpush1.bf16.msra.mxu1 %v8417_v2  ;;  %v8423_v6 = vld [vmem:[%s12402_s1 + $0x18] ss:$12 sps:$4 sm:$0xff]   ;;  %v8425_v8 = vld [vmem:[%s12402_s1 + $0x34] ss:$12 sps:$4 sm:$0xff]   ;;  %v8429_v10 = vld [vmem:[%s12402_s1 + $0x30] ss:$12 sps:$4 sm:$0xff]  }
   0x4   :  { %5416 = vmatpush1.bf16.msra.mxu0 %v8418_v3  ;;  %5294 = vmatprep.subr.bf16.mxu1 %v8419_v4  ;;  %v8424_v7 = vld [vmem:[%s12402_s1 + $0x498] ss:$12 sps:$4 sm:$0xff]   ;;  %v8427_v9 = vld [vmem:[%s12402_s1 + $0x4b4] ss:$12 sps:$4 sm:$0xff]   ;;  %v8430_v11 = vld [vmem:[%s12402_s1 + $0x4b0] ss:$12 sps:$4 sm:$0xff]  }
   0x5   :  { %5417 = vmatprep.subr.bf16.mxu0 %v8421_v5  ;;  %v8431_v12 = vld [vmem:[%s12402_s1 + $0x4c] ss:$12 sps:$4 sm:$0xff]   ;;  %v8435_v14 = vld [vmem:[%s12402_s1 + $0x48] ss:$12 sps:$4 sm:$0xff]   ;;  %v8437_v16 = vld [vmem:[%s12402_s1 + $0x64] ss:$12 sps:$4 sm:$0xff]  }
   0x6   :  { %v8433_v13 = vld [vmem:[%s12402_s1 + $0x4cc] ss:$12 sps:$4 sm:$0xff]   ;;  %v8436_v15 = vld [vmem:[%s12402_s1 + $0x4c8] ss:$12 sps:$4 sm:$0xff]   ;;  %v8439_v17 = vld [vmem:[%s12402_s1 + $0x4e4] ss:$12 sps:$4 sm:$0xff]  }
   0x7   :  { %5295 = vmatpush1.bf16.msra.mxu1 %v8423_v6  ;;  %v8441_v18 = vld [vmem:[%s12402_s1 + $0x60] ss:$12 sps:$4 sm:$0xff]   ;;  %v8443_v20 = vld [vmem:[%s12402_s1 + $0x7c] ss:$12 sps:$4 sm:$0xff]   ;;  %v8447_v22 = vld [vmem:[%s12402_s1 + $0x78] ss:$12 sps:$4 sm:$0xff]  }
   0x8   :  { %5418 = vmatpush1.bf16.msra.mxu0 %v8424_v7  ;;  %5296 = vmatprep.subr.bf16.mxu1 %v8425_v8  ;;  %v8442_v19 = vld [vmem:[%s12402_s1 + $0x4e0] ss:$12 sps:$4 sm:$0xff]   ;;  %v8445_v21 = vld [vmem:[%s12402_s1 + $0x4fc] ss:$12 sps:$4 sm:$0xff]   ;;  %v8448_v23 = vld [vmem:[%s12402_s1 + $0x4f8] ss:$12 sps:$4 sm:$0xff]  }
   0x9   :  { %5419 = vmatprep.subr.bf16.mxu0 %v8427_v9  ;;  %v8449_v24 = vld [vmem:[%s12402_s1 + $0x94] ss:$12 sps:$4 sm:$0xff]   ;;  %v8453_v26 = vld [vmem:[%s12402_s1 + $0x90] ss:$12 sps:$4 sm:$0xff]   ;;  %v8455_v28 = vld [vmem:[%s12402_s1 + $0xac] ss:$12 sps:$4 sm:$0xff]  }
   0xa   :  { %v8451_v25 = vld [vmem:[%s12402_s1 + $0x514] ss:$12 sps:$4 sm:$0xff]   ;;  %v8454_v27 = vld [vmem:[%s12402_s1 + $0x510] ss:$12 sps:$4 sm:$0xff]   ;;  %v8457_v29 = vld [vmem:[%s12402_s1 + $0x52c] ss:$12 sps:$4 sm:$0xff]  }
   0xb   :  { %5297 = vmatpush1.bf16.msra.mxu1 %v8429_v10  ;;  %v8459_v30 = vld [vmem:[%s12402_s1 + $0xa8] ss:$12 sps:$4 sm:$0xff]   ;;  %v8461_v32 = vld [vmem:[%s12402_s1 + $0xc4] ss:$12 sps:$4 sm:$0xff]   ;;  %v8465_v34 = vld [vmem:[%s12402_s1 + $0xc0] ss:$12 sps:$4 sm:$0xff]  }
   0xc   :  { %5420 = vmatpush1.bf16.msra.mxu0 %v8430_v11  ;;  %5298 = vmatprep.subr.bf16.mxu1 %v8431_v12  ;;  %v8460_v31 = vld [vmem:[%s12402_s1 + $0x528] ss:$12 sps:$4 sm:$0xff]   ;;  %v8463_v33 = vld [vmem:[%s12402_s1 + $0x544] ss:$12 sps:$4 sm:$0xff]   ;;  %v8466_v35 = vld [vmem:[%s12402_s1 + $0x540] ss:$12 sps:$4 sm:$0xff]  }
   0xd   :  { %5421 = vmatprep.subr.bf16.mxu0 %v8433_v13  ;;  %v8467_v36 = vld [vmem:[%s12402_s1 + $0xdc] ss:$12 sps:$4 sm:$0xff]   ;;  %v8471_v38 = vld [vmem:[%s12402_s1 + $0xd8] ss:$12 sps:$4 sm:$0xff]   ;;  %v8473_v40 = vld [vmem:[%s12402_s1 + $0xf4] ss:$12 sps:$4 sm:$0xff]  }
   0xe   :  { %v8469_v37 = vld [vmem:[%s12402_s1 + $0x55c] ss:$12 sps:$4 sm:$0xff]   ;;  %v8472_v39 = vld [vmem:[%s12402_s1 + $0x558] ss:$12 sps:$4 sm:$0xff]   ;;  %v8475_v41 = vld [vmem:[%s12402_s1 + $0x574] ss:$12 sps:$4 sm:$0xff]  }
   0xf   :  { %5299 = vmatpush1.bf16.msra.mxu1 %v8435_v14  ;;  %v8477_v42 = vld [vmem:[%s12402_s1 + $0xf0] ss:$12 sps:$4 sm:$0xff]   ;;  %v8479_v44 = vld [vmem:[%s12402_s1 + $0x10c] ss:$12 sps:$4 sm:$0xff]   ;;  %v27_v46 = vld [vmem:[%s12403_s0] sm:$0xff] }
  0x10   :  { %5422 = vmatpush1.bf16.msra.mxu0 %v8436_v15  ;;  %5300 = vmatprep.subr.bf16.mxu1 %v8437_v16  ;;  %v8478_v43 = vld [vmem:[%s12402_s1 + $0x570] ss:$12 sps:$4 sm:$0xff]   ;;  %v8481_v45 = vld [vmem:[%s12402_s1 + $0x58c] ss:$12 sps:$4 sm:$0xff]   ;;  %v8483_v47 = vld [vmem:[%s12402_s1 + $0x108] ss:$12 sps:$4 sm:$0xff]   ;;  %v9739_v48 = vcombine.high %v27_v46, %v27_v46  ;;  %v9805_v6 = vcombine.low %v27_v46, %v27_v46 }
  0x11   :  { %5423 = vmatprep.subr.bf16.mxu0 %v8439_v17  ;;  %v8484_v49 = vld [vmem:[%s12402_s1 + $0x588] ss:$12 sps:$4 sm:$0xff]   ;;  %v30_v50 = vld [vmem:[%s12403_s0 + $0x18] sm:$0xff]  ;;  %v8485_v51 = vld [vmem:[%s12402_s1 + $0x124] ss:$12 sps:$4 sm:$0xff]  }
  0x12   :  { %v8487_v52 = vld [vmem:[%s12402_s1 + $0x5a4] ss:$12 sps:$4 sm:$0xff]   ;;  %v9753_v53 = vcombine.high %v30_v50, %v30_v50  ;;  %5324 = vmatprep.mubr.bf16.mxu1 %v9739_v48  ;;  %v8489_v54 = vld [vmem:[%s12402_s1 + $0x120] ss:$12 sps:$4 sm:$0xff]   ;;  %v8491_v56 = vld [vmem:[%s12402_s1 + $0x13c] ss:$12 sps:$4 sm:$0xff]   ;;  %v9807_v7 = vcombine.low %v30_v50, %v30_v50 }
  0x13   :  { %5301 = vmatpush1.bf16.msra.mxu1 %v8441_v18  ;;  %v8490_v55 = vld [vmem:[%s12402_s1 + $0x5a0] ss:$12 sps:$4 sm:$0xff]   ;;  %v8493_v57 = vld [vmem:[%s12402_s1 + $0x5bc] ss:$12 sps:$4 sm:$0xff]   ;;  %v8495_v58 = vld [vmem:[%s12402_s1 + $0x138] ss:$12 sps:$4 sm:$0xff]  }
  0x14   :  { %5424 = vmatpush1.bf16.msra.mxu0 %v8442_v19  ;;  %5302 = vmatprep.subr.bf16.mxu1 %v8443_v20  ;;  %v8496_v59 = vld [vmem:[%s12402_s1 + $0x5b8] ss:$12 sps:$4 sm:$0xff]   ;;  %v8497_v60 = vld [vmem:[%s12402_s1 + $0x154] ss:$12 sps:$4 sm:$0xff]   ;;  %v8501_v62 = vld [vmem:[%s12402_s1 + $0x150] ss:$12 sps:$4 sm:$0xff]  }
  0x15   :  { %5425 = vmatprep.subr.bf16.mxu0 %v8445_v21  ;;  %5447 = vmatprep.mubr.bf16.mxu0 %v9753_v53  ;;  %v8499_v61 = vld [vmem:[%s12402_s1 + $0x5d4] ss:$12 sps:$4 sm:$0xff]   ;;  %v8502_v63 = vld [vmem:[%s12402_s1 + $0x5d0] ss:$12 sps:$4 sm:$0xff]   ;;  %v8503_v0 = vld [vmem:[%s12402_s1 + $0x16c] ss:$12 sps:$4 sm:$0xff]  }
  0x16   :  { %v8505_v1 = vld [vmem:[%s12402_s1 + $0x5ec] ss:$12 sps:$4 sm:$0xff]   ;;  %v8507_v2 = vld [vmem:[%s12402_s1 + $0x168] ss:$12 sps:$4 sm:$0xff]   ;;  %v8513_v4 = vld [vmem:[%s12402_s1 + $0x184] ss:$12 sps:$4 sm:$0xff]  }
  0x17   :  { %5303 = vmatpush1.bf16.msra.mxu1 %v8447_v22  ;;  %v8508_v3 = vld [vmem:[%s12402_s1 + $0x5e8] ss:$12 sps:$4 sm:$0xff]   ;;  %v8518_v5 = vld [vmem:[%s12402_s1 + $0x604] ss:$12 sps:$4 sm:$0xff]   ;;  %v8511_v8 = vld [vmem:[%s12402_s1 + $0x180] ss:$12 sps:$4 sm:$0xff]  }
  0x18   :  { %5426 = vmatpush1.bf16.msra.mxu0 %v8448_v23  ;;  %5304 = vmatprep.subr.bf16.mxu1 %v8449_v24  ;;  %v8516_v9 = vld [vmem:[%s12402_s1 + $0x600] ss:$12 sps:$4 sm:$0xff]   ;;  %v8521_v10 = vld [vmem:[%s12402_s1 + $0x19c] ss:$12 sps:$4 sm:$0xff]   ;;  %v8519_v12 = vld [vmem:[%s12402_s1 + $0x198] ss:$12 sps:$4 sm:$0xff]  }
  0x19   :  { %5427 = vmatprep.subr.bf16.mxu0 %v8451_v25  ;;  %v8524_v11 = vld [vmem:[%s12402_s1 + $0x61c] ss:$12 sps:$4 sm:$0xff]   ;;  %v8522_v13 = vld [vmem:[%s12402_s1 + $0x618] ss:$12 sps:$4 sm:$0xff]   ;;  %v8527_v14 = vld [vmem:[%s12402_s1 + $0x1b4] ss:$12 sps:$4 sm:$0xff]  }
  0x1a   :  { %v8530_v15 = vld [vmem:[%s12402_s1 + $0x634] ss:$12 sps:$4 sm:$0xff]   ;;  %v8525_v16 = vld [vmem:[%s12402_s1 + $0x1b0] ss:$12 sps:$4 sm:$0xff]   ;;  %v8533_v18 = vld [vmem:[%s12402_s1 + $0x1cc] ss:$12 sps:$4 sm:$0xff]  }
  0x1b   :  { %5305 = vmatpush1.bf16.msra.mxu1 %v8453_v26  ;;  %v8528_v17 = vld [vmem:[%s12402_s1 + $0x630] ss:$12 sps:$4 sm:$0xff]   ;;  %v8536_v19 = vld [vmem:[%s12402_s1 + $0x64c] ss:$12 sps:$4 sm:$0xff]   ;;  %v8531_v20 = vld [vmem:[%s12402_s1 + $0x1c8] ss:$12 sps:$4 sm:$0xff]  }
  0x1c   :  { %5428 = vmatpush1.bf16.msra.mxu0 %v8454_v27  ;;  %5306 = vmatprep.subr.bf16.mxu1 %v8455_v28  ;;  %v8534_v21 = vld [vmem:[%s12402_s1 + $0x648] ss:$12 sps:$4 sm:$0xff]   ;;  %v8539_v22 = vld [vmem:[%s12402_s1 + $0x1e4] ss:$12 sps:$4 sm:$0xff]   ;;  %v8537_v24 = vld [vmem:[%s12402_s1 + $0x1e0] ss:$12 sps:$4 sm:$0xff]  }
  0x1d   :  { %5429 = vmatprep.subr.bf16.mxu0 %v8457_v29  ;;  %v8542_v23 = vld [vmem:[%s12402_s1 + $0x664] ss:$12 sps:$4 sm:$0xff]   ;;  %v8540_v25 = vld [vmem:[%s12402_s1 + $0x660] ss:$12 sps:$4 sm:$0xff]   ;;  %v8545_v26 = vld [vmem:[%s12402_s1 + $0x1fc] ss:$12 sps:$4 sm:$0xff]  }
  0x1e   :  { %v8548_v27 = vld [vmem:[%s12402_s1 + $0x67c] ss:$12 sps:$4 sm:$0xff]   ;;  %v8543_v28 = vld [vmem:[%s12402_s1 + $0x1f8] ss:$12 sps:$4 sm:$0xff]  }
  0x1f   :  { %5307 = vmatpush1.bf16.msra.mxu1 %v8459_v30  ;;  %v8546_v29 = vld [vmem:[%s12402_s1 + $0x678] ss:$12 sps:$4 sm:$0xff]   ;;  %v8551_v30 = vld [vmem:[%s12402_s1 + $0x214] ss:$12 sps:$4 sm:$0xff]   ;;  %v8569_v46 = vld [vmem:[%s12402_s1 + $0x25c] ss:$12 sps:$4 sm:$0xff]  }
  0x20   :  { %5430 = vmatpush1.bf16.msra.mxu0 %v8460_v31  ;;  %5308 = vmatprep.subr.bf16.mxu1 %v8461_v32  ;;  %v8554_v31 = vld [vmem:[%s12402_s1 + $0x694] ss:$12 sps:$4 sm:$0xff]   ;;  %v9886_v32 = vld [vmem:[%s12403_s0 + $0x8] sm:$0xff]  ;;  %v8570_v50 = vld [vmem:[%s12402_s1 + $0x6d8] ss:$12 sps:$4 sm:$0xff]  }
  0x21   :  { %5431 = vmatprep.subr.bf16.mxu0 %v8463_v33  ;;  %v8549_v33 = vld [vmem:[%s12402_s1 + $0x210] ss:$12 sps:$4 sm:$0xff]  }
  0x23   :  { %5309 = vmatpush1.bf16.msra.mxu1 %v8465_v34  ;;  %v8552_v34 = vld [vmem:[%s12402_s1 + $0x690] ss:$12 sps:$4 sm:$0xff]  }
  0x24   :  { %5432 = vmatpush1.bf16.msra.mxu0 %v8466_v35  ;;  %5310 = vmatprep.subr.bf16.mxu1 %v8467_v36  ;;  %v9896_v35 = vcombine.high %v9886_v32, %v9886_v32  ;;  %v9901_v36 = vld [vmem:[%s12403_s0 + $0x20] sm:$0xff] }
  0x25   :  { %5433 = vmatprep.subr.bf16.mxu0 %v8469_v37  ;;  %v8557_v37 = vld [vmem:[%s12402_s1 + $0x22c] ss:$12 sps:$4 sm:$0xff]  }
  0x27   :  { %5311 = vmatpush1.bf16.msra.mxu1 %v8471_v38  ;;  %v9908_v38 = vcombine.high %v9901_v36, %v9901_v36 }
  0x28   :  { %5434 = vmatpush1.bf16.msra.mxu0 %v8472_v39  ;;  %5312 = vmatprep.subr.bf16.mxu1 %v8473_v40  ;;  %v8560_v39 = vld [vmem:[%s12402_s1 + $0x6ac] ss:$12 sps:$4 sm:$0xff]   ;;  %v8555_v40 = vld [vmem:[%s12402_s1 + $0x228] ss:$12 sps:$4 sm:$0xff]  }
  0x29   :  { %5435 = vmatprep.subr.bf16.mxu0 %v8475_v41  ;;  %v8558_v41 = vld [vmem:[%s12402_s1 + $0x6a8] ss:$12 sps:$4 sm:$0xff]  }
  0x2b   :  { %5313 = vmatpush1.bf16.msra.mxu1 %v8477_v42  ;;  %v8563_v42 = vld [vmem:[%s12402_s1 + $0x244] ss:$12 sps:$4 sm:$0xff]  }
  0x2c   :  { %5436 = vmatpush1.bf16.msra.mxu0 %v8478_v43  ;;  %5314 = vmatprep.subr.bf16.mxu1 %v8479_v44  ;;  %v8566_v43 = vld [vmem:[%s12402_s1 + $0x6c4] ss:$12 sps:$4 sm:$0xff]   ;;  %v8561_v44 = vld [vmem:[%s12402_s1 + $0x240] ss:$12 sps:$4 sm:$0xff]  }
  0x2d   :  { %5437 = vmatprep.subr.bf16.mxu0 %v8481_v45  ;;  %v8564_v45 = vld [vmem:[%s12402_s1 + $0x6c0] ss:$12 sps:$4 sm:$0xff]  }
  0x2f   :  { %5315 = vmatpush1.bf16.msra.mxu1 %v8483_v47  ;;  %v8572_v47 = vld [vmem:[%s12402_s1 + $0x6dc] ss:$12 sps:$4 sm:$0xff]  }
  0x30   :  { %5438 = vmatpush1.bf16.msra.mxu0 %v8484_v49  ;;  %5316 = vmatprep.subr.bf16.mxu1 %v8485_v51  ;;  %v8567_v49 = vld [vmem:[%s12402_s1 + $0x258] ss:$12 sps:$4 sm:$0xff]   ;;  %v8575_v51 = vld [vmem:[%s12402_s1 + $0x274] ss:$12 sps:$4 sm:$0xff]  }
  0x31   :  { %5439 = vmatprep.subr.bf16.mxu0 %v8487_v52  ;;  %v8578_v52 = vld [vmem:[%s12402_s1 + $0x6f4] ss:$12 sps:$4 sm:$0xff]  }
  0x33   :  { %5317 = vmatpush1.bf16.msra.mxu1 %v8489_v54  ;;  %v8573_v54 = vld [vmem:[%s12402_s1 + $0x270] ss:$12 sps:$4 sm:$0xff]  }
  0x34   :  { %5440 = vmatpush1.bf16.msra.mxu0 %v8490_v55  ;;  %5318 = vmatprep.subr.bf16.mxu1 %v8491_v56  ;;  %v8576_v55 = vld [vmem:[%s12402_s1 + $0x6f0] ss:$12 sps:$4 sm:$0xff]   ;;  %v8581_v56 = vld [vmem:[%s12402_s1 + $0x28c] ss:$12 sps:$4 sm:$0xff]  }
  0x35   :  { %5441 = vmatprep.subr.bf16.mxu0 %v8493_v57  ;;  %v8584_v57 = vld [vmem:[%s12402_s1 + $0x70c] ss:$12 sps:$4 sm:$0xff]  }
  0x37   :  { %5319 = vmatpush1.bf16.msra.mxu1 %v8495_v58  ;;  %v8579_v58 = vld [vmem:[%s12402_s1 + $0x288] ss:$12 sps:$4 sm:$0xff]  }
  0x38   :  { %5442 = vmatpush1.bf16.msra.mxu0 %v8496_v59  ;;  %5320 = vmatprep.subr.bf16.mxu1 %v8497_v60  ;;  %v8582_v59 = vld [vmem:[%s12402_s1 + $0x708] ss:$12 sps:$4 sm:$0xff]   ;;  %v8587_v60 = vld [vmem:[%s12402_s1 + $0x2a4] ss:$12 sps:$4 sm:$0xff]  }
  0x39   :  { %5443 = vmatprep.subr.bf16.mxu0 %v8499_v61  ;;  %v8590_v61 = vld [vmem:[%s12402_s1 + $0x724] ss:$12 sps:$4 sm:$0xff]  }
  0x3b   :  { %5321 = vmatpush1.bf16.msra.mxu1 %v8501_v62  ;;  %v8585_v62 = vld [vmem:[%s12402_s1 + $0x2a0] ss:$12 sps:$4 sm:$0xff]  }
  0x3c   :  { %5444 = vmatpush1.bf16.msra.mxu0 %v8502_v63  ;;  %5322 = vmatprep.subr.bf16.mxu1 %v8503_v0  ;;  %v8588_v63 = vld [vmem:[%s12402_s1 + $0x720] ss:$12 sps:$4 sm:$0xff]   ;;  %v8593_v0 = vld [vmem:[%s12402_s1 + $0x2bc] ss:$12 sps:$4 sm:$0xff]  }
  0x3d   :  { %5445 = vmatprep.subr.bf16.mxu0 %v8505_v1  ;;  %v8596_v1 = vld [vmem:[%s12402_s1 + $0x73c] ss:$12 sps:$4 sm:$0xff]  }
  0x3f   :  { %5323 = vmatpush1.bf16.msra.mxu1 %v8507_v2  ;;  %v8591_v2 = vld [vmem:[%s12402_s1 + $0x2b8] ss:$12 sps:$4 sm:$0xff]  }
  0x40   :  { %5446 = vmatpush1.bf16.msra.mxu0 %v8508_v3  ;;  %5333 = vmatprep.subr.bf16.mxu1 %v8513_v4  ;;  %v8594_v3 = vld [vmem:[%s12402_s1 + $0x738] ss:$12 sps:$4 sm:$0xff]   ;;  %v8599_v4 = vld [vmem:[%s12402_s1 + $0x2d4] ss:$12 sps:$4 sm:$0xff]  }
  0x41   :  { %5456 = vmatprep.subr.bf16.mxu0 %v8518_v5  ;;  %v8602_v5 = vld [vmem:[%s12402_s1 + $0x754] ss:$12 sps:$4 sm:$0xff]  }
  0x42   :  { %5325 = vmatmul.mubr.bf16.vlgmr.msra.gmra.mrb[0].mxu1 %v9805_v6 }
  0x43   :  { %5448 = vmatmul.mubr.bf16.vlgmr.msra.gmra.mrb[0].mxu0 %v9807_v7  ;;  %5334 = vmatpush1.bf16.msra.mxu1 %v8511_v8  ;;  %v8597_v8 = vld [vmem:[%s12402_s1 + $0x2d0] ss:$12 sps:$4 sm:$0xff]  }
  0x44   :  { %5457 = vmatpush1.bf16.msra.mxu0 %v8516_v9  ;;  %5335 = vmatprep.subr.bf16.mxu1 %v8521_v10  ;;  %v8600_v9 = vld [vmem:[%s12402_s1 + $0x750] ss:$12 sps:$4 sm:$0xff]   ;;  %v8605_v10 = vld [vmem:[%s12402_s1 + $0x2ec] ss:$12 sps:$4 sm:$0xff]  }
  0x45   :  { %5458 = vmatprep.subr.bf16.mxu0 %v8524_v11  ;;  %5365 = vmatprep.mubr.bf16.mxu1 %v9896_v35  ;;  %v8608_v11 = vld [vmem:[%s12402_s1 + $0x76c] ss:$12 sps:$4 sm:$0xff]  }
  0x46   :  { %5488 = vmatprep.mubr.bf16.mxu0 %v9908_v38 }
  0x47   :  { %5336 = vmatpush1.bf16.msra.mxu1 %v8519_v12  ;;  %v8603_v12 = vld [vmem:[%s12402_s1 + $0x2e8] ss:$12 sps:$4 sm:$0xff]  }
  0x48   :  { %5459 = vmatpush1.bf16.msra.mxu0 %v8522_v13  ;;  %5337 = vmatprep.subr.bf16.mxu1 %v8527_v14  ;;  %v8606_v13 = vld [vmem:[%s12402_s1 + $0x768] ss:$12 sps:$4 sm:$0xff]   ;;  %v8613_v14 = vld [vmem:[%s12402_s1 + $0x304] ss:$12 sps:$4 sm:$0xff]  }
  0x49   :  { %5460 = vmatprep.subr.bf16.mxu0 %v8530_v15  ;;  %v8618_v15 = vld [vmem:[%s12402_s1 + $0x784] ss:$12 sps:$4 sm:$0xff]  }
  0x4b   :  { %5338 = vmatpush1.bf16.msra.mxu1 %v8525_v16  ;;  %v10025_v16 = vcombine.low %v9886_v32, %v9886_v32  ;;  %v8633_v32 = vld [vmem:[%s12402_s1 + $0x34c] ss:$12 sps:$4 sm:$0xff]  }
  0x4c   :  { %5461 = vmatpush1.bf16.msra.mxu0 %v8528_v17  ;;  %5339 = vmatprep.subr.bf16.mxu1 %v8533_v18  ;;  %v8611_v17 = vld [vmem:[%s12402_s1 + $0x300] ss:$12 sps:$4 sm:$0xff]   ;;  %v10032_v18 = vcombine.low %v9901_v36, %v9901_v36  ;;  %v8634_v36 = vld [vmem:[%s12402_s1 + $0x7c8] ss:$12 sps:$4 sm:$0xff]  }
  0x4d   :  { %5462 = vmatprep.subr.bf16.mxu0 %v8536_v19  ;;  %v8616_v19 = vld [vmem:[%s12402_s1 + $0x780] ss:$12 sps:$4 sm:$0xff]  }
  0x4f   :  { %5340 = vmatpush1.bf16.msra.mxu1 %v8531_v20  ;;  %v8621_v20 = vld [vmem:[%s12402_s1 + $0x31c] ss:$12 sps:$4 sm:$0xff]  }
  0x50   :  { %5463 = vmatpush1.bf16.msra.mxu0 %v8534_v21  ;;  %5341 = vmatprep.subr.bf16.mxu1 %v8539_v22  ;;  %v8624_v21 = vld [vmem:[%s12402_s1 + $0x79c] ss:$12 sps:$4 sm:$0xff]   ;;  %v10046_v22 = vld [vmem:[%s12403_s0 + $0x10] sm:$0xff] }
  0x51   :  { %5464 = vmatprep.subr.bf16.mxu0 %v8542_v23  ;;  %v10051_v23 = vld [vmem:[%s12403_s0 + $0x28] sm:$0xff] }
  0x53   :  { %5342 = vmatpush1.bf16.msra.mxu1 %v8537_v24  ;;  %v8619_v24 = vld [vmem:[%s12402_s1 + $0x318] ss:$12 sps:$4 sm:$0xff]  }
  0x54   :  { %5465 = vmatpush1.bf16.msra.mxu0 %v8540_v25  ;;  %5343 = vmatprep.subr.bf16.mxu1 %v8545_v26  ;;  %v10058_v25 = vcombine.high %v10046_v22, %v10046_v22  ;;  %v10062_v26 = vcombine.high %v10051_v23, %v10051_v23 }
  0x55   :  { %5466 = vmatprep.subr.bf16.mxu0 %v8548_v27  ;;  %v8622_v27 = vld [vmem:[%s12402_s1 + $0x798] ss:$12 sps:$4 sm:$0xff]  }
  0x57   :  { %5344 = vmatpush1.bf16.msra.mxu1 %v8543_v28  ;;  %v8627_v28 = vld [vmem:[%s12402_s1 + $0x334] ss:$12 sps:$4 sm:$0xff]  }
  0x58   :  { %5467 = vmatpush1.bf16.msra.mxu0 %v8546_v29  ;;  %5345 = vmatprep.subr.bf16.mxu1 %v8551_v30  ;;  %v8630_v29 = vld [vmem:[%s12402_s1 + $0x7b4] ss:$12 sps:$4 sm:$0xff]   ;;  %v8625_v30 = vld [vmem:[%s12402_s1 + $0x330] ss:$12 sps:$4 sm:$0xff]  }
  0x59   :  { %5468 = vmatprep.subr.bf16.mxu0 %v8554_v31  ;;  %v8628_v31 = vld [vmem:[%s12402_s1 + $0x7b0] ss:$12 sps:$4 sm:$0xff]  }
  0x5b   :  { %5346 = vmatpush1.bf16.msra.mxu1 %v8549_v33  ;;  %v8636_v33 = vld [vmem:[%s12402_s1 + $0x7cc] ss:$12 sps:$4 sm:$0xff]  }
  0x5c   :  { %5469 = vmatpush1.bf16.msra.mxu0 %v8552_v34  ;;  %5347 = vmatprep.subr.bf16.mxu1 %v8557_v37  ;;  %v8631_v34 = vld [vmem:[%s12402_s1 + $0x348] ss:$12 sps:$4 sm:$0xff]   ;;  %v8639_v37 = vld [vmem:[%s12402_s1 + $0x364] ss:$12 sps:$4 sm:$0xff]  }
  0x5d   :  { %5470 = vmatprep.subr.bf16.mxu0 %v8560_v39  ;;  %v8642_v39 = vld [vmem:[%s12402_s1 + $0x7e4] ss:$12 sps:$4 sm:$0xff]  }
  0x5f   :  { %5348 = vmatpush1.bf16.msra.mxu1 %v8555_v40  ;;  %v8637_v40 = vld [vmem:[%s12402_s1 + $0x360] ss:$12 sps:$4 sm:$0xff]  }
  0x60   :  { %5471 = vmatpush1.bf16.msra.mxu0 %v8558_v41  ;;  %5349 = vmatprep.subr.bf16.mxu1 %v8563_v42  ;;  %v8640_v41 = vld [vmem:[%s12402_s1 + $0x7e0] ss:$12 sps:$4 sm:$0xff]   ;;  %v8645_v42 = vld [vmem:[%s12402_s1 + $0x37c] ss:$12 sps:$4 sm:$0xff]  }
  0x61   :  { %5472 = vmatprep.subr.bf16.mxu0 %v8566_v43  ;;  %v8648_v43 = vld [vmem:[%s12402_s1 + $0x7fc] ss:$12 sps:$4 sm:$0xff]  }
  0x63   :  { %5350 = vmatpush1.bf16.msra.mxu1 %v8561_v44  ;;  %v8643_v44 = vld [vmem:[%s12402_s1 + $0x378] ss:$12 sps:$4 sm:$0xff]  }
  0x64   :  { %5473 = vmatpush1.bf16.msra.mxu0 %v8564_v45  ;;  %5351 = vmatprep.subr.bf16.mxu1 %v8569_v46  ;;  %v8646_v45 = vld [vmem:[%s12402_s1 + $0x7f8] ss:$12 sps:$4 sm:$0xff]   ;;  %v8651_v46 = vld [vmem:[%s12402_s1 + $0x394] ss:$12 sps:$4 sm:$0xff]  }
  0x65   :  { %5474 = vmatprep.subr.bf16.mxu0 %v8572_v47  ;;  %v8654_v47 = vld [vmem:[%s12402_s1 + $0x814] ss:$12 sps:$4 sm:$0xff]  }
  0x67   :  { %5352 = vmatpush1.bf16.msra.mxu1 %v8567_v49  ;;  %v8649_v49 = vld [vmem:[%s12402_s1 + $0x390] ss:$12 sps:$4 sm:$0xff]  }
  0x68   :  { %5475 = vmatpush1.bf16.msra.mxu0 %v8570_v50  ;;  %5353 = vmatprep.subr.bf16.mxu1 %v8575_v51  ;;  %v8652_v50 = vld [vmem:[%s12402_s1 + $0x810] ss:$12 sps:$4 sm:$0xff]   ;;  %v8657_v51 = vld [vmem:[%s12402_s1 + $0x3ac] ss:$12 sps:$4 sm:$0xff]  }
  0x69   :  { %5476 = vmatprep.subr.bf16.mxu0 %v8578_v52  ;;  %v8660_v52 = vld [vmem:[%s12402_s1 + $0x82c] ss:$12 sps:$4 sm:$0xff]  }
  0x6b   :  { %5354 = vmatpush1.bf16.msra.mxu1 %v8573_v54  ;;  %v8655_v54 = vld [vmem:[%s12402_s1 + $0x3a8] ss:$12 sps:$4 sm:$0xff]  }
  0x6c   :  { %5477 = vmatpush1.bf16.msra.mxu0 %v8576_v55  ;;  %5355 = vmatprep.subr.bf16.mxu1 %v8581_v56  ;;  %v8658_v55 = vld [vmem:[%s12402_s1 + $0x828] ss:$12 sps:$4 sm:$0xff]   ;;  %v8663_v56 = vld [vmem:[%s12402_s1 + $0x3c4] ss:$12 sps:$4 sm:$0xff]  }
  0x6d   :  { %5478 = vmatprep.subr.bf16.mxu0 %v8584_v57  ;;  %v8666_v57 = vld [vmem:[%s12402_s1 + $0x844] ss:$12 sps:$4 sm:$0xff]  }
  0x6f   :  { %5356 = vmatpush1.bf16.msra.mxu1 %v8579_v58  ;;  %v8661_v58 = vld [vmem:[%s12402_s1 + $0x3c0] ss:$12 sps:$4 sm:$0xff]  }
  0x70   :  { %5479 = vmatpush1.bf16.msra.mxu0 %v8582_v59  ;;  %5357 = vmatprep.subr.bf16.mxu1 %v8587_v60  ;;  %v8664_v59 = vld [vmem:[%s12402_s1 + $0x840] ss:$12 sps:$4 sm:$0xff]   ;;  %v8669_v60 = vld [vmem:[%s12402_s1 + $0x3dc] ss:$12 sps:$4 sm:$0xff]  }
  0x71   :  { %5480 = vmatprep.subr.bf16.mxu0 %v8590_v61  ;;  %v8672_v61 = vld [vmem:[%s12402_s1 + $0x85c] ss:$12 sps:$4 sm:$0xff]  }
  0x73   :  { %5358 = vmatpush1.bf16.msra.mxu1 %v8585_v62  ;;  %v8667_v62 = vld [vmem:[%s12402_s1 + $0x3d8] ss:$12 sps:$4 sm:$0xff]  }
  0x74   :  { %5481 = vmatpush1.bf16.msra.mxu0 %v8588_v63  ;;  %5359 = vmatprep.subr.bf16.mxu1 %v8593_v0  ;;  %v8670_v63 = vld [vmem:[%s12402_s1 + $0x858] ss:$12 sps:$4 sm:$0xff]   ;;  %v8675_v0 = vld [vmem:[%s12402_s1 + $0x3f4] ss:$12 sps:$4 sm:$0xff]  }
  0x75   :  { %5482 = vmatprep.subr.bf16.mxu0 %v8596_v1  ;;  %v8678_v1 = vld [vmem:[%s12402_s1 + $0x874] ss:$12 sps:$4 sm:$0xff]  }
  0x77   :  { %5360 = vmatpush1.bf16.msra.mxu1 %v8591_v2  ;;  %v8673_v2 = vld [vmem:[%s12402_s1 + $0x3f0] ss:$12 sps:$4 sm:$0xff]  }
  0x78   :  { %5483 = vmatpush1.bf16.msra.mxu0 %v8594_v3  ;;  %5361 = vmatprep.subr.bf16.mxu1 %v8599_v4  ;;  %v8676_v3 = vld [vmem:[%s12402_s1 + $0x870] ss:$12 sps:$4 sm:$0xff]   ;;  %v8681_v4 = vld [vmem:[%s12402_s1 + $0x40c] ss:$12 sps:$4 sm:$0xff]  }
  0x79   :  { %5484 = vmatprep.subr.bf16.mxu0 %v8602_v5  ;;  %v8684_v5 = vld [vmem:[%s12402_s1 + $0x88c] ss:$12 sps:$4 sm:$0xff]  }
  0x7b   :  { %5362 = vmatpush1.bf16.msra.mxu1 %v8597_v8  ;;  %v8679_v8 = vld [vmem:[%s12402_s1 + $0x408] ss:$12 sps:$4 sm:$0xff]  }
  0x7c   :  { %5485 = vmatpush1.bf16.msra.mxu0 %v8600_v9  ;;  %5363 = vmatprep.subr.bf16.mxu1 %v8605_v10  ;;  %v8682_v9 = vld [vmem:[%s12402_s1 + $0x888] ss:$12 sps:$4 sm:$0xff]   ;;  %v8687_v10 = vld [vmem:[%s12402_s1 + $0x424] ss:$12 sps:$4 sm:$0xff]  }
  0x7d   :  { %5486 = vmatprep.subr.bf16.mxu0 %v8608_v11  ;;  %v8690_v11 = vld [vmem:[%s12402_s1 + $0x8a4] ss:$12 sps:$4 sm:$0xff]  }
  0x7f   :  { %5364 = vmatpush1.bf16.msra.mxu1 %v8603_v12  ;;  %v8685_v12 = vld [vmem:[%s12402_s1 + $0x420] ss:$12 sps:$4 sm:$0xff]  }
  0x80   :  { %5487 = vmatpush1.bf16.msra.mxu0 %v8606_v13  ;;  %5374 = vmatprep.subr.bf16.mxu1 %v8613_v14  ;;  %v8688_v13 = vld [vmem:[%s12402_s1 + $0x8a0] ss:$12 sps:$4 sm:$0xff]   ;;  %v8693_v14 = vld [vmem:[%s12402_s1 + $0x43c] ss:$12 sps:$4 sm:$0xff]  }
  0x81   :  { %5497 = vmatprep.subr.bf16.mxu0 %v8618_v15  ;;  %v8696_v15 = vld [vmem:[%s12402_s1 + $0x8bc] ss:$12 sps:$4 sm:$0xff]  }
  0x82   :  { %5366 = vmatmul.mubr.bf16.vlgmr.msra.gmra.mrb[0].mxu1 %v10025_v16 }
  0x83   :  { %5489 = vmatmul.mubr.bf16.vlgmr.msra.gmra.mrb[0].mxu0 %v10032_v18  ;;  %5375 = vmatpush1.bf16.msra.mxu1 %v8611_v17  ;;  %v8691_v17 = vld [vmem:[%s12402_s1 + $0x438] ss:$12 sps:$4 sm:$0xff]  }
  0x84   :  { %5498 = vmatpush1.bf16.msra.mxu0 %v8616_v19  ;;  %5376 = vmatprep.subr.bf16.mxu1 %v8621_v20  ;;  %v8694_v19 = vld [vmem:[%s12402_s1 + $0x8b8] ss:$12 sps:$4 sm:$0xff]   ;;  %v8699_v20 = vld [vmem:[%s12402_s1 + $0x454] ss:$12 sps:$4 sm:$0xff]  }
  0x85   :  { %5499 = vmatprep.subr.bf16.mxu0 %v8624_v21  ;;  %5406 = vmatprep.mubr.bf16.mxu1 %v10058_v25  ;;  %v8702_v21 = vld [vmem:[%s12402_s1 + $0x8d4] ss:$12 sps:$4 sm:$0xff]  }
  0x86   :  { %5529 = vmatprep.mubr.bf16.mxu0 %v10062_v26 }
  0x87   :  { %5377 = vmatpush1.bf16.msra.mxu1 %v8619_v24  ;;  %v8697_v24 = vld [vmem:[%s12402_s1 + $0x450] ss:$12 sps:$4 sm:$0xff]  }
  0x88   :  { %5500 = vmatpush1.bf16.msra.mxu0 %v8622_v27  ;;  %5378 = vmatprep.subr.bf16.mxu1 %v8627_v28  ;;  %v8700_v27 = vld [vmem:[%s12402_s1 + $0x8d0] ss:$12 sps:$4 sm:$0xff]   ;;  %v8705_v28 = vld [vmem:[%s12402_s1 + $0x46c] ss:$12 sps:$4 sm:$0xff]  }
  0x89   :  { %5501 = vmatprep.subr.bf16.mxu0 %v8630_v29  ;;  %v8708_v29 = vld [vmem:[%s12402_s1 + $0x8ec] ss:$12 sps:$4 sm:$0xff]  }
  0x8b   :  { %5379 = vmatpush1.bf16.msra.mxu1 %v8625_v30  ;;  %v8703_v30 = vld [vmem:[%s12402_s1 + $0x468] ss:$12 sps:$4 sm:$0xff]  }
  0x8c   :  { %5502 = vmatpush1.bf16.msra.mxu0 %v8628_v31  ;;  %5380 = vmatprep.subr.bf16.mxu1 %v8633_v32  ;;  %v8706_v31 = vld [vmem:[%s12402_s1 + $0x8e8] ss:$12 sps:$4 sm:$0xff]   ;;  %v8715_v32 = vld [vmem:[%s12402_s1 + $0x904] ss:$12 sps:$4 sm:$0xff]  }
  0x8d   :  { %5503 = vmatprep.subr.bf16.mxu0 %v8636_v33  ;;  %v8716_v33 = vld [vmem:[%s12402_s1 + $0xc8] ss:$12 sps:$4 sm:$0xff]  }
  0x8f   :  { %5381 = vmatpush1.bf16.msra.mxu1 %v8631_v34  ;;  %v8713_v34 = vld [vmem:[%s12402_s1 + $0x900] ss:$12 sps:$4 sm:$0xff]  }
  0x90   :  { %5504 = vmatpush1.bf16.msra.mxu0 %v8634_v36  ;;  %5382 = vmatprep.subr.bf16.mxu1 %v8639_v37  ;;  %v10250_v36 = vcombine.low %v10046_v22, %v10046_v22  ;;  %v10254_v37 = vcombine.low %v10051_v23, %v10051_v23  ;;  %v8720_v22 = vld [vmem:[%s12402_s1 + $0x91c] ss:$12 sps:$4 sm:$0xff]   ;;  %v8721_v23 = vld [vmem:[%s12402_s1 + $0xe0] ss:$12 sps:$4 sm:$0xff]  }
  0x91   :  { %5505 = vmatprep.subr.bf16.mxu0 %v8642_v39  ;;  %v8717_v39 = vld [vmem:[%s12402_s1 + $0x8] ss:$12 sps:$4 sm:$0xff]  }
  0x93   :  { %5383 = vmatpush1.bf16.msra.mxu1 %v8637_v40  ;;  %v10262_v40 = vld [vmem:[%s12403_s0 + $0x30] sm:$0xff] }
  0x94   :  { %5506 = vmatpush1.bf16.msra.mxu0 %v8640_v41  ;;  %5384 = vmatprep.subr.bf16.mxu1 %v8645_v42  ;;  %v8718_v41 = vld [vmem:[%s12402_s1 + $0x918] ss:$12 sps:$4 sm:$0xff]   ;;  %v10275_v42 = vcombine.high %v10262_v40, %v10262_v40 }
  0x95   :  { %5507 = vmatprep.subr.bf16.mxu0 %v8648_v43  ;;  %v8722_v43 = vld [vmem:[%s12402_s1 + $0x20] ss:$12 sps:$4 sm:$0xff]  }
  0x97   :  { %5385 = vmatpush1.bf16.msra.mxu1 %v8643_v44  ;;  %v8725_v44 = vld [vmem:[%s12402_s1 + $0x934] ss:$12 sps:$4 sm:$0xff]  }
  0x98   :  { %5508 = vmatpush1.bf16.msra.mxu0 %v8646_v45  ;;  %5386 = vmatprep.subr.bf16.mxu1 %v8651_v46  ;;  %v8726_v45 = vld [vmem:[%s12402_s1 + $0xf8] ss:$12 sps:$4 sm:$0xff]   ;;  %v8723_v46 = vld [vmem:[%s12402_s1 + $0x930] ss:$12 sps:$4 sm:$0xff]  }
  0x99   :  { %5509 = vmatprep.subr.bf16.mxu0 %v8654_v47  ;;  %v8727_v47 = vld [vmem:[%s12402_s1 + $0x38] ss:$12 sps:$4 sm:$0xff]  }
  0x9b   :  { %5387 = vmatpush1.bf16.msra.mxu1 %v8649_v49  ;;  %v8730_v49 = vld [vmem:[%s12402_s1 + $0x94c] ss:$12 sps:$4 sm:$0xff]  }
  0x9c   :  { %5510 = vmatpush1.bf16.msra.mxu0 %v8652_v50  ;;  %5388 = vmatprep.subr.bf16.mxu1 %v8657_v51  ;;  %v8728_v50 = vld [vmem:[%s12402_s1 + $0x948] ss:$12 sps:$4 sm:$0xff]   ;;  %v8732_v51 = vld [vmem:[%s12402_s1 + $0x50] ss:$12 sps:$4 sm:$0xff]  }
  0x9d   :  { %5511 = vmatprep.subr.bf16.mxu0 %v8660_v52  ;;  %v8735_v52 = vld [vmem:[%s12402_s1 + $0x964] ss:$12 sps:$4 sm:$0xff]  }
  0x9f   :  { %5389 = vmatpush1.bf16.msra.mxu1 %v8655_v54  ;;  %v8736_v54 = vld [vmem:[%s12402_s1 + $0x128] ss:$12 sps:$4 sm:$0xff]  }
  0xa0   :  { %5512 = vmatpush1.bf16.msra.mxu0 %v8658_v55  ;;  %5390 = vmatprep.subr.bf16.mxu1 %v8663_v56  ;;  %v8733_v55 = vld [vmem:[%s12402_s1 + $0x960] ss:$12 sps:$4 sm:$0xff]   ;;  %v8737_v56 = vld [vmem:[%s12402_s1 + $0x68] ss:$12 sps:$4 sm:$0xff]  }
  0xa1   :  { %5513 = vmatprep.subr.bf16.mxu0 %v8666_v57  ;;  %v8740_v57 = vld [vmem:[%s12402_s1 + $0x97c] ss:$12 sps:$4 sm:$0xff]  }
  0xa3   :  { %5391 = vmatpush1.bf16.msra.mxu1 %v8661_v58  ;;  %v8741_v58 = vld [vmem:[%s12402_s1 + $0x140] ss:$12 sps:$4 sm:$0xff]  }
  0xa4   :  { %5514 = vmatpush1.bf16.msra.mxu0 %v8664_v59  ;;  %5392 = vmatprep.subr.bf16.mxu1 %v8669_v60  ;;  %v8738_v59 = vld [vmem:[%s12402_s1 + $0x978] ss:$12 sps:$4 sm:$0xff]   ;;  %v8742_v60 = vld [vmem:[%s12402_s1 + $0x80] ss:$12 sps:$4 sm:$0xff]  }
  0xa5   :  { %5515 = vmatprep.subr.bf16.mxu0 %v8672_v61  ;;  %v8745_v61 = vld [vmem:[%s12402_s1 + $0x994] ss:$12 sps:$4 sm:$0xff]  }
  0xa7   :  { %5393 = vmatpush1.bf16.msra.mxu1 %v8667_v62  ;;  %v8746_v62 = vld [vmem:[%s12402_s1 + $0x158] ss:$12 sps:$4 sm:$0xff]  }
  0xa8   :  { %5516 = vmatpush1.bf16.msra.mxu0 %v8670_v63  ;;  %5394 = vmatprep.subr.bf16.mxu1 %v8675_v0  ;;  %v8743_v63 = vld [vmem:[%s12402_s1 + $0x990] ss:$12 sps:$4 sm:$0xff]   ;;  %v8747_v0 = vld [vmem:[%s12402_s1 + $0x98] ss:$12 sps:$4 sm:$0xff]  }
  0xa9   :  { %5517 = vmatprep.subr.bf16.mxu0 %v8678_v1  ;;  %v8750_v1 = vld [vmem:[%s12402_s1 + $0x9ac] ss:$12 sps:$4 sm:$0xff]  }
  0xab   :  { %5395 = vmatpush1.bf16.msra.mxu1 %v8673_v2  ;;  %v8751_v2 = vld [vmem:[%s12402_s1 + $0x170] ss:$12 sps:$4 sm:$0xff]  }
  0xac   :  { %5518 = vmatpush1.bf16.msra.mxu0 %v8676_v3  ;;  %5396 = vmatprep.subr.bf16.mxu1 %v8681_v4  ;;  %v8748_v3 = vld [vmem:[%s12402_s1 + $0x9a8] ss:$12 sps:$4 sm:$0xff]   ;;  %v8752_v4 = vld [vmem:[%s12402_s1 + $0xb0] ss:$12 sps:$4 sm:$0xff]  }
  0xad   :  { %5519 = vmatprep.subr.bf16.mxu0 %v8684_v5  ;;  %v8755_v5 = vld [vmem:[%s12402_s1 + $0x9c4] ss:$12 sps:$4 sm:$0xff]  }
  0xaf   :  { %5397 = vmatpush1.bf16.msra.mxu1 %v8679_v8  ;;  %v8756_v8 = vld [vmem:[%s12402_s1 + $0x248] ss:$12 sps:$4 sm:$0xff]  }
  0xb0   :  { %5520 = vmatpush1.bf16.msra.mxu0 %v8682_v9  ;;  %5398 = vmatprep.subr.bf16.mxu1 %v8687_v10  ;;  %v8753_v9 = vld [vmem:[%s12402_s1 + $0x9c0] ss:$12 sps:$4 sm:$0xff]   ;;  %v8757_v10 = vld [vmem:[%s12402_s1 + $0x188] ss:$12 sps:$4 sm:$0xff]  }
  0xb1   :  { %5521 = vmatprep.subr.bf16.mxu0 %v8690_v11  ;;  %v8760_v11 = vld [vmem:[%s12402_s1 + $0x9dc] ss:$12 sps:$4 sm:$0xff]  }
  0xb3   :  { %5399 = vmatpush1.bf16.msra.mxu1 %v8685_v12  ;;  %v8761_v12 = vld [vmem:[%s12402_s1 + $0x260] ss:$12 sps:$4 sm:$0xff]  }
  0xb4   :  { %5522 = vmatpush1.bf16.msra.mxu0 %v8688_v13  ;;  %5400 = vmatprep.subr.bf16.mxu1 %v8693_v14  ;;  %v8758_v13 = vld [vmem:[%s12402_s1 + $0x9d8] ss:$12 sps:$4 sm:$0xff]   ;;  %v8762_v14 = vld [vmem:[%s12402_s1 + $0x1a0] ss:$12 sps:$4 sm:$0xff]  }
  0xb5   :  { %5523 = vmatprep.subr.bf16.mxu0 %v8696_v15  ;;  %v8765_v15 = vld [vmem:[%s12402_s1 + $0x9f4] ss:$12 sps:$4 sm:$0xff]  }
  0xb7   :  { %5401 = vmatpush1.bf16.msra.mxu1 %v8691_v17  ;;  %v8766_v17 = vld [vmem:[%s12402_s1 + $0x278] ss:$12 sps:$4 sm:$0xff]  }
  0xb8   :  { %5524 = vmatpush1.bf16.msra.mxu0 %v8694_v19  ;;  %5402 = vmatprep.subr.bf16.mxu1 %v8699_v20  ;;  %v8767_v19 = vld [vmem:[%s12402_s1 + $0x1b8] ss:$12 sps:$4 sm:$0xff]  }
  0xb9   :  { %5525 = vmatprep.subr.bf16.mxu0 %v8702_v21  ;;  %v8770_v20 = vld [vmem:[%s12402_s1 + $0xa0c] ss:$12 sps:$4 sm:$0xff]   ;;  %v8768_v21 = vld [vmem:[%s12402_s1 + $0xa08] ss:$12 sps:$4 sm:$0xff]  }
  0xbb   :  { %5403 = vmatpush1.bf16.msra.mxu1 %v8697_v24  ;;  %v8772_v24 = vld [vmem:[%s12402_s1 + $0x1d0] ss:$12 sps:$4 sm:$0xff]  }
  0xbc   :  { %5526 = vmatpush1.bf16.msra.mxu0 %v8700_v27  ;;  %5404 = vmatprep.subr.bf16.mxu1 %v8705_v28  ;;  %v8775_v27 = vld [vmem:[%s12402_s1 + $0xa24] ss:$12 sps:$4 sm:$0xff]   ;;  %v8776_v28 = vld [vmem:[%s12402_s1 + $0x2a8] ss:$12 sps:$4 sm:$0xff]  }
  0xbd   :  { %5527 = vmatprep.subr.bf16.mxu0 %v8708_v29  ;;  %v8773_v29 = vld [vmem:[%s12402_s1 + $0xa20] ss:$12 sps:$4 sm:$0xff]  }
  0xbf   :  { %5405 = vmatpush1.bf16.msra.mxu1 %v8703_v30  ;;  %v8777_v30 = vld [vmem:[%s12402_s1 + $0x1e8] ss:$12 sps:$4 sm:$0xff]  }
  0xc0   :  { %5528 = vmatpush1.bf16.msra.mxu0 %v8706_v31  ;;  %7994 = vmatprep.subr.bf16.mxu1 %v8716_v33  ;;  %v8780_v31 = vld [vmem:[%s12402_s1 + $0xa3c] ss:$12 sps:$4 sm:$0xff]   ;;  %v8778_v33 = vld [vmem:[%s12402_s1 + $0xa38] ss:$12 sps:$4 sm:$0xff]  }
  0xc1   :  { %5538 = vmatprep.subr.bf16.mxu0 %v8715_v32  ;;  %v8781_v32 = vld [vmem:[%s12402_s1 + $0x2c0] ss:$12 sps:$4 sm:$0xff]  }
  0xc2   :  { %5407 = vmatmul.mubr.bf16.vlgmr.msra.gmra.mrb[0].mxu1 %v10250_v36 }
  0xc3   :  { %5530 = vmatmul.mubr.bf16.vlgmr.msra.gmra.mrb[0].mxu0 %v10254_v37  ;;  %7995 = vmatpush3.bf16.msra.mxu1 %v8717_v39  ;;  %v8785_v39 = vld [vmem:[%s12402_s1 + $0xa54] ss:$12 sps:$4 sm:$0xff]  }
  0xc4   :  { %5539 = vmatpush1.bf16.msra.mxu0 %v8713_v34  ;;  %7996 = vmatprep.subr.bf16.mxu1 %v8721_v23  ;;  %v8782_v34 = vld [vmem:[%s12402_s1 + $0x200] ss:$12 sps:$4 sm:$0xff]   ;;  %v8783_v23 = vld [vmem:[%s12402_s1 + $0xa50] ss:$12 sps:$4 sm:$0xff]  }
  0xc5   :  { %5540 = vmatprep.subr.bf16.mxu0 %v8720_v22  ;;  %5980 = vmatprep.mubr.bf16.mxu1 %v9739_v48  ;;  %v8731_v48 = vld [vmem:[%s12402_s1 + $0x110] ss:$12 sps:$4 sm:$0xff]   ;;  %v8786_v22 = vld [vmem:[%s12402_s1 + $0x2d8] ss:$12 sps:$4 sm:$0xff]  }
  0xc6   :  { %5570 = vmatprep.mubr.bf16.mxu0 %v10275_v42 }
  0xc7   :  { %7997 = vmatpush3.bf16.msra.mxu1 %v8722_v43  ;;  %v8790_v43 = vld [vmem:[%s12402_s1 + $0xa6c] ss:$12 sps:$4 sm:$0xff]  }
  0xc8   :  { %5541 = vmatpush1.bf16.msra.mxu0 %v8718_v41  ;;  %7998 = vmatprep.subr.bf16.mxu1 %v8726_v45  ;;  %v8787_v41 = vld [vmem:[%s12402_s1 + $0x218] ss:$12 sps:$4 sm:$0xff]   ;;  %v8788_v45 = vld [vmem:[%s12402_s1 + $0xa68] ss:$12 sps:$4 sm:$0xff]  }
  0xc9   :  { %5542 = vmatprep.subr.bf16.mxu0 %v8725_v44  ;;  %v8791_v44 = vld [vmem:[%s12402_s1 + $0x2f0] ss:$12 sps:$4 sm:$0xff]  }
  0xcb   :  { %7999 = vmatpush3.bf16.msra.mxu1 %v8727_v47  ;;  %v8797_v47 = vld [vmem:[%s12402_s1 + $0xa84] ss:$12 sps:$4 sm:$0xff]  }
  0xcc   :  { %5543 = vmatpush1.bf16.msra.mxu0 %v8723_v46  ;;  %8000 = vmatprep.subr.bf16.mxu1 %v8731_v48  ;;  %v8792_v46 = vld [vmem:[%s12402_s1 + $0x230] ss:$12 sps:$4 sm:$0xff]   ;;  %v8795_v48 = vld [vmem:[%s12402_s1 + $0xa80] ss:$12 sps:$4 sm:$0xff]  }
  0xcd   :  { %5544 = vmatprep.subr.bf16.mxu0 %v8730_v49  ;;  %v8798_v49 = vld [vmem:[%s12402_s1 + $0x3c8] ss:$12 sps:$4 sm:$0xff]  }
  0xcf   :  { %8001 = vmatpush3.bf16.msra.mxu1 %v8732_v51  ;;  %v10468_v51 = vcombine.low %v10262_v40, %v10262_v40 }
  0xd0   :  { %5545 = vmatpush1.bf16.msra.mxu0 %v8728_v50  ;;  %8002 = vmatprep.subr.bf16.mxu1 %v8736_v54  ;;  %v8799_v50 = vld [vmem:[%s12402_s1 + $0x308] ss:$12 sps:$4 sm:$0xff]  }
  0xd1   :  { %5546 = vmatprep.subr.bf16.mxu0 %v8735_v52  ;;  %v10473_v52 = vld [vmem:[%s12403_s0 + $0x38] sm:$0xff] }
  0xd2   :  { %v8802_v54 = vld [vmem:[%s12402_s1 + $0xa9c] ss:$12 sps:$4 sm:$0xff]   ;;  %v10483_v40 = vcombine.high %v10473_v52, %v10473_v52 }
  0xd3   :  { %8003 = vmatpush3.bf16.msra.mxu1 %v8737_v56  ;;  %v8800_v56 = vld [vmem:[%s12402_s1 + $0xa98] ss:$12 sps:$4 sm:$0xff]  }
  0xd4   :  { %5547 = vmatpush1.bf16.msra.mxu0 %v8733_v55  ;;  %8004 = vmatprep.subr.bf16.mxu1 %v8741_v58  ;;  %v8803_v55 = vld [vmem:[%s12402_s1 + $0x3e0] ss:$12 sps:$4 sm:$0xff]  }
  0xd5   :  { %5548 = vmatprep.subr.bf16.mxu0 %v8740_v57  ;;  %v8804_v57 = vld [vmem:[%s12402_s1 + $0x320] ss:$12 sps:$4 sm:$0xff]  }
  0xd6   :  { %v8807_v58 = vld [vmem:[%s12402_s1 + $0xab4] ss:$12 sps:$4 sm:$0xff]  }
  0xd7   :  { %8005 = vmatpush3.bf16.msra.mxu1 %v8742_v60  ;;  %v8809_v60 = vld [vmem:[%s12402_s1 + $0x338] ss:$12 sps:$4 sm:$0xff]  }
  0xd8   :  { %5549 = vmatpush1.bf16.msra.mxu0 %v8738_v59  ;;  %8006 = vmatprep.subr.bf16.mxu1 %v8746_v62  ;;  %v8805_v59 = vld [vmem:[%s12402_s1 + $0xab0] ss:$12 sps:$4 sm:$0xff]  }
  0xd9   :  { %5550 = vmatprep.subr.bf16.mxu0 %v8745_v61  ;;  %v8812_v61 = vld [vmem:[%s12402_s1 + $0xacc] ss:$12 sps:$4 sm:$0xff]   ;;  %v8813_v62 = vld [vmem:[%s12402_s1 + $0x410] ss:$12 sps:$4 sm:$0xff]  }
  0xdb   :  { %8007 = vmatpush3.bf16.msra.mxu1 %v8747_v0  ;;  %v8817_v0 = vld [vmem:[%s12402_s1 + $0xae4] ss:$12 sps:$4 sm:$0xff]  }
  0xdc   :  { %5551 = vmatpush1.bf16.msra.mxu0 %v8743_v63  ;;  %8008 = vmatprep.subr.bf16.mxu1 %v8751_v2  ;;  %v8814_v63 = vld [vmem:[%s12402_s1 + $0x350] ss:$12 sps:$4 sm:$0xff]   ;;  %v8815_v2 = vld [vmem:[%s12402_s1 + $0xae0] ss:$12 sps:$4 sm:$0xff]  }
  0xdd   :  { %5552 = vmatprep.subr.bf16.mxu0 %v8750_v1  ;;  %v8818_v1 = vld [vmem:[%s12402_s1 + $0x428] ss:$12 sps:$4 sm:$0xff]  }
  0xdf   :  { %8009 = vmatpush3.bf16.msra.mxu1 %v8752_v4  ;;  %v8822_v4 = vld [vmem:[%s12402_s1 + $0xafc] ss:$12 sps:$4 sm:$0xff]  }
  0xe0   :  { %5553 = vmatpush1.bf16.msra.mxu0 %v8748_v3  ;;  %8016 = vmatprep.subr.bf16.mxu1 %v8756_v8  ;;  %v8819_v3 = vld [vmem:[%s12402_s1 + $0x368] ss:$12 sps:$4 sm:$0xff]   ;;  %v8820_v8 = vld [vmem:[%s12402_s1 + $0xaf8] ss:$12 sps:$4 sm:$0xff]  }
  0xe1   :  { %5554 = vmatprep.subr.bf16.mxu0 %v8755_v5  ;;  %v8823_v5 = vld [vmem:[%s12402_s1 + $0x440] ss:$12 sps:$4 sm:$0xff]  }
  0xe2   :  { %5981 = vmatmul.mubr.bf16.vlgmr.msra.gmra.mrb[4].mxu1 %v9805_v6  ;;  %v8763_v6 = vld [vmem:[%s12402_s1 + $0x9f0] ss:$12 sps:$4 sm:$0xff]  }
  0xe3   :  { %8017 = vmatpush3.bf16.msra.mxu1 %v8757_v10  ;;  %6020 = vmatprep.mubr.bf16.mxu1 %v9896_v35  ;;  %v8771_v35 = vld [vmem:[%s12402_s1 + $0x290] ss:$12 sps:$4 sm:$0xff]   ;;  %v8827_v10 = vld [vmem:[%s12402_s1 + $0xb14] ss:$12 sps:$4 sm:$0xff]  }
  0xe4   :  { %5555 = vmatpush1.bf16.msra.mxu0 %v8753_v9  ;;  %8018 = vmatprep.subr.bf16.mxu1 %v8761_v12  ;;  %v8824_v9 = vld [vmem:[%s12402_s1 + $0x380] ss:$12 sps:$4 sm:$0xff]   ;;  %v8825_v12 = vld [vmem:[%s12402_s1 + $0xb10] ss:$12 sps:$4 sm:$0xff]  }
  0xe5   :  { %5556 = vmatprep.subr.bf16.mxu0 %v8760_v11  ;;  %v8828_v11 = vld [vmem:[%s12402_s1 + $0x458] ss:$12 sps:$4 sm:$0xff]  }
  0xe7   :  { %8019 = vmatpush3.bf16.msra.mxu1 %v8762_v14  ;;  %v8832_v14 = vld [vmem:[%s12402_s1 + $0xb2c] ss:$12 sps:$4 sm:$0xff]  }
  0xe8   :  { %5557 = vmatpush1.bf16.msra.mxu0 %v8758_v13  ;;  %8020 = vmatprep.subr.bf16.mxu1 %v8766_v17  ;;  %v8829_v13 = vld [vmem:[%s12402_s1 + $0x398] ss:$12 sps:$4 sm:$0xff]   ;;  %v8830_v17 = vld [vmem:[%s12402_s1 + $0xb28] ss:$12 sps:$4 sm:$0xff]  }
  0xe9   :  { %5558 = vmatprep.subr.bf16.mxu0 %v8765_v15  ;;  %v8833_v15 = vld [vmem:[%s12402_s1 + $0x470] ss:$12 sps:$4 sm:$0xff]  }
  0xeb   :  { %8021 = vmatpush3.bf16.msra.mxu1 %v8767_v19  ;;  %v8837_v19 = vld [vmem:[%s12402_s1 + $0xb44] ss:$12 sps:$4 sm:$0xff]  }
  0xec   :  { %5559 = vmatpush1.bf16.msra.mxu0 %v8763_v6  ;;  %8022 = vmatprep.subr.bf16.mxu1 %v8771_v35  ;;  %v8834_v6 = vld [vmem:[%s12402_s1 + $0x3b0] ss:$12 sps:$4 sm:$0xff]   ;;  %v8835_v35 = vld [vmem:[%s12402_s1 + $0xb40] ss:$12 sps:$4 sm:$0xff]  }
  0xed   :  { %5560 = vmatprep.subr.bf16.mxu0 %v8770_v20  ;;  %v8838_v20 = vld [vmem:[%s12402_s1 + $0x548] ss:$12 sps:$4 sm:$0xff]  }
  0xef   :  { %8023 = vmatpush3.bf16.msra.mxu1 %v8772_v24  ;;  %v8842_v24 = vld [vmem:[%s12402_s1 + $0xb5c] ss:$12 sps:$4 sm:$0xff]  }
  0xf0   :  { %5561 = vmatpush1.bf16.msra.mxu0 %v8768_v21  ;;  %8024 = vmatprep.subr.bf16.mxu1 %v8776_v28  ;;  %v8839_v21 = vld [vmem:[%s12402_s1 + $0x488] ss:$12 sps:$4 sm:$0xff]   ;;  %v8840_v28 = vld [vmem:[%s12402_s1 + $0xb58] ss:$12 sps:$4 sm:$0xff]  }
  0xf1   :  { %5562 = vmatprep.subr.bf16.mxu0 %v8775_v27  ;;  %v8843_v27 = vld [vmem:[%s12402_s1 + $0x560] ss:$12 sps:$4 sm:$0xff]  }
  0xf3   :  { %8025 = vmatpush3.bf16.msra.mxu1 %v8777_v30  ;;  %v8847_v30 = vld [vmem:[%s12402_s1 + $0xb74] ss:$12 sps:$4 sm:$0xff]  }
  0xf4   :  { %5563 = vmatpush1.bf16.msra.mxu0 %v8773_v29  ;;  %8026 = vmatprep.subr.bf16.mxu1 %v8781_v32  ;;  %v8844_v29 = vld [vmem:[%s12402_s1 + $0x4a0] ss:$12 sps:$4 sm:$0xff]   ;;  %v8849_v32 = vld [vmem:[%s12402_s1 + $0x4b8] ss:$12 sps:$4 sm:$0xff]  }
  0xf5   :  { %5564 = vmatprep.subr.bf16.mxu0 %v8780_v31  ;;  %v8848_v31 = vld [vmem:[%s12402_s1 + $0x578] ss:$12 sps:$4 sm:$0xff]  }
  0xf7   :  { %8027 = vmatpush3.bf16.msra.mxu1 %v8782_v34  ;;  %v8850_v34 = vld [vmem:[%s12402_s1 + $0xb88] ss:$12 sps:$4 sm:$0xff]  }
  0xf8   :  { %5565 = vmatpush1.bf16.msra.mxu0 %v8778_v33  ;;  %8028 = vmatprep.subr.bf16.mxu1 %v8786_v22  ;;  %v8852_v33 = vld [vmem:[%s12402_s1 + $0xb8c] ss:$12 sps:$4 sm:$0xff]   ;;  %v8857_v22 = vld [vmem:[%s12402_s1 + $0xba4] ss:$12 sps:$4 sm:$0xff]  }
  0xf9   :  { %5566 = vmatprep.subr.bf16.mxu0 %v8785_v39  ;;  %v8854_v39 = vld [vmem:[%s12402_s1 + $0x4d0] ss:$12 sps:$4 sm:$0xff]  }
  0xfb   :  { %8029 = vmatpush3.bf16.msra.mxu1 %v8787_v41  ;;  %v8855_v41 = vld [vmem:[%s12402_s1 + $0xba0] ss:$12 sps:$4 sm:$0xff]  }
  0xfc   :  { %5567 = vmatpush1.bf16.msra.mxu0 %v8783_v23  ;;  %8030 = vmatprep.subr.bf16.mxu1 %v8791_v44  ;;  %v8858_v23 = vld [vmem:[%s12402_s1 + $0x5a8] ss:$12 sps:$4 sm:$0xff]  }
  0xfd   :  { %5568 = vmatprep.subr.bf16.mxu0 %v8790_v43  ;;  %v8859_v43 = vld [vmem:[%s12402_s1 + $0x4e8] ss:$12 sps:$4 sm:$0xff]  }
  0xfe   :  { %v8862_v44 = vld [vmem:[%s12402_s1 + $0xbbc] ss:$12 sps:$4 sm:$0xff]  }
  0xff   :  { %8031 = vmatpush3.bf16.msra.mxu1 %v8792_v46  ;;  %v8860_v46 = vld [vmem:[%s12402_s1 + $0xbb8] ss:$12 sps:$4 sm:$0xff]  }
 0x100   :  { %5569 = vmatpush1.bf16.msra.mxu0 %v8788_v45  ;;  %8038 = vmatprep.subr.bf16.mxu1 %v8798_v49  ;;  %v8863_v45 = vld [vmem:[%s12402_s1 + $0x5c0] ss:$12 sps:$4 sm:$0xff]  }
 0x101   :  { %5579 = vmatprep.subr.bf16.mxu0 %v8797_v47  ;;  %v8864_v47 = vld [vmem:[%s12402_s1 + $0x500] ss:$12 sps:$4 sm:$0xff]  }
 0x102   :  { %6021 = vmatmul.mubr.bf16.vlgmr.msra.gmra.mrb[8].mxu1 %v10025_v16  ;;  %v8808_v16 = vld [vmem:[%s12402_s1 + $0x3f8] ss:$12 sps:$4 sm:$0xff]   ;;  %v8867_v49 = vld [vmem:[%s12402_s1 + $0xbd4] ss:$12 sps:$4 sm:$0xff]  }
 0x103   :  { %5571 = vmatmul.mubr.bf16.vlgmr.msra.gmra.mrb[0].mxu0 %v10468_v51  ;;  %8039 = vmatpush3.bf16.msra.mxu1 %v8799_v50  ;;  %v8865_v50 = vld [vmem:[%s12402_s1 + $0xbd0] ss:$12 sps:$4 sm:$0xff]  }
 0x104   :  { %5580 = vmatpush1.bf16.msra.mxu0 %v8795_v48  ;;  %8040 = vmatprep.subr.bf16.mxu1 %v8803_v55  ;;  %v8868_v48 = vld [vmem:[%s12402_s1 + $0x5d8] ss:$12 sps:$4 sm:$0xff]  }
 0x105   :  { %5581 = vmatprep.subr.bf16.mxu0 %v8802_v54  ;;  %6060 = vmatprep.mubr.bf16.mxu1 %v10058_v25  ;;  %v8810_v25 = vld [vmem:[%s12402_s1 + $0xac8] ss:$12 sps:$4 sm:$0xff]   ;;  %v8869_v54 = vld [vmem:[%s12402_s1 + $0x518] ss:$12 sps:$4 sm:$0xff]  }
 0x106   :  { %5611 = vmatprep.mubr.bf16.mxu0 %v10483_v40  ;;  %v8872_v55 = vld [vmem:[%s12402_s1 + $0xbec] ss:$12 sps:$4 sm:$0xff]  }
 0x107   :  { %8041 = vmatpush3.bf16.msra.mxu1 %v8804_v57  ;;  %v8870_v57 = vld [vmem:[%s12402_s1 + $0xbe8] ss:$12 sps:$4 sm:$0xff]  }
 0x108   :  { %5582 = vmatpush1.bf16.msra.mxu0 %v8800_v56  ;;  %8042 = vmatprep.subr.bf16.mxu1 %v8808_v16  ;;  %v8873_v56 = vld [vmem:[%s12402_s1 + $0x5f0] ss:$12 sps:$4 sm:$0xff]  }
 0x109   :  { %5583 = vmatprep.subr.bf16.mxu0 %v8807_v58  ;;  %v8874_v58 = vld [vmem:[%s12402_s1 + $0x530] ss:$12 sps:$4 sm:$0xff]  }
 0x10a   :  { %v8879_v16 = vld [vmem:[%s12402_s1 + $0xc04] ss:$12 sps:$4 sm:$0xff]  }
 0x10b   :  { %8043 = vmatpush3.bf16.msra.mxu1 %v8809_v60  ;;  %v8877_v60 = vld [vmem:[%s12402_s1 + $0xc00] ss:$12 sps:$4 sm:$0xff]  }
 0x10c   :  { %5584 = vmatpush1.bf16.msra.mxu0 %v8805_v59  ;;  %8044 = vmatprep.subr.bf16.mxu1 %v8813_v62  ;;  %v8880_v59 = vld [vmem:[%s12402_s1 + $0x6c8] ss:$12 sps:$4 sm:$0xff]   ;;  %v10679_v62 = vcombine.low %v10473_v52, %v10473_v52 }
 0x10d   :  { %5585 = vmatprep.subr.bf16.mxu0 %v8812_v61  ;;  %v8881_v61 = vld [vmem:[%s12402_s1 + $0x608] ss:$12 sps:$4 sm:$0xff]  }
 0x10f   :  { %8045 = vmatpush3.bf16.msra.mxu1 %v8814_v63  ;;  %v8884_v63 = vld [vmem:[%s12402_s1 + $0xc1c] ss:$12 sps:$4 sm:$0xff]  }
 0x110   :  { %5586 = vmatpush1.bf16.msra.mxu0 %v8810_v25  ;;  %8046 = vmatprep.subr.bf16.mxu1 %v8818_v1  ;;  %v10684_v25 = vld [vmem:[%s12403_s0 + $0x40] sm:$0xff] }
 0x111   :  { %5587 = vmatprep.subr.bf16.mxu0 %v8817_v0  ;;  %v8885_v0 = vld [vmem:[%s12402_s1 + $0x6e0] ss:$12 sps:$4 sm:$0xff]   ;;  %v10694_v52 = vcombine.high %v10684_v25, %v10684_v25  ;;  %v8882_v1 = vld [vmem:[%s12402_s1 + $0xc18] ss:$12 sps:$4 sm:$0xff]  }
 0x113   :  { %8047 = vmatpush3.bf16.msra.mxu1 %v8819_v3  ;;  %v8889_v3 = vld [vmem:[%s12402_s1 + $0xc34] ss:$12 sps:$4 sm:$0xff]  }
 0x114   :  { %5588 = vmatpush1.bf16.msra.mxu0 %v8815_v2  ;;  %8048 = vmatprep.subr.bf16.mxu1 %v8823_v5  ;;  %v8886_v2 = vld [vmem:[%s12402_s1 + $0x620] ss:$12 sps:$4 sm:$0xff]   ;;  %v8891_v5 = vld [vmem:[%s12402_s1 + $0x638] ss:$12 sps:$4 sm:$0xff]  }
 0x115   :  { %5589 = vmatprep.subr.bf16.mxu0 %v8822_v4  ;;  %v8887_v4 = vld [vmem:[%s12402_s1 + $0xc30] ss:$12 sps:$4 sm:$0xff]  }
 0x117   :  { %8049 = vmatpush3.bf16.msra.mxu1 %v8824_v9  ;;  %v8892_v9 = vld [vmem:[%s12402_s1 + $0xc48] ss:$12 sps:$4 sm:$0xff]  }
 0x118   :  { %5590 = vmatpush1.bf16.msra.mxu0 %v8820_v8  ;;  %8050 = vmatprep.subr.bf16.mxu1 %v8828_v11  ;;  %v8894_v8 = vld [vmem:[%s12402_s1 + $0xc4c] ss:$12 sps:$4 sm:$0xff]   ;;  %v8899_v11 = vld [vmem:[%s12402_s1 + $0xc64] ss:$12 sps:$4 sm:$0xff]  }
 0x119   :  { %5591 = vmatprep.subr.bf16.mxu0 %v8827_v10  ;;  %v8896_v10 = vld [vmem:[%s12402_s1 + $0x650] ss:$12 sps:$4 sm:$0xff]  }
 0x11b   :  { %8051 = vmatpush3.bf16.msra.mxu1 %v8829_v13  ;;  %v8897_v13 = vld [vmem:[%s12402_s1 + $0xc60] ss:$12 sps:$4 sm:$0xff]  }
 0x11c   :  { %5592 = vmatpush1.bf16.msra.mxu0 %v8825_v12  ;;  %8052 = vmatprep.subr.bf16.mxu1 %v8833_v15  ;;  %v8900_v12 = vld [vmem:[%s12402_s1 + $0x728] ss:$12 sps:$4 sm:$0xff]  }
 0x11d   :  { %5593 = vmatprep.subr.bf16.mxu0 %v8832_v14  ;;  %v8901_v14 = vld [vmem:[%s12402_s1 + $0x668] ss:$12 sps:$4 sm:$0xff]  }
 0x11e   :  { %v8904_v15 = vld [vmem:[%s12402_s1 + $0xc7c] ss:$12 sps:$4 sm:$0xff]  }
 0x11f   :  { %8053 = vmatpush3.bf16.msra.mxu1 %v8834_v6  ;;  %v8902_v6 = vld [vmem:[%s12402_s1 + $0xc78] ss:$12 sps:$4 sm:$0xff]  }
 0x120   :  { %5594 = vmatpush1.bf16.msra.mxu0 %v8830_v17  ;;  %8060 = vmatprep.subr.bf16.mxu1 %v8838_v20  ;;  %v8905_v17 = vld [vmem:[%s12402_s1 + $0x740] ss:$12 sps:$4 sm:$0xff]  }
 0x121   :  { %5595 = vmatprep.subr.bf16.mxu0 %v8837_v19  ;;  %v8906_v19 = vld [vmem:[%s12402_s1 + $0x680] ss:$12 sps:$4 sm:$0xff]  }
 0x122   :  { %6061 = vmatmul.mubr.bf16.vlgmr.msra.gmra.mrb[12].mxu1 %v10250_v36  ;;  %v8845_v36 = vld [vmem:[%s12402_s1 + $0xb70] ss:$12 sps:$4 sm:$0xff]   ;;  %v8909_v20 = vld [vmem:[%s12402_s1 + $0xc94] ss:$12 sps:$4 sm:$0xff]  }
 0x123   :  { %8061 = vmatpush3.bf16.msra.mxu1 %v8839_v21  ;;  %6100 = vmatprep.mubr.bf16.mxu1 %v9753_v53  ;;  %v8853_v53 = vld [vmem:[%s12402_s1 + $0x590] ss:$12 sps:$4 sm:$0xff]  }
 0x124   :  { %5596 = vmatpush1.bf16.msra.mxu0 %v8835_v35  ;;  %8062 = vmatprep.subr.bf16.mxu1 %v8843_v27  ;;  %v8910_v35 = vld [vmem:[%s12402_s1 + $0x758] ss:$12 sps:$4 sm:$0xff]   ;;  %v8907_v21 = vld [vmem:[%s12402_s1 + $0xc90] ss:$12 sps:$4 sm:$0xff]  }
 0x125   :  { %5597 = vmatprep.subr.bf16.mxu0 %v8842_v24  ;;  %v8911_v24 = vld [vmem:[%s12402_s1 + $0x698] ss:$12 sps:$4 sm:$0xff]  }
 0x126   :  { %v8914_v27 = vld [vmem:[%s12402_s1 + $0xcac] ss:$12 sps:$4 sm:$0xff]  }
 0x127   :  { %8063 = vmatpush3.bf16.msra.mxu1 %v8844_v29  ;;  %v8912_v29 = vld [vmem:[%s12402_s1 + $0xca8] ss:$12 sps:$4 sm:$0xff]  }
 0x128   :  { %5598 = vmatpush1.bf16.msra.mxu0 %v8840_v28  ;;  %8064 = vmatprep.subr.bf16.mxu1 %v8848_v31  ;;  %v8915_v28 = vld [vmem:[%s12402_s1 + $0x770] ss:$12 sps:$4 sm:$0xff]  }
 0x129   :  { %5599 = vmatprep.subr.bf16.mxu0 %v8847_v30  ;;  %v8916_v30 = vld [vmem:[%s12402_s1 + $0x6b0] ss:$12 sps:$4 sm:$0xff]  }
 0x12a   :  { %v8919_v31 = vld [vmem:[%s12402_s1 + $0xcc4] ss:$12 sps:$4 sm:$0xff]  }
 0x12b   :  { %8065 = vmatpush3.bf16.msra.mxu1 %v8849_v32  ;;  %v8917_v32 = vld [vmem:[%s12402_s1 + $0xcc0] ss:$12 sps:$4 sm:$0xff]  }
 0x12c   :  { %5600 = vmatpush1.bf16.msra.mxu0 %v8845_v36  ;;  %8066 = vmatprep.subr.bf16.mxu1 %v8853_v53  ;;  %v8920_v36 = vld [vmem:[%s12402_s1 + $0x848] ss:$12 sps:$4 sm:$0xff]  }
 0x12d   :  { %5601 = vmatprep.subr.bf16.mxu0 %v8852_v33  ;;  %v8921_v33 = vld [vmem:[%s12402_s1 + $0x788] ss:$12 sps:$4 sm:$0xff]  }
 0x12e   :  { %v8924_v53 = vld [vmem:[%s12402_s1 + $0xcdc] ss:$12 sps:$4 sm:$0xff]  }
 0x12f   :  { %8067 = vmatpush3.bf16.msra.mxu1 %v8854_v39  ;;  %v8922_v39 = vld [vmem:[%s12402_s1 + $0xcd8] ss:$12 sps:$4 sm:$0xff]  }
 0x130   :  { %5602 = vmatpush1.bf16.msra.mxu0 %v8850_v34  ;;  %8068 = vmatprep.subr.bf16.mxu1 %v8858_v23  ;;  %v8925_v34 = vld [vmem:[%s12402_s1 + $0x860] ss:$12 sps:$4 sm:$0xff]  }
 0x131   :  { %5603 = vmatprep.subr.bf16.mxu0 %v8857_v22  ;;  %v8926_v22 = vld [vmem:[%s12402_s1 + $0x7a0] ss:$12 sps:$4 sm:$0xff]  }
 0x132   :  { %v8929_v23 = vld [vmem:[%s12402_s1 + $0xcf4] ss:$12 sps:$4 sm:$0xff]  }
 0x133   :  { %8069 = vmatpush3.bf16.msra.mxu1 %v8859_v43  ;;  %v8931_v43 = vld [vmem:[%s12402_s1 + $0x7b8] ss:$12 sps:$4 sm:$0xff]  }
 0x134   :  { %5604 = vmatpush1.bf16.msra.mxu0 %v8855_v41  ;;  %8070 = vmatprep.subr.bf16.mxu1 %v8863_v45  ;;  %v8930_v41 = vld [vmem:[%s12402_s1 + $0x878] ss:$12 sps:$4 sm:$0xff]   ;;  %v8932_v45 = vld [vmem:[%s12402_s1 + $0xd08] ss:$12 sps:$4 sm:$0xff]  }
 0x135   :  { %5605 = vmatprep.subr.bf16.mxu0 %v8862_v44  ;;  %v8934_v44 = vld [vmem:[%s12402_s1 + $0xd0c] ss:$12 sps:$4 sm:$0xff]  }
 0x137   :  { %8071 = vmatpush3.bf16.msra.mxu1 %v8864_v47  ;;  %v8939_v47 = vld [vmem:[%s12402_s1 + $0xd24] ss:$12 sps:$4 sm:$0xff]  }
 0x138   :  { %5606 = vmatpush1.bf16.msra.mxu0 %v8860_v46  ;;  %8072 = vmatprep.subr.bf16.mxu1 %v8868_v48  ;;  %v8936_v46 = vld [vmem:[%s12402_s1 + $0x7d0] ss:$12 sps:$4 sm:$0xff]   ;;  %v8937_v48 = vld [vmem:[%s12402_s1 + $0xd20] ss:$12 sps:$4 sm:$0xff]  }
 0x139   :  { %5607 = vmatprep.subr.bf16.mxu0 %v8867_v49  ;;  %v8940_v49 = vld [vmem:[%s12402_s1 + $0x8a8] ss:$12 sps:$4 sm:$0xff]  }
 0x13b   :  { %8073 = vmatpush3.bf16.msra.mxu1 %v8869_v54  ;;  %v8944_v54 = vld [vmem:[%s12402_s1 + $0xd3c] ss:$12 sps:$4 sm:$0xff]  }
 0x13c   :  { %5608 = vmatpush1.bf16.msra.mxu0 %v8865_v50  ;;  %8074 = vmatprep.subr.bf16.mxu1 %v8873_v56  ;;  %v8941_v50 = vld [vmem:[%s12402_s1 + $0x7e8] ss:$12 sps:$4 sm:$0xff]   ;;  %v8942_v56 = vld [vmem:[%s12402_s1 + $0xd38] ss:$12 sps:$4 sm:$0xff]  }
 0x13d   :  { %5609 = vmatprep.subr.bf16.mxu0 %v8872_v55  ;;  %v8945_v55 = vld [vmem:[%s12402_s1 + $0x8c0] ss:$12 sps:$4 sm:$0xff]  }
 0x13f   :  { %8075 = vmatpush3.bf16.msra.mxu1 %v8874_v58  ;;  %v8949_v58 = vld [vmem:[%s12402_s1 + $0xd54] ss:$12 sps:$4 sm:$0xff]  }
 0x140   :  { %5610 = vmatpush1.bf16.msra.mxu0 %v8870_v57  ;;  %8082 = vmatprep.subr.bf16.mxu1 %v8880_v59  ;;  %v8946_v57 = vld [vmem:[%s12402_s1 + $0x800] ss:$12 sps:$4 sm:$0xff]   ;;  %v8947_v59 = vld [vmem:[%s12402_s1 + $0xd50] ss:$12 sps:$4 sm:$0xff]  }
 0x141   :  { %5620 = vmatprep.subr.bf16.mxu0 %v8879_v16  ;;  %v8950_v16 = vld [vmem:[%s12402_s1 + $0x8d8] ss:$12 sps:$4 sm:$0xff]  }
 0x142   :  { %6101 = vmatmul.mubr.bf16.vlgmr.msra.gmra.mrb[16].mxu1 %v9807_v7  ;;  %v8890_v7 = vld [vmem:[%s12402_s1 + $0x6f8] ss:$12 sps:$4 sm:$0xff]  }
 0x143   :  { %5612 = vmatmul.mubr.bf16.vlgmr.msra.gmra.mrb[0].mxu0 %v10679_v62  ;;  %8083 = vmatpush3.bf16.msra.mxu1 %v8881_v61  ;;  %v8954_v61 = vld [vmem:[%s12402_s1 + $0xd6c] ss:$12 sps:$4 sm:$0xff]  }
 0x144   :  { %5621 = vmatpush1.bf16.msra.mxu0 %v8877_v60  ;;  %8084 = vmatprep.subr.bf16.mxu1 %v8885_v0  ;;  %v8951_v60 = vld [vmem:[%s12402_s1 + $0x818] ss:$12 sps:$4 sm:$0xff]   ;;  %v8952_v0 = vld [vmem:[%s12402_s1 + $0xd68] ss:$12 sps:$4 sm:$0xff]  }
 0x145   :  { %5622 = vmatprep.subr.bf16.mxu0 %v8884_v63  ;;  %6140 = vmatprep.mubr.bf16.mxu1 %v9908_v38  ;;  %v8895_v38 = vld [vmem:[%s12402_s1 + $0x710] ss:$12 sps:$4 sm:$0xff]  }
 0x146   :  { %5652 = vmatprep.mubr.bf16.mxu0 %v10694_v52  ;;  %v8955_v63 = vld [vmem:[%s12402_s1 + $0x8f0] ss:$12 sps:$4 sm:$0xff]  }
 0x147   :  { %8085 = vmatpush3.bf16.msra.mxu1 %v8886_v2  ;;  %v8961_v2 = vld [vmem:[%s12402_s1 + $0xd84] ss:$12 sps:$4 sm:$0xff]  }
 0x148   :  { %5623 = vmatpush1.bf16.msra.mxu0 %v8882_v1  ;;  %8086 = vmatprep.subr.bf16.mxu1 %v8890_v7  ;;  %v8956_v1 = vld [vmem:[%s12402_s1 + $0x830] ss:$12 sps:$4 sm:$0xff]   ;;  %v8959_v7 = vld [vmem:[%s12402_s1 + $0xd80] ss:$12 sps:$4 sm:$0xff]  }
 0x149   :  { %5624 = vmatprep.subr.bf16.mxu0 %v8889_v3  ;;  %v8962_v3 = vld [vmem:[%s12402_s1 + $0x9c8] ss:$12 sps:$4 sm:$0xff]  }
 0x14b   :  { %8087 = vmatpush3.bf16.msra.mxu1 %v8891_v5  ;;  %v10890_v5 = vcombine.low %v10684_v25, %v10684_v25 }
 0x14c   :  { %5625 = vmatpush1.bf16.msra.mxu0 %v8887_v4  ;;  %8088 = vmatprep.subr.bf16.mxu1 %v8895_v38  ;;  %v8963_v4 = vld [vmem:[%s12402_s1 + $0x908] ss:$12 sps:$4 sm:$0xff]  }
 0x14d   :  { %5626 = vmatprep.subr.bf16.mxu0 %v8894_v8  ;;  %v10895_v8 = vld [vmem:[%s12403_s0 + $0x48] sm:$0xff] }
 0x14e   :  { %v8966_v38 = vld [vmem:[%s12402_s1 + $0xd9c] ss:$12 sps:$4 sm:$0xff]   ;;  %v10905_v25 = vcombine.high %v10895_v8, %v10895_v8 }
 0x14f   :  { %8089 = vmatpush3.bf16.msra.mxu1 %v8896_v10  ;;  %v8964_v10 = vld [vmem:[%s12402_s1 + $0xd98] ss:$12 sps:$4 sm:$0xff]  }
 0x150   :  { %5627 = vmatpush1.bf16.msra.mxu0 %v8892_v9  ;;  %8090 = vmatprep.subr.bf16.mxu1 %v8900_v12  ;;  %v8967_v9 = vld [vmem:[%s12402_s1 + $0x9e0] ss:$12 sps:$4 sm:$0xff]  }
 0x151   :  { %5628 = vmatprep.subr.bf16.mxu0 %v8899_v11  ;;  %v8968_v11 = vld [vmem:[%s12402_s1 + $0x920] ss:$12 sps:$4 sm:$0xff]  }
 0x152   :  { %v8971_v12 = vld [vmem:[%s12402_s1 + $0xdb4] ss:$12 sps:$4 sm:$0xff]  }
 0x153   :  { %8091 = vmatpush3.bf16.msra.mxu1 %v8901_v14  ;;  %v8973_v14 = vld [vmem:[%s12402_s1 + $0x938] ss:$12 sps:$4 sm:$0xff]  }
 0x154   :  { %5629 = vmatpush1.bf16.msra.mxu0 %v8897_v13  ;;  %8092 = vmatprep.subr.bf16.mxu1 %v8905_v17  ;;  %v8969_v13 = vld [vmem:[%s12402_s1 + $0xdb0] ss:$12 sps:$4 sm:$0xff]   ;;  %v8974_v17 = vld [vmem:[%s12402_s1 + $0xdc8] ss:$12 sps:$4 sm:$0xff]  }
 0x155   :  { %5630 = vmatprep.subr.bf16.mxu0 %v8904_v15  ;;  %v8976_v15 = vld [vmem:[%s12402_s1 + $0xdcc] ss:$12 sps:$4 sm:$0xff]  }
 0x157   :  { %8093 = vmatpush3.bf16.msra.mxu1 %v8906_v19  ;;  %v8981_v19 = vld [vmem:[%s12402_s1 + $0xde4] ss:$12 sps:$4 sm:$0xff]  }
 0x158   :  { %5631 = vmatpush1.bf16.msra.mxu0 %v8902_v6  ;;  %8094 = vmatprep.subr.bf16.mxu1 %v8910_v35  ;;  %v8978_v6 = vld [vmem:[%s12402_s1 + $0x950] ss:$12 sps:$4 sm:$0xff]   ;;  %v8979_v35 = vld [vmem:[%s12402_s1 + $0xde0] ss:$12 sps:$4 sm:$0xff]  }
 0x159   :  { %5632 = vmatprep.subr.bf16.mxu0 %v8909_v20  ;;  %v8982_v20 = vld [vmem:[%s12402_s1 + $0xa28] ss:$12 sps:$4 sm:$0xff]  }
 0x15b   :  { %8095 = vmatpush3.bf16.msra.mxu1 %v8911_v24  ;;  %v8986_v24 = vld [vmem:[%s12402_s1 + $0xdfc] ss:$12 sps:$4 sm:$0xff]  }
 0x15c   :  { %5633 = vmatpush1.bf16.msra.mxu0 %v8907_v21  ;;  %8096 = vmatprep.subr.bf16.mxu1 %v8915_v28  ;;  %v8983_v21 = vld [vmem:[%s12402_s1 + $0x968] ss:$12 sps:$4 sm:$0xff]   ;;  %v8984_v28 = vld [vmem:[%s12402_s1 + $0xdf8] ss:$12 sps:$4 sm:$0xff]  }
 0x15d   :  { %5634 = vmatprep.subr.bf16.mxu0 %v8914_v27  ;;  %v8987_v27 = vld [vmem:[%s12402_s1 + $0xa40] ss:$12 sps:$4 sm:$0xff]  }
 0x15f   :  { %8097 = vmatpush3.bf16.msra.mxu1 %v8916_v30  ;;  %v8991_v30 = vld [vmem:[%s12402_s1 + $0xe14] ss:$12 sps:$4 sm:$0xff]  }
 0x160   :  { %5635 = vmatpush1.bf16.msra.mxu0 %v8912_v29  ;;  %8104 = vmatprep.subr.bf16.mxu1 %v8920_v36  ;;  %v8988_v29 = vld [vmem:[%s12402_s1 + $0x980] ss:$12 sps:$4 sm:$0xff]   ;;  %v8989_v36 = vld [vmem:[%s12402_s1 + $0xe10] ss:$12 sps:$4 sm:$0xff]  }
 0x161   :  { %5636 = vmatprep.subr.bf16.mxu0 %v8919_v31  ;;  %v8992_v31 = vld [vmem:[%s12402_s1 + $0xa58] ss:$12 sps:$4 sm:$0xff]  }
 0x162   :  { %6141 = vmatmul.mubr.bf16.vlgmr.msra.gmra.mrb[20].mxu1 %v10032_v18  ;;  %v8927_v18 = vld [vmem:[%s12402_s1 + $0xcf0] ss:$12 sps:$4 sm:$0xff]  }
 0x163   :  { %8105 = vmatpush3.bf16.msra.mxu1 %v8921_v33  ;;  %6180 = vmatprep.mubr.bf16.mxu1 %v10062_v26  ;;  %v8935_v26 = vld [vmem:[%s12402_s1 + $0x890] ss:$12 sps:$4 sm:$0xff]  }
 0x164   :  { %5637 = vmatpush1.bf16.msra.mxu0 %v8917_v32  ;;  %8106 = vmatprep.subr.bf16.mxu1 %v8925_v34  ;;  %v8993_v32 = vld [vmem:[%s12402_s1 + $0x998] ss:$12 sps:$4 sm:$0xff]  }
 0x165   :  { %5638 = vmatprep.subr.bf16.mxu0 %v8924_v53  ;;  %v8996_v34 = vld [vmem:[%s12402_s1 + $0xe2c] ss:$12 sps:$4 sm:$0xff]  }
 0x167   :  { %8107 = vmatpush3.bf16.msra.mxu1 %v8926_v22  ;;  %v8997_v22 = vld [vmem:[%s12402_s1 + $0xa70] ss:$12 sps:$4 sm:$0xff]  }
 0x168   :  { %5639 = vmatpush1.bf16.msra.mxu0 %v8922_v39  ;;  %8108 = vmatprep.subr.bf16.mxu1 %v8930_v41  ;;  %v8994_v41 = vld [vmem:[%s12402_s1 + $0xe28] ss:$12 sps:$4 sm:$0xff]  }
 0x169   :  { %5640 = vmatprep.subr.bf16.mxu0 %v8929_v23 }
 0x16b   :  { %8109 = vmatpush3.bf16.msra.mxu1 %v8931_v43  ;;  %v9001_v43 = vld [vmem:[%s12402_s1 + $0xe44] ss:$12 sps:$4 sm:$0xff]  }
 0x16c   :  { %5641 = vmatpush1.bf16.msra.mxu0 %v8927_v18  ;;  %8110 = vmatprep.subr.bf16.mxu1 %v8935_v26  ;;  %v8998_v18 = vld [vmem:[%s12402_s1 + $0x9b0] ss:$12 sps:$4 sm:$0xff]   ;;  %v8999_v26 = vld [vmem:[%s12402_s1 + $0xe40] ss:$12 sps:$4 sm:$0xff]  }
 0x16d   :  { %5642 = vmatprep.subr.bf16.mxu0 %v8934_v44  ;;  %v9002_v44 = vld [vmem:[%s12402_s1 + $0xb48] ss:$12 sps:$4 sm:$0xff]  }
 0x16f   :  { %8111 = vmatpush3.bf16.msra.mxu1 %v8936_v46  ;;  %v9006_v46 = vld [vmem:[%s12402_s1 + $0xe5c] ss:$12 sps:$4 sm:$0xff]  }
 0x170   :  { %5643 = vmatpush1.bf16.msra.mxu0 %v8932_v45  ;;  %8112 = vmatprep.subr.bf16.mxu1 %v8940_v49  ;;  %v9003_v45 = vld [vmem:[%s12402_s1 + $0xa88] ss:$12 sps:$4 sm:$0xff]   ;;  %v9004_v49 = vld [vmem:[%s12402_s1 + $0xe58] ss:$12 sps:$4 sm:$0xff]  }
 0x171   :  { %5644 = vmatprep.subr.bf16.mxu0 %v8939_v47  ;;  %v9007_v47 = vld [vmem:[%s12402_s1 + $0xb60] ss:$12 sps:$4 sm:$0xff]  }
 0x173   :  { %8113 = vmatpush3.bf16.msra.mxu1 %v8941_v50  ;;  %v9011_v50 = vld [vmem:[%s12402_s1 + $0xe74] ss:$12 sps:$4 sm:$0xff]  }
 0x174   :  { %5645 = vmatpush1.bf16.msra.mxu0 %v8937_v48  ;;  %8114 = vmatprep.subr.bf16.mxu1 %v8945_v55  ;;  %v9008_v48 = vld [vmem:[%s12402_s1 + $0xaa0] ss:$12 sps:$4 sm:$0xff]   ;;  %v9013_v55 = vld [vmem:[%s12402_s1 + $0xab8] ss:$12 sps:$4 sm:$0xff]  }
 0x175   :  { %5646 = vmatprep.subr.bf16.mxu0 %v8944_v54  ;;  %v9009_v54 = vld [vmem:[%s12402_s1 + $0xe70] ss:$12 sps:$4 sm:$0xff]  }
 0x177   :  { %8115 = vmatpush3.bf16.msra.mxu1 %v8946_v57  ;;  %v9017_v57 = vld [vmem:[%s12402_s1 + $0xb90] ss:$12 sps:$4 sm:$0xff]  }
 0x178   :  { %5647 = vmatpush1.bf16.msra.mxu0 %v8942_v56  ;;  %8116 = vmatprep.subr.bf16.mxu1 %v8950_v16  ;;  %v9016_v56 = vld [vmem:[%s12402_s1 + $0xe8c] ss:$12 sps:$4 sm:$0xff]   ;;  %v9021_v16 = vld [vmem:[%s12402_s1 + $0xea4] ss:$12 sps:$4 sm:$0xff]  }
 0x179   :  { %5648 = vmatprep.subr.bf16.mxu0 %v8949_v58  ;;  %v9018_v58 = vld [vmem:[%s12402_s1 + $0xad0] ss:$12 sps:$4 sm:$0xff]  }
 0x17b   :  { %8117 = vmatpush3.bf16.msra.mxu1 %v8951_v60  ;;  %v9019_v60 = vld [vmem:[%s12402_s1 + $0xea0] ss:$12 sps:$4 sm:$0xff]  }
 0x17c   :  { %5649 = vmatpush1.bf16.msra.mxu0 %v8947_v59  ;;  %8118 = vmatprep.subr.bf16.mxu1 %v8955_v63  ;;  %v9022_v59 = vld [vmem:[%s12402_s1 + $0xba8] ss:$12 sps:$4 sm:$0xff]  }
 0x17d   :  { %5650 = vmatprep.subr.bf16.mxu0 %v8954_v61  ;;  %v9023_v61 = vld [vmem:[%s12402_s1 + $0xae8] ss:$12 sps:$4 sm:$0xff]  }
 0x17e   :  { %v9026_v63 = vld [vmem:[%s12402_s1 + $0xebc] ss:$12 sps:$4 sm:$0xff]  }
 0x17f   :  { %8119 = vmatpush3.bf16.msra.mxu1 %v8956_v1  ;;  %v9024_v1 = vld [vmem:[%s12402_s1 + $0xeb8] ss:$12 sps:$4 sm:$0xff]  }
 0x180   :  { %5651 = vmatpush1.bf16.msra.mxu0 %v8952_v0  ;;  %8126 = vmatprep.subr.bf16.mxu1 %v8962_v3  ;;  %v9027_v0 = vld [vmem:[%s12402_s1 + $0xbc0] ss:$12 sps:$4 sm:$0xff]  }
 0x181   :  { %5661 = vmatprep.subr.bf16.mxu0 %v8961_v2  ;;  %v9028_v2 = vld [vmem:[%s12402_s1 + $0xb00] ss:$12 sps:$4 sm:$0xff]  }
 0x182   :  { %6181 = vmatmul.mubr.bf16.vlgmr.msra.gmra.mrb[24].mxu1 %v10254_v37  ;;  %v8972_v37 = vld [vmem:[%s12402_s1 + $0x9f8] ss:$12 sps:$4 sm:$0xff]   ;;  %v9031_v3 = vld [vmem:[%s12402_s1 + $0xed4] ss:$12 sps:$4 sm:$0xff]  }
 0x183   :  { %5653 = vmatmul.mubr.bf16.vlgmr.msra.gmra.mrb[0].mxu0 %v10890_v5  ;;  %8127 = vmatpush3.bf16.msra.mxu1 %v8963_v4  ;;  %v9029_v4 = vld [vmem:[%s12402_s1 + $0xed0] ss:$12 sps:$4 sm:$0xff]  }
 0x184   :  { %5662 = vmatpush1.bf16.msra.mxu0 %v8959_v7  ;;  %8128 = vmatprep.subr.bf16.mxu1 %v8967_v9  ;;  %v9032_v7 = vld [vmem:[%s12402_s1 + $0xbd8] ss:$12 sps:$4 sm:$0xff]  }
 0x185   :  { %5663 = vmatprep.subr.bf16.mxu0 %v8966_v38  ;;  %6220 = vmatprep.mubr.bf16.mxu1 %v10275_v42  ;;  %v8977_v42 = vld [vmem:[%s12402_s1 + $0xa10] ss:$12 sps:$4 sm:$0xff]   ;;  %v9033_v38 = vld [vmem:[%s12402_s1 + $0xb18] ss:$12 sps:$4 sm:$0xff]  }
 0x186   :  { %5693 = vmatprep.mubr.bf16.mxu0 %v10905_v25  ;;  %v9036_v9 = vld [vmem:[%s12402_s1 + $0xeec] ss:$12 sps:$4 sm:$0xff]  }
 0x187   :  { %8129 = vmatpush3.bf16.msra.mxu1 %v8968_v11  ;;  %v9034_v11 = vld [vmem:[%s12402_s1 + $0xee8] ss:$12 sps:$4 sm:$0xff]  }
 0x188   :  { %5664 = vmatpush1.bf16.msra.mxu0 %v8964_v10  ;;  %8130 = vmatprep.subr.bf16.mxu1 %v8972_v37  ;;  %v9037_v10 = vld [vmem:[%s12402_s1 + $0xbf0] ss:$12 sps:$4 sm:$0xff]  }
 0x189   :  { %5665 = vmatprep.subr.bf16.mxu0 %v8971_v12  ;;  %v9038_v12 = vld [vmem:[%s12402_s1 + $0xb30] ss:$12 sps:$4 sm:$0xff]  }
 0x18a   :  { %v9043_v37 = vld [vmem:[%s12402_s1 + $0xf04] ss:$12 sps:$4 sm:$0xff]  }
 0x18b   :  { %8131 = vmatpush3.bf16.msra.mxu1 %v8973_v14  ;;  %v9041_v14 = vld [vmem:[%s12402_s1 + $0xf00] ss:$12 sps:$4 sm:$0xff]  }
 0x18c   :  { %5666 = vmatpush1.bf16.msra.mxu0 %v8969_v13  ;;  %8132 = vmatprep.subr.bf16.mxu1 %v8977_v42  ;;  %v9044_v13 = vld [vmem:[%s12402_s1 + $0xcc8] ss:$12 sps:$4 sm:$0xff]  }
 0x18d   :  { %5667 = vmatprep.subr.bf16.mxu0 %v8976_v15  ;;  %v11102_v15 = vcombine.low %v10895_v8, %v10895_v8  ;;  %v11107_v42 = vld [vmem:[%s12403_s0 + $0x50] sm:$0xff]  ;;  %v9049_v8 = vld [vmem:[%s12402_s1 + $0xce0] ss:$12 sps:$4 sm:$0xff]  }
 0x18f   :  { %8133 = vmatpush3.bf16.msra.mxu1 %v8978_v6  ;;  %v9048_v6 = vld [vmem:[%s12402_s1 + $0xf1c] ss:$12 sps:$4 sm:$0xff]  }
 0x190   :  { %5668 = vmatpush1.bf16.msra.mxu0 %v8974_v17  ;;  %8134 = vmatprep.subr.bf16.mxu1 %v8982_v20  ;;  %v9045_v17 = vld [vmem:[%s12402_s1 + $0xc08] ss:$12 sps:$4 sm:$0xff]   ;;  %v9046_v20 = vld [vmem:[%s12402_s1 + $0xf18] ss:$12 sps:$4 sm:$0xff]  }
 0x191   :  { %5669 = vmatprep.subr.bf16.mxu0 %v8981_v19  ;;  %v11120_v19 = vcombine.high %v11107_v42, %v11107_v42 }
 0x193   :  { %8135 = vmatpush3.bf16.msra.mxu1 %v8983_v21  ;;  %v9053_v21 = vld [vmem:[%s12402_s1 + $0xf34] ss:$12 sps:$4 sm:$0xff]  }
 0x194   :  { %5670 = vmatpush1.bf16.msra.mxu0 %v8979_v35  ;;  %8136 = vmatprep.subr.bf16.mxu1 %v8987_v27  ;;  %v9050_v35 = vld [vmem:[%s12402_s1 + $0xc20] ss:$12 sps:$4 sm:$0xff]   ;;  %v9051_v27 = vld [vmem:[%s12402_s1 + $0xf30] ss:$12 sps:$4 sm:$0xff]  }
 0x195   :  { %5671 = vmatprep.subr.bf16.mxu0 %v8986_v24  ;;  %v10977_v33 = vpop.f32.mrb[0].mxu1  ;;  %v1069_v24 = vlaneseq }
 0x196   :  { %v10979_v53 = vpop.f32.mrb[1].mxu1 }
 0x197   :  { %8137 = vmatpush3.bf16.msra.mxu1 %v8988_v29  ;;  %v5412_v39 = vpop.f32.mrb[2].mxu1  ;;  %v9058_v29 = vld [vmem:[%s12402_s1 + $0xf4c] ss:$12 sps:$4 sm:$0xff]  }
 0x198   :  { %5672 = vmatpush1.bf16.msra.mxu0 %v8984_v28  ;;  %8138 = vmatprep.subr.bf16.mxu1 %v8992_v31  ;;  %v5413_v23 = vpop.f32.mrb[3].mxu1  ;;  %v9055_v28 = vld [vmem:[%s12402_s1 + $0xc38] ss:$12 sps:$4 sm:$0xff]   ;;  %v9056_v31 = vld [vmem:[%s12402_s1 + $0xf48] ss:$12 sps:$4 sm:$0xff]  }
 0x199   :  { %5673 = vmatprep.subr.bf16.mxu0 %v8991_v30  ;;  %v9063_v39 = vld [vmem:[%s12402_s1 + $0xf64] ss:$12 sps:$4 sm:$0xff]   ;;  %v9064_v23 = vld [vmem:[%s12402_s1 + $0xd28] ss:$12 sps:$4 sm:$0xff]  }
 0x19b   :  { %8139 = vmatpush3.bf16.msra.mxu1 %v8993_v32  ;;  %v9060_v32 = vld [vmem:[%s12402_s1 + $0xc50] ss:$12 sps:$4 sm:$0xff]  }
 0x19c   :  { %5674 = vmatpush1.bf16.msra.mxu0 %v8989_v36  ;;  %8140 = vmatprep.subr.bf16.mxu1 %v8997_v22  ;;  %v11153_v36 = vshrl.u32 %v1069_v24, 7  ;;  %v9108_v24 = vld [vmem:[%s12402_s1 + $0x103c] ss:$12 sps:$4 sm:$0xff]  }
 0x19d   :  { %5675 = vmatprep.subr.bf16.mxu0 %v8996_v34 }
 0x19f   :  { %8141 = vmatpush3.bf16.msra.mxu1 %v8998_v18  ;;  %v1079_v18 = vsub.s32 2, %v11153_v36 }
 0x1a0   :  { %5676 = vmatpush1.bf16.msra.mxu0 %v8994_v41  ;;  %8148 = vmatprep.subr.bf16.mxu1 %v9002_v44  ;;  %v1067_v44 = vld [vmem:[%s12404_s2] sm:$0x7] }
 0x1a1   :  { %5677 = vmatprep.subr.bf16.mxu0 %v9001_v43 }
 0x1a2   :  { %6221 = vmatmul.mubr.bf16.vlgmr.msra.gmra.mrb[28].mxu1 %v10468_v51  ;;  %v9012_v51 = vld [vmem:[%s12402_s1 + $0xb78] ss:$12 sps:$4 sm:$0xff]  }
 0x1a3   :  { %8149 = vmatpush3.bf16.msra.mxu1 %v9003_v45  ;;  %6260 = vmatprep.mubr.bf16.mxu1 %v10483_v40  ;;  %v9014_v40 = vld [vmem:[%s12402_s1 + $0xe88] ss:$12 sps:$4 sm:$0xff]  }
 0x1a4   :  { %5678 = vmatpush1.bf16.msra.mxu0 %v8999_v26  ;;  %8150 = vmatprep.subr.bf16.mxu1 %v9007_v47  ;;  %v9061_v26 = vld [vmem:[%s12402_s1 + $0xf60] ss:$12 sps:$4 sm:$0xff]   ;;  %v9065_v45 = vld [vmem:[%s12402_s1 + $0xc68] ss:$12 sps:$4 sm:$0xff]  }
 0x1a5   :  { %5679 = vmatprep.subr.bf16.mxu0 %v9006_v46  ;;  %v9068_v46 = vld [vmem:[%s12402_s1 + $0xf7c] ss:$12 sps:$4 sm:$0xff]   ;;  %v9069_v47 = vld [vmem:[%s12402_s1 + $0xd40] ss:$12 sps:$4 sm:$0xff]  }
 0x1a7   :  { %8151 = vmatpush3.bf16.msra.mxu1 %v9008_v48  ;;  %v1080_v48 = vrot.slane %v1067_v44, %v1079_v18  ;;  %v9119_v18 = vld [vmem:[%s12402_s1 + $0xef0] ss:$12 sps:$4 sm:$0xff]   ;;  %v9116_v44 = vld [vmem:[%s12402_s1 + $0x1068] ss:$12 sps:$4 sm:$0xff]  }
 0x1a8   :  { %5680 = vmatpush1.bf16.msra.mxu0 %v9004_v49  ;;  %8152 = vmatprep.subr.bf16.mxu1 %v9012_v51  ;;  %v9066_v49 = vld [vmem:[%s12402_s1 + $0xf78] ss:$12 sps:$4 sm:$0xff]   ;;  %v9073_v51 = vld [vmem:[%s12402_s1 + $0xf94] ss:$12 sps:$4 sm:$0xff]  }
 0x1a9   :  { %5681 = vmatprep.subr.bf16.mxu0 %v9011_v50  ;;  %v9070_v50 = vld [vmem:[%s12402_s1 + $0xc80] ss:$12 sps:$4 sm:$0xff]  }
 0x1ab   :  { %8153 = vmatpush3.bf16.msra.mxu1 %v9013_v55  ;;  %v9071_v55 = vld [vmem:[%s12402_s1 + $0xf90] ss:$12 sps:$4 sm:$0xff]  }
 0x1ac   :  { %5682 = vmatpush1.bf16.msra.mxu0 %v9009_v54  ;;  %8154 = vmatprep.subr.bf16.mxu1 %v9017_v57  ;;  %v9074_v54 = vld [vmem:[%s12402_s1 + $0xd58] ss:$12 sps:$4 sm:$0xff]  }
 0x1ad   :  { %5683 = vmatprep.subr.bf16.mxu0 %v9016_v56 }
 0x1af   :  { %8155 = vmatpush3.bf16.msra.mxu1 %v9018_v58 }
 0x1b0   :  { %5684 = vmatpush1.bf16.msra.mxu0 %v9014_v40  ;;  %8156 = vmatprep.subr.bf16.mxu1 %v9022_v59  ;;  %v9075_v40 = vld [vmem:[%s12402_s1 + $0xc98] ss:$12 sps:$4 sm:$0xff]  }
 0x1b1   :  { %5685 = vmatprep.subr.bf16.mxu0 %v9021_v16 }
 0x1b3   :  { %8157 = vmatpush3.bf16.msra.mxu1 %v9023_v61  ;;  %v9079_v61 = vld [vmem:[%s12402_s1 + $0xd70] ss:$12 sps:$4 sm:$0xff]  }
 0x1b4   :  { %5686 = vmatpush1.bf16.msra.mxu0 %v9019_v60  ;;  %8158 = vmatprep.subr.bf16.mxu1 %v9027_v0  ;;  %v9078_v60 = vld [vmem:[%s12402_s1 + $0xfac] ss:$12 sps:$4 sm:$0xff]  }
 0x1b5   :  { %5687 = vmatprep.subr.bf16.mxu0 %v9026_v63  ;;  %v8010_v30 = vpop.f32.mrb[4].mxu1 }
 0x1b6   :  { %v8011_v34 = vpop.f32.mrb[5].mxu1 }
 0x1b7   :  { %8159 = vmatpush3.bf16.msra.mxu1 %v9028_v2  ;;  %v8012_v22 = vadd.f32 %v8011_v34, %v8010_v30  ;;  %v8013_v41 = vpop.f32.mrb[6].mxu1  ;;  %v9080_v2 = vld [vmem:[%s12402_s1 + $0xcb0] ss:$12 sps:$4 sm:$0xff]   ;;  %v9113_v30 = vld [vmem:[%s12402_s1 + $0x1054] ss:$12 sps:$4 sm:$0xff]  }
 0x1b8   :  { %5688 = vmatpush1.bf16.msra.mxu0 %v9024_v1  ;;  %8160 = vmatprep.subr.bf16.mxu1 %v9032_v7  ;;  %v8014_v43 = vpop.f32.mrb[7].mxu1  ;;  %v9076_v1 = vld [vmem:[%s12402_s1 + $0xfa8] ss:$12 sps:$4 sm:$0xff]   ;;  %v9118_v41 = vld [vmem:[%s12402_s1 + $0x106c] ss:$12 sps:$4 sm:$0xff]  }
 0x1b9   :  { %5689 = vmatprep.subr.bf16.mxu0 %v9031_v3  ;;  %v5983_v56 = vadd.f32 %v8012_v22, %v1080_v48  ;;  %v9083_v3 = vld [vmem:[%s12402_s1 + $0xfc4] ss:$12 sps:$4 sm:$0xff]   ;;  %v9084_v7 = vld [vmem:[%s12402_s1 + $0xe48] ss:$12 sps:$4 sm:$0xff]   ;;  %v11324_v48 = vcombine.low %v11107_v42, %v11107_v42  ;;  %v9131_v42 = vld [vmem:[%s12402_s1 + $0xfe0] ss:$12 sps:$4 sm:$0xff]  }
 0x1bb   :  { %8161 = vmatpush3.bf16.msra.mxu1 %v9033_v38  ;;  %v9085_v38 = vld [vmem:[%s12402_s1 + $0xd88] ss:$12 sps:$4 sm:$0xff]  }
 0x1bc   :  { %5690 = vmatpush1.bf16.msra.mxu0 %v9029_v4  ;;  %8162 = vmatprep.subr.bf16.mxu1 %v9037_v10  ;;  %v9081_v4 = vld [vmem:[%s12402_s1 + $0xfc0] ss:$12 sps:$4 sm:$0xff]  }
 0x1bd   :  { %5691 = vmatprep.subr.bf16.mxu0 %v9036_v9  ;;  %v9088_v9 = vld [vmem:[%s12402_s1 + $0xfdc] ss:$12 sps:$4 sm:$0xff]   ;;  %v9089_v10 = vld [vmem:[%s12402_s1 + $0xe60] ss:$12 sps:$4 sm:$0xff]  }
 0x1bf   :  { %8163 = vmatpush3.bf16.msra.mxu1 %v9038_v12  ;;  %v9090_v12 = vld [vmem:[%s12402_s1 + $0xda0] ss:$12 sps:$4 sm:$0xff]  }
 0x1c0   :  { %5692 = vmatpush1.bf16.msra.mxu0 %v9034_v11  ;;  %8170 = vmatprep.subr.bf16.mxu1 %v9044_v13  ;;  %v9086_v11 = vld [vmem:[%s12402_s1 + $0xfd8] ss:$12 sps:$4 sm:$0xff]  }
 0x1c1   :  { %5702 = vmatprep.subr.bf16.mxu0 %v9043_v37  ;;  %v9093_v37 = vld [vmem:[%s12402_s1 + $0xff4] ss:$12 sps:$4 sm:$0xff]   ;;  %v9094_v13 = vld [vmem:[%s12402_s1 + $0xe78] ss:$12 sps:$4 sm:$0xff]  }
 0x1c2   :  { %6261 = vmatmul.mubr.bf16.vlgmr.msra.gmra.mrb[32].mxu1 %v10679_v62  ;;  %v9054_v62 = vld [vmem:[%s12402_s1 + $0xcf8] ss:$12 sps:$4 sm:$0xff]  }
 0x1c3   :  { %5694 = vmatmul.mubr.bf16.vlgmr.msra.gmra.mrb[0].mxu0 %v11102_v15  ;;  %8171 = vmatpush3.bf16.msra.mxu1 %v9045_v17  ;;  %v9098_v17 = vld [vmem:[%s12402_s1 + $0x100c] ss:$12 sps:$4 sm:$0xff]  }
 0x1c4   :  { %5703 = vmatpush1.bf16.msra.mxu0 %v9041_v14  ;;  %8172 = vmatprep.subr.bf16.mxu1 %v9049_v8  ;;  %v9095_v14 = vld [vmem:[%s12402_s1 + $0xdb8] ss:$12 sps:$4 sm:$0xff]   ;;  %v9100_v8 = vld [vmem:[%s12402_s1 + $0xdd0] ss:$12 sps:$4 sm:$0xff]  }
 0x1c5   :  { %5704 = vmatprep.subr.bf16.mxu0 %v9048_v6  ;;  %6300 = vmatprep.mubr.bf16.mxu1 %v10694_v52  ;;  %v9059_v52 = vld [vmem:[%s12402_s1 + $0xd10] ss:$12 sps:$4 sm:$0xff]  }
 0x1c6   :  { %5734 = vmatprep.mubr.bf16.mxu0 %v11120_v19  ;;  %v9099_v6 = vld [vmem:[%s12402_s1 + $0xe90] ss:$12 sps:$4 sm:$0xff]  }
 0x1c7   :  { %8173 = vmatpush3.bf16.msra.mxu1 %v9050_v35  ;;  %v9104_v35 = vld [vmem:[%s12402_s1 + $0xea8] ss:$12 sps:$4 sm:$0xff]  }
 0x1c8   :  { %5705 = vmatpush1.bf16.msra.mxu0 %v9046_v20  ;;  %8174 = vmatprep.subr.bf16.mxu1 %v9054_v62  ;;  %v9103_v20 = vld [vmem:[%s12402_s1 + $0x1024] ss:$12 sps:$4 sm:$0xff]   ;;  %v9105_v62 = vld [vmem:[%s12402_s1 + $0xde8] ss:$12 sps:$4 sm:$0xff]  }
 0x1c9   :  { %5706 = vmatprep.subr.bf16.mxu0 %v9053_v21  ;;  %v9101_v21 = vld [vmem:[%s12402_s1 + $0x1020] ss:$12 sps:$4 sm:$0xff]  }
 0x1cb   :  { %8175 = vmatpush3.bf16.msra.mxu1 %v9055_v28  ;;  %v9106_v28 = vld [vmem:[%s12402_s1 + $0x1038] ss:$12 sps:$4 sm:$0xff]  }
 0x1cc   :  { %5707 = vmatpush1.bf16.msra.mxu0 %v9051_v27  ;;  %8176 = vmatprep.subr.bf16.mxu1 %v9059_v52  ;;  %v9109_v27 = vld [vmem:[%s12402_s1 + $0xec0] ss:$12 sps:$4 sm:$0xff]   ;;  %v9114_v52 = vld [vmem:[%s12402_s1 + $0xed8] ss:$12 sps:$4 sm:$0xff]  }
 0x1cd   :  { %5708 = vmatprep.subr.bf16.mxu0 %v9058_v29  ;;  %v9110_v29 = vld [vmem:[%s12402_s1 + $0xe00] ss:$12 sps:$4 sm:$0xff]  }
 0x1cf   :  { %8177 = vmatpush3.bf16.msra.mxu1 %v9060_v32  ;;  %v9115_v32 = vld [vmem:[%s12402_s1 + $0xe18] ss:$12 sps:$4 sm:$0xff]  }
 0x1d0   :  { %5709 = vmatpush1.bf16.msra.mxu0 %v9056_v31  ;;  %8178 = vmatprep.subr.bf16.mxu1 %v9064_v23  ;;  %v9111_v31 = vld [vmem:[%s12402_s1 + $0x1050] ss:$12 sps:$4 sm:$0xff]  }
 0x1d1   :  { %5710 = vmatprep.subr.bf16.mxu0 %v9063_v39 }
 0x1d3   :  { %8179 = vmatpush3.bf16.msra.mxu1 %v9065_v45  ;;  %v9120_v45 = vld [vmem:[%s12402_s1 + $0xe30] ss:$12 sps:$4 sm:$0xff]  }
 0x1d4   :  { %5711 = vmatpush1.bf16.msra.mxu0 %v9061_v26  ;;  %8180 = vmatprep.subr.bf16.mxu1 %v9069_v47  ;;  %v9126_v47 = vld [vmem:[%s12402_s1 + $0xfc8] ss:$12 sps:$4 sm:$0xff]  }
 0x1d5   :  { %5712 = vmatprep.subr.bf16.mxu0 %v9068_v46  ;;  %v8032_v57 = vpop.f32.mrb[8].mxu1  ;;  %v9125_v46 = vld [vmem:[%s12402_s1 + $0x1084] ss:$12 sps:$4 sm:$0xff]  }
 0x1d6   :  { %v8033_v58 = vpop.f32.mrb[9].mxu1 }
 0x1d7   :  { %8181 = vmatpush3.bf16.msra.mxu1 %v9070_v50  ;;  %v8034_v16 = vadd.f32 %v8033_v58, %v8032_v57  ;;  %v8035_v59 = vpop.f32.mrb[10].mxu1  ;;  %v11329_v50 = vld [vmem:[%s12403_s0 + $0x58] sm:$0xff]  ;;  %v9132_v57 = vld [vmem:[%s12402_s1 + $0xf20] ss:$12 sps:$4 sm:$0xff]  }
 0x1d8   :  { %5713 = vmatpush1.bf16.msra.mxu0 %v9066_v49  ;;  %8182 = vmatprep.subr.bf16.mxu1 %v9074_v54  ;;  %v8036_v63 = vpop.f32.mrb[11].mxu1  ;;  %v9123_v49 = vld [vmem:[%s12402_s1 + $0x1080] ss:$12 sps:$4 sm:$0xff]   ;;  %v9130_v54 = vld [vmem:[%s12402_s1 + $0x109c] ss:$12 sps:$4 sm:$0xff]  }
 0x1d9   :  { %5714 = vmatprep.subr.bf16.mxu0 %v9073_v51  ;;  %v11204_v0 = vadd.f32 %v8034_v16, %v5983_v56  ;;  %v9127_v51 = vld [vmem:[%s12402_s1 + $0xf08] ss:$12 sps:$4 sm:$0xff]   ;;  %v11345_v56 = vcombine.high %v11329_v50, %v11329_v50  ;;  %v9136_v58 = vld [vmem:[%s12402_s1 + $0xff8] ss:$12 sps:$4 sm:$0xff]  }
 0x1da   :  { %v9137_v16 = vld [vmem:[%s12402_s1 + $0xf38] ss:$12 sps:$4 sm:$0xff]  }
 0x1db   :  { %8183 = vmatpush3.bf16.msra.mxu1 %v9075_v40  ;;  %v9135_v40 = vld [vmem:[%s12402_s1 + $0x10b4] ss:$12 sps:$4 sm:$0xff]   ;;  %v9140_v59 = vld [vmem:[%s12402_s1 + $0x10cc] ss:$12 sps:$4 sm:$0xff]   ;;  %v9145_v63 = vld [vmem:[%s12402_s1 + $0x10e4] ss:$12 sps:$4 sm:$0xff]  }
 0x1dc   :  { %5715 = vmatpush1.bf16.msra.mxu0 %v9071_v55  ;;  %8184 = vmatprep.subr.bf16.mxu1 %v9079_v61  ;;  %v9128_v55 = vld [vmem:[%s12402_s1 + $0x1098] ss:$12 sps:$4 sm:$0xff]   ;;  %v9142_v61 = vld [vmem:[%s12402_s1 + $0xf50] ss:$12 sps:$4 sm:$0xff]  }
 0x1dd   :  { %5716 = vmatprep.subr.bf16.mxu0 %v9078_v60  ;;  %v9141_v60 = vld [vmem:[%s12402_s1 + $0x1010] ss:$12 sps:$4 sm:$0xff]  }
 0x1df   :  { %8185 = vmatpush3.bf16.msra.mxu1 %v9080_v2  ;;  %v9147_v2 = vld [vmem:[%s12402_s1 + $0xf68] ss:$12 sps:$4 sm:$0xff]  }
 0x1e0   :  { %5717 = vmatpush1.bf16.msra.mxu0 %v9076_v1  ;;  %8192 = vmatprep.subr.bf16.mxu1 %v9084_v7  ;;  %v9143_v1 = vld [vmem:[%s12402_s1 + $0x10e0] ss:$12 sps:$4 sm:$0xff]  }
 0x1e1   :  { %5718 = vmatprep.subr.bf16.mxu0 %v9083_v3  ;;  %v9150_v3 = vld [vmem:[%s12402_s1 + $0x10fc] ss:$12 sps:$4 sm:$0xff]   ;;  %v9151_v7 = vld [vmem:[%s12402_s1 + $0x1040] ss:$12 sps:$4 sm:$0xff]  }
 0x1e2   :  { %6301 = vmatmul.mubr.bf16.vlgmr.msra.gmra.mrb[36].mxu1 %v10890_v5  ;;  %v9091_v5 = vld [vmem:[%s12402_s1 + $0xff0] ss:$12 sps:$4 sm:$0xff]  }
 0x1e3   :  { %8193 = vmatpush3.bf16.msra.mxu1 %v9085_v38  ;;  %6340 = vmatprep.mubr.bf16.mxu1 %v10905_v25  ;;  %v9096_v25 = vld [vmem:[%s12402_s1 + $0x1008] ss:$12 sps:$4 sm:$0xff]   ;;  %v9152_v38 = vld [vmem:[%s12402_s1 + $0xf80] ss:$12 sps:$4 sm:$0xff]  }
 0x1e4   :  { %5719 = vmatpush1.bf16.msra.mxu0 %v9081_v4  ;;  %8194 = vmatprep.subr.bf16.mxu1 %v9089_v10  ;;  %v9148_v4 = vld [vmem:[%s12402_s1 + $0x10f8] ss:$12 sps:$4 sm:$0xff]  }
 0x1e5   :  { %5720 = vmatprep.subr.bf16.mxu0 %v9088_v9  ;;  %v9155_v9 = vld [vmem:[%s12402_s1 + $0x1114] ss:$12 sps:$4 sm:$0xff]   ;;  %v9156_v10 = vld [vmem:[%s12402_s1 + $0x1058] ss:$12 sps:$4 sm:$0xff]  }
 0x1e7   :  { %8195 = vmatpush3.bf16.msra.mxu1 %v9090_v12  ;;  %v9157_v12 = vld [vmem:[%s12402_s1 + $0xf98] ss:$12 sps:$4 sm:$0xff]  }
 0x1e8   :  { %5721 = vmatpush1.bf16.msra.mxu0 %v9086_v11  ;;  %8196 = vmatprep.subr.bf16.mxu1 %v9094_v13  ;;  %v9153_v11 = vld [vmem:[%s12402_s1 + $0x1110] ss:$12 sps:$4 sm:$0xff]  }
 0x1e9   :  { %5722 = vmatprep.subr.bf16.mxu0 %v9093_v37 }
 0x1eb   :  { %8197 = vmatpush3.bf16.msra.mxu1 %v9095_v14 }
 0x1ec   :  { %5723 = vmatpush1.bf16.msra.mxu0 %v9091_v5  ;;  %8198 = vmatprep.subr.bf16.mxu1 %v9099_v6  ;;  %v9161_v6 = vld [vmem:[%s12402_s1 + $0x1070] ss:$12 sps:$4 sm:$0xff]  }
 0x1ed   :  { %5724 = vmatprep.subr.bf16.mxu0 %v9098_v17  ;;  %v9160_v17 = vld [vmem:[%s12402_s1 + $0x112c] ss:$12 sps:$4 sm:$0xff]  }
 0x1ef   :  { %8199 = vmatpush3.bf16.msra.mxu1 %v9100_v8  ;;  %v9158_v8 = vld [vmem:[%s12402_s1 + $0x1128] ss:$12 sps:$4 sm:$0xff]  }
 0x1f0   :  { %5725 = vmatpush1.bf16.msra.mxu0 %v9096_v25  ;;  %8200 = vmatprep.subr.bf16.mxu1 %v9104_v35  ;;  %v9162_v35 = vld [vmem:[%s12402_s1 + $0xfb0] ss:$12 sps:$4 sm:$0xff]  }
 0x1f1   :  { %5726 = vmatprep.subr.bf16.mxu0 %v9103_v20 }
 0x1f3   :  { %8201 = vmatpush3.bf16.msra.mxu1 %v9105_v62  ;;  %v9166_v62 = vld [vmem:[%s12402_s1 + $0x1148] ss:$12 sps:$4 sm:$0xff]  }
 0x1f4   :  { %5727 = vmatpush1.bf16.msra.mxu0 %v9101_v21  ;;  %8202 = vmatprep.subr.bf16.mxu1 %v9109_v27  ;;  %v9165_v21 = vld [vmem:[%s12402_s1 + $0x1144] ss:$12 sps:$4 sm:$0xff]   ;;  %v9167_v27 = vld [vmem:[%s12402_s1 + $0x1088] ss:$12 sps:$4 sm:$0xff]  }
 0x1f5   :  { %5728 = vmatprep.subr.bf16.mxu0 %v9108_v24  ;;  %v8054_v34 = vpop.f32.mrb[12].mxu1  ;;  %v9163_v24 = vld [vmem:[%s12402_s1 + $0x1140] ss:$12 sps:$4 sm:$0xff]  }
 0x1f6   :  { %v8055_v39 = vpop.f32.mrb[13].mxu1 }
 0x1f7   :  { %8203 = vmatpush3.bf16.msra.mxu1 %v9110_v29  ;;  %v8056_v22 = vadd.f32 %v8055_v39, %v8054_v34  ;;  %v8057_v23 = vpop.f32.mrb[14].mxu1  ;;  %v9171_v29 = vld [vmem:[%s12402_s1 + $0x1160] ss:$12 sps:$4 sm:$0xff]   ;;  %v9173_v34 = vld [vmem:[%s12402_s1 + $0x1170] ss:$12 sps:$4 sm:$0xff]  }
 0x1f8   :  { %5729 = vmatpush1.bf16.msra.mxu0 %v9106_v28  ;;  %8204 = vmatprep.subr.bf16.mxu1 %v9114_v52  ;;  %v8058_v43 = vpop.f32.mrb[15].mxu1  ;;  %v9170_v28 = vld [vmem:[%s12402_s1 + $0x115c] ss:$12 sps:$4 sm:$0xff]   ;;  %v9172_v52 = vld [vmem:[%s12402_s1 + $0x10a0] ss:$12 sps:$4 sm:$0xff]  }
 0x1f9   :  { %5730 = vmatprep.subr.bf16.mxu0 %v9113_v30  ;;  %v11308_v26 = vadd.f32 %v8056_v22, %v11204_v0  ;;  %v9146_v0 = vld [vmem:[%s12402_s1 + $0x1028] ss:$12 sps:$4 sm:$0xff]   ;;  %v9168_v30 = vld [vmem:[%s12402_s1 + $0x1158] ss:$12 sps:$4 sm:$0xff]   ;;  %v9181_v23 = vld [vmem:[%s12402_s1 + $0x1190] ss:$12 sps:$4 sm:$0xff]  }
 0x1fa   :  { %v9177_v39 = vld [vmem:[%s12402_s1 + $0x10b8] ss:$12 sps:$4 sm:$0xff]  }
 0x1fb   :  { %8205 = vmatpush3.bf16.msra.mxu1 %v9115_v32  ;;  %v9176_v32 = vld [vmem:[%s12402_s1 + $0x1178] ss:$12 sps:$4 sm:$0xff]  }
 0x1fc   :  { %5731 = vmatpush1.bf16.msra.mxu0 %v9111_v31  ;;  %8206 = vmatprep.subr.bf16.mxu1 %v9119_v18  ;;  %v9175_v31 = vld [vmem:[%s12402_s1 + $0x1174] ss:$12 sps:$4 sm:$0xff]   ;;  %v9180_v22 = vld [vmem:[%s12402_s1 + $0x118c] ss:$12 sps:$4 sm:$0xff]   ;;  %v9182_v18 = vld [vmem:[%s12402_s1 + $0x10d0] ss:$12 sps:$4 sm:$0xff]  }
 0x1fd   :  { %5732 = vmatprep.subr.bf16.mxu0 %v9118_v41  ;;  %v9178_v41 = vld [vmem:[%s12402_s1 + $0x1188] ss:$12 sps:$4 sm:$0xff]   ;;  %v9185_v43 = vld [vmem:[%s12402_s1 + $0x11a4] ss:$12 sps:$4 sm:$0xff]  }
 0x1ff   :  { %8207 = vmatpush3.bf16.msra.mxu1 %v9120_v45  ;;  %v9187_v45 = vld [vmem:[%s12402_s1 + $0x10e8] ss:$12 sps:$4 sm:$0xff]  }
 0x200   :  { %5733 = vmatpush1.bf16.msra.mxu0 %v9116_v44  ;;  %8214 = vmatprep.subr.bf16.mxu1 %v9126_v47  ;;  %v9186_v44 = vld [vmem:[%s12402_s1 + $0x11a8] ss:$12 sps:$4 sm:$0xff]   ;;  %v9191_v47 = vld [vmem:[%s12402_s1 + $0x11c0] ss:$12 sps:$4 sm:$0xff]  }
 0x201   :  { %5743 = vmatprep.subr.bf16.mxu0 %v9125_v46  ;;  %v9190_v46 = vld [vmem:[%s12402_s1 + $0x11bc] ss:$12 sps:$4 sm:$0xff]  }
 0x202   :  { %6341 = vmatmul.mubr.bf16.vlgmr.msra.gmra.mrb[40].mxu1 %v11102_v15  ;;  %v9133_v15 = vld [vmem:[%s12402_s1 + $0x10b0] ss:$12 sps:$4 sm:$0xff]  }
 0x203   :  { %5735 = vmatmul.mubr.bf16.vlgmr.msra.gmra.mrb[0].mxu0 %v11324_v48  ;;  %8215 = vmatpush3.bf16.msra.mxu1 %v9127_v51  ;;  %v9195_v51 = vld [vmem:[%s12402_s1 + $0x11d4] ss:$12 sps:$4 sm:$0xff]  }
 0x204   :  { %5744 = vmatpush1.bf16.msra.mxu0 %v9123_v49  ;;  %8216 = vmatprep.subr.bf16.mxu1 %v9131_v42  ;;  %v9188_v49 = vld [vmem:[%s12402_s1 + $0x11b8] ss:$12 sps:$4 sm:$0xff]   ;;  %v9193_v42 = vld [vmem:[%s12402_s1 + $0x11d0] ss:$12 sps:$4 sm:$0xff]  }
 0x205   :  { %5745 = vmatprep.subr.bf16.mxu0 %v9130_v54  ;;  %6380 = vmatprep.mubr.bf16.mxu1 %v11120_v19  ;;  %v9138_v19 = vld [vmem:[%s12402_s1 + $0x10c8] ss:$12 sps:$4 sm:$0xff]   ;;  %v9196_v54 = vld [vmem:[%s12402_s1 + $0x11d8] ss:$12 sps:$4 sm:$0xff]  }
 0x206   :  { %5775 = vmatprep.mubr.bf16.mxu0 %v11345_v56 }
 0x207   :  { %8217 = vmatpush3.bf16.msra.mxu1 %v9132_v57 }
 0x208   :  { %5746 = vmatpush1.bf16.msra.mxu0 %v9128_v55  ;;  %8218 = vmatprep.subr.bf16.mxu1 %v9136_v58  ;;  %v9197_v55 = vld [vmem:[%s12402_s1 + $0x1118] ss:$12 sps:$4 sm:$0xff]  }
 0x209   :  { %5747 = vmatprep.subr.bf16.mxu0 %v9135_v40 }
 0x20b   :  { %8219 = vmatpush3.bf16.msra.mxu1 %v9137_v16  ;;  %v9201_v16 = vld [vmem:[%s12402_s1 + $0x11f0] ss:$12 sps:$4 sm:$0xff]  }
 0x20c   :  { %5748 = vmatpush1.bf16.msra.mxu0 %v9133_v15  ;;  %8220 = vmatprep.subr.bf16.mxu1 %v9141_v60  ;;  %v9200_v15 = vld [vmem:[%s12402_s1 + $0x11ec] ss:$12 sps:$4 sm:$0xff]   ;;  %v9198_v60 = vld [vmem:[%s12402_s1 + $0x11e8] ss:$12 sps:$4 sm:$0xff]  }
 0x20d   :  { %5749 = vmatprep.subr.bf16.mxu0 %v9140_v59 }
 0x20f   :  { %8221 = vmatpush3.bf16.msra.mxu1 %v9142_v61  ;;  %v9202_v61 = vld [vmem:[%s12402_s1 + $0x1130] ss:$12 sps:$4 sm:$0xff]  }
 0x210   :  { %5750 = vmatpush1.bf16.msra.mxu0 %v9138_v19  ;;  %8222 = vmatprep.subr.bf16.mxu1 %v9146_v0  ;;  %v9208_v0 = vld [vmem:[%s12402_s1 + $0x12c8] ss:$12 sps:$4 sm:$0xff]  }
 0x211   :  { %5751 = vmatprep.subr.bf16.mxu0 %v9145_v63  ;;  %v9207_v63 = vld [vmem:[%s12402_s1 + $0x1204] ss:$12 sps:$4 sm:$0xff]  }
 0x213   :  { %8223 = vmatpush3.bf16.msra.mxu1 %v9147_v2  ;;  %v9209_v2 = vld [vmem:[%s12402_s1 + $0x1208] ss:$12 sps:$4 sm:$0xff]  }
 0x214   :  { %5752 = vmatpush1.bf16.msra.mxu0 %v9143_v1  ;;  %8224 = vmatprep.subr.bf16.mxu1 %v9151_v7  ;;  %v9205_v1 = vld [vmem:[%s12402_s1 + $0x1200] ss:$12 sps:$4 sm:$0xff]  }
 0x215   :  { %5753 = vmatprep.subr.bf16.mxu0 %v9150_v3  ;;  %v8076_v37 = vpop.f32.mrb[16].mxu1  ;;  %v7154_v3 = vcombine.low %v11329_v50, %v11329_v50  ;;  %v11547_v7 = vld [vmem:[%s12403_s0 + $0x60] sm:$0xff] }
 0x216   :  { %v8077_v13 = vpop.f32.mrb[17].mxu1  ;;  %v9210_v50 = vld [vmem:[%s12402_s1 + $0x1218] ss:$12 sps:$4 sm:$0xff]  }
 0x217   :  { %8225 = vmatpush3.bf16.msra.mxu1 %v9152_v38  ;;  %v8078_v5 = vadd.f32 %v8077_v13, %v8076_v37  ;;  %v8079_v14 = vpop.f32.mrb[18].mxu1  ;;  %v9213_v38 = vld [vmem:[%s12402_s1 + $0x12e0] ss:$12 sps:$4 sm:$0xff]   ;;  %v9215_v37 = vld [vmem:[%s12402_s1 + $0x1230] ss:$12 sps:$4 sm:$0xff]  }
 0x218   :  { %5754 = vmatpush1.bf16.msra.mxu0 %v9148_v4  ;;  %8226 = vmatprep.subr.bf16.mxu1 %v9156_v10  ;;  %v8080_v25 = vpop.f32.mrb[19].mxu1  ;;  %v9212_v4 = vld [vmem:[%s12402_s1 + $0x121c] ss:$12 sps:$4 sm:$0xff]   ;;  %v7157_v10 = vcombine.high %v11547_v7, %v11547_v7  ;;  %v9219_v13 = vld [vmem:[%s12402_s1 + $0x1238] ss:$12 sps:$4 sm:$0xff]  }
 0x219   :  { %5755 = vmatprep.subr.bf16.mxu0 %v9155_v9  ;;  %v11424_v20 = vadd.f32 %v8078_v5, %v11308_v26  ;;  %v9183_v26 = vld [vmem:[%s12402_s1 + $0x11a0] ss:$12 sps:$4 sm:$0xff]   ;;  %v9223_v14 = vld [vmem:[%s12402_s1 + $0x1310] ss:$12 sps:$4 sm:$0xff]  }
 0x21a   :  { %v9214_v9 = vld [vmem:[%s12402_s1 + $0x1220] ss:$12 sps:$4 sm:$0xff]   ;;  %v9227_v25 = vld [vmem:[%s12402_s1 + $0x1264] ss:$12 sps:$4 sm:$0xff]  }
 0x21b   :  { %8227 = vmatpush3.bf16.msra.mxu1 %v9157_v12  ;;  %v9218_v12 = vld [vmem:[%s12402_s1 + $0x12f8] ss:$12 sps:$4 sm:$0xff]  }
 0x21c   :  { %5756 = vmatpush1.bf16.msra.mxu0 %v9153_v11  ;;  %8228 = vmatprep.subr.bf16.mxu1 %v9161_v6  ;;  %v9217_v11 = vld [vmem:[%s12402_s1 + $0x1234] ss:$12 sps:$4 sm:$0xff]   ;;  %v9222_v5 = vld [vmem:[%s12402_s1 + $0x124c] ss:$12 sps:$4 sm:$0xff]   ;;  %v9224_v6 = vld [vmem:[%s12402_s1 + $0x1250] ss:$12 sps:$4 sm:$0xff]  }
 0x21d   :  { %5757 = vmatprep.subr.bf16.mxu0 %v9160_v17  ;;  %v9220_v17 = vld [vmem:[%s12402_s1 + $0x1248] ss:$12 sps:$4 sm:$0xff]  }
 0x21f   :  { %8229 = vmatpush3.bf16.msra.mxu1 %v9162_v35  ;;  %v9229_v35 = vld [vmem:[%s12402_s1 + $0x1268] ss:$12 sps:$4 sm:$0xff]  }
 0x220   :  { %5758 = vmatpush1.bf16.msra.mxu0 %v9158_v8  ;;  %8236 = vmatprep.subr.bf16.mxu1 %v9166_v62  ;;  %v9228_v8 = vld [vmem:[%s12402_s1 + $0x1328] ss:$12 sps:$4 sm:$0xff]   ;;  %v9233_v62 = vld [vmem:[%s12402_s1 + $0x1340] ss:$12 sps:$4 sm:$0xff]  }
 0x221   :  { %5759 = vmatprep.subr.bf16.mxu0 %v9165_v21  ;;  %v9232_v21 = vld [vmem:[%s12402_s1 + $0x127c] ss:$12 sps:$4 sm:$0xff]  }
 0x222   :  { %6381 = vmatmul.mubr.bf16.vlgmr.msra.gmra.mrb[44].mxu1 %v11324_v48  ;;  %v9192_v48 = vld [vmem:[%s12402_s1 + $0x1100] ss:$12 sps:$4 sm:$0xff]  }
 0x223   :  { %8237 = vmatpush3.bf16.msra.mxu1 %v9167_v27  ;;  %6420 = vmatprep.mubr.bf16.mxu1 %v11345_v56  ;;  %v9234_v27 = vld [vmem:[%s12402_s1 + $0x1280] ss:$12 sps:$4 sm:$0xff]  }
 0x224   :  { %5760 = vmatpush1.bf16.msra.mxu0 %v9163_v24  ;;  %8238 = vmatprep.subr.bf16.mxu1 %v9171_v29  ;;  %v9230_v24 = vld [vmem:[%s12402_s1 + $0x1278] ss:$12 sps:$4 sm:$0xff]  }
 0x225   :  { %5761 = vmatprep.subr.bf16.mxu0 %v9170_v28  ;;  %v9237_v28 = vld [vmem:[%s12402_s1 + $0x1294] ss:$12 sps:$4 sm:$0xff]   ;;  %v9238_v29 = vld [vmem:[%s12402_s1 + $0x1358] ss:$12 sps:$4 sm:$0xff]  }
 0x227   :  { %8239 = vmatpush3.bf16.msra.mxu1 %v9172_v52 }
 0x228   :  { %5762 = vmatpush1.bf16.msra.mxu0 %v9168_v30  ;;  %8240 = vmatprep.subr.bf16.mxu1 %v9176_v32  ;;  %v9239_v32 = vld [vmem:[%s12402_s1 + $0x1298] ss:$12 sps:$4 sm:$0xff]  }
 0x229   :  { %5763 = vmatprep.subr.bf16.mxu0 %v9175_v31  ;;  %v9235_v31 = vld [vmem:[%s12402_s1 + $0x1290] ss:$12 sps:$4 sm:$0xff]  }
 0x22b   :  { %8241 = vmatpush3.bf16.msra.mxu1 %v9177_v39 }
 0x22c   :  { %5764 = vmatpush1.bf16.msra.mxu0 %v9173_v34  ;;  %8242 = vmatprep.subr.bf16.mxu1 %v9181_v23  ;;  %v9243_v23 = vld [vmem:[%s12402_s1 + $0x1370] ss:$12 sps:$4 sm:$0xff]  }
 0x22d   :  { %5765 = vmatprep.subr.bf16.mxu0 %v9180_v22  ;;  %v9242_v22 = vld [vmem:[%s12402_s1 + $0x12ac] ss:$12 sps:$4 sm:$0xff]  }
 0x22f   :  { %8243 = vmatpush3.bf16.msra.mxu1 %v9182_v18 }
 0x230   :  { %5766 = vmatpush1.bf16.msra.mxu0 %v9178_v41  ;;  %8244 = vmatprep.subr.bf16.mxu1 %v9186_v44  ;;  %v9244_v44 = vld [vmem:[%s12402_s1 + $0x12b0] ss:$12 sps:$4 sm:$0xff]  }
 0x231   :  { %5767 = vmatprep.subr.bf16.mxu0 %v9185_v43  ;;  %v9240_v43 = vld [vmem:[%s12402_s1 + $0x12a8] ss:$12 sps:$4 sm:$0xff]  }
 0x233   :  { %8245 = vmatpush3.bf16.msra.mxu1 %v9187_v45  ;;  %v9250_v45 = vld [vmem:[%s12402_s1 + $0x1448] ss:$12 sps:$4 sm:$0xff]  }
 0x234   :  { %5768 = vmatpush1.bf16.msra.mxu0 %v9183_v26  ;;  %8246 = vmatprep.subr.bf16.mxu1 %v9191_v47  ;;  %v9249_v26 = vld [vmem:[%s12402_s1 + $0x12c4] ss:$12 sps:$4 sm:$0xff]   ;;  %v11651_v47 = vld [vmem:[%s12403_s0 + $0x68] sm:$0xff] }
 0x235   :  { %5769 = vmatprep.subr.bf16.mxu0 %v9190_v46  ;;  %v8098_v56 = vpop.f32.mrb[20].mxu1  ;;  %v11646_v46 = vcombine.low %v11547_v7, %v11547_v7  ;;  %v9272_v7 = vld [vmem:[%s12402_s1 + $0x1338] ss:$12 sps:$4 sm:$0xff]  }
 0x236   :  { %v8099_v57 = vpop.f32.mrb[21].mxu1 }
 0x237   :  { %8247 = vmatpush3.bf16.msra.mxu1 %v9192_v48  ;;  %v8100_v40 = vadd.f32 %v8099_v57, %v8098_v56  ;;  %v8101_v58 = vpop.f32.mrb[22].mxu1  ;;  %v9251_v48 = vld [vmem:[%s12402_s1 + $0x1388] ss:$12 sps:$4 sm:$0xff]   ;;  %v9256_v56 = vld [vmem:[%s12402_s1 + $0x13a0] ss:$12 sps:$4 sm:$0xff]  }
 0x238   :  { %5770 = vmatpush1.bf16.msra.mxu0 %v9188_v49  ;;  %8248 = vmatprep.subr.bf16.mxu1 %v9196_v54  ;;  %v8102_v59 = vpop.f32.mrb[23].mxu1  ;;  %v9247_v49 = vld [vmem:[%s12402_s1 + $0x12c0] ss:$12 sps:$4 sm:$0xff]   ;;  %v9257_v58 = vld [vmem:[%s12402_s1 + $0x12f0] ss:$12 sps:$4 sm:$0xff]  }
 0x239   :  { %5771 = vmatprep.subr.bf16.mxu0 %v9195_v51  ;;  %v11525_v19 = vadd.f32 %v8100_v40, %v11424_v20  ;;  %v9225_v20 = vld [vmem:[%s12402_s1 + $0x1260] ss:$12 sps:$4 sm:$0xff]   ;;  %v9254_v51 = vld [vmem:[%s12402_s1 + $0x12dc] ss:$12 sps:$4 sm:$0xff]   ;;  %v9260_v40 = vld [vmem:[%s12402_s1 + $0x1478] ss:$12 sps:$4 sm:$0xff]  }
 0x23a   :  { %v9255_v54 = vld [vmem:[%s12402_s1 + $0x1460] ss:$12 sps:$4 sm:$0xff]   ;;  %v9265_v59 = vld [vmem:[%s12402_s1 + $0x1490] ss:$12 sps:$4 sm:$0xff]  }
 0x23b   :  { %8249 = vmatpush3.bf16.msra.mxu1 %v9197_v55  ;;  %v9252_v55 = vld [vmem:[%s12402_s1 + $0x12d8] ss:$12 sps:$4 sm:$0xff]   ;;  %v9259_v57 = vld [vmem:[%s12402_s1 + $0x12f4] ss:$12 sps:$4 sm:$0xff]  }
 0x23c   :  { %5772 = vmatpush1.bf16.msra.mxu0 %v9193_v42  ;;  %8250 = vmatprep.subr.bf16.mxu1 %v9201_v16  ;;  %v11667_v42 = vcombine.high %v11651_v47, %v11651_v47  ;;  %v9264_v16 = vld [vmem:[%s12402_s1 + $0x130c] ss:$12 sps:$4 sm:$0xff]  }
 0x23d   :  { %5773 = vmatprep.subr.bf16.mxu0 %v9200_v15  ;;  %v9261_v15 = vld [vmem:[%s12402_s1 + $0x13b8] ss:$12 sps:$4 sm:$0xff]  }
 0x23f   :  { %8251 = vmatpush3.bf16.msra.mxu1 %v9202_v61  ;;  %v9269_v61 = vld [vmem:[%s12402_s1 + $0x1324] ss:$12 sps:$4 sm:$0xff]  }
 0x240   :  { %5774 = vmatpush1.bf16.msra.mxu0 %v9198_v60  ;;  %8258 = vmatprep.subr.bf16.mxu1 %v9208_v0  ;;  %v9262_v60 = vld [vmem:[%s12402_s1 + $0x1308] ss:$12 sps:$4 sm:$0xff]   ;;  %v9267_v0 = vld [vmem:[%s12402_s1 + $0x1320] ss:$12 sps:$4 sm:$0xff]  }
 0x241   :  { %5784 = vmatprep.subr.bf16.mxu0 %v9207_v63  ;;  %v9270_v63 = vld [vmem:[%s12402_s1 + $0x14a8] ss:$12 sps:$4 sm:$0xff]  }
 0x242   :  { %6421 = vmatmul.mubr.bf16.vlgmr.msra.gmra.mrb[48].mxu1 %v7154_v3 }
 0x243   :  { %5776 = vmatmul.mubr.bf16.vlgmr.msra.gmra.mrb[0].mxu0 %v7154_v3  ;;  %8259 = vmatpush3.bf16.msra.mxu1 %v9209_v2  ;;  %v9274_v2 = vld [vmem:[%s12402_s1 + $0x133c] ss:$12 sps:$4 sm:$0xff]   ;;  %v9275_v3 = vld [vmem:[%s12402_s1 + $0x14c0] ss:$12 sps:$4 sm:$0xff]  }
 0x244   :  { %5785 = vmatpush1.bf16.msra.mxu0 %v9205_v1  ;;  %8260 = vmatprep.subr.bf16.mxu1 %v9213_v38  ;;  %v9271_v1 = vld [vmem:[%s12402_s1 + $0x13e8] ss:$12 sps:$4 sm:$0xff]  }
 0x245   :  { %5786 = vmatprep.subr.bf16.mxu0 %v9212_v4  ;;  %6460 = vmatprep.mubr.bf16.mxu1 %v7157_v10  ;;  %v9276_v4 = vld [vmem:[%s12402_s1 + $0x1400] ss:$12 sps:$4 sm:$0xff]  }
 0x246   :  { %5816 = vmatprep.mubr.bf16.mxu0 %v7157_v10  ;;  %v9279_v38 = vld [vmem:[%s12402_s1 + $0x1354] ss:$12 sps:$4 sm:$0xff]  }
 0x247   :  { %8261 = vmatpush3.bf16.msra.mxu1 %v9214_v9 }
 0x248   :  { %5787 = vmatpush1.bf16.msra.mxu0 %v9210_v50  ;;  %8262 = vmatprep.subr.bf16.mxu1 %v9218_v12  ;;  %v9280_v50 = vld [vmem:[%s12402_s1 + $0x14d8] ss:$12 sps:$4 sm:$0xff]   ;;  %v9277_v12 = vld [vmem:[%s12402_s1 + $0x1350] ss:$12 sps:$4 sm:$0xff]  }
 0x249   :  { %5788 = vmatprep.subr.bf16.mxu0 %v9217_v11 }
 0x24b   :  { %8263 = vmatpush3.bf16.msra.mxu1 %v9219_v13 }
 0x24c   :  { %5789 = vmatpush1.bf16.msra.mxu0 %v9215_v37  ;;  %8264 = vmatprep.subr.bf16.mxu1 %v9223_v14  ;;  %v9281_v37 = vld [vmem:[%s12402_s1 + $0x1418] ss:$12 sps:$4 sm:$0xff]   ;;  %v9285_v14 = vld [vmem:[%s12402_s1 + $0x14f0] ss:$12 sps:$4 sm:$0xff]  }
 0x24d   :  { %5790 = vmatprep.subr.bf16.mxu0 %v9222_v5  ;;  %v9284_v5 = vld [vmem:[%s12402_s1 + $0x136c] ss:$12 sps:$4 sm:$0xff]  }
 0x24f   :  { %8265 = vmatpush3.bf16.msra.mxu1 %v9224_v6 }
 0x250   :  { %5791 = vmatpush1.bf16.msra.mxu0 %v9220_v17  ;;  %8266 = vmatprep.subr.bf16.mxu1 %v9228_v8  ;;  %v9286_v8 = vld [vmem:[%s12402_s1 + $0x1430] ss:$12 sps:$4 sm:$0xff]  }
 0x251   :  { %5792 = vmatprep.subr.bf16.mxu0 %v9227_v25  ;;  %v9282_v25 = vld [vmem:[%s12402_s1 + $0x1368] ss:$12 sps:$4 sm:$0xff]  }
 0x253   :  { %8267 = vmatpush3.bf16.msra.mxu1 %v9229_v35  ;;  %v9292_v35 = vld [vmem:[%s12402_s1 + $0x15c8] ss:$12 sps:$4 sm:$0xff]  }
 0x254   :  { %5793 = vmatpush1.bf16.msra.mxu0 %v9225_v20  ;;  %8268 = vmatprep.subr.bf16.mxu1 %v9233_v62  ;;  %v9291_v20 = vld [vmem:[%s12402_s1 + $0x1384] ss:$12 sps:$4 sm:$0xff]  }
 0x255   :  { %5794 = vmatprep.subr.bf16.mxu0 %v9232_v21  ;;  %v8120_v30 = vpop.f32.mrb[24].mxu1  ;;  %v11760_v21 = vcombine.low %v11651_v47, %v11651_v47  ;;  %v11765_v62 = vld [vmem:[%s12403_s0 + $0x70] sm:$0xff]  ;;  %v9316_v47 = vld [vmem:[%s12402_s1 + $0x13fc] ss:$12 sps:$4 sm:$0xff]  }
 0x256   :  { %v8121_v52 = vpop.f32.mrb[25].mxu1 }
 0x257   :  { %8269 = vmatpush3.bf16.msra.mxu1 %v9234_v27  ;;  %v8122_v34 = vadd.f32 %v8121_v52, %v8120_v30  ;;  %v8123_v39 = vpop.f32.mrb[26].mxu1  ;;  %v9293_v27 = vld [vmem:[%s12402_s1 + $0x1508] ss:$12 sps:$4 sm:$0xff]   ;;  %v11781_v30 = vcombine.high %v11765_v62, %v11765_v62  ;;  %v9294_v52 = vld [vmem:[%s12402_s1 + $0x1398] ss:$12 sps:$4 sm:$0xff]  }
 0x258   :  { %5795 = vmatpush1.bf16.msra.mxu0 %v9230_v24  ;;  %8270 = vmatprep.subr.bf16.mxu1 %v9238_v29  ;;  %v8124_v41 = vpop.f32.mrb[27].mxu1  ;;  %v9289_v24 = vld [vmem:[%s12402_s1 + $0x1380] ss:$12 sps:$4 sm:$0xff]   ;;  %v9299_v39 = vld [vmem:[%s12402_s1 + $0x13b0] ss:$12 sps:$4 sm:$0xff]  }
 0x259   :  { %5796 = vmatprep.subr.bf16.mxu0 %v9237_v28  ;;  %v11630_v18 = vadd.f32 %v8122_v34, %v11525_v19  ;;  %v9266_v19 = vld [vmem:[%s12402_s1 + $0x13d0] ss:$12 sps:$4 sm:$0xff]   ;;  %v9297_v29 = vld [vmem:[%s12402_s1 + $0x15e0] ss:$12 sps:$4 sm:$0xff]   ;;  %v9302_v34 = vld [vmem:[%s12402_s1 + $0x15f8] ss:$12 sps:$4 sm:$0xff]  }
 0x25a   :  { %v9296_v28 = vld [vmem:[%s12402_s1 + $0x139c] ss:$12 sps:$4 sm:$0xff]  }
 0x25b   :  { %8271 = vmatpush3.bf16.msra.mxu1 %v9239_v32  ;;  %v9301_v32 = vld [vmem:[%s12402_s1 + $0x13b4] ss:$12 sps:$4 sm:$0xff]   ;;  %v9307_v41 = vld [vmem:[%s12402_s1 + $0x1610] ss:$12 sps:$4 sm:$0xff]  }
 0x25c   :  { %5797 = vmatpush1.bf16.msra.mxu0 %v9235_v31  ;;  %8272 = vmatprep.subr.bf16.mxu1 %v9243_v23  ;;  %v9298_v31 = vld [vmem:[%s12402_s1 + $0x1520] ss:$12 sps:$4 sm:$0xff]  }
 0x25d   :  { %5798 = vmatprep.subr.bf16.mxu0 %v9242_v22  ;;  %v9303_v22 = vld [vmem:[%s12402_s1 + $0x1538] ss:$12 sps:$4 sm:$0xff]  }
 0x25e   :  { %v9306_v23 = vld [vmem:[%s12402_s1 + $0x13cc] ss:$12 sps:$4 sm:$0xff]  }
 0x25f   :  { %8273 = vmatpush3.bf16.msra.mxu1 %v9244_v44  ;;  %v9311_v44 = vld [vmem:[%s12402_s1 + $0x13e4] ss:$12 sps:$4 sm:$0xff]  }
 0x260   :  { %5799 = vmatpush1.bf16.msra.mxu0 %v9240_v43  ;;  %8280 = vmatprep.subr.bf16.mxu1 %v9250_v45  ;;  %v9308_v43 = vld [vmem:[%s12402_s1 + $0x1550] ss:$12 sps:$4 sm:$0xff]   ;;  %v9309_v45 = vld [vmem:[%s12402_s1 + $0x13e0] ss:$12 sps:$4 sm:$0xff]  }
 0x261   :  { %5800 = vmatprep.subr.bf16.mxu0 %v9249_v26  ;;  %v9312_v26 = vld [vmem:[%s12402_s1 + $0x1628] ss:$12 sps:$4 sm:$0xff]  }
 0x262   :  { %6461 = vmatmul.mubr.bf16.vlgmr.msra.gmra.mrb[52].mxu1 %v11646_v46 }
 0x263   :  { %8281 = vmatpush3.bf16.msra.mxu1 %v9251_v48  ;;  %6500 = vmatprep.mubr.bf16.mxu1 %v11667_v42  ;;  %v9314_v48 = vld [vmem:[%s12402_s1 + $0x13f8] ss:$12 sps:$4 sm:$0xff]  }
 0x264   :  { %5801 = vmatpush1.bf16.msra.mxu0 %v9247_v49  ;;  %8282 = vmatprep.subr.bf16.mxu1 %v9255_v54  ;;  %v9317_v49 = vld [vmem:[%s12402_s1 + $0x1640] ss:$12 sps:$4 sm:$0xff]  }
 0x265   :  { %5802 = vmatprep.subr.bf16.mxu0 %v9254_v51  ;;  %v9318_v51 = vld [vmem:[%s12402_s1 + $0x1580] ss:$12 sps:$4 sm:$0xff]  }
 0x266   :  { %v9321_v54 = vld [vmem:[%s12402_s1 + $0x1414] ss:$12 sps:$4 sm:$0xff]  }
 0x267   :  { %8283 = vmatpush3.bf16.msra.mxu1 %v9256_v56 }
 0x268   :  { %5803 = vmatpush1.bf16.msra.mxu0 %v9252_v55  ;;  %8284 = vmatprep.subr.bf16.mxu1 %v9260_v40  ;;  %v9319_v40 = vld [vmem:[%s12402_s1 + $0x1410] ss:$12 sps:$4 sm:$0xff]  }
 0x269   :  { %5804 = vmatprep.subr.bf16.mxu0 %v9259_v57 }
 0x26b   :  { %8285 = vmatpush3.bf16.msra.mxu1 %v9261_v15 }
 0x26c   :  { %5805 = vmatpush1.bf16.msra.mxu0 %v9257_v58  ;;  %8286 = vmatprep.subr.bf16.mxu1 %v9265_v59  ;;  %v9323_v58 = vld [vmem:[%s12402_s1 + $0x1598] ss:$12 sps:$4 sm:$0xff]   ;;  %v9327_v59 = vld [vmem:[%s12402_s1 + $0x1670] ss:$12 sps:$4 sm:$0xff]  }
 0x26d   :  { %5806 = vmatprep.subr.bf16.mxu0 %v9264_v16  ;;  %v9326_v16 = vld [vmem:[%s12402_s1 + $0x142c] ss:$12 sps:$4 sm:$0xff]  }
 0x26f   :  { %8287 = vmatpush3.bf16.msra.mxu1 %v9266_v19 }
 0x270   :  { %5807 = vmatpush1.bf16.msra.mxu0 %v9262_v60  ;;  %8288 = vmatprep.subr.bf16.mxu1 %v9270_v63  ;;  %v9328_v63 = vld [vmem:[%s12402_s1 + $0x15b0] ss:$12 sps:$4 sm:$0xff]  }
 0x271   :  { %5808 = vmatprep.subr.bf16.mxu0 %v9269_v61  ;;  %v9324_v61 = vld [vmem:[%s12402_s1 + $0x1428] ss:$12 sps:$4 sm:$0xff]  }
 0x273   :  { %8289 = vmatpush3.bf16.msra.mxu1 %v9271_v1  ;;  %v9334_v1 = vld [vmem:[%s12402_s1 + $0x1748] ss:$12 sps:$4 sm:$0xff]  }
 0x274   :  { %5809 = vmatpush1.bf16.msra.mxu0 %v9267_v0  ;;  %8290 = vmatprep.subr.bf16.mxu1 %v9275_v3  ;;  %v9333_v0 = vld [vmem:[%s12402_s1 + $0x1444] ss:$12 sps:$4 sm:$0xff]   ;;  %v11881_v3 = vld [vmem:[%s12403_s0 + $0x78] sm:$0xff] }
 0x275   :  { %5810 = vmatprep.subr.bf16.mxu0 %v9274_v2  ;;  %v8142_v9 = vpop.f32.mrb[28].mxu1  ;;  %v11876_v2 = vcombine.low %v11765_v62, %v11765_v62  ;;  %v9355_v62 = vld [vmem:[%s12402_s1 + $0x16e8] ss:$12 sps:$4 sm:$0xff]  }
 0x276   :  { %v8143_v10 = vpop.f32.mrb[29].mxu1 }
 0x277   :  { %v8144_v11 = vadd.f32 %v8143_v10, %v8142_v9  ;;  %8291 = vmatpush3.bf16.msra.mxu1 %v9276_v4  ;;  %v8145_v13 = vpop.f32.mrb[30].mxu1  ;;  %v9335_v4 = vld [vmem:[%s12402_s1 + $0x1688] ss:$12 sps:$4 sm:$0xff]   ;;  %v11897_v9 = vcombine.high %v11881_v3, %v11881_v3  ;;  %v9336_v10 = vld [vmem:[%s12402_s1 + $0x1458] ss:$12 sps:$4 sm:$0xff]  }
 0x278   :  { %5811 = vmatpush1.bf16.msra.mxu0 %v9272_v7  ;;  %8292 = vmatprep.subr.bf16.mxu1 %v9280_v50  ;;  %v8146_v17 = vpop.f32.mrb[31].mxu1  ;;  %v9331_v7 = vld [vmem:[%s12402_s1 + $0x1440] ss:$12 sps:$4 sm:$0xff]   ;;  %v9341_v13 = vld [vmem:[%s12402_s1 + $0x1470] ss:$12 sps:$4 sm:$0xff]  }
 0x279   :  { %5812 = vmatprep.subr.bf16.mxu0 %v9279_v38  ;;  %v11744_v6 = vadd.f32 %v8144_v11, %v11630_v18  ;;  %v9304_v18 = vld [vmem:[%s12402_s1 + $0x13c8] ss:$12 sps:$4 sm:$0xff]   ;;  %v9339_v50 = vld [vmem:[%s12402_s1 + $0x1760] ss:$12 sps:$4 sm:$0xff]   ;;  %v9349_v17 = vld [vmem:[%s12402_s1 + $0x1790] ss:$12 sps:$4 sm:$0xff]  }
 0x27a   :  { %v9338_v38 = vld [vmem:[%s12402_s1 + $0x145c] ss:$12 sps:$4 sm:$0xff]   ;;  %v9340_v11 = vld [vmem:[%s12402_s1 + $0x16a0] ss:$12 sps:$4 sm:$0xff]  }
 0x27b   :  { %8293 = vmatpush3.bf16.msra.mxu1 %v9281_v37  ;;  %v9344_v37 = vld [vmem:[%s12402_s1 + $0x1778] ss:$12 sps:$4 sm:$0xff]  }
 0x27c   :  { %5813 = vmatpush1.bf16.msra.mxu0 %v9277_v12  ;;  %8294 = vmatprep.subr.bf16.mxu1 %v9285_v14  ;;  %v9343_v12 = vld [vmem:[%s12402_s1 + $0x1474] ss:$12 sps:$4 sm:$0xff]   ;;  %v9348_v14 = vld [vmem:[%s12402_s1 + $0x148c] ss:$12 sps:$4 sm:$0xff]  }
 0x27d   :  { %5814 = vmatprep.subr.bf16.mxu0 %v9284_v5  ;;  %v9345_v5 = vld [vmem:[%s12402_s1 + $0x16b8] ss:$12 sps:$4 sm:$0xff]  }
 0x27f   :  { %8295 = vmatpush3.bf16.msra.mxu1 %v9286_v8  ;;  %v9353_v8 = vld [vmem:[%s12402_s1 + $0x14a4] ss:$12 sps:$4 sm:$0xff]  }
 0x280   :  { %5815 = vmatpush1.bf16.msra.mxu0 %v9282_v25  ;;  %8302 = vmatprep.subr.bf16.mxu1 %v9292_v35  ;;  %v9350_v25 = vld [vmem:[%s12402_s1 + $0x16d0] ss:$12 sps:$4 sm:$0xff]   ;;  %v9351_v35 = vld [vmem:[%s12402_s1 + $0x14a0] ss:$12 sps:$4 sm:$0xff]  }
 0x281   :  { %5825 = vmatprep.subr.bf16.mxu0 %v9291_v20  ;;  %v9354_v20 = vld [vmem:[%s12402_s1 + $0x17a8] ss:$12 sps:$4 sm:$0xff]  }
 0x282   :  { %6501 = vmatmul.mubr.bf16.vlgmr.msra.gmra.mrb[56].mxu1 %v11760_v21 }
 0x283   :  { %5817 = vmatmul.mubr.bf16.vlgmr.msra.gmra.mrb[0].mxu0 %v11646_v46  ;;  %8303 = vmatpush3.bf16.msra.mxu1 %v9293_v27  ;;  %v9313_v46 = vld [vmem:[%s12402_s1 + $0x1568] ss:$12 sps:$4 sm:$0xff]   ;;  %v9359_v27 = vld [vmem:[%s12402_s1 + $0x17c0] ss:$12 sps:$4 sm:$0xff]  }
 0x284   :  { %5826 = vmatpush1.bf16.msra.mxu0 %v9289_v24  ;;  %8304 = vmatprep.subr.bf16.mxu1 %v9297_v29  ;;  %v9358_v24 = vld [vmem:[%s12402_s1 + $0x14bc] ss:$12 sps:$4 sm:$0xff]   ;;  %v9360_v29 = vld [vmem:[%s12402_s1 + $0x1700] ss:$12 sps:$4 sm:$0xff]  }
 0x285   :  { %5827 = vmatprep.subr.bf16.mxu0 %v9296_v28  ;;  %6540 = vmatprep.mubr.bf16.mxu1 %v11781_v30  ;;  %v9356_v28 = vld [vmem:[%s12402_s1 + $0x14b8] ss:$12 sps:$4 sm:$0xff]  }
 0x286   :  { %5857 = vmatprep.mubr.bf16.mxu0 %v11667_v42  ;;  %v9322_v42 = vld [vmem:[%s12402_s1 + $0x1658] ss:$12 sps:$4 sm:$0xff]  }
 0x287   :  { %8305 = vmatpush3.bf16.msra.mxu1 %v9298_v31  ;;  %v9364_v31 = vld [vmem:[%s12402_s1 + $0x17d8] ss:$12 sps:$4 sm:$0xff]  }
 0x288   :  { %5828 = vmatpush1.bf16.msra.mxu0 %v9294_v52  ;;  %8306 = vmatprep.subr.bf16.mxu1 %v9302_v34  ;;  %v9363_v52 = vld [vmem:[%s12402_s1 + $0x14d4] ss:$12 sps:$4 sm:$0xff]  }
 0x289   :  { %5829 = vmatprep.subr.bf16.mxu0 %v9301_v32 }
 0x28b   :  { %8307 = vmatpush3.bf16.msra.mxu1 %v9303_v22  ;;  %v9361_v22 = vld [vmem:[%s12402_s1 + $0x14d0] ss:$12 sps:$4 sm:$0xff]  }
 0x28c   :  { %5830 = vmatpush1.bf16.msra.mxu0 %v9299_v39  ;;  %8308 = vmatprep.subr.bf16.mxu1 %v9307_v41 }
 0x28d   :  { %5831 = vmatprep.subr.bf16.mxu0 %v9306_v23  ;;  %v9365_v23 = vld [vmem:[%s12402_s1 + $0x1718] ss:$12 sps:$4 sm:$0xff]  }
 0x28f   :  { %8309 = vmatpush3.bf16.msra.mxu1 %v9308_v43  ;;  %v9369_v43 = vld [vmem:[%s12402_s1 + $0x17f0] ss:$12 sps:$4 sm:$0xff]  }
 0x290   :  { %5832 = vmatpush1.bf16.msra.mxu0 %v9304_v18  ;;  %8310 = vmatprep.subr.bf16.mxu1 %v9312_v26  ;;  %v9368_v18 = vld [vmem:[%s12402_s1 + $0x14ec] ss:$12 sps:$4 sm:$0xff]  }
 0x291   :  { %5833 = vmatprep.subr.bf16.mxu0 %v9311_v44 }
 0x293   :  { %8311 = vmatpush3.bf16.msra.mxu1 %v9313_v46  ;;  %v9370_v46 = vld [vmem:[%s12402_s1 + $0x1730] ss:$12 sps:$4 sm:$0xff]  }
 0x294   :  { %5834 = vmatpush1.bf16.msra.mxu0 %v9309_v45  ;;  %8312 = vmatprep.subr.bf16.mxu1 %v9317_v49  ;;  %v9366_v45 = vld [vmem:[%s12402_s1 + $0x14e8] ss:$12 sps:$4 sm:$0xff]   ;;  %v11985_v49 = vcombine.low %v11881_v3, %v11881_v3 }
 0x295   :  { %5835 = vmatprep.subr.bf16.mxu0 %v9316_v47  ;;  %v8164_v55 = vpop.f32.mrb[32].mxu1  ;;  %v9375_v47 = vld [vmem:[%s12402_s1 + $0x1504] ss:$12 sps:$4 sm:$0xff]   ;;  %v9394_v3 = vld [vmem:[%s12402_s1 + $0x15a8] ss:$12 sps:$4 sm:$0xff]  }
 0x296   :  { %v8165_v56 = vpop.f32.mrb[33].mxu1 }
 0x297   :  { %v8166_v57 = vadd.f32 %v8165_v56, %v8164_v55  ;;  %8313 = vmatpush3.bf16.msra.mxu1 %v9318_v51  ;;  %v8167_v15 = vpop.f32.mrb[34].mxu1  ;;  %v9378_v51 = vld [vmem:[%s12402_s1 + $0x151c] ss:$12 sps:$4 sm:$0xff]   ;;  %v9387_v56 = vld [vmem:[%s12402_s1 + $0x1564] ss:$12 sps:$4 sm:$0xff]  }
 0x298   :  { %5836 = vmatpush1.bf16.msra.mxu0 %v9314_v48  ;;  %8314 = vmatprep.subr.bf16.mxu1 %v9322_v42  ;;  %v8168_v60 = vpop.f32.mrb[35].mxu1  ;;  %v9373_v48 = vld [vmem:[%s12402_s1 + $0x1500] ss:$12 sps:$4 sm:$0xff]   ;;  %v9379_v55 = vld [vmem:[%s12402_s1 + $0x1530] ss:$12 sps:$4 sm:$0xff]  }
 0x299   :  { %5837 = vmatprep.subr.bf16.mxu0 %v9321_v54  ;;  %v11860_v19 = vadd.f32 %v8166_v57, %v11744_v6  ;;  %v9346_v6 = vld [vmem:[%s12402_s1 + $0x1488] ss:$12 sps:$4 sm:$0xff]   ;;  %v9376_v54 = vld [vmem:[%s12402_s1 + $0x1518] ss:$12 sps:$4 sm:$0xff]   ;;  %v9385_v57 = vld [vmem:[%s12402_s1 + $0x1560] ss:$12 sps:$4 sm:$0xff]  }
 0x29a   :  { %v9381_v42 = vld [vmem:[%s12402_s1 + $0x1534] ss:$12 sps:$4 sm:$0xff]  }
 0x29b   :  { %8315 = vmatpush3.bf16.msra.mxu1 %v9323_v58  ;;  %v9388_v58 = vld [vmem:[%s12402_s1 + $0x1578] ss:$12 sps:$4 sm:$0xff]   ;;  %v9393_v15 = vld [vmem:[%s12402_s1 + $0x1594] ss:$12 sps:$4 sm:$0xff]  }
 0x29c   :  { %5838 = vmatpush1.bf16.msra.mxu0 %v9319_v40  ;;  %8316 = vmatprep.subr.bf16.mxu1 %v9327_v59  ;;  %v9390_v40 = vld [vmem:[%s12402_s1 + $0x157c] ss:$12 sps:$4 sm:$0xff]  }
 0x29d   :  { %5839 = vmatprep.subr.bf16.mxu0 %v9326_v16 }
 0x29f   :  { %8317 = vmatpush3.bf16.msra.mxu1 %v9328_v63  ;;  %v9396_v63 = vld [vmem:[%s12402_s1 + $0x15ac] ss:$12 sps:$4 sm:$0xff]  }
 0x2a0   :  { %5840 = vmatpush1.bf16.msra.mxu0 %v9324_v61  ;;  %8324 = vmatprep.subr.bf16.mxu1 %v9334_v1 }
 0x2a1   :  { %5841 = vmatprep.subr.bf16.mxu0 %v9333_v0 }
 0x2a2   :  { %6541 = vmatmul.mubr.bf16.vlgmr.msra.gmra.mrb[60].mxu1 %v11876_v2 }
 0x2a3   :  { %8325 = vmatpush3.bf16.msra.mxu1 %v9335_v4  ;;  %6580 = vmatprep.mubr.bf16.mxu1 %v11897_v9  ;;  %v9397_v4 = vld [vmem:[%s12402_s1 + $0x15c0] ss:$12 sps:$4 sm:$0xff]  }
 0x2a4   :  { %5842 = vmatpush1.bf16.msra.mxu0 %v9331_v7  ;;  %8326 = vmatprep.subr.bf16.mxu1 %v9339_v50  ;;  %v9399_v7 = vld [vmem:[%s12402_s1 + $0x15c4] ss:$12 sps:$4 sm:$0xff]  }
 0x2a5   :  { %5843 = vmatprep.subr.bf16.mxu0 %v9338_v38  ;;  %v9402_v38 = vld [vmem:[%s12402_s1 + $0x15dc] ss:$12 sps:$4 sm:$0xff]   ;;  %v9400_v50 = vld [vmem:[%s12402_s1 + $0x15d8] ss:$12 sps:$4 sm:$0xff]  }
 0x2a7   :  { %8327 = vmatpush3.bf16.msra.mxu1 %v9340_v11  ;;  %v9403_v11 = vld [vmem:[%s12402_s1 + $0x15f0] ss:$12 sps:$4 sm:$0xff]  }
 0x2a8   :  { %5844 = vmatpush1.bf16.msra.mxu0 %v9336_v10  ;;  %8328 = vmatprep.subr.bf16.mxu1 %v9344_v37  ;;  %v9405_v10 = vld [vmem:[%s12402_s1 + $0x15f4] ss:$12 sps:$4 sm:$0xff]  }
 0x2a9   :  { %5845 = vmatprep.subr.bf16.mxu0 %v9343_v12  ;;  %v9408_v12 = vld [vmem:[%s12402_s1 + $0x160c] ss:$12 sps:$4 sm:$0xff]   ;;  %v9406_v37 = vld [vmem:[%s12402_s1 + $0x1608] ss:$12 sps:$4 sm:$0xff]  }
 0x2ab   :  { %8329 = vmatpush3.bf16.msra.mxu1 %v9345_v5  ;;  %v9409_v5 = vld [vmem:[%s12402_s1 + $0x1620] ss:$12 sps:$4 sm:$0xff]  }
 0x2ac   :  { %5846 = vmatpush1.bf16.msra.mxu0 %v9341_v13  ;;  %8330 = vmatprep.subr.bf16.mxu1 %v9349_v17  ;;  %v9411_v13 = vld [vmem:[%s12402_s1 + $0x1624] ss:$12 sps:$4 sm:$0xff]  }
 0x2ad   :  { %5847 = vmatprep.subr.bf16.mxu0 %v9348_v14  ;;  %v9414_v14 = vld [vmem:[%s12402_s1 + $0x163c] ss:$12 sps:$4 sm:$0xff]   ;;  %v9412_v17 = vld [vmem:[%s12402_s1 + $0x1638] ss:$12 sps:$4 sm:$0xff]  }
 0x2af   :  { %8331 = vmatpush3.bf16.msra.mxu1 %v9350_v25 }
 0x2b0   :  { %5848 = vmatpush1.bf16.msra.mxu0 %v9346_v6  ;;  %8332 = vmatprep.subr.bf16.mxu1 %v9354_v20  ;;  %v9417_v6 = vld [vmem:[%s12402_s1 + $0x1654] ss:$12 sps:$4 sm:$0xff]  }
 0x2b1   :  { %5849 = vmatprep.subr.bf16.mxu0 %v9353_v8 }
 0x2b3   :  { %8333 = vmatpush3.bf16.msra.mxu1 %v9355_v62 }
 0x2b4   :  { %5850 = vmatpush1.bf16.msra.mxu0 %v9351_v35  ;;  %8334 = vmatprep.subr.bf16.mxu1 %v9359_v27  ;;  %v9415_v35 = vld [vmem:[%s12402_s1 + $0x1650] ss:$12 sps:$4 sm:$0xff]  }
 0x2b5   :  { %5851 = vmatprep.subr.bf16.mxu0 %v9358_v24  ;;  %v8186_v32 = vpop.f32.mrb[36].mxu1  ;;  %v9420_v24 = vld [vmem:[%s12402_s1 + $0x166c] ss:$12 sps:$4 sm:$0xff]  }
 0x2b6   :  { %v8187_v34 = vpop.f32.mrb[37].mxu1 }
 0x2b7   :  { %v8188_v39 = vadd.f32 %v8187_v34, %v8186_v32  ;;  %8335 = vmatpush3.bf16.msra.mxu1 %v9360_v29  ;;  %v8189_v41 = vpop.f32.mrb[38].mxu1  ;;  %v9418_v29 = vld [vmem:[%s12402_s1 + $0x1668] ss:$12 sps:$4 sm:$0xff]   ;;  %v9424_v34 = vld [vmem:[%s12402_s1 + $0x1698] ss:$12 sps:$4 sm:$0xff]  }
 0x2b8   :  { %5852 = vmatpush1.bf16.msra.mxu0 %v9356_v28  ;;  %8336 = vmatprep.subr.bf16.mxu1 %v9364_v31  ;;  %v8190_v44 = vpop.f32.mrb[39].mxu1  ;;  %v9421_v31 = vld [vmem:[%s12402_s1 + $0x1680] ss:$12 sps:$4 sm:$0xff]   ;;  %v9426_v32 = vld [vmem:[%s12402_s1 + $0x169c] ss:$12 sps:$4 sm:$0xff]  }
 0x2b9   :  { %5853 = vmatprep.subr.bf16.mxu0 %v9363_v52  ;;  %v6303_v26 = vadd.f32 %v8188_v39, %v11860_v19  ;;  %v9391_v19 = vld [vmem:[%s12402_s1 + $0x1590] ss:$12 sps:$4 sm:$0xff]   ;;  %v9429_v39 = vld [vmem:[%s12402_s1 + $0x16b4] ss:$12 sps:$4 sm:$0xff]  }
 0x2ba   :  { %v9423_v52 = vld [vmem:[%s12402_s1 + $0x1684] ss:$12 sps:$4 sm:$0xff]   ;;  %v9433_v41 = vld [vmem:[%s12402_s1 + $0x16e0] ss:$12 sps:$4 sm:$0xff]  }
 0x2bb   :  { %8337 = vmatpush3.bf16.msra.mxu1 %v9365_v23  ;;  %v9435_v23 = vld [vmem:[%s12402_s1 + $0x16e4] ss:$12 sps:$4 sm:$0xff]   ;;  %v9441_v44 = vld [vmem:[%s12402_s1 + $0x1714] ss:$12 sps:$4 sm:$0xff]  }
 0x2bc   :  { %5854 = vmatpush1.bf16.msra.mxu0 %v9361_v22  ;;  %8338 = vmatprep.subr.bf16.mxu1 %v9369_v43  ;;  %v9427_v22 = vld [vmem:[%s12402_s1 + $0x16b0] ss:$12 sps:$4 sm:$0xff]   ;;  %v9436_v43 = vld [vmem:[%s12402_s1 + $0x16f8] ss:$12 sps:$4 sm:$0xff]  }
 0x2bd   :  { %5855 = vmatprep.subr.bf16.mxu0 %v9368_v18  ;;  %v9438_v18 = vld [vmem:[%s12402_s1 + $0x16fc] ss:$12 sps:$4 sm:$0xff]  }
 0x2bf   :  { %8339 = vmatpush3.bf16.msra.mxu1 %v9370_v46 }
 0x2c0   :  { %5856 = vmatpush1.bf16.msra.mxu0 %v9366_v45 }
 0x2c1   :  { %5866 = vmatprep.subr.bf16.mxu0 %v9375_v47  ;;  %v9439_v47 = vld [vmem:[%s12402_s1 + $0x1710] ss:$12 sps:$4 sm:$0xff]  }
 0x2c2   :  { %6581 = vmatmul.mubr.bf16.vlgmr.msra.gmra.mrb[64].mxu1 %v11985_v49 }
 0x2c3   :  { %5858 = vmatmul.mubr.bf16.vlgmr.msra.gmra.mrb[0].mxu0 %v11760_v21  ;;  %v9384_v21 = vld [vmem:[%s12402_s1 + $0x154c] ss:$12 sps:$4 sm:$0xff]  }
 0x2c4   :  { %5867 = vmatpush1.bf16.msra.mxu0 %v9373_v48  ;;  %5898 = vmatprep.mubr.bf16.mxu0 %v11781_v30  ;;  %v9382_v30 = vld [vmem:[%s12402_s1 + $0x1548] ss:$12 sps:$4 sm:$0xff]  }
 0x2c5   :  { %5868 = vmatprep.subr.bf16.mxu0 %v9378_v51  ;;  %v9444_v51 = vld [vmem:[%s12402_s1 + $0x172c] ss:$12 sps:$4 sm:$0xff]  }
 0x2c8   :  { %5869 = vmatpush1.bf16.msra.mxu0 %v9376_v54 }
 0x2c9   :  { %5870 = vmatprep.subr.bf16.mxu0 %v9381_v42 }
 0x2cc   :  { %5871 = vmatpush1.bf16.msra.mxu0 %v9379_v55  ;;  %v9442_v55 = vld [vmem:[%s12402_s1 + $0x1728] ss:$12 sps:$4 sm:$0xff]  }
 0x2cd   :  { %5872 = vmatprep.subr.bf16.mxu0 %v9384_v21  ;;  %v9447_v21 = vld [vmem:[%s12402_s1 + $0x1744] ss:$12 sps:$4 sm:$0xff]  }
 0x2d0   :  { %5873 = vmatpush1.bf16.msra.mxu0 %v9382_v30  ;;  %v9445_v30 = vld [vmem:[%s12402_s1 + $0x1740] ss:$12 sps:$4 sm:$0xff]  }
 0x2d1   :  { %5874 = vmatprep.subr.bf16.mxu0 %v9387_v56  ;;  %v9469_v56 = vld [vmem:[%s12405_s3] ss:$8 sps:$4 sm:$0xff]  }
 0x2d4   :  { %5875 = vmatpush1.bf16.msra.mxu0 %v9385_v57  ;;  %v9471_v57 = vld [vmem:[%s12405_s3 + $0x4] ss:$8 sps:$4 sm:$0xff]  }
 0x2d5   :  { %5876 = vmatprep.subr.bf16.mxu0 %v9390_v40  ;;  %v8208_v16 = vpop.f32.mrb[40].mxu1  ;;  %v9450_v40 = vld [vmem:[%s12402_s1 + $0x175c] ss:$12 sps:$4 sm:$0xff]   ;;  %6894 = vmatprep.subr.bf16.mxu1 %v9471_v57 }
 0x2d6   :  { %v8209_v59 = vpop.f32.mrb[41].mxu1  ;;  %6895 = vmatpush1.bf16.msra.mxu1 %v9469_v56  ;;  %v9511_v56 = vld [vmem:[%s12405_s3 + $0xe0] ss:$8 sps:$4 sm:$0xff]  }
 0x2d7   :  { %v8210_v60 = vadd.f32 %v8209_v59, %v8208_v16  ;;  %v8211_v61 = vpop.f32.mrb[42].mxu1  ;;  %v9472_v16 = vld [vmem:[%s12405_s3 + $0x10] ss:$8 sps:$4 sm:$0xff]   ;;  %v9477_v59 = vld [vmem:[%s12405_s3 + $0x24] ss:$8 sps:$4 sm:$0xff]  }
 0x2d8   :  { %5877 = vmatpush1.bf16.msra.mxu0 %v9388_v58  ;;  %v8212_v0 = vpop.f32.mrb[43].mxu1  ;;  %v9474_v58 = vld [vmem:[%s12405_s3 + $0x14] ss:$8 sps:$4 sm:$0xff]   ;;  %v9475_v61 = vld [vmem:[%s12405_s3 + $0x20] ss:$8 sps:$4 sm:$0xff]  }
 0x2d9   :  { %5878 = vmatprep.subr.bf16.mxu0 %v9393_v15  ;;  %v6343_v1 = vadd.f32 %v8210_v60, %v6303_v26  ;;  %v9448_v15 = vld [vmem:[%s12402_s1 + $0x1758] ss:$12 sps:$4 sm:$0xff]   ;;  %6896 = vmatprep.subr.bf16.mxu1 %v9474_v58  ;;  %v9453_v60 = vld [vmem:[%s12402_s1 + $0x1774] ss:$12 sps:$4 sm:$0xff]  }
 0x2da   :  { %6897 = vmatpush1.bf16.msra.mxu1 %v9472_v16  ;;  %v9456_v0 = vld [vmem:[%s12402_s1 + $0x178c] ss:$12 sps:$4 sm:$0xff]  }
 0x2db   :  { %6898 = vmatprep.subr.bf16.mxu1 %v9477_v59  ;;  %v9514_v59 = vld [vmem:[%s12405_s3 + $0xf0] ss:$8 sps:$4 sm:$0xff]  }
 0x2dc   :  { %5879 = vmatpush1.bf16.msra.mxu0 %v9391_v19  ;;  %v9451_v19 = vld [vmem:[%s12402_s1 + $0x1770] ss:$12 sps:$4 sm:$0xff]  }
 0x2dd   :  { %5880 = vmatprep.subr.bf16.mxu0 %v9396_v63  ;;  %v9480_v63 = vld [vmem:[%s12405_s3 + $0x34] ss:$8 sps:$4 sm:$0xff]  }
 0x2de   :  { %6899 = vmatpush1.bf16.msra.mxu1 %v9475_v61  ;;  %v9519_v61 = vld [vmem:[%s12405_s3 + $0x104] ss:$8 sps:$4 sm:$0xff]  }
 0x2df   :  { %6900 = vmatprep.subr.bf16.mxu1 %v9480_v63  ;;  %v1071_v63 = vsub.s32 0, %v11153_v36 }
 0x2e0   :  { %5881 = vmatpush1.bf16.msra.mxu0 %v9394_v3  ;;  %v9478_v3 = vld [vmem:[%s12405_s3 + $0x30] ss:$8 sps:$4 sm:$0xff]  }
 0x2e1   :  { %5882 = vmatprep.subr.bf16.mxu0 %v9399_v7  ;;  %v9483_v7 = vld [vmem:[%s12405_s3 + $0x44] ss:$8 sps:$4 sm:$0xff]  }
 0x2e2   :  { %6901 = vmatpush1.bf16.msra.mxu1 %v9478_v3 }
 0x2e3   :  { %6902 = vmatprep.subr.bf16.mxu1 %v9483_v7 }
 0x2e4   :  { %5883 = vmatpush1.bf16.msra.mxu0 %v9397_v4  ;;  %v9459_v4 = vld [vmem:[%s12402_s1 + $0x17a4] ss:$12 sps:$4 sm:$0xff]  }
 0x2e5   :  { %5884 = vmatprep.subr.bf16.mxu0 %v9402_v38  ;;  %v9457_v38 = vld [vmem:[%s12402_s1 + $0x17a0] ss:$12 sps:$4 sm:$0xff]  }
 0x2e8   :  { %5885 = vmatpush1.bf16.msra.mxu0 %v9400_v50  ;;  %v9481_v50 = vld [vmem:[%s12405_s3 + $0x40] ss:$8 sps:$4 sm:$0xff]  }
 0x2e9   :  { %5886 = vmatprep.subr.bf16.mxu0 %v9405_v10  ;;  %v9486_v10 = vld [vmem:[%s12405_s3 + $0x54] ss:$8 sps:$4 sm:$0xff]   ;;  %6903 = vmatpush1.bf16.msra.mxu1 %v9481_v50 }
 0x2ea   :  { %6904 = vmatprep.subr.bf16.mxu1 %v9486_v10 }
 0x2ec   :  { %5887 = vmatpush1.bf16.msra.mxu0 %v9403_v11  ;;  %v9462_v11 = vld [vmem:[%s12402_s1 + $0x17bc] ss:$12 sps:$4 sm:$0xff]  }
 0x2ed   :  { %5888 = vmatprep.subr.bf16.mxu0 %v9408_v12  ;;  %v9484_v12 = vld [vmem:[%s12405_s3 + $0x50] ss:$8 sps:$4 sm:$0xff]  }
 0x2ee   :  { %6905 = vmatpush1.bf16.msra.mxu1 %v9484_v12 }
 0x2f0   :  { %5889 = vmatpush1.bf16.msra.mxu0 %v9406_v37  ;;  %v9460_v37 = vld [vmem:[%s12402_s1 + $0x17b8] ss:$12 sps:$4 sm:$0xff]  }
 0x2f1   :  { %5890 = vmatprep.subr.bf16.mxu0 %v9411_v13  ;;  %v9489_v13 = vld [vmem:[%s12405_s3 + $0x64] ss:$8 sps:$4 sm:$0xff]  }
 0x2f2   :  { %6906 = vmatprep.subr.bf16.mxu1 %v9489_v13 }
 0x2f4   :  { %5891 = vmatpush1.bf16.msra.mxu0 %v9409_v5  ;;  %v9465_v5 = vld [vmem:[%s12402_s1 + $0x17d4] ss:$12 sps:$4 sm:$0xff]  }
 0x2f5   :  { %5892 = vmatprep.subr.bf16.mxu0 %v9414_v14  ;;  %v8230_v25 = vpop.f32.mrb[44].mxu1  ;;  %v9487_v14 = vld [vmem:[%s12405_s3 + $0x60] ss:$8 sps:$4 sm:$0xff]  }
 0x2f6   :  { %v8231_v8 = vpop.f32.mrb[45].mxu1  ;;  %6907 = vmatpush1.bf16.msra.mxu1 %v9487_v14 }
 0x2f7   :  { %v8232_v20 = vadd.f32 %v8231_v8, %v8230_v25  ;;  %v8233_v62 = vpop.f32.mrb[46].mxu1  ;;  %v9463_v8 = vld [vmem:[%s12402_s1 + $0x17d0] ss:$12 sps:$4 sm:$0xff]  }
 0x2f8   :  { %5893 = vmatpush1.bf16.msra.mxu0 %v9412_v17  ;;  %v8234_v27 = vpop.f32.mrb[47].mxu1  ;;  %v9468_v62 = vld [vmem:[%s12402_s1 + $0x17ec] ss:$12 sps:$4 sm:$0xff]  }
 0x2f9   :  { %5894 = vmatprep.subr.bf16.mxu0 %v9417_v6  ;;  %v6383_v28 = vadd.f32 %v8232_v20, %v6343_v1  ;;  %v9454_v1 = vld [vmem:[%s12402_s1 + $0x1788] ss:$12 sps:$4 sm:$0xff]  }
 0x2fc   :  { %5895 = vmatpush1.bf16.msra.mxu0 %v9415_v35  ;;  %v9492_v35 = vld [vmem:[%s12405_s3 + $0x74] ss:$8 sps:$4 sm:$0xff]  }
 0x2fd   :  { %5896 = vmatprep.subr.bf16.mxu0 %v9420_v24  ;;  %6908 = vmatprep.subr.bf16.mxu1 %v9492_v35  ;;  %v9523_v35 = vld [vmem:[%s12405_s3 + $0x120] ss:$8 sps:$4 sm:$0xff]  }
 0x300   :  { %5897 = vmatpush1.bf16.msra.mxu0 %v9418_v29  ;;  %v9466_v29 = vld [vmem:[%s12402_s1 + $0x17e8] ss:$12 sps:$4 sm:$0xff]  }
 0x301   :  { %5907 = vmatprep.subr.bf16.mxu0 %v9423_v52  ;;  %v9495_v52 = vld [vmem:[%s12405_s3 + $0x84] ss:$8 sps:$4 sm:$0xff]  }
 0x303   :  { %5899 = vmatmul.mubr.bf16.vlgmr.msra.gmra.mrb[0].mxu0 %v11876_v2  ;;  %v9432_v2 = vld [vmem:[%s12402_s1 + $0x16cc] ss:$12 sps:$4 sm:$0xff]  }
 0x304   :  { %5908 = vmatpush1.bf16.msra.mxu0 %v9421_v31  ;;  %5939 = vmatprep.mubr.bf16.mxu0 %v11897_v9  ;;  %v9430_v9 = vld [vmem:[%s12402_s1 + $0x16c8] ss:$12 sps:$4 sm:$0xff]  }
 0x305   :  { %5909 = vmatprep.subr.bf16.mxu0 %v9426_v32  ;;  %v9493_v31 = vld [vmem:[%s12405_s3 + $0x80] ss:$8 sps:$4 sm:$0xff]   ;;  %v9498_v32 = vld [vmem:[%s12405_s3 + $0x94] ss:$8 sps:$4 sm:$0xff]  }
 0x308   :  { %5910 = vmatpush1.bf16.msra.mxu0 %v9424_v34  ;;  %v9496_v34 = vld [vmem:[%s12405_s3 + $0x90] ss:$8 sps:$4 sm:$0xff]  }
 0x309   :  { %5911 = vmatprep.subr.bf16.mxu0 %v9429_v39  ;;  %v9501_v39 = vld [vmem:[%s12405_s3 + $0xa4] ss:$8 sps:$4 sm:$0xff]  }
 0x30c   :  { %5912 = vmatpush1.bf16.msra.mxu0 %v9427_v22  ;;  %v9499_v22 = vld [vmem:[%s12405_s3 + $0xa0] ss:$8 sps:$4 sm:$0xff]  }
 0x30d   :  { %5913 = vmatprep.subr.bf16.mxu0 %v9432_v2  ;;  %v9502_v2 = vld [vmem:[%s12405_s3 + $0xb0] ss:$8 sps:$4 sm:$0xff]  }
 0x310   :  { %5914 = vmatpush1.bf16.msra.mxu0 %v9430_v9  ;;  %v9507_v9 = vld [vmem:[%s12405_s3 + $0xc4] ss:$8 sps:$4 sm:$0xff]  }
 0x311   :  { %5915 = vmatprep.subr.bf16.mxu0 %v9435_v23  ;;  %v9505_v23 = vld [vmem:[%s12405_s3 + $0xc0] ss:$8 sps:$4 sm:$0xff]  }
 0x314   :  { %5916 = vmatpush1.bf16.msra.mxu0 %v9433_v41  ;;  %v9510_v41 = vld [vmem:[%s12405_s3 + $0xd4] ss:$8 sps:$4 sm:$0xff]  }
 0x315   :  { %5917 = vmatprep.subr.bf16.mxu0 %v9438_v18  ;;  %v8252_v26 = vpop.f32.mrb[48].mxu1  ;;  %v9508_v18 = vld [vmem:[%s12405_s3 + $0xd0] ss:$8 sps:$4 sm:$0xff]  }
 0x316   :  { %v8253_v45 = vpop.f32.mrb[49].mxu1 }
 0x317   :  { %v8254_v46 = vadd.f32 %v8253_v45, %v8252_v26  ;;  %v8255_v48 = vpop.f32.mrb[50].mxu1 }
 0x318   :  { %5918 = vmatpush1.bf16.msra.mxu0 %v9436_v43  ;;  %v8256_v54 = vpop.f32.mrb[51].mxu1 }
 0x319   :  { %5919 = vmatprep.subr.bf16.mxu0 %v9441_v44  ;;  %v12130_v42 = vadd.f32 %v8254_v46, %v6383_v28  ;;  %v9490_v28 = vld [vmem:[%s12405_s3 + $0x70] ss:$8 sps:$4 sm:$0xff]  }
 0x31a   :  { %6909 = vmatpush1.bf16.msra.mxu1 %v9490_v28  ;;  %v9529_v28 = vld [vmem:[%s12405_s3 + $0x140] ss:$8 sps:$4 sm:$0xff]  }
 0x31b   :  { %6910 = vmatprep.subr.bf16.mxu1 %v9495_v52  ;;  %v9532_v52 = vld [vmem:[%s12405_s3 + $0x150] ss:$8 sps:$4 sm:$0xff]  }
 0x31c   :  { %5920 = vmatpush1.bf16.msra.mxu0 %v9439_v47 }
 0x31d   :  { %5921 = vmatprep.subr.bf16.mxu0 %v9444_v51 }
 0x31e   :  { %6911 = vmatpush1.bf16.msra.mxu1 %v9493_v31  ;;  %v9537_v31 = vld [vmem:[%s12405_s3 + $0x164] ss:$8 sps:$4 sm:$0xff]  }
 0x31f   :  { %6912 = vmatprep.subr.bf16.mxu1 %v9498_v32  ;;  %v9535_v32 = vld [vmem:[%s12405_s3 + $0x160] ss:$8 sps:$4 sm:$0xff]  }
 0x320   :  { %5922 = vmatpush1.bf16.msra.mxu0 %v9442_v55 }
 0x321   :  { %5923 = vmatprep.subr.bf16.mxu0 %v9447_v21 }
 0x322   :  { %6913 = vmatpush1.bf16.msra.mxu1 %v9496_v34  ;;  %v9540_v34 = vld [vmem:[%s12405_s3 + $0x174] ss:$8 sps:$4 sm:$0xff]  }
 0x323   :  { %6914 = vmatprep.subr.bf16.mxu1 %v9501_v39  ;;  %v9538_v39 = vld [vmem:[%s12405_s3 + $0x170] ss:$8 sps:$4 sm:$0xff]  }
 0x324   :  { %5924 = vmatpush1.bf16.msra.mxu0 %v9445_v30  ;;  %v9513_v30 = vld [vmem:[%s12405_s3 + $0xe4] ss:$8 sps:$4 sm:$0xff]  }
 0x325   :  { %5925 = vmatprep.subr.bf16.mxu0 %v9450_v40 }
 0x326   :  { %6915 = vmatpush1.bf16.msra.mxu1 %v9499_v22 }
 0x328   :  { %5926 = vmatpush1.bf16.msra.mxu0 %v9448_v15  ;;  %v9516_v15 = vld [vmem:[%s12405_s3 + $0xf4] ss:$8 sps:$4 sm:$0xff]  }
 0x329   :  { %5927 = vmatprep.subr.bf16.mxu0 %v9453_v60 }
 0x32c   :  { %5928 = vmatpush1.bf16.msra.mxu0 %v9451_v19 }
 0x32d   :  { %5929 = vmatprep.subr.bf16.mxu0 %v9456_v0  ;;  %v1075_v0 = vsub.s32 1, %v11153_v36 }
 0x330   :  { %5930 = vmatpush1.bf16.msra.mxu0 %v9454_v1  ;;  %v9553_v1 = vld [vmem:[%s12404_s2] sm:$0x7] }
 0x331   :  { %5931 = vmatprep.subr.bf16.mxu0 %v9459_v4  ;;  %v1072_v3 = vrot.slane %v9553_v1, %v1071_v63  ;;  %v1076_v7 = vrot.slane %v9553_v1, %v1075_v0 }
 0x333   :  { %v8346_v4 = vadd.f32 %v10977_v33, %v1072_v3  ;;  %v9522_v33 = vld [vmem:[%s12405_s3 + $0x114] ss:$8 sps:$4 sm:$0xff]  }
 0x334   :  { %5932 = vmatpush1.bf16.msra.mxu0 %v9457_v38  ;;  %v8348_v38 = vadd.f32 %v10979_v53, %v1076_v7  ;;  %v9520_v53 = vld [vmem:[%s12405_s3 + $0x110] ss:$8 sps:$4 sm:$0xff]  }
 0x335   :  { %5933 = vmatprep.subr.bf16.mxu0 %v9462_v11  ;;  %v8274_v17 = vpop.f32.mrb[52].mxu1 }
 0x336   :  { %v8275_v6 = vpop.f32.mrb[53].mxu1 }
 0x337   :  { %v8276_v25 = vadd.f32 %v8275_v6, %v8274_v17  ;;  %v8277_v20 = vpop.f32.mrb[54].mxu1  ;;  %v9517_v6 = vld [vmem:[%s12405_s3 + $0x100] ss:$8 sps:$4 sm:$0xff]  }
 0x338   :  { %5934 = vmatpush1.bf16.msra.mxu0 %v9460_v37  ;;  %v8278_v24 = vpop.f32.mrb[55].mxu1  ;;  %v9525_v20 = vld [vmem:[%s12405_s3 + $0x124] ss:$8 sps:$4 sm:$0xff]  }
 0x339   :  { %5935 = vmatprep.subr.bf16.mxu0 %v9465_v5  ;;  %v6463_v27 = vadd.f32 %v8276_v25, %v12130_v42  ;;  %v9526_v24 = vld [vmem:[%s12405_s3 + $0x130] ss:$8 sps:$4 sm:$0xff]  }
 0x33c   :  { %5936 = vmatpush1.bf16.msra.mxu0 %v9463_v8  ;;  %v9554_v8 = vmov 0  }
 0x33d   :  { %5937 = vmatprep.subr.bf16.mxu0 %v9468_v62  ;;  %v9528_v62 = vld [vmem:[%s12405_s3 + $0x134] ss:$8 sps:$4 sm:$0xff]  }
 0x340   :  { %5938 = vmatpush1.bf16.msra.mxu0 %v9466_v29  ;;  %v9534_v29 = vld [vmem:[%s12405_s3 + $0x154] ss:$8 sps:$4 sm:$0xff]  }
 0x343   :  { %5940 = vmatmul.mubr.bf16.vlgmr.msra.gmra.mrb[0].mxu0 %v11985_v49  ;;  %v9504_v49 = vld [vmem:[%s12405_s3 + $0xb4] ss:$8 sps:$4 sm:$0xff]  }
 0x344   :  { %6916 = vmatprep.subr.bf16.mxu1 %v9504_v49  ;;  %v9541_v49 = vld [vmem:[%s12406_s5] sm:$0xff]  }
 0x345   :  { %6917 = vmatpush1.bf16.msra.mxu1 %v9502_v2 }
 0x346   :  { %6918 = vmatprep.subr.bf16.mxu1 %v9507_v9  ;;  %v9542_v9 = vld [vmem:[%s12406_s5 + $0x8] sm:$0xff]  }
 0x349   :  { %6919 = vmatpush1.bf16.msra.mxu1 %v9505_v23  ;;  %v9543_v23 = vld [vmem:[%s12406_s5 + $0x10] sm:$0xff]  }
 0x34a   :  { %6920 = vmatprep.subr.bf16.mxu1 %v9510_v41  ;;  %v9544_v41 = vld [vmem:[%s12406_s5 + $0x18] sm:$0xff]  }
 0x34d   :  { %6921 = vmatpush1.bf16.msra.mxu1 %v9508_v18  ;;  %v9545_v18 = vld [vmem:[%s12406_s5 + $0x20] sm:$0xff]  }
 0x34e   :  { %6922 = vmatprep.subr.bf16.mxu1 %v9513_v30 }
 0x351   :  { %6923 = vmatpush1.bf16.msra.mxu1 %v9511_v56 }
 0x352   :  { %6924 = vmatprep.subr.bf16.mxu1 %v9516_v15 }
 0x355   :  { %v8296_v43 = vpop.f32.mrb[56].mxu1  ;;  %6925 = vmatpush1.bf16.msra.mxu1 %v9514_v59 }
 0x356   :  { %v8297_v44 = vpop.f32.mrb[57].mxu1  ;;  %6935 = vmatprep.subr.bf16.mxu1 %v9519_v61 }
 0x357   :  { %v8298_v26 = vadd.f32 %v8297_v44, %v8296_v43  ;;  %v8299_v45 = vpop.f32.mrb[58].mxu1  ;;  %v9546_v43 = vld [vmem:[%s12406_s5 + $0x28] sm:$0xff]   ;;  %v9547_v44 = vld [vmem:[%s12406_s5 + $0x30] sm:$0xff]  }
 0x358   :  { %v8300_v46 = vpop.f32.mrb[59].mxu1  ;;  %v9549_v45 = vld [vmem:[%s12406_s5 + $0x40] sm:$0xff]  }
 0x359   :  { %v6503_v47 = vadd.f32 %v8298_v26, %v6463_v27  ;;  %v9531_v27 = vld [vmem:[%s12405_s3 + $0x144] ss:$8 sps:$4 sm:$0xff]   ;;  %v9548_v26 = vld [vmem:[%s12406_s5 + $0x38] sm:$0xff]  }
 0x35a   :  { %v9550_v46 = vld [vmem:[%s12406_s5 + $0x48] sm:$0xff]  }
 0x375   :  { %v8318_v48 = vpop.f32.mrb[60].mxu1 }
 0x376   :  { %v8319_v51 = vpop.f32.mrb[61].mxu1 }
 0x377   :  { %v8320_v54 = vadd.f32 %v8319_v51, %v8318_v48  ;;  %v8321_v42 = vpop.f32.mrb[62].mxu1  ;;  %v9552_v48 = vld [vmem:[%s12406_s5 + $0x58] sm:$0xff]   ;;  %v6642_v51 = vld [vmem:[%s12407_s4] sm:$0x3] }
 0x378   :  { %v8322_v55 = vpop.f32.mrb[63].mxu1  ;;  %v6651_v42 = vrot.slane %v6642_v51, %v1075_v0 }
 0x379   :  { %v6543_v21 = vadd.f32 %v8320_v54, %v6503_v47  ;;  %v9551_v47 = vld [vmem:[%s12406_s5 + $0x50] sm:$0xff]   ;;  %v6647_v54 = vrot.slane %v6642_v51, %v1071_v63 }
 0x395   :  { %v8340_v57 = vpop.f32.mrb[64].mxu1 }
 0x396   :  { %v8341_v40 = vpop.f32.mrb[65].mxu1 }
 0x397   :  { %v8342_v58 = vadd.f32 %v8341_v40, %v8340_v57  ;;  %v8343_v16 = vpop.f32.mrb[66].mxu1 }
 0x398   :  { %v8344_v60 = vpop.f32.mrb[67].mxu1 }
 0x399   :  { %v6583_v19 = vadd.f32 %v8342_v58, %v6543_v21  ;;  %v7980_v60 = vld [vmem:[%s12408_s6] ss:$0 sm:$0xff] }
 0x39b   :  { %v6590_v22 = vmax.f32 %v6583_v19, 0.0 }
 0x39d   :  { %v6593_v2 = vpack.c.bf16 %v6590_v22, %v6590_v22 }
 0x416   :  { %v5941_v50 = vpop.f32.mrb[0].mxu0 }
 0x417   :  { %v8347_v10 = vadd.f32 %v8346_v4, %v5941_v50  ;;  %v5943_v11 = vpop.f32.mrb[1].mxu0 }
 0x418   :  { %v8349_v12 = vadd.f32 %v8348_v38, %v5943_v11  ;;  %v5945_v37 = vpop.f32.mrb[2].mxu0 }
 0x419   :  { %v6588_v13 = vmax.f32 %v8347_v10, 0.0  ;;  %v5946_v5 = vpop.f32.mrb[3].mxu0 }
 0x41a   :  { %v6589_v14 = vmax.f32 %v8349_v12, 0.0 }
 0x41b   :  { %v6591_v25 = vpack.c.bf16 %v6588_v13, %v6588_v13 }
 0x41c   :  { %v6592_v17 = vpack.c.bf16 %v6589_v14, %v6589_v14 }
 0x41e   :  { %6926 = vmatprep.mubr.bf16.mxu1 %v6592_v17 }
 0x41f   :  { %6927 = vmatmul.mubr.bf16.vlgmr.msra.gmra.mrb[68].mxu1 %v6591_v25 }
 0x420   :  { %6936 = vmatpush1.bf16.msra.mxu1 %v9517_v6  ;;  %6967 = vmatprep.mubr.bf16.mxu1 %v9554_v8 }
 0x421   :  { %6937 = vmatprep.subr.bf16.mxu1 %v9522_v33 }
 0x424   :  { %6938 = vmatpush1.bf16.msra.mxu1 %v9520_v53 }
 0x425   :  { %6939 = vmatprep.subr.bf16.mxu1 %v9525_v20 }
 0x428   :  { %6940 = vmatpush1.bf16.msra.mxu1 %v9523_v35 }
 0x429   :  { %6941 = vmatprep.subr.bf16.mxu1 %v9528_v62 }
 0x42c   :  { %6942 = vmatpush1.bf16.msra.mxu1 %v9526_v24 }
 0x42d   :  { %6943 = vmatprep.subr.bf16.mxu1 %v9531_v27 }
 0x430   :  { %6944 = vmatpush1.bf16.msra.mxu1 %v9529_v28 }
 0x431   :  { %6945 = vmatprep.subr.bf16.mxu1 %v9534_v29 }
 0x434   :  { %6946 = vmatpush1.bf16.msra.mxu1 %v9532_v52 }
 0x435   :  { %6947 = vmatprep.subr.bf16.mxu1 %v9537_v31 }
 0x438   :  { %6948 = vmatpush1.bf16.msra.mxu1 %v9535_v32 }
 0x439   :  { %6949 = vmatprep.subr.bf16.mxu1 %v9540_v34 }
 0x43c   :  { %6950 = vmatpush1.bf16.msra.mxu1 %v9538_v39 }
 0x43d   :  { %7087 = vmatprep.subr.bf16.mxu1 %v9554_v8 }
 0x43f   :  { %6968 = vmatmul.mubr.bf16.vlgmr.msra.gmra.mrb[68].mxu1 %v6593_v2 }
 0x440   :  { %7088 = vmatpush1.bf16.msra.mxu1 %v9541_v49 }
 0x441   :  { %7089 = vmatprep.subr.bf16.mxu1 %v9554_v8 }
 0x444   :  { %7090 = vmatpush1.bf16.msra.mxu1 %v9542_v9 }
 0x445   :  { %7091 = vmatprep.subr.bf16.mxu1 %v9554_v8 }
 0x448   :  { %7092 = vmatpush1.bf16.msra.mxu1 %v9543_v23 }
 0x449   :  { %7093 = vmatprep.subr.bf16.mxu1 %v9554_v8 }
 0x44c   :  { %7094 = vmatpush1.bf16.msra.mxu1 %v9544_v41 }
 0x44d   :  { %7095 = vmatprep.subr.bf16.mxu1 %v9554_v8 }
 0x450   :  { %7096 = vmatpush1.bf16.msra.mxu1 %v9545_v18 }
 0x451   :  { %7097 = vmatprep.subr.bf16.mxu1 %v9554_v8 }
 0x454   :  { %7098 = vmatpush1.bf16.msra.mxu1 %v9546_v43 }
 0x455   :  { %7099 = vmatprep.subr.bf16.mxu1 %v9554_v8 }
 0x458   :  { %7100 = vmatpush1.bf16.msra.mxu1 %v9547_v44 }
 0x459   :  { %7101 = vmatprep.subr.bf16.mxu1 %v9554_v8 }
 0x45c   :  { %7102 = vmatpush1.bf16.msra.mxu1 %v9548_v26 }
 0x45d   :  { %7103 = vmatprep.subr.bf16.mxu1 %v9554_v8 }
 0x460   :  { %7104 = vmatpush1.bf16.msra.mxu1 %v9549_v45 }
 0x461   :  { %7105 = vmatprep.subr.bf16.mxu1 %v9554_v8 }
 0x464   :  { %7106 = vmatpush1.bf16.msra.mxu1 %v9550_v46 }
 0x465   :  { %7107 = vmatprep.subr.bf16.mxu1 %v9554_v8 }
 0x468   :  { %7108 = vmatpush1.bf16.msra.mxu1 %v9551_v47 }
 0x469   :  { %7109 = vmatprep.subr.bf16.mxu1 %v9554_v8 }
 0x46c   :  { %7110 = vmatpush1.bf16.msra.mxu1 %v9552_v48 }
 0x512   :  { %v6969_v55 = vpop.f32.mrb[68].mxu1 }
 0x513   :  { %v8350_v21 = vadd.f32 %v6969_v55, %v6647_v54  ;;  %v6971_v30 = vpop.f32.mrb[69].mxu1 }
 0x514   :  { %v8351_v56 = vadd.f32 %v6971_v30, %v6651_v42  ;;  %v6973_v57 = vpop.f32.mrb[70].mxu1 }
 0x515   :  { %v6976_v40 = vmax.f32 %v8350_v21, 0.0  ;;  %v6974_v58 = vpop.f32.mrb[71].mxu1 }
 0x516   :  { %v6977_v15 = vmax.f32 %v8351_v56, 0.0 }
 0x517   :  { %v6978_v59 = vpack.c.bf16 %v6976_v40, %v6976_v40 }
 0x518   :  { %v6979_v16 = vpack.c.bf16 %v6977_v15, %v6977_v15 }
 0x51a   :  { %7993 = vmatprep.mubr.msk.bf16.mxu1 %vm7083_vm0, %v6979_v16 }
 0x51b   :  { %7120 = vmatmul.mubr.bf16.vlgmr.msra.gmra.mrb[72].mxu1 %v6978_v59 }
 0x5ee   :  { %v7121_v19 = vpop.f32.mrb[72].mxu1 }
 0x5ef   :  { %v7122_v36 = vadd.f32 %v7980_v60, %v7121_v19  ;;  %v7123_v61 = vpop.f32.mrb[73].mxu1 }
 0x5f0   :  { %v7124_v63 = vpop.f32.mrb[74].mxu1 }
 0x5f1   :  { %7127 = vst [vmem:[%s12409_s7] sm:$0xff] %v7122_v36  ;;  %v7125_v0 = vpop.f32.mrb[75].mxu1 }

</bundles_post_ra>
